<compile_context>
chip_gen: v7x
topology: tpu7x:2x2x1
jax: 0.10.0
libtpu: 0.0.40
codegen_flags: <defaults>
</compile_context>

<pallas_src>
import numpy as np
import jax
import jax.numpy as jnp
from jax.experimental import pallas as pl
from jax.experimental.pallas import tpu as pltpu

BN_EPS = 1e-5


# ----------------------------- static tiling helpers -----------------------------

def _pick_batch_tile(n, max_tile=8, min_steps=4):
    """Largest divisor of n that is <= max_tile and leaves >= min_steps grid steps
    (falling back to >=2 steps, then 1).  Divisor tiling keeps BN statistics exact
    (no padded rows) and tile=1 is always valid, so there is no single-huge-block
    failure mode."""
    divisors = [d for d in range(1, n + 1) if n % d == 0 and d <= max_tile]
    for steps in (min_steps, 2, 1):
        ok = [d for d in divisors if n // d >= steps]
        if ok:
            return ok[-1]
    return 1


# ----------------------------- host-side weight packing -----------------------------

def _build_toeplitz(w, k, pad, W):
    """Conv weight (Cout, Cin, k, k) -> block-Toeplitz T (k, Wp*Cin, W*Cout) with
    T[di][(j+dj)*Cin + ci, j*Cout + co] = w[co, ci, di, dj], so that
    y[n, i, j*Cout+co] = sum_di x_pad_row[n, i+di, :] @ T[di]."""
    w = np.asarray(w, np.float32)
    cout, cin = w.shape[0], w.shape[1]
    wp = W + 2 * pad
    T = np.zeros((k, wp * cin, W * cout), np.float32)
    for di in range(k):
        for dj in range(k):
            blk = w[:, :, di, dj].T                       # (Cin, Cout)
            for j in range(W):
                jp = j + dj
                T[di, jp * cin:(jp + 1) * cin, j * cout:(j + 1) * cout] = blk
    return T


# ----------------------------- Pallas kernels -----------------------------

def _make_conv_kernel(tb, k, H):
    """Fused conv-as-row-GEMM kernel (per image: y = bias + sum_di x[di:di+H] @ T[di])
    with BN partial stats (column sum / sum-of-squares, f32) in the epilogue."""
    def kernel(x_ref, w_ref, b_ref, y_ref, st_ref):
        wc = b_ref.shape[1]
        bias = b_ref[...]                                  # (1, W*Cout) f32
        ssum = jnp.zeros((1, wc), jnp.float32)
        ssq = jnp.zeros((1, wc), jnp.float32)
        for b in range(tb):                                # static unroll (tb <= 8)
            acc = jnp.zeros((H, wc), jnp.float32)
            for di in range(k):                            # static unroll (k <= 5)
                acc = acc + jnp.dot(x_ref[b, di:di + H, :], w_ref[di],
                                    preferred_element_type=jnp.float32)
            acc = acc + bias
            y_ref[b] = acc.astype(y_ref.dtype)             # lane-dense bf16 writeback
            ssum = ssum + jnp.sum(acc, axis=0, keepdims=True)
            ssq = ssq + jnp.sum(acc * acc, axis=0, keepdims=True)
        st_ref[...] = jnp.concatenate([ssum, ssq], axis=0)  # (2, W*Cout) f32
    return kernel


def _make_pool_kernel(cout):
    """Fused BN(affine) + ReLU + AvgPool2d(2); bf16 in, bf16 out."""
    def kernel(y_ref, sc_ref, sh_ref, o_ref):
        y = y_ref[...]                                     # (tp, 2, Wo, 2*cout) bf16
        s = sc_ref[...]                                    # (1, 1, cout) f32
        t = sh_ref[...]

        def bnr(tap):                                      # BN affine + ReLU, per tap
            return jnp.maximum(tap.astype(jnp.float32) * s + t, 0.0)

        acc = (bnr(y[:, 0, :, :cout]) + bnr(y[:, 0, :, cout:])
               + bnr(y[:, 1, :, :cout]) + bnr(y[:, 1, :, cout:]))
        o_ref[...] = (acc * 0.25).astype(o_ref.dtype)
    return kernel


def _fc_kernel(y_ref, sc_ref, sh_ref, w_ref, b_ref, o_ref):
    """conv3 BN affine + ReLU fused into the FC GEMM prologue.  The contraction is
    split over the 7 spatial rows so the (h, w, c) feature order matches torch's
    NCHW flatten (handled by the pre-permuted FC weight)."""
    tfb = y_ref.shape[0]
    sc = sc_ref[...]
    sh = sh_ref[...]
    acc = jnp.zeros((tfb, b_ref.shape[1]), jnp.float32)
    for h in range(y_ref.shape[1]):                        # static unroll (7)
        a = jnp.maximum(y_ref[:, h, :].astype(jnp.float32) * sc + sh, 0.0)
        acc = acc + jnp.dot(a.astype(jnp.bfloat16), w_ref[h],
                            preferred_element_type=jnp.float32)
    o_ref[...] = (acc + b_ref[...])[:, None, :]


# ----------------------------- pallas_call wrappers -----------------------------

def conv_toeplitz(x_pad, T, bias, *, H, W, k, cout):
    """x_pad: (N, Hp, Wp*Cin) bf16 -> y (N, H, W*cout) bf16, stats (g, 2, W*cout) f32."""
    n, hp, wpcin = x_pad.shape
    wc = W * cout
    tb = _pick_batch_tile(n, max_tile=8)
    g = n // tb
    return pl.pallas_call(
        _make_conv_kernel(tb, k, H),
        out_shape=(jax.ShapeDtypeStruct((n, H, wc), jnp.bfloat16),
                   jax.ShapeDtypeStruct((g, 2, wc), jnp.float32)),
        grid=(g,),
        in_specs=[pl.BlockSpec((tb, hp, wpcin), lambda i: (i, 0, 0)),
                  pl.BlockSpec((k, wpcin, wc), lambda i: (0, 0, 0)),   # fetched once
                  pl.BlockSpec((1, wc), lambda i: (0, 0))],
        out_specs=(pl.BlockSpec((tb, H, wc), lambda i: (i, 0, 0)),
                   pl.BlockSpec((None, 2, wc), lambda i: (i, 0, 0))),
        compiler_params=pltpu.CompilerParams(dimension_semantics=("parallel",)),
    )(x_pad, T, bias)


def _bn_scale_shift(stats, gamma, beta, W, cout, count):
    """Reduce per-block partial stats -> per-channel affine (training-mode batch
    stats, biased variance, eps=1e-5).  var clamped at 0 before rsqrt."""
    s = stats.reshape(-1, 2, W, cout).sum(axis=(0, 2))     # (2, cout) f32
    mean = s[0] / count
    var = jnp.maximum(s[1] / count - mean * mean, 0.0)
    scale = gamma * jax.lax.rsqrt(var + BN_EPS)
    shift = beta - mean * scale
    return scale, shift


def bn_relu_pool(y, scale, shift, n, h, w, cout):
    """y: (N, H, W*cout) bf16 -> (N, H/2, W/2, cout) bf16 (BN + ReLU + AvgPool2d(2))."""
    ho, wo = h // 2, w // 2
    lead = n * ho
    y4 = y.reshape(lead, 2, wo, 2 * cout)                  # free view: (n,ho | hh | wo | ww,c)
    tp = _pick_batch_tile(lead, max_tile=64)
    g = lead // tp
    out = pl.pallas_call(
        _make_pool_kernel(cout),
        out_shape=jax.ShapeDtypeStruct((lead, wo, cout), jnp.bfloat16),
        grid=(g,),
        in_specs=[pl.BlockSpec((tp, 2, wo, 2 * cout), lambda i: (i, 0, 0, 0)),
                  pl.BlockSpec((1, 1, cout), lambda i: (0, 0, 0)),
                  pl.BlockSpec((1, 1, cout), lambda i: (0, 0, 0))],
        out_specs=pl.BlockSpec((tp, wo, cout), lambda i: (i, 0, 0)),
        compiler_params=pltpu.CompilerParams(dimension_semantics=("parallel",)),
    )(y4, scale.reshape(1, 1, cout).astype(jnp.float32),
      shift.reshape(1, 1, cout).astype(jnp.float32))
    return out.reshape(n, ho, wo, cout)


def fc_forward(y3, scale_t, shift_t, wfc, bfc):
    """y3: (N, 7, 448) bf16 conv3 output; BN+ReLU applied inside the FC kernel."""
    n, hh, wc = y3.shape
    nout = wfc.shape[-1]                                   # 128 (10 real + padding)
    tfb = _pick_batch_tile(n, max_tile=128)
    g = n // tfb
    out = pl.pallas_call(
        _fc_kernel,
        out_shape=jax.ShapeDtypeStruct((n, 1, nout), jnp.float32),
        grid=(g,),
        in_specs=[pl.BlockSpec((tfb, hh, wc), lambda i: (i, 0, 0)),
                  pl.BlockSpec((1, wc), lambda i: (0, 0)),
                  pl.BlockSpec((1, wc), lambda i: (0, 0)),
                  pl.BlockSpec((hh, wc, nout), lambda i: (0, 0, 0)),
                  pl.BlockSpec((1, nout), lambda i: (0, 0))],
        out_specs=pl.BlockSpec((tfb, 1, nout), lambda i: (i, 0, 0)),
        compiler_params=pltpu.CompilerParams(dimension_semantics=("parallel",)),
    )(y3, scale_t, shift_t, wfc, bfc)
    return out.reshape(n, nout)


# ----------------------------- parameter packing / init -----------------------------

def prepare_params(p):
    """One-time host packing: block-Toeplitz conv weights (bf16), lane-tiled biases,
    FC weight pre-permuted to the conv3 (h, w, c) activation order."""
    def conv_layer(w, b, gamma, beta, k, pad, W):
        w_np = np.asarray(jax.device_get(w), np.float32)
        b_np = np.asarray(jax.device_get(b), np.float32)
        cout = w_np.shape[0]
        return dict(
            T=jnp.asarray(_build_toeplitz(w_np, k, pad, W), jnp.bfloat16),
            bias=jnp.asarray(np.tile(b_np, W).reshape(1, W * cout), jnp.float32),
            gamma=gamma, beta=beta,
        )

    prep = dict(
        l1=conv_layer(p["w1"], p["b1"], p["g1"], p["be1"], 5, 2, 28),
        l2=conv_layer(p["w2"], p["b2"], p["g2"], p["be2"], 5, 2, 14),
        l3=conv_layer(p["w3"], p["b3"], p["g3"], p["be3"], 3, 1, 7),
    )
    # FC: torch flattens NCHW -> feature order (c, h, w); pre-permute to (h, w, c)
    # (the conv3 output layout) and pad the 10 outputs to 128 lanes.
    wfc = p["wfc"].reshape(10, 64, 7, 7).transpose(2, 3, 1, 0)     # (h, w, c, out)
    wfc = jnp.pad(wfc, ((0, 0), (0, 0), (0, 0), (0, 118)))
    prep["wfc"] = wfc.reshape(7, 7 * 64, 128).astype(jnp.bfloat16)
    prep["bfc"] = jnp.pad(p["bfc"], (0, 118)).reshape(1, 128).astype(jnp.float32)
    return prep


def init_params(key):
    ks = jax.random.split(key, 14)
    f = jnp.float32
    return dict(
        w1=0.1 * jax.random.normal(ks[0], (16, 1, 5, 5), f),
        b1=0.1 * jax.random.normal(ks[1], (16,), f),
        g1=1.0 + 0.1 * jax.random.normal(ks[2], (16,), f),
        be1=0.1 * jax.random.normal(ks[3], (16,), f),
        w2=0.05 * jax.random.normal(ks[4], (32, 16, 5, 5), f),
        b2=0.1 * jax.random.normal(ks[5], (32,), f),
        g2=1.0 + 0.1 * jax.random.normal(ks[6], (32,), f),
        be2=0.1 * jax.random.normal(ks[7], (32,), f),
        w3=0.05 * jax.random.normal(ks[8], (64, 32, 3, 3), f),
        b3=0.1 * jax.random.normal(ks[9], (64,), f),
        g3=1.0 + 0.1 * jax.random.normal(ks[10], (64,), f),
        be3=0.1 * jax.random.normal(ks[11], (64,), f),
        wfc=0.02 * jax.random.normal(ks[12], (10, 7 * 7 * 64), f),
        bfc=0.1 * jax.random.normal(ks[13], (10,), f),
    )


# ----------------------------- forward pass -----------------------------

def cnn_forward(x_nchw, prep):
    n = x_nchw.shape[0]
    # TODO(synk): the inter-layer spatial zero-padding and this NCHW->row-slab
    # transform are plain XLA glue over tiny arrays; they could be folded into the
    # pool kernel's output spec to save one small copy pass per layer.
    x = jnp.transpose(x_nchw, (0, 2, 3, 1))                          # (N,28,28,1)
    x = jnp.pad(x, ((0, 0), (2, 2), (2, 2), (0, 0)))
    x = x.reshape(n, 32, 32).astype(jnp.bfloat16)                    # (N, Hp, Wp*Cin)

    l1 = prep["l1"]
    y1, st1 = conv_toeplitz(x, l1["T"], l1["bias"], H=28, W=28, k=5, cout=16)
    sc1, sh1 = _bn_scale_shift(st1, l1["gamma"], l1["beta"], 28, 16, n * 28 * 28)
    p1 = bn_relu_pool(y1, sc1, sh1, n, 28, 28, 16)                   # (N,14,14,16) bf16
    x2 = jnp.pad(p1, ((0, 0), (2, 2), (2, 2), (0, 0))).reshape(n, 18, 18 * 16)

    l2 = prep["l2"]
    y2, st2 = conv_toeplitz(x2, l2["T"], l2["bias"], H=14, W=14, k=5, cout=32)
    sc2, sh2 = _bn_scale_shift(st2, l2["gamma"], l2["beta"], 14, 32, n * 14 * 14)
    p2 = bn_relu_pool(y2, sc2, sh2, n, 14, 14, 32)                   # (N,7,7,32) bf16
    x3 = jnp.pad(p2, ((0, 0), (1, 1), (1, 1), (0, 0))).reshape(n, 9, 9 * 32)

    l3 = prep["l3"]
    y3, st3 = conv_toeplitz(x3, l3["T"], l3["bias"], H=7, W=7, k=3, cout=64)
    sc3, sh3 = _bn_scale_shift(st3, l3["gamma"], l3["beta"], 7, 64, n * 7 * 7)
    sc3t = jnp.tile(sc3, 7).reshape(1, 448).astype(jnp.float32)      # per (w, c) lane
    sh3t = jnp.tile(sh3, 7).reshape(1, 448).astype(jnp.float32)

    logits = fc_forward(y3, sc3t, sh3t, prep["wfc"], prep["bfc"])    # (N, 128) f32
    return logits[:, :10]


if __name__ == "__main__":
    key = jax.random.PRNGKey(0)
    kx, kp = jax.random.split(key)
    x = jax.random.normal(kx, (2, 1, 28, 28), jnp.float32)   # NCHW, fc expects 7*7*64
    params = init_params(kp)
    prep = prepare_params(params)                            # host-side packing, once

    logits = jax.jit(cnn_forward)(x, prep)
    jax.block_until_ready(logits)
    assert logits.shape == (2, 10) and logits.dtype == jnp.float32
    assert bool(jnp.all(jnp.isfinite(logits)))
    print("KERNEL_OK")
</pallas_src>

<mosaic_0001>
module attributes {stable_mosaic.version = 11 : i64} {
  func.func @kernel(%arg0: i32, %arg1: memref<1x32x32xbf16, #tpu.memory_space<vmem>>, %arg2: memref<5x32x448xbf16, #tpu.memory_space<vmem>>, %arg3: memref<1x448xf32, #tpu.memory_space<vmem>>, %arg4: memref<1x28x448xbf16, #tpu.memory_space<vmem>>, %arg5: memref<1x2x448xf32, #tpu.memory_space<vmem>>) attributes {dimension_semantics = [#tpu.dimension_semantics<parallel>], iteration_bounds = array<i64: 2>, scalar_prefetch = 0 : i64, scratch_operands = 0 : i64, tpu.core_type = #tpu.core_type<tc>, window_params = [{transform_indices = @transform_0, window_bounds = array<i64: 1, 32, 32>}, {pipeline_mode = #tpu.pipeline_mode<synchronous>, transform_indices = @transform_1, window_bounds = array<i64: 5, 32, 448>}, {pipeline_mode = #tpu.pipeline_mode<synchronous>, transform_indices = @transform_2, window_bounds = array<i64: 1, 448>}, {transform_indices = @transform_3, window_bounds = array<i64: 1, 28, 448>}, {transform_indices = @transform_4, window_bounds = array<i64: 1, 2, 448>}]} {
    %c0 = arith.constant 0 : index
    %c0_0 = arith.constant 0 : index
    %0 = vector.load %arg3[%c0, %c0_0] : memref<1x448xf32, #tpu.memory_space<vmem>>, vector<1x448xf32>
    %cst = arith.constant 0.000000e+00 : f32
    %1 = vector.broadcast %cst : f32 to vector<1x448xf32>
    %cst_1 = arith.constant 0.000000e+00 : f32
    %2 = vector.broadcast %cst_1 : f32 to vector<1x448xf32>
    %cst_2 = arith.constant 0.000000e+00 : f32
    %3 = vector.broadcast %cst_2 : f32 to vector<28x448xf32>
    %c0_3 = arith.constant 0 : index
    %c0_4 = arith.constant 0 : index
    %c0_5 = arith.constant 0 : index
    %4 = vector.load %arg1[%c0_3, %c0_4, %c0_5] : memref<1x32x32xbf16, #tpu.memory_space<vmem>>, vector<1x28x32xbf16>
    %5 = vector.shape_cast %4 : vector<1x28x32xbf16> to vector<28x32xbf16>
    %c0_6 = arith.constant 0 : index
    %c0_7 = arith.constant 0 : index
    %c0_8 = arith.constant 0 : index
    %6 = vector.load %arg2[%c0_6, %c0_7, %c0_8] : memref<5x32x448xbf16, #tpu.memory_space<vmem>>, vector<1x32x448xbf16>
    %7 = vector.shape_cast %6 : vector<1x32x448xbf16> to vector<32x448xbf16>
    %cst_9 = arith.constant dense<0.000000e+00> : vector<28x448xf32>
    %8 = tpu.matmul %5, %7, %cst_9 {dimension_numbers = #tpu.dot_dimension_numbers<[1], [0], [0], [1], [0, 0, 1, 1], [], []>} : vector<28x32xbf16>, vector<32x448xbf16>, vector<28x448xf32> -> vector<28x448xf32>
    %9 = arith.addf %3, %8 : vector<28x448xf32>
    %c0_10 = arith.constant 0 : index
    %c1 = arith.constant 1 : index
    %c0_11 = arith.constant 0 : index
    %10 = vector.load %arg1[%c0_10, %c1, %c0_11] : memref<1x32x32xbf16, #tpu.memory_space<vmem>>, vector<1x28x32xbf16>
    %11 = vector.shape_cast %10 : vector<1x28x32xbf16> to vector<28x32xbf16>
    %c1_12 = arith.constant 1 : index
    %c0_13 = arith.constant 0 : index
    %c0_14 = arith.constant 0 : index
    %12 = vector.load %arg2[%c1_12, %c0_13, %c0_14] : memref<5x32x448xbf16, #tpu.memory_space<vmem>>, vector<1x32x448xbf16>
    %13 = vector.shape_cast %12 : vector<1x32x448xbf16> to vector<32x448xbf16>
    %cst_15 = arith.constant dense<0.000000e+00> : vector<28x448xf32>
    %14 = tpu.matmul %11, %13, %cst_15 {dimension_numbers = #tpu.dot_dimension_numbers<[1], [0], [0], [1], [0, 0, 1, 1], [], []>} : vector<28x32xbf16>, vector<32x448xbf16>, vector<28x448xf32> -> vector<28x448xf32>
    %15 = arith.addf %9, %14 : vector<28x448xf32>
    %c0_16 = arith.constant 0 : index
    %c2 = arith.constant 2 : index
    %c0_17 = arith.constant 0 : index
    %16 = vector.load %arg1[%c0_16, %c2, %c0_17] : memref<1x32x32xbf16, #tpu.memory_space<vmem>>, vector<1x28x32xbf16>
    %17 = vector.shape_cast %16 : vector<1x28x32xbf16> to vector<28x32xbf16>
    %c2_18 = arith.constant 2 : index
    %c0_19 = arith.constant 0 : index
    %c0_20 = arith.constant 0 : index
    %18 = vector.load %arg2[%c2_18, %c0_19, %c0_20] : memref<5x32x448xbf16, #tpu.memory_space<vmem>>, vector<1x32x448xbf16>
    %19 = vector.shape_cast %18 : vector<1x32x448xbf16> to vector<32x448xbf16>
    %cst_21 = arith.constant dense<0.000000e+00> : vector<28x448xf32>
    %20 = tpu.matmul %17, %19, %cst_21 {dimension_numbers = #tpu.dot_dimension_numbers<[1], [0], [0], [1], [0, 0, 1, 1], [], []>} : vector<28x32xbf16>, vector<32x448xbf16>, vector<28x448xf32> -> vector<28x448xf32>
    %21 = arith.addf %15, %20 : vector<28x448xf32>
    %c0_22 = arith.constant 0 : index
    %c3 = arith.constant 3 : index
    %c0_23 = arith.constant 0 : index
    %22 = vector.load %arg1[%c0_22, %c3, %c0_23] : memref<1x32x32xbf16, #tpu.memory_space<vmem>>, vector<1x28x32xbf16>
    %23 = vector.shape_cast %22 : vector<1x28x32xbf16> to vector<28x32xbf16>
    %c3_24 = arith.constant 3 : index
    %c0_25 = arith.constant 0 : index
    %c0_26 = arith.constant 0 : index
    %24 = vector.load %arg2[%c3_24, %c0_25, %c0_26] : memref<5x32x448xbf16, #tpu.memory_space<vmem>>, vector<1x32x448xbf16>
    %25 = vector.shape_cast %24 : vector<1x32x448xbf16> to vector<32x448xbf16>
    %cst_27 = arith.constant dense<0.000000e+00> : vector<28x448xf32>
    %26 = tpu.matmul %23, %25, %cst_27 {dimension_numbers = #tpu.dot_dimension_numbers<[1], [0], [0], [1], [0, 0, 1, 1], [], []>} : vector<28x32xbf16>, vector<32x448xbf16>, vector<28x448xf32> -> vector<28x448xf32>
    %27 = arith.addf %21, %26 : vector<28x448xf32>
    %c0_28 = arith.constant 0 : index
    %c4 = arith.constant 4 : index
    %c0_29 = arith.constant 0 : index
    %28 = vector.load %arg1[%c0_28, %c4, %c0_29] : memref<1x32x32xbf16, #tpu.memory_space<vmem>>, vector<1x28x32xbf16>
    %29 = vector.shape_cast %28 : vector<1x28x32xbf16> to vector<28x32xbf16>
    %c4_30 = arith.constant 4 : index
    %c0_31 = arith.constant 0 : index
    %c0_32 = arith.constant 0 : index
    %30 = vector.load %arg2[%c4_30, %c0_31, %c0_32] : memref<5x32x448xbf16, #tpu.memory_space<vmem>>, vector<1x32x448xbf16>
    %31 = vector.shape_cast %30 : vector<1x32x448xbf16> to vector<32x448xbf16>
    %cst_33 = arith.constant dense<0.000000e+00> : vector<28x448xf32>
    %32 = tpu.matmul %29, %31, %cst_33 {dimension_numbers = #tpu.dot_dimension_numbers<[1], [0], [0], [1], [0, 0, 1, 1], [], []>} : vector<28x32xbf16>, vector<32x448xbf16>, vector<28x448xf32> -> vector<28x448xf32>
    %33 = arith.addf %27, %32 : vector<28x448xf32>
    %34 = vector.broadcast %0 : vector<1x448xf32> to vector<28x448xf32>
    %35 = arith.addf %33, %34 : vector<28x448xf32>
    %36 = arith.truncf %35 : vector<28x448xf32> to vector<28x448xbf16>
    %c0_34 = arith.constant 0 : index
    %c0_35 = arith.constant 0 : index
    %c0_36 = arith.constant 0 : index
    %37 = vector.load %arg4[%c0_34, %c0_35, %c0_36] : memref<1x28x448xbf16, #tpu.memory_space<vmem>>, vector<1x28x448xbf16>
    %38 = vector.shape_cast %37 : vector<1x28x448xbf16> to vector<28x448xbf16>
    %39 = vector.shape_cast %36 : vector<28x448xbf16> to vector<1x28x448xbf16>
    tpu.vector_store %arg4[%c0_34, %c0_35, %c0_36], %39 {strides = array<i32>} : memref<1x28x448xbf16, #tpu.memory_space<vmem>>, vector<1x28x448xbf16>,
    %cst_37 = arith.constant dense<0.000000e+00> : vector<448xf32>
    %40 = vector.multi_reduction <add>, %35, %cst_37 [0] : vector<28x448xf32> to vector<448xf32>
    %41 = vector.shape_cast %40 : vector<448xf32> to vector<1x448xf32>
    %42 = arith.addf %1, %41 : vector<1x448xf32>
    %43 = arith.mulf %35, %35 : vector<28x448xf32>
    %cst_38 = arith.constant dense<0.000000e+00> : vector<448xf32>
    %44 = vector.multi_reduction <add>, %43, %cst_38 [0] : vector<28x448xf32> to vector<448xf32>
    %45 = vector.shape_cast %44 : vector<448xf32> to vector<1x448xf32>
    %46 = arith.addf %2, %45 : vector<1x448xf32>
    %47 = tpu.concatenate %42, %46 in 0 : vector<1x448xf32>, vector<1x448xf32> -> vector<2x448xf32>
    %c0_39 = arith.constant 0 : index
    %c0_40 = arith.constant 0 : index
    %c0_41 = arith.constant 0 : index
    %48 = vector.load %arg5[%c0_39, %c0_40, %c0_41] : memref<1x2x448xf32, #tpu.memory_space<vmem>>, vector<1x2x448xf32>
    %49 = vector.shape_cast %48 : vector<1x2x448xf32> to vector<2x448xf32>
    %50 = vector.shape_cast %47 : vector<2x448xf32> to vector<1x2x448xf32>
    tpu.vector_store %arg5[%c0_39, %c0_40, %c0_41], %50 {strides = array<i32>} : memref<1x2x448xf32, #tpu.memory_space<vmem>>, vector<1x2x448xf32>,
    return
  }
  func.func @transform_0(%arg0: i32) -> (i32, i32, i32) {
    %c0_i32 = arith.constant 0 : i32
    %c0_i32_0 = arith.constant 0 : i32
    %c0_i32_1 = arith.constant 0 : i32
    return %arg0, %c0_i32, %c0_i32_0 : i32, i32, i32
  }
  func.func @transform_1(%arg0: i32) -> (i32, i32, i32) {
    %c0_i32 = arith.constant 0 : i32
    %c0_i32_0 = arith.constant 0 : i32
    %c0_i32_1 = arith.constant 0 : i32
    %c0_i32_2 = arith.constant 0 : i32
    return %c0_i32, %c0_i32_0, %c0_i32_1 : i32, i32, i32
  }
  func.func @transform_2(%arg0: i32) -> (i32, i32) {
    %c0_i32 = arith.constant 0 : i32
    %c0_i32_0 = arith.constant 0 : i32
    %c0_i32_1 = arith.constant 0 : i32
    return %c0_i32, %c0_i32_0 : i32, i32
  }
  func.func @transform_3(%arg0: i32) -> (i32, i32, i32) {
    %c0_i32 = arith.constant 0 : i32
    %c0_i32_0 = arith.constant 0 : i32
    %c0_i32_1 = arith.constant 0 : i32
    return %arg0, %c0_i32, %c0_i32_0 : i32, i32, i32
  }
  func.func @transform_4(%arg0: i32) -> (i32, i32, i32) {
    %c0_i32 = arith.constant 0 : i32
    %c0_i32_0 = arith.constant 0 : i32
    %c0_i32_1 = arith.constant 0 : i32
    return %arg0, %c0_i32, %c0_i32_0 : i32, i32, i32
  }
}

module attributes {stable_mosaic.version = 11 : i64} {
  func.func @kernel(%arg0: i32, %arg1: memref<7x2x14x32xbf16, #tpu.memory_space<vmem>>, %arg2: memref<1x1x16xf32, #tpu.memory_space<vmem>>, %arg3: memref<1x1x16xf32, #tpu.memory_space<vmem>>, %arg4: memref<7x14x16xbf16, #tpu.memory_space<vmem>>) attributes {dimension_semantics = [#tpu.dimension_semantics<parallel>], iteration_bounds = array<i64: 4>, scalar_prefetch = 0 : i64, scratch_operands = 0 : i64, tpu.core_type = #tpu.core_type<tc>, window_params = [{transform_indices = @transform_0, window_bounds = array<i64: 7, 2, 14, 32>}, {pipeline_mode = #tpu.pipeline_mode<synchronous>, transform_indices = @transform_1, window_bounds = array<i64: 1, 1, 16>}, {pipeline_mode = #tpu.pipeline_mode<synchronous>, transform_indices = @transform_2, window_bounds = array<i64: 1, 1, 16>}, {transform_indices = @transform_3, window_bounds = array<i64: 7, 14, 16>}]} {
    %c0 = arith.constant 0 : index
    %c0_0 = arith.constant 0 : index
    %c0_1 = arith.constant 0 : index
    %c0_2 = arith.constant 0 : index
    %0 = vector.load %arg1[%c0, %c0_0, %c0_1, %c0_2] : memref<7x2x14x32xbf16, #tpu.memory_space<vmem>>, vector<7x2x14x32xbf16>
    %c0_3 = arith.constant 0 : index
    %c0_4 = arith.constant 0 : index
    %c0_5 = arith.constant 0 : index
    %1 = vector.load %arg2[%c0_3, %c0_4, %c0_5] : memref<1x1x16xf32, #tpu.memory_space<vmem>>, vector<1x1x16xf32>
    %c0_6 = arith.constant 0 : index
    %c0_7 = arith.constant 0 : index
    %c0_8 = arith.constant 0 : index
    %2 = vector.load %arg3[%c0_6, %c0_7, %c0_8] : memref<1x1x16xf32, #tpu.memory_space<vmem>>, vector<1x1x16xf32>
    %3 = vector.extract_strided_slice %0 {offsets = [0, 0, 0, 0], sizes = [7, 1, 14, 16], strides = [1, 1, 1, 1]} : vector<7x2x14x32xbf16> to vector<7x1x14x16xbf16>
    %4 = vector.shape_cast %3 : vector<7x1x14x16xbf16> to vector<7x14x16xbf16>
    %5 = arith.extf %4 : vector<7x14x16xbf16> to vector<7x14x16xf32>
    %6 = vector.broadcast %1 : vector<1x1x16xf32> to vector<7x14x16xf32>
    %7 = arith.mulf %5, %6 : vector<7x14x16xf32>
    %8 = vector.broadcast %2 : vector<1x1x16xf32> to vector<7x14x16xf32>
    %9 = arith.addf %7, %8 : vector<7x14x16xf32>
    %cst = arith.constant 0.000000e+00 : f32
    %10 = vector.broadcast %cst : f32 to vector<7x14x16xf32>
    %11 = arith.maximumf %9, %10 : vector<7x14x16xf32>
    %12 = vector.extract_strided_slice %0 {offsets = [0, 0, 0, 16], sizes = [7, 1, 14, 16], strides = [1, 1, 1, 1]} : vector<7x2x14x32xbf16> to vector<7x1x14x16xbf16>
    %13 = vector.shape_cast %12 : vector<7x1x14x16xbf16> to vector<7x14x16xbf16>
    %14 = arith.extf %13 : vector<7x14x16xbf16> to vector<7x14x16xf32>
    %15 = vector.broadcast %1 : vector<1x1x16xf32> to vector<7x14x16xf32>
    %16 = arith.mulf %14, %15 : vector<7x14x16xf32>
    %17 = vector.broadcast %2 : vector<1x1x16xf32> to vector<7x14x16xf32>
    %18 = arith.addf %16, %17 : vector<7x14x16xf32>
    %cst_9 = arith.constant 0.000000e+00 : f32
    %19 = vector.broadcast %cst_9 : f32 to vector<7x14x16xf32>
    %20 = arith.maximumf %18, %19 : vector<7x14x16xf32>
    %21 = arith.addf %11, %20 : vector<7x14x16xf32>
    %22 = vector.extract_strided_slice %0 {offsets = [0, 1, 0, 0], sizes = [7, 1, 14, 16], strides = [1, 1, 1, 1]} : vector<7x2x14x32xbf16> to vector<7x1x14x16xbf16>
    %23 = vector.shape_cast %22 : vector<7x1x14x16xbf16> to vector<7x14x16xbf16>
    %24 = arith.extf %23 : vector<7x14x16xbf16> to vector<7x14x16xf32>
    %25 = vector.broadcast %1 : vector<1x1x16xf32> to vector<7x14x16xf32>
    %26 = arith.mulf %24, %25 : vector<7x14x16xf32>
    %27 = vector.broadcast %2 : vector<1x1x16xf32> to vector<7x14x16xf32>
    %28 = arith.addf %26, %27 : vector<7x14x16xf32>
    %cst_10 = arith.constant 0.000000e+00 : f32
    %29 = vector.broadcast %cst_10 : f32 to vector<7x14x16xf32>
    %30 = arith.maximumf %28, %29 : vector<7x14x16xf32>
    %31 = arith.addf %21, %30 : vector<7x14x16xf32>
    %32 = vector.extract_strided_slice %0 {offsets = [0, 1, 0, 16], sizes = [7, 1, 14, 16], strides = [1, 1, 1, 1]} : vector<7x2x14x32xbf16> to vector<7x1x14x16xbf16>
    %33 = vector.shape_cast %32 : vector<7x1x14x16xbf16> to vector<7x14x16xbf16>
    %34 = arith.extf %33 : vector<7x14x16xbf16> to vector<7x14x16xf32>
    %35 = vector.broadcast %1 : vector<1x1x16xf32> to vector<7x14x16xf32>
    %36 = arith.mulf %34, %35 : vector<7x14x16xf32>
    %37 = vector.broadcast %2 : vector<1x1x16xf32> to vector<7x14x16xf32>
    %38 = arith.addf %36, %37 : vector<7x14x16xf32>
    %cst_11 = arith.constant 0.000000e+00 : f32
    %39 = vector.broadcast %cst_11 : f32 to vector<7x14x16xf32>
    %40 = arith.maximumf %38, %39 : vector<7x14x16xf32>
    %41 = arith.addf %31, %40 : vector<7x14x16xf32>
    %cst_12 = arith.constant 2.500000e-01 : f32
    %42 = vector.broadcast %cst_12 : f32 to vector<7x14x16xf32>
    %43 = arith.mulf %41, %42 : vector<7x14x16xf32>
    %44 = arith.truncf %43 : vector<7x14x16xf32> to vector<7x14x16xbf16>
    %c0_13 = arith.constant 0 : index
    %c0_14 = arith.constant 0 : index
    %c0_15 = arith.constant 0 : index
    %45 = vector.load %arg4[%c0_13, %c0_14, %c0_15] : memref<7x14x16xbf16, #tpu.memory_space<vmem>>, vector<7x14x16xbf16>
    tpu.vector_store %arg4[%c0_13, %c0_14, %c0_15], %44 {strides = array<i32>} : memref<7x14x16xbf16, #tpu.memory_space<vmem>>, vector<7x14x16xbf16>,
    return
  }
  func.func @transform_0(%arg0: i32) -> (i32, i32, i32, i32) {
    %c0_i32 = arith.constant 0 : i32
    %c0_i32_0 = arith.constant 0 : i32
    %c0_i32_1 = arith.constant 0 : i32
    %c0_i32_2 = arith.constant 0 : i32
    return %arg0, %c0_i32, %c0_i32_0, %c0_i32_1 : i32, i32, i32, i32
  }
  func.func @transform_1(%arg0: i32) -> (i32, i32, i32) {
    %c0_i32 = arith.constant 0 : i32
    %c0_i32_0 = arith.constant 0 : i32
    %c0_i32_1 = arith.constant 0 : i32
    %c0_i32_2 = arith.constant 0 : i32
    return %c0_i32, %c0_i32_0, %c0_i32_1 : i32, i32, i32
  }
  func.func @transform_2(%arg0: i32) -> (i32, i32, i32) {
    %c0_i32 = arith.constant 0 : i32
    %c0_i32_0 = arith.constant 0 : i32
    %c0_i32_1 = arith.constant 0 : i32
    %c0_i32_2 = arith.constant 0 : i32
    return %c0_i32, %c0_i32_0, %c0_i32_1 : i32, i32, i32
  }
  func.func @transform_3(%arg0: i32) -> (i32, i32, i32) {
    %c0_i32 = arith.constant 0 : i32
    %c0_i32_0 = arith.constant 0 : i32
    %c0_i32_1 = arith.constant 0 : i32
    return %arg0, %c0_i32, %c0_i32_0 : i32, i32, i32
  }
}

module attributes {stable_mosaic.version = 11 : i64} {
  func.func @kernel(%arg0: i32, %arg1: memref<1x18x288xbf16, #tpu.memory_space<vmem>>, %arg2: memref<5x288x448xbf16, #tpu.memory_space<vmem>>, %arg3: memref<1x448xf32, #tpu.memory_space<vmem>>, %arg4: memref<1x14x448xbf16, #tpu.memory_space<vmem>>, %arg5: memref<1x2x448xf32, #tpu.memory_space<vmem>>) attributes {dimension_semantics = [#tpu.dimension_semantics<parallel>], iteration_bounds = array<i64: 2>, scalar_prefetch = 0 : i64, scratch_operands = 0 : i64, tpu.core_type = #tpu.core_type<tc>, window_params = [{transform_indices = @transform_0, window_bounds = array<i64: 1, 18, 288>}, {pipeline_mode = #tpu.pipeline_mode<synchronous>, transform_indices = @transform_1, window_bounds = array<i64: 5, 288, 448>}, {pipeline_mode = #tpu.pipeline_mode<synchronous>, transform_indices = @transform_2, window_bounds = array<i64: 1, 448>}, {transform_indices = @transform_3, window_bounds = array<i64: 1, 14, 448>}, {transform_indices = @transform_4, window_bounds = array<i64: 1, 2, 448>}]} {
    %c0 = arith.constant 0 : index
    %c0_0 = arith.constant 0 : index
    %0 = vector.load %arg3[%c0, %c0_0] : memref<1x448xf32, #tpu.memory_space<vmem>>, vector<1x448xf32>
    %cst = arith.constant 0.000000e+00 : f32
    %1 = vector.broadcast %cst : f32 to vector<1x448xf32>
    %cst_1 = arith.constant 0.000000e+00 : f32
    %2 = vector.broadcast %cst_1 : f32 to vector<1x448xf32>
    %cst_2 = arith.constant 0.000000e+00 : f32
    %3 = vector.broadcast %cst_2 : f32 to vector<14x448xf32>
    %c0_3 = arith.constant 0 : index
    %c0_4 = arith.constant 0 : index
    %c0_5 = arith.constant 0 : index
    %4 = vector.load %arg1[%c0_3, %c0_4, %c0_5] : memref<1x18x288xbf16, #tpu.memory_space<vmem>>, vector<1x14x288xbf16>
    %5 = vector.shape_cast %4 : vector<1x14x288xbf16> to vector<14x288xbf16>
    %c0_6 = arith.constant 0 : index
    %c0_7 = arith.constant 0 : index
    %c0_8 = arith.constant 0 : index
    %6 = vector.load %arg2[%c0_6, %c0_7, %c0_8] : memref<5x288x448xbf16, #tpu.memory_space<vmem>>, vector<1x288x448xbf16>
    %7 = vector.shape_cast %6 : vector<1x288x448xbf16> to vector<288x448xbf16>
    %cst_9 = arith.constant dense<0.000000e+00> : vector<14x448xf32>
    %8 = tpu.matmul %5, %7, %cst_9 {dimension_numbers = #tpu.dot_dimension_numbers<[1], [0], [0], [1], [0, 0, 1, 1], [], []>} : vector<14x288xbf16>, vector<288x448xbf16>, vector<14x448xf32> -> vector<14x448xf32>
    %9 = arith.addf %3, %8 : vector<14x448xf32>
    %c0_10 = arith.constant 0 : index
    %c1 = arith.constant 1 : index
    %c0_11 = arith.constant 0 : index
    %10 = vector.load %arg1[%c0_10, %c1, %c0_11] : memref<1x18x288xbf16, #tpu.memory_space<vmem>>, vector<1x14x288xbf16>
    %11 = vector.shape_cast %10 : vector<1x14x288xbf16> to vector<14x288xbf16>
    %c1_12 = arith.constant 1 : index
    %c0_13 = arith.constant 0 : index
    %c0_14 = arith.constant 0 : index
    %12 = vector.load %arg2[%c1_12, %c0_13, %c0_14] : memref<5x288x448xbf16, #tpu.memory_space<vmem>>, vector<1x288x448xbf16>
    %13 = vector.shape_cast %12 : vector<1x288x448xbf16> to vector<288x448xbf16>
    %cst_15 = arith.constant dense<0.000000e+00> : vector<14x448xf32>
    %14 = tpu.matmul %11, %13, %cst_15 {dimension_numbers = #tpu.dot_dimension_numbers<[1], [0], [0], [1], [0, 0, 1, 1], [], []>} : vector<14x288xbf16>, vector<288x448xbf16>, vector<14x448xf32> -> vector<14x448xf32>
    %15 = arith.addf %9, %14 : vector<14x448xf32>
    %c0_16 = arith.constant 0 : index
    %c2 = arith.constant 2 : index
    %c0_17 = arith.constant 0 : index
    %16 = vector.load %arg1[%c0_16, %c2, %c0_17] : memref<1x18x288xbf16, #tpu.memory_space<vmem>>, vector<1x14x288xbf16>
    %17 = vector.shape_cast %16 : vector<1x14x288xbf16> to vector<14x288xbf16>
    %c2_18 = arith.constant 2 : index
    %c0_19 = arith.constant 0 : index
    %c0_20 = arith.constant 0 : index
    %18 = vector.load %arg2[%c2_18, %c0_19, %c0_20] : memref<5x288x448xbf16, #tpu.memory_space<vmem>>, vector<1x288x448xbf16>
    %19 = vector.shape_cast %18 : vector<1x288x448xbf16> to vector<288x448xbf16>
    %cst_21 = arith.constant dense<0.000000e+00> : vector<14x448xf32>
    %20 = tpu.matmul %17, %19, %cst_21 {dimension_numbers = #tpu.dot_dimension_numbers<[1], [0], [0], [1], [0, 0, 1, 1], [], []>} : vector<14x288xbf16>, vector<288x448xbf16>, vector<14x448xf32> -> vector<14x448xf32>
    %21 = arith.addf %15, %20 : vector<14x448xf32>
    %c0_22 = arith.constant 0 : index
    %c3 = arith.constant 3 : index
    %c0_23 = arith.constant 0 : index
    %22 = vector.load %arg1[%c0_22, %c3, %c0_23] : memref<1x18x288xbf16, #tpu.memory_space<vmem>>, vector<1x14x288xbf16>
    %23 = vector.shape_cast %22 : vector<1x14x288xbf16> to vector<14x288xbf16>
    %c3_24 = arith.constant 3 : index
    %c0_25 = arith.constant 0 : index
    %c0_26 = arith.constant 0 : index
    %24 = vector.load %arg2[%c3_24, %c0_25, %c0_26] : memref<5x288x448xbf16, #tpu.memory_space<vmem>>, vector<1x288x448xbf16>
    %25 = vector.shape_cast %24 : vector<1x288x448xbf16> to vector<288x448xbf16>
    %cst_27 = arith.constant dense<0.000000e+00> : vector<14x448xf32>
    %26 = tpu.matmul %23, %25, %cst_27 {dimension_numbers = #tpu.dot_dimension_numbers<[1], [0], [0], [1], [0, 0, 1, 1], [], []>} : vector<14x288xbf16>, vector<288x448xbf16>, vector<14x448xf32> -> vector<14x448xf32>
    %27 = arith.addf %21, %26 : vector<14x448xf32>
    %c0_28 = arith.constant 0 : index
    %c4 = arith.constant 4 : index
    %c0_29 = arith.constant 0 : index
    %28 = vector.load %arg1[%c0_28, %c4, %c0_29] : memref<1x18x288xbf16, #tpu.memory_space<vmem>>, vector<1x14x288xbf16>
    %29 = vector.shape_cast %28 : vector<1x14x288xbf16> to vector<14x288xbf16>
    %c4_30 = arith.constant 4 : index
    %c0_31 = arith.constant 0 : index
    %c0_32 = arith.constant 0 : index
    %30 = vector.load %arg2[%c4_30, %c0_31, %c0_32] : memref<5x288x448xbf16, #tpu.memory_space<vmem>>, vector<1x288x448xbf16>
    %31 = vector.shape_cast %30 : vector<1x288x448xbf16> to vector<288x448xbf16>
    %cst_33 = arith.constant dense<0.000000e+00> : vector<14x448xf32>
    %32 = tpu.matmul %29, %31, %cst_33 {dimension_numbers = #tpu.dot_dimension_numbers<[1], [0], [0], [1], [0, 0, 1, 1], [], []>} : vector<14x288xbf16>, vector<288x448xbf16>, vector<14x448xf32> -> vector<14x448xf32>
    %33 = arith.addf %27, %32 : vector<14x448xf32>
    %34 = vector.broadcast %0 : vector<1x448xf32> to vector<14x448xf32>
    %35 = arith.addf %33, %34 : vector<14x448xf32>
    %36 = arith.truncf %35 : vector<14x448xf32> to vector<14x448xbf16>
    %c0_34 = arith.constant 0 : index
    %c0_35 = arith.constant 0 : index
    %c0_36 = arith.constant 0 : index
    %37 = vector.load %arg4[%c0_34, %c0_35, %c0_36] : memref<1x14x448xbf16, #tpu.memory_space<vmem>>, vector<1x14x448xbf16>
    %38 = vector.shape_cast %37 : vector<1x14x448xbf16> to vector<14x448xbf16>
    %39 = vector.shape_cast %36 : vector<14x448xbf16> to vector<1x14x448xbf16>
    tpu.vector_store %arg4[%c0_34, %c0_35, %c0_36], %39 {strides = array<i32>} : memref<1x14x448xbf16, #tpu.memory_space<vmem>>, vector<1x14x448xbf16>,
    %cst_37 = arith.constant dense<0.000000e+00> : vector<448xf32>
    %40 = vector.multi_reduction <add>, %35, %cst_37 [0] : vector<14x448xf32> to vector<448xf32>
    %41 = vector.shape_cast %40 : vector<448xf32> to vector<1x448xf32>
    %42 = arith.addf %1, %41 : vector<1x448xf32>
    %43 = arith.mulf %35, %35 : vector<14x448xf32>
    %cst_38 = arith.constant dense<0.000000e+00> : vector<448xf32>
    %44 = vector.multi_reduction <add>, %43, %cst_38 [0] : vector<14x448xf32> to vector<448xf32>
    %45 = vector.shape_cast %44 : vector<448xf32> to vector<1x448xf32>
    %46 = arith.addf %2, %45 : vector<1x448xf32>
    %47 = tpu.concatenate %42, %46 in 0 : vector<1x448xf32>, vector<1x448xf32> -> vector<2x448xf32>
    %c0_39 = arith.constant 0 : index
    %c0_40 = arith.constant 0 : index
    %c0_41 = arith.constant 0 : index
    %48 = vector.load %arg5[%c0_39, %c0_40, %c0_41] : memref<1x2x448xf32, #tpu.memory_space<vmem>>, vector<1x2x448xf32>
    %49 = vector.shape_cast %48 : vector<1x2x448xf32> to vector<2x448xf32>
    %50 = vector.shape_cast %47 : vector<2x448xf32> to vector<1x2x448xf32>
    tpu.vector_store %arg5[%c0_39, %c0_40, %c0_41], %50 {strides = array<i32>} : memref<1x2x448xf32, #tpu.memory_space<vmem>>, vector<1x2x448xf32>,
    return
  }
  func.func @transform_0(%arg0: i32) -> (i32, i32, i32) {
    %c0_i32 = arith.constant 0 : i32
    %c0_i32_0 = arith.constant 0 : i32
    %c0_i32_1 = arith.constant 0 : i32
    return %arg0, %c0_i32, %c0_i32_0 : i32, i32, i32
  }
  func.func @transform_1(%arg0: i32) -> (i32, i32, i32) {
    %c0_i32 = arith.constant 0 : i32
    %c0_i32_0 = arith.constant 0 : i32
    %c0_i32_1 = arith.constant 0 : i32
    %c0_i32_2 = arith.constant 0 : i32
    return %c0_i32, %c0_i32_0, %c0_i32_1 : i32, i32, i32
  }
  func.func @transform_2(%arg0: i32) -> (i32, i32) {
    %c0_i32 = arith.constant 0 : i32
    %c0_i32_0 = arith.constant 0 : i32
    %c0_i32_1 = arith.constant 0 : i32
    return %c0_i32, %c0_i32_0 : i32, i32
  }
  func.func @transform_3(%arg0: i32) -> (i32, i32, i32) {
    %c0_i32 = arith.constant 0 : i32
    %c0_i32_0 = arith.constant 0 : i32
    %c0_i32_1 = arith.constant 0 : i32
    return %arg0, %c0_i32, %c0_i32_0 : i32, i32, i32
  }
  func.func @transform_4(%arg0: i32) -> (i32, i32, i32) {
    %c0_i32 = arith.constant 0 : i32
    %c0_i32_0 = arith.constant 0 : i32
    %c0_i32_1 = arith.constant 0 : i32
    return %arg0, %c0_i32, %c0_i32_0 : i32, i32, i32
  }
}

module attributes {stable_mosaic.version = 11 : i64} {
  func.func @kernel(%arg0: i32, %arg1: memref<2x2x7x64xbf16, #tpu.memory_space<vmem>>, %arg2: memref<1x1x32xf32, #tpu.memory_space<vmem>>, %arg3: memref<1x1x32xf32, #tpu.memory_space<vmem>>, %arg4: memref<2x7x32xbf16, #tpu.memory_space<vmem>>) attributes {dimension_semantics = [#tpu.dimension_semantics<parallel>], iteration_bounds = array<i64: 7>, scalar_prefetch = 0 : i64, scratch_operands = 0 : i64, tpu.core_type = #tpu.core_type<tc>, window_params = [{transform_indices = @transform_0, window_bounds = array<i64: 2, 2, 7, 64>}, {pipeline_mode = #tpu.pipeline_mode<synchronous>, transform_indices = @transform_1, window_bounds = array<i64: 1, 1, 32>}, {pipeline_mode = #tpu.pipeline_mode<synchronous>, transform_indices = @transform_2, window_bounds = array<i64: 1, 1, 32>}, {transform_indices = @transform_3, window_bounds = array<i64: 2, 7, 32>}]} {
    %c0 = arith.constant 0 : index
    %c0_0 = arith.constant 0 : index
    %c0_1 = arith.constant 0 : index
    %c0_2 = arith.constant 0 : index
    %0 = vector.load %arg1[%c0, %c0_0, %c0_1, %c0_2] : memref<2x2x7x64xbf16, #tpu.memory_space<vmem>>, vector<2x2x7x64xbf16>
    %c0_3 = arith.constant 0 : index
    %c0_4 = arith.constant 0 : index
    %c0_5 = arith.constant 0 : index
    %1 = vector.load %arg2[%c0_3, %c0_4, %c0_5] : memref<1x1x32xf32, #tpu.memory_space<vmem>>, vector<1x1x32xf32>
    %c0_6 = arith.constant 0 : index
    %c0_7 = arith.constant 0 : index
    %c0_8 = arith.constant 0 : index
    %2 = vector.load %arg3[%c0_6, %c0_7, %c0_8] : memref<1x1x32xf32, #tpu.memory_space<vmem>>, vector<1x1x32xf32>
    %3 = vector.extract_strided_slice %0 {offsets = [0, 0, 0, 0], sizes = [2, 1, 7, 32], strides = [1, 1, 1, 1]} : vector<2x2x7x64xbf16> to vector<2x1x7x32xbf16>
    %4 = vector.shape_cast %3 : vector<2x1x7x32xbf16> to vector<2x7x32xbf16>
    %5 = arith.extf %4 : vector<2x7x32xbf16> to vector<2x7x32xf32>
    %6 = vector.broadcast %1 : vector<1x1x32xf32> to vector<2x7x32xf32>
    %7 = arith.mulf %5, %6 : vector<2x7x32xf32>
    %8 = vector.broadcast %2 : vector<1x1x32xf32> to vector<2x7x32xf32>
    %9 = arith.addf %7, %8 : vector<2x7x32xf32>
    %cst = arith.constant 0.000000e+00 : f32
    %10 = vector.broadcast %cst : f32 to vector<2x7x32xf32>
    %11 = arith.maximumf %9, %10 : vector<2x7x32xf32>
    %12 = vector.extract_strided_slice %0 {offsets = [0, 0, 0, 32], sizes = [2, 1, 7, 32], strides = [1, 1, 1, 1]} : vector<2x2x7x64xbf16> to vector<2x1x7x32xbf16>
    %13 = vector.shape_cast %12 : vector<2x1x7x32xbf16> to vector<2x7x32xbf16>
    %14 = arith.extf %13 : vector<2x7x32xbf16> to vector<2x7x32xf32>
    %15 = vector.broadcast %1 : vector<1x1x32xf32> to vector<2x7x32xf32>
    %16 = arith.mulf %14, %15 : vector<2x7x32xf32>
    %17 = vector.broadcast %2 : vector<1x1x32xf32> to vector<2x7x32xf32>
    %18 = arith.addf %16, %17 : vector<2x7x32xf32>
    %cst_9 = arith.constant 0.000000e+00 : f32
    %19 = vector.broadcast %cst_9 : f32 to vector<2x7x32xf32>
    %20 = arith.maximumf %18, %19 : vector<2x7x32xf32>
    %21 = arith.addf %11, %20 : vector<2x7x32xf32>
    %22 = vector.extract_strided_slice %0 {offsets = [0, 1, 0, 0], sizes = [2, 1, 7, 32], strides = [1, 1, 1, 1]} : vector<2x2x7x64xbf16> to vector<2x1x7x32xbf16>
    %23 = vector.shape_cast %22 : vector<2x1x7x32xbf16> to vector<2x7x32xbf16>
    %24 = arith.extf %23 : vector<2x7x32xbf16> to vector<2x7x32xf32>
    %25 = vector.broadcast %1 : vector<1x1x32xf32> to vector<2x7x32xf32>
    %26 = arith.mulf %24, %25 : vector<2x7x32xf32>
    %27 = vector.broadcast %2 : vector<1x1x32xf32> to vector<2x7x32xf32>
    %28 = arith.addf %26, %27 : vector<2x7x32xf32>
    %cst_10 = arith.constant 0.000000e+00 : f32
    %29 = vector.broadcast %cst_10 : f32 to vector<2x7x32xf32>
    %30 = arith.maximumf %28, %29 : vector<2x7x32xf32>
    %31 = arith.addf %21, %30 : vector<2x7x32xf32>
    %32 = vector.extract_strided_slice %0 {offsets = [0, 1, 0, 32], sizes = [2, 1, 7, 32], strides = [1, 1, 1, 1]} : vector<2x2x7x64xbf16> to vector<2x1x7x32xbf16>
    %33 = vector.shape_cast %32 : vector<2x1x7x32xbf16> to vector<2x7x32xbf16>
    %34 = arith.extf %33 : vector<2x7x32xbf16> to vector<2x7x32xf32>
    %35 = vector.broadcast %1 : vector<1x1x32xf32> to vector<2x7x32xf32>
    %36 = arith.mulf %34, %35 : vector<2x7x32xf32>
    %37 = vector.broadcast %2 : vector<1x1x32xf32> to vector<2x7x32xf32>
    %38 = arith.addf %36, %37 : vector<2x7x32xf32>
    %cst_11 = arith.constant 0.000000e+00 : f32
    %39 = vector.broadcast %cst_11 : f32 to vector<2x7x32xf32>
    %40 = arith.maximumf %38, %39 : vector<2x7x32xf32>
    %41 = arith.addf %31, %40 : vector<2x7x32xf32>
    %cst_12 = arith.constant 2.500000e-01 : f32
    %42 = vector.broadcast %cst_12 : f32 to vector<2x7x32xf32>
    %43 = arith.mulf %41, %42 : vector<2x7x32xf32>
    %44 = arith.truncf %43 : vector<2x7x32xf32> to vector<2x7x32xbf16>
    %c0_13 = arith.constant 0 : index
    %c0_14 = arith.constant 0 : index
    %c0_15 = arith.constant 0 : index
    %45 = vector.load %arg4[%c0_13, %c0_14, %c0_15] : memref<2x7x32xbf16, #tpu.memory_space<vmem>>, vector<2x7x32xbf16>
    tpu.vector_store %arg4[%c0_13, %c0_14, %c0_15], %44 {strides = array<i32>} : memref<2x7x32xbf16, #tpu.memory_space<vmem>>, vector<2x7x32xbf16>,
    return
  }
  func.func @transform_0(%arg0: i32) -> (i32, i32, i32, i32) {
    %c0_i32 = arith.constant 0 : i32
    %c0_i32_0 = arith.constant 0 : i32
    %c0_i32_1 = arith.constant 0 : i32
    %c0_i32_2 = arith.constant 0 : i32
    return %arg0, %c0_i32, %c0_i32_0, %c0_i32_1 : i32, i32, i32, i32
  }
  func.func @transform_1(%arg0: i32) -> (i32, i32, i32) {
    %c0_i32 = arith.constant 0 : i32
    %c0_i32_0 = arith.constant 0 : i32
    %c0_i32_1 = arith.constant 0 : i32
    %c0_i32_2 = arith.constant 0 : i32
    return %c0_i32, %c0_i32_0, %c0_i32_1 : i32, i32, i32
  }
  func.func @transform_2(%arg0: i32) -> (i32, i32, i32) {
    %c0_i32 = arith.constant 0 : i32
    %c0_i32_0 = arith.constant 0 : i32
    %c0_i32_1 = arith.constant 0 : i32
    %c0_i32_2 = arith.constant 0 : i32
    return %c0_i32, %c0_i32_0, %c0_i32_1 : i32, i32, i32
  }
  func.func @transform_3(%arg0: i32) -> (i32, i32, i32) {
    %c0_i32 = arith.constant 0 : i32
    %c0_i32_0 = arith.constant 0 : i32
    %c0_i32_1 = arith.constant 0 : i32
    return %arg0, %c0_i32, %c0_i32_0 : i32, i32, i32
  }
}

module attributes {stable_mosaic.version = 11 : i64} {
  func.func @kernel(%arg0: i32, %arg1: memref<1x9x288xbf16, #tpu.memory_space<vmem>>, %arg2: memref<3x288x448xbf16, #tpu.memory_space<vmem>>, %arg3: memref<1x448xf32, #tpu.memory_space<vmem>>, %arg4: memref<1x7x448xbf16, #tpu.memory_space<vmem>>, %arg5: memref<1x2x448xf32, #tpu.memory_space<vmem>>) attributes {dimension_semantics = [#tpu.dimension_semantics<parallel>], iteration_bounds = array<i64: 2>, scalar_prefetch = 0 : i64, scratch_operands = 0 : i64, tpu.core_type = #tpu.core_type<tc>, window_params = [{transform_indices = @transform_0, window_bounds = array<i64: 1, 9, 288>}, {pipeline_mode = #tpu.pipeline_mode<synchronous>, transform_indices = @transform_1, window_bounds = array<i64: 3, 288, 448>}, {pipeline_mode = #tpu.pipeline_mode<synchronous>, transform_indices = @transform_2, window_bounds = array<i64: 1, 448>}, {transform_indices = @transform_3, window_bounds = array<i64: 1, 7, 448>}, {transform_indices = @transform_4, window_bounds = array<i64: 1, 2, 448>}]} {
    %c0 = arith.constant 0 : index
    %c0_0 = arith.constant 0 : index
    %0 = vector.load %arg3[%c0, %c0_0] : memref<1x448xf32, #tpu.memory_space<vmem>>, vector<1x448xf32>
    %cst = arith.constant 0.000000e+00 : f32
    %1 = vector.broadcast %cst : f32 to vector<1x448xf32>
    %cst_1 = arith.constant 0.000000e+00 : f32
    %2 = vector.broadcast %cst_1 : f32 to vector<1x448xf32>
    %cst_2 = arith.constant 0.000000e+00 : f32
    %3 = vector.broadcast %cst_2 : f32 to vector<7x448xf32>
    %c0_3 = arith.constant 0 : index
    %c0_4 = arith.constant 0 : index
    %c0_5 = arith.constant 0 : index
    %4 = vector.load %arg1[%c0_3, %c0_4, %c0_5] : memref<1x9x288xbf16, #tpu.memory_space<vmem>>, vector<1x7x288xbf16>
    %5 = vector.shape_cast %4 : vector<1x7x288xbf16> to vector<7x288xbf16>
    %c0_6 = arith.constant 0 : index
    %c0_7 = arith.constant 0 : index
    %c0_8 = arith.constant 0 : index
    %6 = vector.load %arg2[%c0_6, %c0_7, %c0_8] : memref<3x288x448xbf16, #tpu.memory_space<vmem>>, vector<1x288x448xbf16>
    %7 = vector.shape_cast %6 : vector<1x288x448xbf16> to vector<288x448xbf16>
    %cst_9 = arith.constant dense<0.000000e+00> : vector<7x448xf32>
    %8 = tpu.matmul %5, %7, %cst_9 {dimension_numbers = #tpu.dot_dimension_numbers<[1], [0], [0], [1], [0, 0, 1, 1], [], []>} : vector<7x288xbf16>, vector<288x448xbf16>, vector<7x448xf32> -> vector<7x448xf32>
    %9 = arith.addf %3, %8 : vector<7x448xf32>
    %c0_10 = arith.constant 0 : index
    %c1 = arith.constant 1 : index
    %c0_11 = arith.constant 0 : index
    %10 = vector.load %arg1[%c0_10, %c1, %c0_11] : memref<1x9x288xbf16, #tpu.memory_space<vmem>>, vector<1x7x288xbf16>
    %11 = vector.shape_cast %10 : vector<1x7x288xbf16> to vector<7x288xbf16>
    %c1_12 = arith.constant 1 : index
    %c0_13 = arith.constant 0 : index
    %c0_14 = arith.constant 0 : index
    %12 = vector.load %arg2[%c1_12, %c0_13, %c0_14] : memref<3x288x448xbf16, #tpu.memory_space<vmem>>, vector<1x288x448xbf16>
    %13 = vector.shape_cast %12 : vector<1x288x448xbf16> to vector<288x448xbf16>
    %cst_15 = arith.constant dense<0.000000e+00> : vector<7x448xf32>
    %14 = tpu.matmul %11, %13, %cst_15 {dimension_numbers = #tpu.dot_dimension_numbers<[1], [0], [0], [1], [0, 0, 1, 1], [], []>} : vector<7x288xbf16>, vector<288x448xbf16>, vector<7x448xf32> -> vector<7x448xf32>
    %15 = arith.addf %9, %14 : vector<7x448xf32>
    %c0_16 = arith.constant 0 : index
    %c2 = arith.constant 2 : index
    %c0_17 = arith.constant 0 : index
    %16 = vector.load %arg1[%c0_16, %c2, %c0_17] : memref<1x9x288xbf16, #tpu.memory_space<vmem>>, vector<1x7x288xbf16>
    %17 = vector.shape_cast %16 : vector<1x7x288xbf16> to vector<7x288xbf16>
    %c2_18 = arith.constant 2 : index
    %c0_19 = arith.constant 0 : index
    %c0_20 = arith.constant 0 : index
    %18 = vector.load %arg2[%c2_18, %c0_19, %c0_20] : memref<3x288x448xbf16, #tpu.memory_space<vmem>>, vector<1x288x448xbf16>
    %19 = vector.shape_cast %18 : vector<1x288x448xbf16> to vector<288x448xbf16>
    %cst_21 = arith.constant dense<0.000000e+00> : vector<7x448xf32>
    %20 = tpu.matmul %17, %19, %cst_21 {dimension_numbers = #tpu.dot_dimension_numbers<[1], [0], [0], [1], [0, 0, 1, 1], [], []>} : vector<7x288xbf16>, vector<288x448xbf16>, vector<7x448xf32> -> vector<7x448xf32>
    %21 = arith.addf %15, %20 : vector<7x448xf32>
    %22 = vector.broadcast %0 : vector<1x448xf32> to vector<7x448xf32>
    %23 = arith.addf %21, %22 : vector<7x448xf32>
    %24 = arith.truncf %23 : vector<7x448xf32> to vector<7x448xbf16>
    %c0_22 = arith.constant 0 : index
    %c0_23 = arith.constant 0 : index
    %c0_24 = arith.constant 0 : index
    %25 = vector.load %arg4[%c0_22, %c0_23, %c0_24] : memref<1x7x448xbf16, #tpu.memory_space<vmem>>, vector<1x7x448xbf16>
    %26 = vector.shape_cast %25 : vector<1x7x448xbf16> to vector<7x448xbf16>
    %27 = vector.shape_cast %24 : vector<7x448xbf16> to vector<1x7x448xbf16>
    tpu.vector_store %arg4[%c0_22, %c0_23, %c0_24], %27 {strides = array<i32>} : memref<1x7x448xbf16, #tpu.memory_space<vmem>>, vector<1x7x448xbf16>,
    %cst_25 = arith.constant dense<0.000000e+00> : vector<448xf32>
    %28 = vector.multi_reduction <add>, %23, %cst_25 [0] : vector<7x448xf32> to vector<448xf32>
    %29 = vector.shape_cast %28 : vector<448xf32> to vector<1x448xf32>
    %30 = arith.addf %1, %29 : vector<1x448xf32>
    %31 = arith.mulf %23, %23 : vector<7x448xf32>
    %cst_26 = arith.constant dense<0.000000e+00> : vector<448xf32>
    %32 = vector.multi_reduction <add>, %31, %cst_26 [0] : vector<7x448xf32> to vector<448xf32>
    %33 = vector.shape_cast %32 : vector<448xf32> to vector<1x448xf32>
    %34 = arith.addf %2, %33 : vector<1x448xf32>
    %35 = tpu.concatenate %30, %34 in 0 : vector<1x448xf32>, vector<1x448xf32> -> vector<2x448xf32>
    %c0_27 = arith.constant 0 : index
    %c0_28 = arith.constant 0 : index
    %c0_29 = arith.constant 0 : index
    %36 = vector.load %arg5[%c0_27, %c0_28, %c0_29] : memref<1x2x448xf32, #tpu.memory_space<vmem>>, vector<1x2x448xf32>
    %37 = vector.shape_cast %36 : vector<1x2x448xf32> to vector<2x448xf32>
    %38 = vector.shape_cast %35 : vector<2x448xf32> to vector<1x2x448xf32>
    tpu.vector_store %arg5[%c0_27, %c0_28, %c0_29], %38 {strides = array<i32>} : memref<1x2x448xf32, #tpu.memory_space<vmem>>, vector<1x2x448xf32>,
    return
  }
  func.func @transform_0(%arg0: i32) -> (i32, i32, i32) {
    %c0_i32 = arith.constant 0 : i32
    %c0_i32_0 = arith.constant 0 : i32
    %c0_i32_1 = arith.constant 0 : i32
    return %arg0, %c0_i32, %c0_i32_0 : i32, i32, i32
  }
  func.func @transform_1(%arg0: i32) -> (i32, i32, i32) {
    %c0_i32 = arith.constant 0 : i32
    %c0_i32_0 = arith.constant 0 : i32
    %c0_i32_1 = arith.constant 0 : i32
    %c0_i32_2 = arith.constant 0 : i32
    return %c0_i32, %c0_i32_0, %c0_i32_1 : i32, i32, i32
  }
  func.func @transform_2(%arg0: i32) -> (i32, i32) {
    %c0_i32 = arith.constant 0 : i32
    %c0_i32_0 = arith.constant 0 : i32
    %c0_i32_1 = arith.constant 0 : i32
    return %c0_i32, %c0_i32_0 : i32, i32
  }
  func.func @transform_3(%arg0: i32) -> (i32, i32, i32) {
    %c0_i32 = arith.constant 0 : i32
    %c0_i32_0 = arith.constant 0 : i32
    %c0_i32_1 = arith.constant 0 : i32
    return %arg0, %c0_i32, %c0_i32_0 : i32, i32, i32
  }
  func.func @transform_4(%arg0: i32) -> (i32, i32, i32) {
    %c0_i32 = arith.constant 0 : i32
    %c0_i32_0 = arith.constant 0 : i32
    %c0_i32_1 = arith.constant 0 : i32
    return %arg0, %c0_i32, %c0_i32_0 : i32, i32, i32
  }
}

module attributes {stable_mosaic.version = 11 : i64} {
  func.func @_fc_kernel(%arg0: i32, %arg1: memref<1x7x448xbf16, #tpu.memory_space<vmem>>, %arg2: memref<1x448xf32, #tpu.memory_space<vmem>>, %arg3: memref<1x448xf32, #tpu.memory_space<vmem>>, %arg4: memref<7x448x128xbf16, #tpu.memory_space<vmem>>, %arg5: memref<1x128xf32, #tpu.memory_space<vmem>>, %arg6: memref<1x1x128xf32, #tpu.memory_space<vmem>>) attributes {dimension_semantics = [#tpu.dimension_semantics<parallel>], iteration_bounds = array<i64: 2>, scalar_prefetch = 0 : i64, scratch_operands = 0 : i64, tpu.core_type = #tpu.core_type<tc>, window_params = [{transform_indices = @transform_0, window_bounds = array<i64: 1, 7, 448>}, {pipeline_mode = #tpu.pipeline_mode<synchronous>, transform_indices = @transform_1, window_bounds = array<i64: 1, 448>}, {pipeline_mode = #tpu.pipeline_mode<synchronous>, transform_indices = @transform_2, window_bounds = array<i64: 1, 448>}, {pipeline_mode = #tpu.pipeline_mode<synchronous>, transform_indices = @transform_3, window_bounds = array<i64: 7, 448, 128>}, {pipeline_mode = #tpu.pipeline_mode<synchronous>, transform_indices = @transform_4, window_bounds = array<i64: 1, 128>}, {transform_indices = @transform_5, window_bounds = array<i64: 1, 1, 128>}]} {
    %c0 = arith.constant 0 : index
    %c0_0 = arith.constant 0 : index
    %0 = vector.load %arg2[%c0, %c0_0] : memref<1x448xf32, #tpu.memory_space<vmem>>, vector<1x448xf32>
    %c0_1 = arith.constant 0 : index
    %c0_2 = arith.constant 0 : index
    %1 = vector.load %arg3[%c0_1, %c0_2] : memref<1x448xf32, #tpu.memory_space<vmem>>, vector<1x448xf32>
    %cst = arith.constant 0.000000e+00 : f32
    %2 = vector.broadcast %cst : f32 to vector<1x128xf32>
    %c0_3 = arith.constant 0 : index
    %c0_4 = arith.constant 0 : index
    %c0_5 = arith.constant 0 : index
    %3 = vector.load %arg1[%c0_3, %c0_4, %c0_5] : memref<1x7x448xbf16, #tpu.memory_space<vmem>>, vector<1x1x448xbf16>
    %4 = vector.shape_cast %3 : vector<1x1x448xbf16> to vector<1x448xbf16>
    %5 = arith.extf %4 : vector<1x448xbf16> to vector<1x448xf32>
    %6 = arith.mulf %5, %0 : vector<1x448xf32>
    %7 = arith.addf %6, %1 : vector<1x448xf32>
    %cst_6 = arith.constant 0.000000e+00 : f32
    %8 = vector.broadcast %cst_6 : f32 to vector<1x448xf32>
    %9 = arith.maximumf %7, %8 : vector<1x448xf32>
    %10 = arith.truncf %9 : vector<1x448xf32> to vector<1x448xbf16>
    %c0_7 = arith.constant 0 : index
    %c0_8 = arith.constant 0 : index
    %c0_9 = arith.constant 0 : index
    %11 = vector.load %arg4[%c0_7, %c0_8, %c0_9] : memref<7x448x128xbf16, #tpu.memory_space<vmem>>, vector<1x448x128xbf16>
    %12 = vector.shape_cast %11 : vector<1x448x128xbf16> to vector<448x128xbf16>
    %cst_10 = arith.constant dense<0.000000e+00> : vector<1x128xf32>
    %13 = tpu.matmul %10, %12, %cst_10 {dimension_numbers = #tpu.dot_dimension_numbers<[1], [0], [0], [1], [0, 0, 1, 1], [], []>} : vector<1x448xbf16>, vector<448x128xbf16>, vector<1x128xf32> -> vector<1x128xf32>
    %14 = arith.addf %2, %13 : vector<1x128xf32>
    %c0_11 = arith.constant 0 : index
    %c1 = arith.constant 1 : index
    %c0_12 = arith.constant 0 : index
    %15 = vector.load %arg1[%c0_11, %c1, %c0_12] : memref<1x7x448xbf16, #tpu.memory_space<vmem>>, vector<1x1x448xbf16>
    %16 = vector.shape_cast %15 : vector<1x1x448xbf16> to vector<1x448xbf16>
    %17 = arith.extf %16 : vector<1x448xbf16> to vector<1x448xf32>
    %18 = arith.mulf %17, %0 : vector<1x448xf32>
    %19 = arith.addf %18, %1 : vector<1x448xf32>
    %cst_13 = arith.constant 0.000000e+00 : f32
    %20 = vector.broadcast %cst_13 : f32 to vector<1x448xf32>
    %21 = arith.maximumf %19, %20 : vector<1x448xf32>
    %22 = arith.truncf %21 : vector<1x448xf32> to vector<1x448xbf16>
    %c1_14 = arith.constant 1 : index
    %c0_15 = arith.constant 0 : index
    %c0_16 = arith.constant 0 : index
    %23 = vector.load %arg4[%c1_14, %c0_15, %c0_16] : memref<7x448x128xbf16, #tpu.memory_space<vmem>>, vector<1x448x128xbf16>
    %24 = vector.shape_cast %23 : vector<1x448x128xbf16> to vector<448x128xbf16>
    %cst_17 = arith.constant dense<0.000000e+00> : vector<1x128xf32>
    %25 = tpu.matmul %22, %24, %cst_17 {dimension_numbers = #tpu.dot_dimension_numbers<[1], [0], [0], [1], [0, 0, 1, 1], [], []>} : vector<1x448xbf16>, vector<448x128xbf16>, vector<1x128xf32> -> vector<1x128xf32>
    %26 = arith.addf %14, %25 : vector<1x128xf32>
    %c0_18 = arith.constant 0 : index
    %c2 = arith.constant 2 : index
    %c0_19 = arith.constant 0 : index
    %27 = vector.load %arg1[%c0_18, %c2, %c0_19] : memref<1x7x448xbf16, #tpu.memory_space<vmem>>, vector<1x1x448xbf16>
    %28 = vector.shape_cast %27 : vector<1x1x448xbf16> to vector<1x448xbf16>
    %29 = arith.extf %28 : vector<1x448xbf16> to vector<1x448xf32>
    %30 = arith.mulf %29, %0 : vector<1x448xf32>
    %31 = arith.addf %30, %1 : vector<1x448xf32>
    %cst_20 = arith.constant 0.000000e+00 : f32
    %32 = vector.broadcast %cst_20 : f32 to vector<1x448xf32>
    %33 = arith.maximumf %31, %32 : vector<1x448xf32>
    %34 = arith.truncf %33 : vector<1x448xf32> to vector<1x448xbf16>
    %c2_21 = arith.constant 2 : index
    %c0_22 = arith.constant 0 : index
    %c0_23 = arith.constant 0 : index
    %35 = vector.load %arg4[%c2_21, %c0_22, %c0_23] : memref<7x448x128xbf16, #tpu.memory_space<vmem>>, vector<1x448x128xbf16>
    %36 = vector.shape_cast %35 : vector<1x448x128xbf16> to vector<448x128xbf16>
    %cst_24 = arith.constant dense<0.000000e+00> : vector<1x128xf32>
    %37 = tpu.matmul %34, %36, %cst_24 {dimension_numbers = #tpu.dot_dimension_numbers<[1], [0], [0], [1], [0, 0, 1, 1], [], []>} : vector<1x448xbf16>, vector<448x128xbf16>, vector<1x128xf32> -> vector<1x128xf32>
    %38 = arith.addf %26, %37 : vector<1x128xf32>
    %c0_25 = arith.constant 0 : index
    %c3 = arith.constant 3 : index
    %c0_26 = arith.constant 0 : index
    %39 = vector.load %arg1[%c0_25, %c3, %c0_26] : memref<1x7x448xbf16, #tpu.memory_space<vmem>>, vector<1x1x448xbf16>
    %40 = vector.shape_cast %39 : vector<1x1x448xbf16> to vector<1x448xbf16>
    %41 = arith.extf %40 : vector<1x448xbf16> to vector<1x448xf32>
    %42 = arith.mulf %41, %0 : vector<1x448xf32>
    %43 = arith.addf %42, %1 : vector<1x448xf32>
    %cst_27 = arith.constant 0.000000e+00 : f32
    %44 = vector.broadcast %cst_27 : f32 to vector<1x448xf32>
    %45 = arith.maximumf %43, %44 : vector<1x448xf32>
    %46 = arith.truncf %45 : vector<1x448xf32> to vector<1x448xbf16>
    %c3_28 = arith.constant 3 : index
    %c0_29 = arith.constant 0 : index
    %c0_30 = arith.constant 0 : index
    %47 = vector.load %arg4[%c3_28, %c0_29, %c0_30] : memref<7x448x128xbf16, #tpu.memory_space<vmem>>, vector<1x448x128xbf16>
    %48 = vector.shape_cast %47 : vector<1x448x128xbf16> to vector<448x128xbf16>
    %cst_31 = arith.constant dense<0.000000e+00> : vector<1x128xf32>
    %49 = tpu.matmul %46, %48, %cst_31 {dimension_numbers = #tpu.dot_dimension_numbers<[1], [0], [0], [1], [0, 0, 1, 1], [], []>} : vector<1x448xbf16>, vector<448x128xbf16>, vector<1x128xf32> -> vector<1x128xf32>
    %50 = arith.addf %38, %49 : vector<1x128xf32>
    %c0_32 = arith.constant 0 : index
    %c4 = arith.constant 4 : index
    %c0_33 = arith.constant 0 : index
    %51 = vector.load %arg1[%c0_32, %c4, %c0_33] : memref<1x7x448xbf16, #tpu.memory_space<vmem>>, vector<1x1x448xbf16>
    %52 = vector.shape_cast %51 : vector<1x1x448xbf16> to vector<1x448xbf16>
    %53 = arith.extf %52 : vector<1x448xbf16> to vector<1x448xf32>
    %54 = arith.mulf %53, %0 : vector<1x448xf32>
    %55 = arith.addf %54, %1 : vector<1x448xf32>
    %cst_34 = arith.constant 0.000000e+00 : f32
    %56 = vector.broadcast %cst_34 : f32 to vector<1x448xf32>
    %57 = arith.maximumf %55, %56 : vector<1x448xf32>
    %58 = arith.truncf %57 : vector<1x448xf32> to vector<1x448xbf16>
    %c4_35 = arith.constant 4 : index
    %c0_36 = arith.constant 0 : index
    %c0_37 = arith.constant 0 : index
    %59 = vector.load %arg4[%c4_35, %c0_36, %c0_37] : memref<7x448x128xbf16, #tpu.memory_space<vmem>>, vector<1x448x128xbf16>
    %60 = vector.shape_cast %59 : vector<1x448x128xbf16> to vector<448x128xbf16>
    %cst_38 = arith.constant dense<0.000000e+00> : vector<1x128xf32>
    %61 = tpu.matmul %58, %60, %cst_38 {dimension_numbers = #tpu.dot_dimension_numbers<[1], [0], [0], [1], [0, 0, 1, 1], [], []>} : vector<1x448xbf16>, vector<448x128xbf16>, vector<1x128xf32> -> vector<1x128xf32>
    %62 = arith.addf %50, %61 : vector<1x128xf32>
    %c0_39 = arith.constant 0 : index
    %c5 = arith.constant 5 : index
    %c0_40 = arith.constant 0 : index
    %63 = vector.load %arg1[%c0_39, %c5, %c0_40] : memref<1x7x448xbf16, #tpu.memory_space<vmem>>, vector<1x1x448xbf16>
    %64 = vector.shape_cast %63 : vector<1x1x448xbf16> to vector<1x448xbf16>
    %65 = arith.extf %64 : vector<1x448xbf16> to vector<1x448xf32>
    %66 = arith.mulf %65, %0 : vector<1x448xf32>
    %67 = arith.addf %66, %1 : vector<1x448xf32>
    %cst_41 = arith.constant 0.000000e+00 : f32
    %68 = vector.broadcast %cst_41 : f32 to vector<1x448xf32>
    %69 = arith.maximumf %67, %68 : vector<1x448xf32>
    %70 = arith.truncf %69 : vector<1x448xf32> to vector<1x448xbf16>
    %c5_42 = arith.constant 5 : index
    %c0_43 = arith.constant 0 : index
    %c0_44 = arith.constant 0 : index
    %71 = vector.load %arg4[%c5_42, %c0_43, %c0_44] : memref<7x448x128xbf16, #tpu.memory_space<vmem>>, vector<1x448x128xbf16>
    %72 = vector.shape_cast %71 : vector<1x448x128xbf16> to vector<448x128xbf16>
    %cst_45 = arith.constant dense<0.000000e+00> : vector<1x128xf32>
    %73 = tpu.matmul %70, %72, %cst_45 {dimension_numbers = #tpu.dot_dimension_numbers<[1], [0], [0], [1], [0, 0, 1, 1], [], []>} : vector<1x448xbf16>, vector<448x128xbf16>, vector<1x128xf32> -> vector<1x128xf32>
    %74 = arith.addf %62, %73 : vector<1x128xf32>
    %c0_46 = arith.constant 0 : index
    %c6 = arith.constant 6 : index
    %c0_47 = arith.constant 0 : index
    %75 = vector.load %arg1[%c0_46, %c6, %c0_47] : memref<1x7x448xbf16, #tpu.memory_space<vmem>>, vector<1x1x448xbf16>
    %76 = vector.shape_cast %75 : vector<1x1x448xbf16> to vector<1x448xbf16>
    %77 = arith.extf %76 : vector<1x448xbf16> to vector<1x448xf32>
    %78 = arith.mulf %77, %0 : vector<1x448xf32>
    %79 = arith.addf %78, %1 : vector<1x448xf32>
    %cst_48 = arith.constant 0.000000e+00 : f32
    %80 = vector.broadcast %cst_48 : f32 to vector<1x448xf32>
    %81 = arith.maximumf %79, %80 : vector<1x448xf32>
    %82 = arith.truncf %81 : vector<1x448xf32> to vector<1x448xbf16>
    %c6_49 = arith.constant 6 : index
    %c0_50 = arith.constant 0 : index
    %c0_51 = arith.constant 0 : index
    %83 = vector.load %arg4[%c6_49, %c0_50, %c0_51] : memref<7x448x128xbf16, #tpu.memory_space<vmem>>, vector<1x448x128xbf16>
    %84 = vector.shape_cast %83 : vector<1x448x128xbf16> to vector<448x128xbf16>
    %cst_52 = arith.constant dense<0.000000e+00> : vector<1x128xf32>
    %85 = tpu.matmul %82, %84, %cst_52 {dimension_numbers = #tpu.dot_dimension_numbers<[1], [0], [0], [1], [0, 0, 1, 1], [], []>} : vector<1x448xbf16>, vector<448x128xbf16>, vector<1x128xf32> -> vector<1x128xf32>
    %86 = arith.addf %74, %85 : vector<1x128xf32>
    %c0_53 = arith.constant 0 : index
    %c0_54 = arith.constant 0 : index
    %87 = vector.load %arg5[%c0_53, %c0_54] : memref<1x128xf32, #tpu.memory_space<vmem>>, vector<1x128xf32>
    %88 = arith.addf %86, %87 : vector<1x128xf32>
    %89 = vector.shape_cast %88 : vector<1x128xf32> to vector<1x1x128xf32>
    %c0_55 = arith.constant 0 : index
    %c0_56 = arith.constant 0 : index
    %c0_57 = arith.constant 0 : index
    %90 = vector.load %arg6[%c0_55, %c0_56, %c0_57] : memref<1x1x128xf32, #tpu.memory_space<vmem>>, vector<1x1x128xf32>
    tpu.vector_store %arg6[%c0_55, %c0_56, %c0_57], %89 {strides = array<i32>} : memref<1x1x128xf32, #tpu.memory_space<vmem>>, vector<1x1x128xf32>,
    return
  }
  func.func @transform_0(%arg0: i32) -> (i32, i32, i32) {
    %c0_i32 = arith.constant 0 : i32
    %c0_i32_0 = arith.constant 0 : i32
    %c0_i32_1 = arith.constant 0 : i32
    return %arg0, %c0_i32, %c0_i32_0 : i32, i32, i32
  }
  func.func @transform_1(%arg0: i32) -> (i32, i32) {
    %c0_i32 = arith.constant 0 : i32
    %c0_i32_0 = arith.constant 0 : i32
    %c0_i32_1 = arith.constant 0 : i32
    return %c0_i32, %c0_i32_0 : i32, i32
  }
  func.func @transform_2(%arg0: i32) -> (i32, i32) {
    %c0_i32 = arith.constant 0 : i32
    %c0_i32_0 = arith.constant 0 : i32
    %c0_i32_1 = arith.constant 0 : i32
    return %c0_i32, %c0_i32_0 : i32, i32
  }
  func.func @transform_3(%arg0: i32) -> (i32, i32, i32) {
    %c0_i32 = arith.constant 0 : i32
    %c0_i32_0 = arith.constant 0 : i32
    %c0_i32_1 = arith.constant 0 : i32
    %c0_i32_2 = arith.constant 0 : i32
    return %c0_i32, %c0_i32_0, %c0_i32_1 : i32, i32, i32
  }
  func.func @transform_4(%arg0: i32) -> (i32, i32) {
    %c0_i32 = arith.constant 0 : i32
    %c0_i32_0 = arith.constant 0 : i32
    %c0_i32_1 = arith.constant 0 : i32
    return %c0_i32, %c0_i32_0 : i32, i32
  }
  func.func @transform_5(%arg0: i32) -> (i32, i32, i32) {
    %c0_i32 = arith.constant 0 : i32
    %c0_i32_0 = arith.constant 0 : i32
    %c0_i32_1 = arith.constant 0 : i32
    return %arg0, %c0_i32, %c0_i32_0 : i32, i32, i32
  }
}

</mosaic_0001>

<bundles_post_ra>
// kernel: cnn_forward.7
= control target key start
LH: loop header
LB: loop body
LE: loop exit
PB: predicated region body
PF: predicated region fallthrough
CT: control target
= control target key end

     0   :  { %s804_s12 = smov 0   ;;  %s1255_s0 = inlined_call_operand.vmem [shape: bf16[28,2,14,32], index: 0, kind: input, shape index: {}]   ;;  %s1256_s1 = inlined_call_operand.vmem [shape: f32[1,1,16], index: 1, kind: input, shape index: {}]   ;;  %s1257_s2 = inlined_call_operand.vmem [shape: f32[1,1,16], index: 2, kind: input, shape index: {}]   ;;  %s1258_s3 = inlined_call_operand.vmem [shape: bf16[28,14,16], index: 3, kind: output, shape index: {}]  }
   0x1 LB: > { %s721_s13 = sadd.s32 4294967295, %s780_s12   ;;  %p725_p0 = scmp.ge.s32.totalorder %s780_s12, 1  ;;  %s780_s12 = sphi %s804_s12, %s13_s12  }
   0x2   : > { %p139_p1 = scmp.lt.s32.totalorder %s780_s12, 5 }
   0x4   : > { %p140_p2 = pnand %p725_p0, %p139_p1 }
   0x5   : > { %v815_v0 = vld [vmem:[%s1256_s1] ss:$0 sm:$0xff] (!%p140_p2)  ;;  %s782_s16 = smov (!%p140_p2), 16   ;;  %s165_s19 = smul.u32 (!%p140_p2), 7, %s721_s13  ;;  %vm647_vm0 = vcmask (!%p140_p2), 125952   ;;  %vm649_vm1 = vcmask (!%p140_p2), 124928  }
   0x6   : > { %143 = sbr.rel (%p140_p2) target bundleno = 307 (0x133), region = 32  ;;  %277 = vrot.lane.b32.xlu0 (!%p140_p2), %v815_v0, %s782_s16  ;;  %v821_v1 = vld [vmem:[%s1257_s2] ss:$0 sm:$0xff] (!%p140_p2)  ;;  %s783_s24 = smov (!%p140_p2), 112  }
   0x7   : > { %p166_p3 = scmp.lt.s32.totalorder (!%p140_p2), %s165_s19, 27 }
   0xa   : > { %294 = vrot.lane.b32.xlu0 (!%p140_p2), %v821_v1, %s782_s16 }
   0xd   : > { %s1262_s19 = smov (!%p166_p3, %s165_s19), 27 }
   0xe   : > { %s748_s20 = sshll.u32 %s1262_s19, 4  ;;  %s749_s25 = sshll.u32 %s1262_s19, 3 }
   0xf   : > { %s830_s23 = scalar_lea.vmem %s1255_s0, %s748_s20  ;;  %s1210_s28 = scalar_lea.vmem %s1258_s3, %s749_s25 }
  0x10   : > { %v833_v2 = vld [vmem:[%s830_s23] ss:$16 sps:$4 sm:$0xff]   ;;  %v839_v4 = vld [vmem:[%s830_s23 + $0x4] sm:$0x7]  ;;  %v848_v10 = vld [vmem:[%s830_s23 + $0x14] sm:$0x7] }
  0x11   : > { %v836_v3 = vld [vmem:[%s830_s23 + $0x20] ss:$16 sps:$4 sm:$0xff]   ;;  %v211_v5 = vunpack.c.h.bf16 %v833_v2  ;;  %v209_v6 = vunpack.c.l.bf16 %v833_v2  ;;  %v210_v9 = vunpack.c.l.bf16 %v839_v4  ;;  %v212_v15 = vunpack.c.l.bf16 %v848_v10  ;;  %v872_v21 = vld [vmem:[%s830_s23 + $0x24] sm:$0x7]  ;;  %v887_v30 = vld [vmem:[%s830_s23 + $0x34] sm:$0x7] }
  0x12   : > { %v213_v8 = vunpack.c.l.bf16 %v836_v3  ;;  %v215_v14 = vunpack.c.h.bf16 %v836_v3  ;;  %v869_v20 = vld [vmem:[%s830_s23 + $0x40] ss:$16 sps:$4 sm:$0xff]   ;;  %v214_v29 = vunpack.c.l.bf16 %v872_v21  ;;  %v216_v38 = vunpack.c.l.bf16 %v887_v30  ;;  %v905_v40 = vld [vmem:[%s830_s23 + $0x44] sm:$0x7]  ;;  %v920_v49 = vld [vmem:[%s830_s23 + $0x54] sm:$0x7] }
  0x13   : > { %v217_v28 = vunpack.c.l.bf16 %v869_v20  ;;  %v219_v37 = vunpack.c.h.bf16 %v869_v20  ;;  %v902_v39 = vld [vmem:[%s830_s23 + $0x8] ss:$88 sps:$4 sm:$0xff]   ;;  %v218_v48 = vunpack.c.l.bf16 %v905_v40  ;;  %v220_v57 = vunpack.c.l.bf16 %v920_v49  ;;  %v938_v59 = vld [vmem:[%s830_s23 + $0x64] sm:$0x7] }
  0x14   : > { %v221_v47 = vunpack.c.h.bf16 %v902_v39  ;;  %v395_v56 = vunpack.c.l.bf16 %v902_v39  ;;  %v935_v58 = vld [vmem:[%s830_s23 + $0x18] ss:$16 sps:$4 sm:$0xff]   ;;  %v230_v2 = vmul.f32 %v815_v0, %v210_v9  ;;  %v235_v4 = vmul.f32 %v815_v0, %v215_v14 }
  0x78   : > { %v843_v7 = vpop.permute.xlu0 %277 }
  0x79   : > { %v282_v11 = vmul.f32 %v843_v7, %v211_v5  ;;  %v280_v12 = vmul.f32 %v843_v7, %v209_v6  ;;  %v284_v18 = vmul.f32 %v843_v7, %v213_v8  ;;  %v281_v19 = vmul.f32 %v843_v7, %v210_v9 }
  0x7a   : > { %v286_v26 = vmul.f32 %v843_v7, %v215_v14  ;;  %v283_v27 = vmul.f32 %v843_v7, %v212_v15  ;;  %v288_v35 = vmul.f32 %v843_v7, %v217_v28  ;;  %v285_v36 = vmul.f32 %v843_v7, %v214_v29 }
  0x7b   : > { %v290_v45 = vmul.f32 %v843_v7, %v219_v37  ;;  %v287_v46 = vmul.f32 %v843_v7, %v216_v38  ;;  %v292_v54 = vmul.f32 %v843_v7, %v221_v47  ;;  %v289_v55 = vmul.f32 %v843_v7, %v218_v48 }
  0x7c   : > { %v856_v13 = vpop.permute.xlu0 %294  ;;  %v232_v9 = vmul.f32 %v815_v0, %v212_v15 }
  0x7d   : > { %v299_v16 = vadd.f32 %v856_v13, %v282_v11  ;;  %v297_v17 = vadd.f32 %v856_v13, %v280_v12  ;;  %v301_v24 = vadd.f32 %v856_v13, %v284_v18  ;;  %v298_v25 = vadd.f32 %v856_v13, %v281_v19  ;;  %v953_v18 = vld [vmem:[%s830_s23 + $0xc] sm:$0x7] }
  0x7e   : > { %v303_v33 = vadd.f32 %v856_v13, %v286_v26  ;;  %v300_v34 = vadd.f32 %v856_v13, %v283_v27  ;;  %v305_v43 = vadd.f32 %v856_v13, %v288_v35  ;;  %v302_v44 = vadd.f32 %v856_v13, %v285_v36 }
  0x7f   : > { %v313_v22 = vmax.f32 %v299_v16, 0.0  ;;  %v311_v23 = vmax.f32 %v297_v17, 0.0  ;;  %v315_v31 = vmax.f32 %v301_v24, 0.0  ;;  %v312_v32 = vmax.f32 %v298_v25, 0.0 }
  0x80   : > { %v317_v41 = vmax.f32 %v303_v33, 0.0  ;;  %v314_v42 = vmax.f32 %v300_v34, 0.0  ;;  %v319_v50 = vmax.f32 %v305_v43, 0.0  ;;  %v316_v51 = vmax.f32 %v302_v44, 0.0  ;;  %v971_v33 = vld [vmem:[%s830_s23 + $0x1c] sm:$0x7] }
  0x81   : > { %343 = vrot.lane.b32.xlu0 %v313_v22, %s783_s24  ;;  %339 = vrot.lane.b32.xlu1 %v311_v23, %s783_s24  ;;  %v307_v52 = vadd.f32 %v856_v13, %v290_v45  ;;  %v304_v53 = vadd.f32 %v856_v13, %v287_v46  ;;  %v309_v62 = vadd.f32 %v856_v13, %v292_v54  ;;  %v397_v16 = vunpack.c.l.bf16 %v935_v58  ;;  %v986_v46 = vld [vmem:[%s830_s23 + $0x2c] sm:$0x7] }
  0x82   : > { %v306_v63 = vadd.f32 %v856_v13, %v289_v55  ;;  %v465_v11 = vmul.f32 %v395_v56, %v843_v7  ;;  %v291_v12 = vmul.f32 %v843_v7, %v220_v57  ;;  %v1259_v17 = vunpack.c.l.bf16 %v938_v59 }
  0x83   : > { %v321_v60 = vmax.f32 %v307_v52, 0.0  ;;  %v318_v61 = vmax.f32 %v304_v53, 0.0  ;;  %v323_v19 = vmax.f32 %v309_v62, 0.0  ;;  %v467_v25 = vmul.f32 %v397_v16, %v843_v7  ;;  %v1001_v62 = vld [vmem:[%s830_s23 + $0x58] ss:$16 sps:$4 sm:$0xff]  }
  0x84   : > { %v320_v22 = vmax.f32 %v306_v63, 0.0  ;;  %v479_v23 = vadd.f32 %v465_v11, %v856_v13  ;;  %v308_v24 = vadd.f32 %v856_v13, %v291_v12  ;;  %v293_v26 = vmul.f32 %v843_v7, %v1259_v17  ;;  %v1004_v63 = vld [vmem:[%s830_s23 + $0x3c] sm:$0x7] }
  0x85   : > { %347 = vrot.lane.b32.xlu0 %v315_v31, %s783_s24  ;;  %341 = vrot.lane.b32.xlu1 %v312_v32, %s783_s24  ;;  %v399_v27 = vunpack.c.h.bf16 %v935_v58  ;;  %v396_v31 = vunpack.c.l.bf16 %v953_v18  ;;  %v968_v32 = vld [vmem:[%s830_s23 + $0x38] ss:$16 sps:$4 sm:$0xff]   ;;  %v481_v36 = vadd.f32 %v467_v25, %v856_v13  ;;  %v398_v45 = vunpack.c.l.bf16 %v971_v33 }
  0x86   : > { %v493_v34 = vmax.f32 %v479_v23, 0.0  ;;  %v322_v35 = vmax.f32 %v308_v24, 0.0  ;;  %v401_v44 = vunpack.c.l.bf16 %v968_v32  ;;  %v405_v25 = vunpack.c.l.bf16 %v1001_v62 }
  0x87   : > { %v466_v43 = vmul.f32 %v396_v31, %v843_v7  ;;  %v468_v55 = vmul.f32 %v398_v45, %v843_v7  ;;  %v250_v58 = vadd.f32 %v821_v1, %v230_v2 }
  0x88   : > { %v471_v54 = vmul.f32 %v401_v44, %v843_v7  ;;  %v415_v18 = vmul.f32 %v815_v0, %v401_v44  ;;  %v237_v44 = vmul.f32 %v815_v0, %v217_v28  ;;  %v419_v20 = vmul.f32 %v815_v0, %v405_v25 }
  0x89   : > { %351 = vrot.lane.b32.xlu0 %v317_v41, %s783_s24  ;;  %345 = vrot.lane.b32.xlu1 %v314_v42, %s783_s24  ;;  %v310_v41 = vadd.f32 %v856_v13, %v293_v26  ;;  %v469_v42 = vmul.f32 %v399_v27, %v843_v7  ;;  %v480_v53 = vadd.f32 %v466_v43, %v856_v13  ;;  %v402_v26 = vunpack.c.l.bf16 %v1004_v63 }
  0x8a   : > { %v475_v43 = vmul.f32 %v405_v25, %v843_v7 }
  0x8b   : > { %v483_v52 = vadd.f32 %v469_v42, %v856_v13  ;;  %v494_v12 = vmax.f32 %v480_v53, 0.0  ;;  %v1034_v53 = vld [vmem:[%s830_s23 + $0x5c] sm:$0x7]  ;;  %v416_v30 = vmul.f32 %v815_v0, %v402_v26 }
  0x8d   : > { %355 = vrot.lane.b32.xlu0 %v319_v50, %s783_s24  ;;  %349 = vrot.lane.b32.xlu1 %v316_v51, %s783_s24  ;;  %v495_v50 = vmax.f32 %v481_v36, 0.0  ;;  %v324_v51 = vmax.f32 %v310_v41, 0.0  ;;  %v497_v11 = vmax.f32 %v483_v52, 0.0 }
  0x91   : > { %359 = vrot.lane.b32.xlu0 %v321_v60, %s783_s24  ;;  %353 = vrot.lane.b32.xlu1 %v318_v61, %s783_s24  ;;  %v403_v60 = vunpack.c.h.bf16 %v968_v32  ;;  %v400_v61 = vunpack.c.l.bf16 %v986_v46  ;;  %v239_v32 = vmul.f32 %v815_v0, %v219_v37 }
  0x93   : > { %v473_v23 = vmul.f32 %v403_v60, %v843_v7  ;;  %v470_v24 = vmul.f32 %v400_v61, %v843_v7 }
  0x95   : > { %363 = vrot.lane.b32.xlu0 %v323_v19, %s783_s24  ;;  %357 = vrot.lane.b32.xlu1 %v320_v22, %s783_s24  ;;  %v485_v19 = vadd.f32 %v471_v54, %v856_v13  ;;  %v482_v22 = vadd.f32 %v468_v55, %v856_v13  ;;  %v487_v41 = vadd.f32 %v473_v23, %v856_v13  ;;  %v406_v23 = vunpack.c.l.bf16 %v1034_v53 }
  0x96   : > { %v484_v42 = vadd.f32 %v470_v24, %v856_v13  ;;  %v1048_v24 = vld [vmem:[%s830_s23 + $0x6c] sm:$0x7] }
  0x97   : > { %v496_v36 = vmax.f32 %v482_v22, 0.0  ;;  %v501_v54 = vmax.f32 %v487_v41, 0.0 }
  0x98   : > { %v498_v55 = vmax.f32 %v484_v42, 0.0 }
  0x99   : > { %521 = vrot.lane.b32.xlu0 %v493_v34, %s783_s24  ;;  %361 = vrot.lane.b32.xlu1 %v322_v35, %s783_s24  ;;  %v1019_v34 = vld [vmem:[%s830_s23 + $0x4c] sm:$0x7]  ;;  %v499_v35 = vmax.f32 %v485_v19, 0.0 }
  0x9a   : > { %v404_v52 = vunpack.c.l.bf16 %v1019_v34 }
  0x9c   : > { %v474_v22 = vmul.f32 %v404_v52, %v843_v7  ;;  %v418_v39 = vmul.f32 %v815_v0, %v404_v52 }
  0x9d   : > { %525 = vrot.lane.b32.xlu0 %v495_v50, %s783_s24  ;;  %365 = vrot.lane.b32.xlu1 %v324_v51, %s783_s24  ;;  %v472_v50 = vmul.f32 %v402_v26, %v843_v7  ;;  %v407_v51 = vunpack.c.h.bf16 %v1001_v62  ;;  %v240_v62 = vmul.f32 %v815_v0, %v220_v57 }
  0x9e   : > { %v488_v42 = vadd.f32 %v474_v22, %v856_v13 }
  0x9f   : > { %v477_v19 = vmul.f32 %v407_v51, %v843_v7 }
  0xa1   : > { %529 = vrot.lane.b32.xlu0 %v497_v11, %s783_s24  ;;  %523 = vrot.lane.b32.xlu1 %v494_v12, %s783_s24  ;;  %v489_v11 = vadd.f32 %v475_v43, %v856_v13  ;;  %v486_v12 = vadd.f32 %v472_v50, %v856_v13  ;;  %v491_v41 = vadd.f32 %v477_v19, %v856_v13  ;;  %v408_v50 = vunpack.c.l.bf16 %v1048_v24 }
  0xa2   : > { %v476_v43 = vmul.f32 %v406_v23, %v843_v7 }
  0xa4   : > { %v490_v17 = vadd.f32 %v476_v43, %v856_v13 }
  0xa5   : > { %533 = vrot.lane.b32.xlu0 %v499_v35, %s783_s24  ;;  %527 = vrot.lane.b32.xlu1 %v496_v36, %s783_s24  ;;  %v503_v35 = vmax.f32 %v489_v11, 0.0  ;;  %v500_v36 = vmax.f32 %v486_v12, 0.0  ;;  %v478_v11 = vmul.f32 %v408_v50, %v843_v7  ;;  %v409_v7 = vmul.f32 %v815_v0, %v395_v56 }
  0xa6   : > { %v504_v12 = vmax.f32 %v490_v17, 0.0  ;;  %v233_v17 = vmul.f32 %v815_v0, %v213_v8  ;;  %v410_v8 = vmul.f32 %v815_v0, %v396_v31 }
  0xa7   : > { %v492_v19 = vadd.f32 %v478_v11, %v856_v13  ;;  %v411_v13 = vmul.f32 %v815_v0, %v397_v16  ;;  %v413_v16 = vmul.f32 %v815_v0, %v399_v27  ;;  %v412_v27 = vmul.f32 %v815_v0, %v398_v45 }
  0xa8   : > { %v424_v10 = vadd.f32 %v821_v1, %v410_v8  ;;  %v264_v45 = vmax.f32 %v250_v58, 0.0  ;;  %v236_v8 = vmul.f32 %v815_v0, %v216_v38 }
  0xa9   : > { %537 = vrot.lane.b32.xlu0 %v501_v54, %s783_s24  ;;  %531 = vrot.lane.b32.xlu1 %v498_v55, %s783_s24  ;;  %v505_v54 = vmax.f32 %v491_v41, 0.0  ;;  %v502_v55 = vmax.f32 %v488_v42, 0.0  ;;  %v506_v22 = vmax.f32 %v492_v19, 0.0  ;;  %v425_v56 = vadd.f32 %v821_v1, %v411_v13 }
  0xaa   : > { %v253_v42 = vadd.f32 %v821_v1, %v233_v17  ;;  %v427_v14 = vadd.f32 %v821_v1, %v413_v16  ;;  %v252_v19 = vadd.f32 %v821_v1, %v232_v9  ;;  %v417_v13 = vmul.f32 %v815_v0, %v403_v60 }
  0xab   : > { %v439_v3 = vmax.f32 %v425_v56, 0.0  ;;  %v414_v17 = vmul.f32 %v815_v0, %v400_v61  ;;  %v438_v21 = vmax.f32 %v424_v10, 0.0  ;;  %v257_v16 = vadd.f32 %v821_v1, %v237_v44 }
  0xac   : > { %v267_v11 = vmax.f32 %v253_v42, 0.0  ;;  %v266_v56 = vmax.f32 %v252_v19, 0.0  ;;  %v431_v9 = vadd.f32 %v821_v1, %v417_v13  ;;  %v256_v63 = vadd.f32 %v821_v1, %v236_v8 }
  0xad   : > { %541 = vrot.lane.b32.xlu0 %v503_v35, %s783_s24  ;;  %535 = vrot.lane.b32.xlu1 %v500_v36, %s783_s24  ;;  %v231_v35 = vmul.f32 %v815_v0, %v211_v5  ;;  %v229_v36 = vmul.f32 %v815_v0, %v209_v6  ;;  %v423_v6 = vadd.f32 %v821_v1, %v409_v7 }
  0xae   : > { %v426_v7 = vadd.f32 %v821_v1, %v412_v27  ;;  %v259_v27 = vadd.f32 %v821_v1, %v239_v32  ;;  %v270_v52 = vmax.f32 %v256_v63, 0.0  ;;  %v422_v32 = vmul.f32 %v815_v0, %v408_v50 }
  0xaf   : > { %v251_v41 = vadd.f32 %v821_v1, %v231_v35  ;;  %v249_v5 = vadd.f32 %v821_v1, %v229_v36  ;;  %v437_v31 = vmax.f32 %v423_v6, 0.0  ;;  %v234_v35 = vmul.f32 %v815_v0, %v214_v29 }
  0xb0   : > { %v429_v36 = vadd.f32 %v821_v1, %v415_v18  ;;  %v271_v18 = vmax.f32 %v257_v16, 0.0  ;;  %v273_v44 = vmax.f32 %v259_v27, 0.0  ;;  %v1260_v16 = vunpack.c.l.bf16 %v938_v59 }
  0xb1   : > { %545 = vrot.lane.b32.xlu0 %v505_v54, %s783_s24  ;;  %539 = vrot.lane.b32.xlu1 %v502_v55, %s783_s24  ;;  %v265_v43 = vmax.f32 %v251_v41, 0.0  ;;  %v263_v54 = vmax.f32 %v249_v5, 0.0  ;;  %v441_v5 = vmax.f32 %v427_v14, 0.0  ;;  %v254_v61 = vadd.f32 %v821_v1, %v234_v35 }
  0xb2   : > { %v443_v42 = vmax.f32 %v429_v36, 0.0  ;;  %v432_v35 = vadd.f32 %v821_v1, %v418_v39  ;;  %v420_v36 = vmul.f32 %v815_v0, %v406_v23  ;;  %v242_v53 = vmul.f32 %v815_v0, %v1260_v16 }
  0xb3   : > { %v268_v25 = vmax.f32 %v254_v61, 0.0 }
  0xb4   : > { %v434_v23 = vadd.f32 %v821_v1, %v420_v36  ;;  %v446_v8 = vmax.f32 %v432_v35, 0.0 }
  0xb5   : > { %543 = vrot.lane.b32.xlu1 %v504_v12, %s783_s24  ;;  %v255_v12 = vadd.f32 %v821_v1, %v235_v4  ;;  %v440_v4 = vmax.f32 %v426_v7, 0.0 }
  0xb6   : > { %v448_v24 = vmax.f32 %v434_v23, 0.0 }
  0xb7   : > { %v269_v6 = vmax.f32 %v255_v12, 0.0 }
  0xb9   : > { %547 = vrot.lane.b32.xlu1 %v506_v22, %s783_s24 }
  0xf3   : > { %v344_v55 = vpop.permute.xlu0 %343  ;;  %v340_v15 = vpop.permute.xlu1 %339 }
  0xf4   : > { %v383_v33 = vadd.f32 %v344_v55, %v265_v43  ;;  %v381_v22 = vadd.f32 %v340_v15, %v263_v54  ;;  %v428_v43 = vadd.f32 %v821_v1, %v414_v17  ;;  %v445_v55 = vmax.f32 %v431_v9, 0.0 }
  0xf5   : > { %v421_v15 = vmul.f32 %v815_v0, %v407_v51 }
  0xf6   : > { %v1127_v28 = vadd.f32 %v437_v31, %v381_v22  ;;  %v1129_v41 = vadd.f32 %v439_v3, %v383_v33  ;;  %v241_v31 = vmul.f32 %v815_v0, %v221_v47  ;;  %v238_v3 = vmul.f32 %v815_v0, %v218_v48 }
  0xf7   : > { %v348_v2 = vpop.permute.xlu0 %347  ;;  %v342_v29 = vpop.permute.xlu1 %341  ;;  %v442_v26 = vmax.f32 %v428_v43, 0.0  ;;  %v433_v48 = vadd.f32 %v821_v1, %v419_v20  ;;  %v262_v20 = vadd.f32 %v821_v1, %v242_v53  ;;  %v436_v0 = vadd.f32 %v821_v1, %v422_v32 }
  0xf8   : > { %v385_v60 = vadd.f32 %v348_v2, %v267_v11  ;;  %v382_v46 = vadd.f32 %v342_v29, %v264_v45  ;;  %v430_v11 = vadd.f32 %v821_v1, %v416_v30  ;;  %v261_v33 = vadd.f32 %v821_v1, %v241_v31 }
  0xf9   : > { %v258_v22 = vadd.f32 %v821_v1, %v238_v3  ;;  %v435_v45 = vadd.f32 %v821_v1, %v421_v15  ;;  %v447_v49 = vmax.f32 %v433_v48, 0.0  ;;  %v260_v2 = vadd.f32 %v821_v1, %v240_v62 }
  0xfa   : > { %v1141_v54 = vadd.f32 %v441_v5, %v385_v60  ;;  %v1143_v58 = vadd.f32 %v438_v21, %v382_v46  ;;  %v444_v17 = vmax.f32 %v430_v11, 0.0  ;;  %v275_v21 = vmax.f32 %v261_v33, 0.0 }
  0xfb   : > { %v352_v37 = vpop.permute.xlu0 %351  ;;  %v346_v38 = vpop.permute.xlu1 %345  ;;  %v449_v61 = vmax.f32 %v435_v45, 0.0  ;;  %v274_v59 = vmax.f32 %v260_v2, 0.0  ;;  %v276_v31 = vmax.f32 %v262_v20, 0.0 }
  0xfc   : > { %v387_v14 = vadd.f32 %v352_v37, %v269_v6  ;;  %v384_v10 = vadd.f32 %v346_v38, %v266_v56  ;;  %v272_v56 = vmax.f32 %v258_v22, 0.0 }
  0xfe   : > { %v1165_v47 = vadd.f32 %v443_v42, %v387_v14  ;;  %v1167_v40 = vadd.f32 %v440_v4, %v384_v10  ;;  %v450_v10 = vmax.f32 %v436_v0, 0.0 }
  0xff   : > { %v356_v12 = vpop.permute.xlu0 %355  ;;  %v350_v19 = vpop.permute.xlu1 %349 }
 0x100   : > { %v389_v34 = vadd.f32 %v356_v12, %v271_v18  ;;  %v386_v51 = vadd.f32 %v350_v19, %v268_v25 }
 0x102   : > { %v1181_v7 = vadd.f32 %v445_v55, %v389_v34  ;;  %v1183_v13 = vadd.f32 %v442_v26, %v386_v51 }
 0x103   : > { %v360_v57 = vpop.permute.xlu0 %359  ;;  %v354_v5 = vpop.permute.xlu1 %353 }
 0x104   : > { %v391_v29 = vadd.f32 %v360_v57, %v273_v44  ;;  %v388_v6 = vadd.f32 %v354_v5, %v270_v52 }
 0x106   : > { %v1193_v60 = vadd.f32 %v447_v49, %v391_v29  ;;  %v1195_v46 = vadd.f32 %v444_v17, %v388_v6 }
 0x107   : > { %v364_v42 = vpop.permute.xlu0 %363  ;;  %v358_v4 = vpop.permute.xlu1 %357 }
 0x108   : > { %v393_v9 = vadd.f32 %v364_v42, %v275_v21  ;;  %v390_v43 = vadd.f32 %v358_v4, %v272_v56 }
 0x10a   : > { %v1198_v30 = vadd.f32 %v449_v61, %v393_v9  ;;  %v1200_v37 = vadd.f32 %v446_v8, %v390_v43 }
 0x10b   : > { %v522_v50 = vpop.permute.xlu0 %521  ;;  %v362_v38 = vpop.permute.xlu1 %361 }
 0x10c   : > { %v563_v18 = vadd.f32 %v522_v50, %v1127_v28  ;;  %v392_v27 = vadd.f32 %v362_v38, %v274_v59 }
 0x10e   : > { %v577_v3 = vmul.f32 0.25, %v563_v18  ;;  %v1205_v14 = vadd.f32 %v448_v24, %v392_v27 }
 0x10f   : > { %v526_v1 = vpop.permute.xlu0 %525  ;;  %v366_v25 = vpop.permute.xlu1 %365 }
 0x110   : > { %v750_v63 = vpack.c.bf16 %v577_v3, %v577_v3  ;;  %v565_v55 = vadd.f32 %v526_v1, %v1129_v41  ;;  %v394_v28 = vadd.f32 %v366_v25, %v276_v31 }
 0x112   : > { %648 = vst.msk [vmem:[%s1210_s28] sm:$0xf] %vm647_vm0, %v750_v63  ;;  %v579_v26 = vmul.f32 0.25, %v565_v55  ;;  %v464_v15 = vadd.f32 %v450_v10, %v394_v28 }
 0x113   : > { %v530_v39 = vpop.permute.xlu0 %529  ;;  %v524_v48 = vpop.permute.xlu1 %523 }
 0x114   : > { %v752_v11 = vpack.c.bf16 %v579_v26, %v579_v26  ;;  %v567_v12 = vadd.f32 %v530_v39, %v1141_v54  ;;  %v564_v19 = vadd.f32 %v524_v48, %v1143_v58 }
 0x116   : > { %651 = vst.msk [vmem:[%s1210_s28 + $0x8] sm:$0xf] %vm647_vm0, %v752_v11  ;;  %v581_v44 = vmul.f32 0.25, %v567_v12  ;;  %v578_v33 = vmul.f32 0.25, %v564_v19 }
 0x117   : > { %v534_v41 = vpop.permute.xlu0 %533  ;;  %v528_v62 = vpop.permute.xlu1 %527 }
 0x118   : > { %v754_v34 = vpack.c.bf16 %v581_v44, %v581_v44  ;;  %v751_v51 = vpack.c.bf16 %v578_v33, %v578_v33  ;;  %v569_v52 = vadd.f32 %v534_v41, %v1165_v47  ;;  %v566_v22 = vadd.f32 %v528_v62, %v1167_v40 }
 0x11a   : > { %653 = vst.msk [vmem:[%s1210_s28 + $0x10] sm:$0xf] %vm647_vm0, %v754_v34  ;;  %v583_v54 = vmul.f32 0.25, %v569_v52  ;;  %v580_v58 = vmul.f32 0.25, %v566_v22 }
 0x11b   : > { %650 = vst.msk [vmem:[%s1210_s28 + $0x4] sm:$0x7] %vm649_vm1, %v751_v51  ;;  %v538_v45 = vpop.permute.xlu0 %537  ;;  %v532_v35 = vpop.permute.xlu1 %531 }
 0x11c   : > { %v756_v36 = vpack.c.bf16 %v583_v54, %v583_v54  ;;  %v753_v49 = vpack.c.bf16 %v580_v58, %v580_v58  ;;  %v571_v17 = vadd.f32 %v538_v45, %v1181_v7  ;;  %v568_v57 = vadd.f32 %v532_v35, %v1183_v13 }
 0x11e   : > { %655 = vst.msk [vmem:[%s1210_s28 + $0x18] sm:$0xf] %vm647_vm0, %v756_v36  ;;  %v585_v47 = vmul.f32 0.25, %v571_v17  ;;  %v582_v40 = vmul.f32 0.25, %v568_v57 }
 0x11f   : > { %652 = vst.msk [vmem:[%s1210_s28 + $0xc] sm:$0x7] %vm649_vm1, %v753_v49  ;;  %v542_v5 = vpop.permute.xlu0 %541  ;;  %v536_v21 = vpop.permute.xlu1 %535 }
 0x120   : > { %v758_v2 = vpack.c.bf16 %v585_v47, %v585_v47  ;;  %v755_v29 = vpack.c.bf16 %v582_v40, %v582_v40  ;;  %v573_v6 = vadd.f32 %v542_v5, %v1193_v60  ;;  %v570_v56 = vadd.f32 %v536_v21, %v1195_v46 }
 0x122   : > { %657 = vst.msk [vmem:[%s1210_s28 + $0x20] sm:$0xf] %vm647_vm0, %v758_v2  ;;  %v587_v7 = vmul.f32 0.25, %v573_v6  ;;  %v584_v13 = vmul.f32 0.25, %v570_v56 }
 0x123   : > { %654 = vst.msk [vmem:[%s1210_s28 + $0x14] sm:$0x7] %vm649_vm1, %v755_v29  ;;  %v546_v16 = vpop.permute.xlu0 %545  ;;  %v540_v53 = vpop.permute.xlu1 %539 }
 0x124   : > { %v760_v23 = vpack.c.bf16 %v587_v7, %v587_v7  ;;  %v757_v32 = vpack.c.bf16 %v584_v13, %v584_v13  ;;  %v575_v61 = vadd.f32 %v546_v16, %v1198_v30  ;;  %v572_v8 = vadd.f32 %v540_v53, %v1200_v37 }
 0x126   : > { %659 = vst.msk [vmem:[%s1210_s28 + $0x28] sm:$0xf] %vm647_vm0, %v760_v23  ;;  %v589_v60 = vmul.f32 0.25, %v575_v61  ;;  %v586_v46 = vmul.f32 0.25, %v572_v8 }
 0x127   : > { %656 = vst.msk [vmem:[%s1210_s28 + $0x1c] sm:$0x7] %vm649_vm1, %v757_v32  ;;  %v544_v42 = vpop.permute.xlu1 %543 }
 0x128   : > { %v762_v4 = vpack.c.bf16 %v589_v60, %v589_v60  ;;  %v759_v9 = vpack.c.bf16 %v586_v46, %v586_v46  ;;  %v574_v43 = vadd.f32 %v544_v42, %v1205_v14 }
 0x12a   : > { %661 = vst.msk [vmem:[%s1210_s28 + $0x30] sm:$0xf] %vm647_vm0, %v762_v4  ;;  %v588_v59 = vmul.f32 0.25, %v574_v43 }
 0x12b   : > { %658 = vst.msk [vmem:[%s1210_s28 + $0x24] sm:$0x7] %vm649_vm1, %v759_v9  ;;  %v548_v20 = vpop.permute.xlu1 %547 }
 0x12c   : > { %v761_v30 = vpack.c.bf16 %v588_v59, %v588_v59  ;;  %v576_v37 = vadd.f32 %v548_v20, %v464_v15 }
 0x12e   : > { %660 = vst.msk [vmem:[%s1210_s28 + $0x2c] sm:$0x7] %vm649_vm1, %v761_v30  ;;  %v590_v24 = vmul.f32 0.25, %v576_v37 }
 0x130   : > { %v763_v0 = vpack.c.bf16 %v590_v24, %v590_v24 }
 0x132   : > { %662 = vst.msk [vmem:[%s1210_s28 + $0x34] sm:$0x7] %vm649_vm1, %v763_v0 }
 0x133 PF: > { %s13_s12 = sadd.s32 1, %s780_s12  }
 0x134   : > { %p10_p4 = scmp.ge.s32.totalorder %s13_s12, 6  }
 0x136   :  { %12 = sbr.rel (!%p10_p4) target bundleno = 1 (0x1), region = 62 }

// kernel: cnn_forward.6
= control target key start
LH: loop header
LB: loop body
LE: loop exit
PB: predicated region body
PF: predicated region fallthrough
CT: control target
= control target key end

     0   :  { %10 = vsyncpa [#allocation3], 0  ;;  %s2133_s0 = inlined_call_operand.vmem [shape: bf16[2,32,32], index: 0, kind: input, shape index: {}]   ;;  %s2134_s1 = inlined_call_operand.hbm [shape: bf16[5,32,448], index: 1, kind: input, shape index: {}]   ;;  %s2135_s2 = inlined_call_operand.hbm [shape: f32[1,448], index: 2, kind: input, shape index: {}]   ;;  %s2136_s3 = inlined_call_operand.vmem [shape: bf16[2,28,448], index: 3, kind: output, shape index: {0}]   ;;  %s2137_s4 = inlined_call_operand.vmem [shape: f32[2,2,448], index: 4, kind: output, shape index: {1}]  }
   0x1   :  { %11 = vsyncpa [#allocation5], 0  ;;  %s1888_s15 = smov 0  }
   0x2 LB: > { %s1894_s16 = sadd.s32 4294967295, %s1855_s15   ;;  %p1522_p0 = scmp.ge.s32.totalorder %s1855_s15, 1  ;;  %s1855_s15 = sphi %s1888_s15, %s17_s15  }
   0x3   : > { %p142_p1 = scmp.lt.s32.totalorder %s1855_s15, 3  ;;  %s1857_s17 = smov [#allocation2]  }
   0x4   : > { %s154_s18 = sshll.u32 %s1857_s17, 4  ;;  %p2138_p3 = scmp.eq.s32.totalorder %s1894_s16, 0  ;;  %s155_s18 = int_to_ptr.vmem [resolvable:$true] %s154_s18 }
   0x5   : > { %p1898_p2 = pnand %p1522_p0, %p142_p1  ;;  %s1858_s20 = smov [#allocation4]  }
   0x6   : > { %s168_s21 = sshll.u32 %s1858_s20, 4  ;;  %s1785_s25 = scalar_lea.hbm %s2134_s1, 5120  ;;  %s1911_s21 = int_to_ptr.vmem [resolvable:$true] %s168_s21 }
   0x7   : > { %s2140_s19 = scalar_select %p1898_p2, 1, 0 }
   0x8   : > { %p1694_p4 = pneg %p1898_p2  ;;  %p1786_p6 = scmp.ne.s32.totalorder %s2134_s1, %s1785_s25 }
   0x9   : > { %p1792_p10 = scmp.lt.u32.totalorder %s1785_s25, %s2134_s1 }
   0xa   : > { %p1907_p5 = pnand %p2138_p3, %p1694_p4 }
   0xc   : > { %p1787_p7 = pneg %p1907_p5 }
   0xe   : > { %p1788_p8 = pnand %p1787_p7, %p1786_p6 }
  0x10   : > { %p1789_p9 = pneg %p1788_p8 }
  0x12   : > { %p1794_p11 = pnand %p1792_p10, %p1789_p9 }
  0x14   : > { %1797 = shalt.err (!%p1794_p11)
}
  0x15   : > { %s1798_s30 = scalar_lea.vmem %s155_s18, 5120  ;;  %p1806_p1 = scmp.lt.s32.totalorder %s155_s18, %s155_s18 }
  0x16   : > { %p1799_p12 = scmp.ne.s32.totalorder %s155_s18, %s1798_s30  ;;  %p1807_p4 = scmp.lt.s32.totalorder %s1798_s30, %s1798_s30 }
  0x18   : > { %p1801_p13 = pnand %p1799_p12, %p1787_p7  ;;  %p1808_p3 = por %p1807_p4, %p1806_p1 }
  0x1a   : > { %p1802_p0 = pneg %p1801_p13 }
  0x1c   : > { %p1809_p2 = pnand %p1808_p3, %p1802_p0 }
  0x1e   : > { %1812 = shalt.err (!%p1809_p2)
}
  0x1f   : > { %s1859_s5 = smov 256   ;;  %s1860_s6 = smov 16  }
  0x20   : > { %1697 = dma.hbm_to_vmem [thread:$0]  (!%p1907_p5), %s2134_s1, 5120, %s155_s18, [#allocation3], %s1859_s5, %s1859_s5, %s1860_s6  }
  0x21   : > { %s1813_s11 = scalar_lea.hbm %s2135_s2, 64 }
  0x22   : > { %p1814_p6 = scmp.ne.s32.totalorder %s2135_s2, %s1813_s11  ;;  %p1820_p8 = scmp.lt.u32.totalorder %s1813_s11, %s2135_s2 }
  0x24   : > { %p1816_p2 = pnand %p1814_p6, %p1787_p7 }
  0x26   : > { %p1817_p3 = pneg %p1816_p2 }
  0x28   : > { %p1822_p9 = pnand %p1820_p8, %p1817_p3 }
  0x2a   : > { %1825 = shalt.err (!%p1822_p9)
}
  0x2b   : > { %s1826_s18 = scalar_lea.vmem %s1911_s21, 64  ;;  %p1834_p13 = scmp.lt.s32.totalorder %s1911_s21, %s1911_s21 }
  0x2c   : > { %p1827_p10 = scmp.ne.s32.totalorder %s1911_s21, %s1826_s18  ;;  %p1835_p0 = scmp.lt.s32.totalorder %s1826_s18, %s1826_s18 }
  0x2e   : > { %p1829_p11 = pnand %p1827_p10, %p1787_p7  ;;  %p1836_p1 = por %p1835_p0, %p1834_p13 }
  0x30   : > { %p1830_p12 = pneg %p1829_p11 }
  0x32   : > { %p1837_p4 = pnand %p1836_p1, %p1830_p12 }
  0x34   : > { %1840 = shalt.err (!%p1837_p4)
}
  0x35   : > { %1700 = dma.hbm_to_vmem [thread:$0]  (!%p1907_p5), %s2135_s2, 64, %s1911_s21, [#allocation5]  }
  0x36   : > { %p2142_p6 = scmp.ne.s32.totalorder %s2140_s19, 0 }
  0x37   : > { %p2143_p2 = scmp.eq.s32.totalorder (!%p2142_p6), %s1894_s16, 0 }
  0x38   : > { %189 = sbr.rel (%p2142_p6) target bundleno = 406 (0x196), region = 32 }
  0x3f   : > { %1846 = dma.done.wait (%p2143_p2), [#allocation3], 5120   ;;  %p2144_p7 = pmov %p2143_p2 }
  0x40   : > { %p2145_p3 = pmov %p2143_p2 }
  0x41   : > { %1848 = vsyncadd (%p2144_p7), [#allocation3], 4294962176 }
  0x42   : > { %1850 = dma.done.wait (%p2145_p3), [#allocation5], 64   ;;  %p2146_p8 = pmov %p2143_p2 }
  0x43   : > { %p224_p9 = scmp.lt.s32.totalorder %s1894_s16, 1  ;;  %v1861_v0 = vmov 0   ;;  %v1719_v1 = vld [vmem:[#allocation2 + $0x44] ss:$16 sps:$4 sm:$0xff]   ;;  %v1721_v2 = vld [vmem:[#allocation2 + $0x4c] ss:$16 sps:$4 sm:$0xff]  }
  0x44   : > { %1852 = vsyncadd (%p2146_p8), [#allocation5], 4294967232  ;;  %368 = vmatprep.mubr.bf16.mxu0 %v1861_v0  ;;  %421 = vmatprep.mubr.bf16.mxu1 %v1861_v0  ;;  %v1723_v3 = vld [vmem:[#allocation2 + $0x40] ss:$16 sps:$4 sm:$0xff]   ;;  %v1724_v4 = vld [vmem:[#allocation2 + $0x48] ss:$16 sps:$4 sm:$0xff]  }
  0x45   : > { %s2150_s16 = smov (!%p224_p9, %s1894_s16), 1  ;;  %336 = vmatprep.subr.bf16.mxu0 %v1719_v1  ;;  %389 = vmatprep.subr.bf16.mxu1 %v1721_v2  ;;  %v1725_v5 = vld [vmem:[#allocation2 + $0x64] ss:$16 sps:$4 sm:$0xff]   ;;  %v1727_v6 = vld [vmem:[#allocation2 + $0x6c] ss:$16 sps:$4 sm:$0xff]   ;;  %vm329_vm1 = vcmask 261120  }
  0x46   : > { %s1611_s19 = sshll.u32 %s2150_s16, 4  ;;  %337 = vmatpush1.bf16.msra.mxu0 %v1723_v3  ;;  %390 = vmatpush1.bf16.msra.mxu1 %v1724_v4  ;;  %v1729_v7 = vld [vmem:[#allocation2 + $0x60] ss:$16 sps:$4 sm:$0xff]   ;;  %v1730_v8 = vld [vmem:[#allocation2 + $0x68] ss:$16 sps:$4 sm:$0xff]   ;;  %vm609_vm2 = vcmask 1046528  }
  0x47   : > { %s1980_s24 = scalar_lea.vmem %s2133_s0, %s1611_s19  ;;  %338 = vmatprep.subr.bf16.mxu0 %v1725_v5  ;;  %391 = vmatprep.subr.bf16.mxu1 %v1727_v6  ;;  %v1736_v17 = vld [vmem:[#allocation2 + $0x4] ss:$16 sps:$4 sm:$0xff]   ;;  %v1739_v19 = vld [vmem:[#allocation2 + $0xc] ss:$16 sps:$4 sm:$0xff]   ;;  %vm273_vm0 = vsmask.f32 7424 }
  0x48   : > { %v241_v9 = vld [vmem:[%s1980_s24] sm:$0xf]  ;;  %v1984_v10 = vld [vmem:[%s1980_s24 + $0x4] sm:$0xf]  ;;  %v1987_v11 = vld [vmem:[%s1980_s24 + $0x8] sm:$0xf] }
  0x49   : > { %v253_v12 = vld [vmem:[%s1980_s24 + $0xc] sm:$0x7]  ;;  %v1535_v13 = vcombine.low %v241_v9, %v1984_v10  ;;  %v1734_v23 = vld [vmem:[#allocation2] ss:$16 sps:$4 sm:$0xff]   ;;  %v1737_v24 = vld [vmem:[#allocation2 + $0x8] ss:$16 sps:$4 sm:$0xff]  }
  0x4a   : > { %v1992_v14 = vcombine.low %v1987_v11, %v253_v12  ;;  %339 = vmatpush1.bf16.msra.mxu0 %v1729_v7  ;;  %392 = vmatpush1.bf16.msra.mxu1 %v1730_v8  ;;  %v1742_v25 = vld [vmem:[#allocation2 + $0x24] ss:$16 sps:$4 sm:$0xff]   ;;  %v1745_v27 = vld [vmem:[#allocation2 + $0x2c] ss:$16 sps:$4 sm:$0xff]   ;;  %v1740_v29 = vld [vmem:[#allocation2 + $0x20] ss:$16 sps:$4 sm:$0xff]  }
  0x4b   : > { %v275_v15 = vshrl.u32 %v1535_v13, 16  ;;  %v277_v16 = vshll.u32 %v1535_v13, 16  ;;  %490 = vmatprep.subr.bf16.mxu0 %v1736_v17  ;;  %543 = vmatprep.subr.bf16.mxu1 %v1739_v19  ;;  %v1743_v30 = vld [vmem:[#allocation2 + $0x28] ss:$16 sps:$4 sm:$0xff]   ;;  %v1748_v31 = vld [vmem:[#allocation2 + $0x84] ss:$16 sps:$4 sm:$0xff]   ;;  %v1166_v19 = vlaneseq }
  0x4c   : > { %v282_v18 = vshll.u32 %v1992_v14, 16  ;;  %v286_v28 = vshrl.u32 %v1992_v14, 16  ;;  %v1751_v32 = vld [vmem:[#allocation2 + $0x8c] ss:$16 sps:$4 sm:$0xff]   ;;  %v1746_v34 = vld [vmem:[#allocation2 + $0x80] ss:$16 sps:$4 sm:$0xff]  }
  0x4d   : > { %v279_v20 = vrot.slane %v277_v16, 1  ;;  %v1749_v35 = vld [vmem:[#allocation2 + $0x88] ss:$16 sps:$4 sm:$0xff]   ;;  %v2005_v36 = vld [vmem:[%s1980_s24] sm:$0xc]  ;;  %v611_v50 = vrot.slane %v1992_v14, 1 }
  0x4e   : > { %v284_v21 = vrot.slane %v282_v18, 1  ;;  %v1755_v37 = vld [vmem:[#allocation2 + $0xa4] ss:$16 sps:$4 sm:$0xff]   ;;  %v1758_v38 = vld [vmem:[#allocation2 + $0xac] ss:$16 sps:$4 sm:$0xff]   ;;  %v1588_v39 = vcombine.low %v2005_v36, %v1984_v10  ;;  %vm993_vm4 = vcmask 1045504  }
  0x4f   : > { %v280_v22 = vor.u32 %v279_v20, %v275_v15  ;;  %v244_v40 = vld [vmem:[%s1980_s24 + $0xc] sm:$0x3]  ;;  %v1753_v41 = vld [vmem:[#allocation2 + $0xa0] ss:$16 sps:$4 sm:$0xff]   ;;  %v1756_v42 = vld [vmem:[#allocation2 + $0xa8] ss:$16 sps:$4 sm:$0xff]  }
  0x50   : > { %v288_v33 = vor.u32 %v286_v28, %v284_v21  ;;  %v596_v43 = vld [vmem:[%s1980_s24] sm:$0xe]  ;;  %v1762_v44 = vld [vmem:[#allocation2 + $0xc4] ss:$16 sps:$4 sm:$0xff]   ;;  %v1765_v45 = vld [vmem:[#allocation2 + $0xcc] ss:$16 sps:$4 sm:$0xff]   ;;  %v1549_v46 = vcombine.low %v1987_v11, %v244_v40 }
  0x51   : > { %v285_v26 = vsel %vm273_vm0, %v280_v22, %v284_v21  ;;  %v1562_v47 = vcombine.low %v596_v43, %v1984_v10  ;;  %v781_v48 = vld [vmem:[%s1980_s24 + $0xc] sm:$0xf]  ;;  %v1760_v53 = vld [vmem:[#allocation2 + $0xc0] ss:$16 sps:$4 sm:$0xff]   ;;  %v1763_v54 = vld [vmem:[#allocation2 + $0xc8] ss:$16 sps:$4 sm:$0xff]  }
  0x52   : > { %1545 = vmatmul.mubr.msk.bf16.vlgmr.msra.gmra.mrb[0].mxu0 %vm329_vm1, %v285_v26  ;;  %1547 = vmatmul.mubr.msk.bf16.vlgmr.msra.gmra.mrb[0].mxu1 %vm329_vm1, %v285_v26  ;;  %v1575_v51 = vcombine.low %v1987_v11, %v781_v48  ;;  %v1768_v55 = vld [vmem:[#allocation2 + $0xe4] ss:$16 sps:$4 sm:$0xff]   ;;  %v1771_v56 = vld [vmem:[#allocation2 + $0xec] ss:$16 sps:$4 sm:$0xff]   ;;  %v1766_v59 = vld [vmem:[#allocation2 + $0xe0] ss:$16 sps:$4 sm:$0xff]  }
  0x53   : > { %491 = vmatpush1.bf16.msra.mxu0 %v1734_v23  ;;  %544 = vmatpush1.bf16.msra.mxu1 %v1737_v24  ;;  %v610_v49 = vrot.slane %v1562_v47, 1  ;;  %v1769_v60 = vld [vmem:[#allocation2 + $0xe8] ss:$16 sps:$4 sm:$0xff]   ;;  %v796_v61 = vshrl.u32 %v1562_v47, 16  ;;  %v799_v62 = vshll.u32 %v1562_v47, 16  ;;  %v994_v16 = vrot.slane %v1588_v39, 2 }
  0x54   : > { %378 = vmatprep.mubr.bf16.mxu0 %v1861_v0  ;;  %431 = vmatprep.mubr.bf16.mxu1 %v1861_v0  ;;  %v804_v57 = vshrl.u32 %v1575_v51, 16  ;;  %v807_v58 = vshll.u32 %v1575_v51, 16  ;;  %v1774_v63 = vld [vmem:[#allocation2 + $0x104] ss:$16 sps:$4 sm:$0xff]   ;;  %v1777_v1 = vld [vmem:[#allocation2 + $0x10c] ss:$16 sps:$4 sm:$0xff]  }
  0x55   : > { %492 = vmatprep.subr.bf16.mxu0 %v1742_v25  ;;  %545 = vmatprep.subr.bf16.mxu1 %v1745_v27  ;;  %v612_v52 = vsel %vm609_vm2, %v610_v49, %v611_v50  ;;  %v798_v2 = vrot.slane %v796_v61, 1  ;;  %v801_v3 = vrot.slane %v799_v62, 2  ;;  %vm794_vm3 = vsmask.f32 6400  ;;  %v1772_v9 = vld [vmem:[#allocation2 + $0x100] ss:$16 sps:$4 sm:$0xff]  }
  0x56   : > { %v806_v4 = vrot.slane %v804_v57, 1  ;;  %v809_v5 = vrot.slane %v807_v58, 2  ;;  %v1775_v11 = vld [vmem:[#allocation2 + $0x108] ss:$16 sps:$4 sm:$0xff]   ;;  %v1780_v12 = vld [vmem:[#allocation2 + $0x124] ss:$16 sps:$4 sm:$0xff]  }
  0x57   : > { %493 = vmatpush1.bf16.msra.mxu0 %v1740_v29  ;;  %546 = vmatpush1.bf16.msra.mxu1 %v1743_v30  ;;  %v802_v6 = vor.u32 %v801_v3, %v798_v2  ;;  %v1778_v14 = vld [vmem:[#allocation2 + $0x120] ss:$16 sps:$4 sm:$0xff]   ;;  %v1781_v15 = vld [vmem:[#allocation2 + $0x128] ss:$16 sps:$4 sm:$0xff]   ;;  %v995_v17 = vrot.slane %v1575_v51, 2  ;;  %v2049_v20 = vshrl.u32 %v1166_v19, 7 }
  0x58   : > { %659 = vmatprep.subr.bf16.mxu0 %v1748_v31  ;;  %712 = vmatprep.subr.bf16.mxu1 %v1751_v32  ;;  %v810_v7 = vor.u32 %v809_v5, %v806_v4  ;;  %v240_v22 = vld [vmem:[#allocation4] sm:$0xf]  ;;  %s1612_s25 = sshll.u32 %s2150_s16, 6  ;;  %vm1251_vm5 = vcmask 1043456   ;;  %vm1252_vm6 = vcmask 523268   ;;  %vm1294_vm8 = vcmask 523264  }
  0x59   : > { %v996_v18 = vsel %vm993_vm4, %v994_v16, %v995_v17  ;;  %v1168_v10 = vsub.s32 0, %v2049_v20  ;;  %v1176_v21 = vsub.s32 2, %v2049_v20  ;;  %v1172_v23 = vsub.s32 1, %v2049_v20  ;;  %s2071_s28 = scalar_lea.vmem %s2136_s3, %s1612_s25  ;;  %vm2074_vm7 = vmor %vm1252_vm6, %vm1251_vm5  ;;  %s1613_s29 = sshll.u32 %s2150_s16, 3 }
  0x5a   : > { %1546 = vmatmul.mubr.msk.bf16.gmra.mrb[4].mxu0 %vm329_vm1, %v288_v33  ;;  %1548 = vmatmul.mubr.msk.bf16.gmra.mrb[4].mxu1 %vm329_vm1, %v288_v33  ;;  %v811_v8 = vsel %vm794_vm3, %v802_v6, %v810_v7  ;;  %v1180_v24 = vsub.s32 3, %v2049_v20  ;;  %vm1260_vm9 = vcmask 1041408   ;;  %vm1261_vm10 = vcmask 521220   ;;  %s238_s6 = scalar_lea.vmem %s2137_s4, %s1613_s29 }
  0x5b   : > { %522 = vmatprep.mubr.bf16.mxu0 %v1861_v0  ;;  %575 = vmatprep.mubr.bf16.mxu1 %v1861_v0  ;;  %v2055_v25 = vrot.slane %v240_v22, %v1168_v10  ;;  %v2059_v26 = vrot.slane %v240_v22, %v1172_v23  ;;  %vm1300_vm11 = vcmask 519168   ;;  %vm1262_vm12 = vmor %vm1261_vm10, %vm1260_vm9  ;;  %vm1376_vm13 = vcmask 1040384  }
  0x5c   : > { %v2061_v27 = vrot.slane %v240_v22, %v1180_v24  ;;  %vm1403_vm14 = vcmask 1043458   ;;  %vm1405_vm0 = vcmask 1045508   ;;  %vm1407_vm2 = vcmask 523270  }
  0x5d   : > { %vm1404_vm15 = vmor %vm1403_vm14, %vm1260_vm9 }
  0x62   : > { %1558 = vmatmul.mubr.msk.bf16.vlgmr.msra.gmra.mrb[0].mxu0 %vm329_vm1, %v1535_v13  ;;  %1560 = vmatmul.mubr.msk.bf16.vlgmr.msra.gmra.mrb[0].mxu1 %vm329_vm1, %v1535_v13  ;;  %v1783_v13 = vld [vmem:[#allocation2 + $0x12c] ss:$16 sps:$4 sm:$0xff]  }
  0x63   : > { %660 = vmatpush1.bf16.msra.mxu0 %v1746_v34  ;;  %713 = vmatpush1.bf16.msra.mxu1 %v1749_v35 }
  0x64   : > { %532 = vmatprep.mubr.bf16.mxu0 %v1861_v0  ;;  %585 = vmatprep.mubr.bf16.mxu1 %v1861_v0 }
  0x65   : > { %661 = vmatprep.subr.bf16.mxu0 %v1755_v37  ;;  %714 = vmatprep.subr.bf16.mxu1 %v1758_v38 }
  0x67   : > { %662 = vmatpush1.bf16.msra.mxu0 %v1753_v41  ;;  %715 = vmatpush1.bf16.msra.mxu1 %v1756_v42 }
  0x68   : > { %858 = vmatprep.subr.bf16.mxu0 %v1762_v44  ;;  %911 = vmatprep.subr.bf16.mxu1 %v1765_v45 }
  0x6a   : > { %1559 = vmatmul.mubr.msk.bf16.gmra.mrb[4].mxu0 %vm329_vm1, %v1549_v46  ;;  %1561 = vmatmul.mubr.msk.bf16.gmra.mrb[4].mxu1 %vm329_vm1, %v1549_v46 }
  0x6b   : > { %691 = vmatprep.mubr.bf16.mxu0 %v1861_v0  ;;  %744 = vmatprep.mubr.bf16.mxu1 %v1861_v0 }
  0x72   : > { %1571 = vmatmul.mubr.msk.bf16.vlgmr.msra.gmra.mrb[0].mxu0 %vm329_vm1, %v612_v52  ;;  %1573 = vmatmul.mubr.msk.bf16.vlgmr.msra.gmra.mrb[0].mxu1 %vm329_vm1, %v612_v52 }
  0x73   : > { %859 = vmatpush1.bf16.msra.mxu0 %v1760_v53  ;;  %912 = vmatpush1.bf16.msra.mxu1 %v1763_v54 }
  0x74   : > { %701 = vmatprep.mubr.bf16.mxu0 %v1861_v0  ;;  %754 = vmatprep.mubr.bf16.mxu1 %v1861_v0 }
  0x75   : > { %860 = vmatprep.subr.bf16.mxu0 %v1768_v55  ;;  %913 = vmatprep.subr.bf16.mxu1 %v1771_v56 }
  0x77   : > { %861 = vmatpush1.bf16.msra.mxu0 %v1766_v59  ;;  %914 = vmatpush1.bf16.msra.mxu1 %v1769_v60 }
  0x78   : > { %1043 = vmatprep.subr.bf16.mxu0 %v1774_v63  ;;  %1096 = vmatprep.subr.bf16.mxu1 %v1777_v1 }
  0x7a   : > { %1572 = vmatmul.mubr.msk.bf16.gmra.mrb[4].mxu0 %vm329_vm1, %v611_v50  ;;  %1574 = vmatmul.mubr.msk.bf16.gmra.mrb[4].mxu1 %vm329_vm1, %v611_v50 }
  0x7b   : > { %890 = vmatprep.mubr.bf16.mxu0 %v1861_v0  ;;  %943 = vmatprep.mubr.bf16.mxu1 %v1861_v0 }
  0x82   : > { %1584 = vmatmul.mubr.msk.bf16.vlgmr.msra.gmra.mrb[0].mxu0 %vm329_vm1, %v811_v8  ;;  %1586 = vmatmul.mubr.msk.bf16.vlgmr.msra.gmra.mrb[0].mxu1 %vm329_vm1, %v811_v8 }
  0x83   : > { %1044 = vmatpush1.bf16.msra.mxu0 %v1772_v9  ;;  %1097 = vmatpush1.bf16.msra.mxu1 %v1775_v11 }
  0x84   : > { %900 = vmatprep.mubr.bf16.mxu0 %v1861_v0  ;;  %953 = vmatprep.mubr.bf16.mxu1 %v1861_v0 }
  0x85   : > { %1045 = vmatprep.subr.bf16.mxu0 %v1780_v12  ;;  %1098 = vmatprep.subr.bf16.mxu1 %v1783_v13 }
  0x87   : > { %1046 = vmatpush1.bf16.msra.mxu0 %v1778_v14  ;;  %1099 = vmatpush1.bf16.msra.mxu1 %v1781_v15 }
  0x8a   : > { %1585 = vmatmul.mubr.msk.bf16.gmra.mrb[4].mxu0 %vm329_vm1, %v810_v7  ;;  %1587 = vmatmul.mubr.msk.bf16.gmra.mrb[4].mxu1 %vm329_vm1, %v810_v7 }
  0x8b   : > { %1075 = vmatprep.mubr.bf16.mxu0 %v1861_v0  ;;  %1128 = vmatprep.mubr.bf16.mxu1 %v1861_v0 }
  0x92   : > { %1597 = vmatmul.mubr.msk.bf16.vlgmr.msra.gmra.mrb[0].mxu0 %vm329_vm1, %v996_v18  ;;  %1599 = vmatmul.mubr.msk.bf16.vlgmr.msra.gmra.mrb[0].mxu1 %vm329_vm1, %v996_v18 }
  0x93   : > { %1085 = vmatprep.mubr.bf16.mxu0 %v1861_v0  ;;  %1138 = vmatprep.mubr.bf16.mxu1 %v1861_v0  ;;  %v2057_v0 = vrot.slane %v240_v22, %v1176_v21 }
  0x9a   : > { %1598 = vmatmul.mubr.msk.bf16.gmra.mrb[4].mxu0 %vm329_vm1, %v995_v17  ;;  %1600 = vmatmul.mubr.msk.bf16.gmra.mrb[4].mxu1 %vm329_vm1, %v995_v17  ;;  %vm1406_vm1 = vmor %vm1405_vm0, %vm1404_vm15 }
  0x9b   : > { %vm1408_vm3 = vmor %vm1407_vm2, %vm1406_vm1 }
 0x165   : > { %v1077_v28 = vpop.f32.mrb[0].mxu0  ;;  %v1130_v29 = vpop.f32.mrb[0].mxu1 }
 0x166   : > { %v1186_v30 = vadd.f32 %v2055_v25, %v1077_v28  ;;  %v1188_v31 = vadd.f32 %v2057_v0, %v1130_v29  ;;  %v1079_v32 = vpop.f32.mrb[1].mxu0  ;;  %v1132_v33 = vpop.f32.mrb[1].mxu1 }
 0x167   : > { %v1187_v34 = vadd.f32 %v2059_v26, %v1079_v32  ;;  %v1189_v35 = vadd.f32 %v2061_v27, %v1132_v33  ;;  %v1081_v36 = vpop.f32.mrb[2].mxu0  ;;  %v1134_v37 = vpop.f32.mrb[2].mxu1 }
 0x168   : > { %v1190_v39 = vadd.f32 %v2055_v25, %v1081_v36  ;;  %v1192_v40 = vadd.f32 %v2057_v0, %v1134_v37  ;;  %v1083_v41 = vpop.f32.mrb[3].mxu0  ;;  %v1136_v42 = vpop.f32.mrb[3].mxu1  ;;  %v1313_v43 = vmul.f32 %v1186_v30, %v1186_v30  ;;  %v1315_v50 = vmul.f32 %v1188_v31, %v1188_v31 }
 0x169   : > { %v1614_v44 = vpack.c.bf16 %v1187_v34, %v1186_v30  ;;  %v1615_v45 = vpack.c.bf16 %v1189_v35, %v1188_v31  ;;  %v1316_v46 = vmul.f32 %v1189_v35, %v1189_v35  ;;  %v1191_v52 = vadd.f32 %v2059_v26, %v1083_v41 }
 0x16a   : > { %v1264_v47 = vadd.f32 %v1190_v39, %v1186_v30  ;;  %v1317_v48 = vmul.f32 %v1190_v39, %v1190_v39  ;;  %v1284_v49 = vadd.f32 %v1192_v40, %v1188_v31  ;;  %v1319_v51 = vmul.f32 %v1192_v40, %v1192_v40 }
 0x16b   : > { %1250 = vst [vmem:[%s2071_s28] sm:$0xff] %v1614_v44  ;;  %1254 = vst.msk [vmem:[%s2071_s28 + $0x8] sm:$0xff] %vm2074_vm7, %v1615_v45  ;;  %v1193_v53 = vadd.f32 %v2061_v27, %v1136_v42  ;;  %v1314_v54 = vmul.f32 %v1187_v34, %v1187_v34  ;;  %v1295_v55 = vsel %vm1294_vm8, %v1189_v35, 0.0  ;;  %v1359_v56 = vsel %vm1294_vm8, %v1316_v46, 0.0 }
 0x16c   : > { %v1329_v57 = vadd.f32 %v1317_v48, %v1313_v43  ;;  %v1349_v58 = vadd.f32 %v1319_v51, %v1315_v50  ;;  %v1616_v59 = vpack.c.bf16 %v1191_v52, %v1190_v39  ;;  %v1274_v60 = vadd.f32 %v1191_v52, %v1187_v34 }
 0x16d   : > { %v1318_v61 = vmul.f32 %v1191_v52, %v1191_v52  ;;  %v1087_v62 = vpop.f32.mrb[4].mxu0  ;;  %v1140_v63 = vpop.f32.mrb[4].mxu1  ;;  %v1617_v1 = vpack.c.bf16 %v1193_v53, %v1192_v40  ;;  %v1296_v2 = vsel %vm1294_vm8, %v1193_v53, 0.0  ;;  %v1320_v3 = vmul.f32 %v1193_v53, %v1193_v53 }
 0x16e   : > { %v1194_v4 = vadd.f32 %v2055_v25, %v1087_v62  ;;  %v1089_v5 = vpop.f32.mrb[5].mxu0  ;;  %v1142_v6 = vpop.f32.mrb[5].mxu1  ;;  %1255 = vst [vmem:[%s2071_s28 + $0x10] sm:$0xff] %v1616_v59  ;;  %v1297_v8 = vadd.f32 %v1296_v2, %v1295_v55  ;;  %v1196_v9 = vadd.f32 %v2057_v0, %v1140_v63 }
 0x16f   : > { %v1339_v7 = vadd.f32 %v1318_v61, %v1314_v54  ;;  %v1195_v11 = vadd.f32 %v2059_v26, %v1089_v5  ;;  %v1091_v12 = vpop.f32.mrb[6].mxu0  ;;  %v1144_v13 = vpop.f32.mrb[6].mxu1  ;;  %1256 = vst.msk [vmem:[%s2071_s28 + $0x18] sm:$0xff] %vm2074_vm7, %v1617_v1  ;;  %v1360_v14 = vsel %vm1294_vm8, %v1320_v3, 0.0  ;;  %v1197_v17 = vadd.f32 %v2061_v27, %v1142_v6 }
 0x170   : > { %v1265_v15 = vadd.f32 %v1264_v47, %v1194_v4  ;;  %v1321_v16 = vmul.f32 %v1194_v4, %v1194_v4  ;;  %v1093_v18 = vpop.f32.mrb[7].mxu0  ;;  %v1146_v19 = vpop.f32.mrb[7].mxu1  ;;  %v1361_v10 = vadd.f32 %v1360_v14, %v1359_v56  ;;  %v1285_v21 = vadd.f32 %v1284_v49, %v1196_v9 }
 0x171   : > { %v1323_v22 = vmul.f32 %v1196_v9, %v1196_v9  ;;  %v1618_v23 = vpack.c.bf16 %v1195_v11, %v1194_v4  ;;  %v1275_v28 = vadd.f32 %v1274_v60, %v1195_v11  ;;  %v1322_v29 = vmul.f32 %v1195_v11, %v1195_v11 }
 0x172   : > { %v1330_v24 = vadd.f32 %v1329_v57, %v1321_v16  ;;  %v1619_v30 = vpack.c.bf16 %v1197_v17, %v1196_v9  ;;  %v1298_v32 = vsel %vm1294_vm8, %v1197_v17, 0.0  ;;  %v1324_v33 = vmul.f32 %v1197_v17, %v1197_v17 }
 0x173   : > { %v1350_v31 = vadd.f32 %v1349_v58, %v1323_v22  ;;  %1257 = vst [vmem:[%s2071_s28 + $0x20] sm:$0xff] %v1618_v23  ;;  %v1198_v34 = vadd.f32 %v2055_v25, %v1091_v12  ;;  %v1340_v35 = vadd.f32 %v1339_v7, %v1322_v29  ;;  %v1299_v36 = vadd.f32 %v1298_v32, %v1297_v8 }
 0x174   : > { %1258 = vst.msk [vmem:[%s2071_s28 + $0x28] sm:$0xff] %vm2074_vm7, %v1619_v30  ;;  %v1200_v37 = vadd.f32 %v2057_v0, %v1144_v13  ;;  %v1199_v39 = vadd.f32 %v2059_v26, %v1093_v18  ;;  %v1362_v40 = vsel %vm1294_vm8, %v1324_v33, 0.0  ;;  %v1201_v43 = vadd.f32 %v2061_v27, %v1146_v19 }
 0x175   : > { %v1266_v41 = vsel %vm1251_vm5, %v1198_v34, 0.0  ;;  %v1325_v42 = vmul.f32 %v1198_v34, %v1198_v34  ;;  %v1363_v44 = vadd.f32 %v1362_v40, %v1361_v10 }
 0x176   : > { %v1267_v45 = vadd.f32 %v1266_v41, %v1265_v15  ;;  %v1286_v25 = vsel %vm1251_vm5, %v1200_v37, 0.0  ;;  %v1327_v46 = vmul.f32 %v1200_v37, %v1200_v37  ;;  %v1620_v48 = vpack.c.bf16 %v1199_v39, %v1198_v34 }
 0x177   : > { %v1331_v38 = vsel %vm1251_vm5, %v1325_v42, 0.0  ;;  %v1287_v47 = vadd.f32 %v1286_v25, %v1285_v21  ;;  %v1276_v0 = vsel %vm1251_vm5, %v1199_v39, 0.0  ;;  %v1326_v53 = vmul.f32 %v1199_v39, %v1199_v39 }
 0x178   : > { %v1268_v26 = vrot.slane %v1267_v45, 4  ;;  %v1332_v49 = vadd.f32 %v1331_v38, %v1330_v24  ;;  %v1351_v50 = vsel %vm1251_vm5, %v1327_v46, 0.0  ;;  %v1277_v51 = vadd.f32 %v1276_v0, %v1275_v28  ;;  %1259 = vst [vmem:[%s2071_s28 + $0x30] sm:$0x33] %v1620_v48 }
 0x179   : > { %v1288_v27 = vrot.slane %v1287_v47, 4  ;;  %v1352_v52 = vadd.f32 %v1351_v50, %v1350_v31  ;;  %v1621_v54 = vpack.c.bf16 %v1201_v43, %v1200_v37  ;;  %v1301_v58 = vsel %vm1300_vm11, %v1201_v43, 0.0 }
 0x17a   : > { %v1269_v55 = vadd.f32 %v1268_v26, %v1267_v45  ;;  %v1333_v56 = vrot.slane %v1332_v49, 4  ;;  %v1278_v57 = vrot.slane %v1277_v51, 4  ;;  %v1341_v61 = vsel %vm1251_vm5, %v1326_v53, 0.0 }
 0x17b   : > { %v1289_v59 = vadd.f32 %v1288_v27, %v1287_v47  ;;  %v1353_v60 = vrot.slane %v1352_v52, 4  ;;  %1263 = vst.msk [vmem:[%s2071_s28 + $0x38] sm:$0x33] %vm1262_vm12, %v1621_v54  ;;  %v1302_v62 = vadd.f32 %v1301_v58, %v1299_v36  ;;  %v1342_v3 = vadd.f32 %v1341_v61, %v1340_v35 }
 0x17c   : > { %v1270_v63 = vrot.slane %v1269_v55, 2  ;;  %v1334_v1 = vadd.f32 %v1333_v56, %v1332_v49  ;;  %v1279_v2 = vadd.f32 %v1278_v57, %v1277_v51  ;;  %v1328_v7 = vmul.f32 %v1201_v43, %v1201_v43 }
 0x17d   : > { %v1290_v4 = vrot.slane %v1289_v59, 2  ;;  %v1354_v5 = vadd.f32 %v1353_v60, %v1352_v52  ;;  %v1303_v6 = vrot.slane %v1302_v62, 4  ;;  %v1343_v12 = vrot.slane %v1342_v3, 4 }
 0x17e   : > { %v1271_v8 = vadd.f32 %v1270_v63, %v1269_v55  ;;  %v1335_v9 = vrot.slane %v1334_v1, 2  ;;  %v1280_v11 = vrot.slane %v1279_v2, 2  ;;  %v1364_v16 = vsel %vm1300_vm11, %v1328_v7, 0.0 }
 0x17f   : > { %v1291_v13 = vadd.f32 %v1290_v4, %v1289_v59  ;;  %v1355_v14 = vrot.slane %v1354_v5, 2  ;;  %v1304_v15 = vadd.f32 %v1303_v6, %v1302_v62  ;;  %v1344_v10 = vadd.f32 %v1343_v12, %v1342_v3 }
 0x180   : > { %v1272_v17 = vrot.slane %v1271_v8, 1  ;;  %v1336_v18 = vadd.f32 %v1335_v9, %v1334_v1  ;;  %v1281_v19 = vadd.f32 %v1280_v11, %v1279_v2  ;;  %v1365_v24 = vadd.f32 %v1364_v16, %v1363_v44 }
 0x181   : > { %v1292_v21 = vrot.slane %v1291_v13, 1  ;;  %v1356_v22 = vadd.f32 %v1355_v14, %v1354_v5  ;;  %v1305_v23 = vrot.slane %v1304_v15, 2  ;;  %v1345_v29 = vrot.slane %v1344_v10, 2 }
 0x182   : > { %v1337_v28 = vrot.slane %v1336_v18, 1  ;;  %v1862_v31 = vmov 1983009808   ;;  %v1366_v33 = vrot.slane %v1365_v24, 4  ;;  %v1273_v34 = vadd.f32 %v1272_v17, %v1271_v8 }
 0x183   : > { %v1357_v30 = vrot.slane %v1356_v22, 1  ;;  %v1388_v32 = vunpack.c.l.s4 %v1862_v31  ;;  %v1282_v36 = vrot.slane %v1281_v19, 1  ;;  %v1346_v37 = vadd.f32 %v1345_v29, %v1344_v10 }
 0x184   : > { %v1338_v35 = vadd.f32 %v1337_v28, %v1336_v18  ;;  %v1293_v39 = vadd.f32 %v1292_v21, %v1291_v13  ;;  %v1306_v41 = vadd.f32 %v1305_v23, %v1304_v15  ;;  %v1367_v42 = vadd.f32 %v1366_v33, %v1365_v24 }
 0x185   : > { %v1358_v40 = vadd.f32 %v1357_v30, %v1356_v22  ;;  %v1347_v45 = vrot.slane %v1346_v37, 1  ;;  %v1283_v46 = vadd.f32 %v1282_v36, %v1281_v19  ;;  %v1389_v47 = vunpack.c.0.s8 %v1388_v32 }
 0x186   : > { %v1377_v43 = vsel %vm1376_vm13, %v1273_v34, %v1338_v35  ;;  %v1368_v25 = vrot.slane %v1367_v42, 2  ;;  %v1307_v48 = vrot.slane %v1306_v41, 1 }
 0x187   : > { %v1379_v44 = vsel %vm1376_vm13, %v1293_v39, %v1358_v40  ;;  %v1348_v38 = vadd.f32 %v1347_v45, %v1346_v37  ;;  %v1392_v51 = vsub.s32 %v1389_v47, %v2049_v20 }
 0x188   : > { %v1369_v0 = vadd.f32 %v1368_v25, %v1367_v42  ;;  %v1308_v27 = vadd.f32 %v1307_v48, %v1306_v41 }
 0x189   : > { %v1378_v26 = vsel %vm1376_vm13, %v1283_v46, %v1348_v38 }
 0x18a   : > { %v1385_v49 = vcombine.low %v1377_v43, %v1378_v26  ;;  %v1370_v50 = vrot.slane %v1369_v0, 1 }
 0x18c   : > { %v1371_v52 = vadd.f32 %v1370_v50, %v1369_v0  ;;  %v1393_v54 = vrot.slane %v1385_v49, %v1392_v51 }
 0x18e   : > { %v1380_v53 = vsel %vm1376_vm13, %v1308_v27, %v1371_v52 }
 0x18f   : > { %v1386_v55 = vcombine.low %v1379_v44, %v1380_v53 }
 0x191   : > { %v1400_v56 = vrot.slane %v1386_v55, %v1392_v51 }
 0x193   : > { %v1401_v57 = vcombine.low %v1393_v54, %v1400_v56 }
 0x195   : > { %1409 = vst.msk [vmem:[%s238_s6] sm:$0xff] %vm1408_vm3, %v1401_v57 }
 0x196 PF: > { %s17_s15 = sadd.s32 1, %s1855_s15  }
 0x197   : > { %p14_p5 = scmp.ge.s32.totalorder %s17_s15, 4  }
 0x199   :  { %16 = sbr.rel (!%p14_p5) target bundleno = 2 (0x2), region = 87 }
 0x1a0   :  { %1447 = vsyncpa [#allocation3], 1 }
 0x1a1   :  { %1449 = vsyncpa [#allocation3 + $0x1], 1 }
 0x1a2   :  { %1450 = vsyncpa [#allocation5], 1 }

// kernel: cnn_forward.9
= control target key start
LH: loop header
LB: loop body
LE: loop exit
PB: predicated region body
PF: predicated region fallthrough
CT: control target
= control target key end

     0   :  { %s384_s12 = smov 0   ;;  %s411_s0 = inlined_call_operand.vmem [shape: bf16[14,2,7,64], index: 0, kind: input, shape index: {}]   ;;  %s412_s1 = inlined_call_operand.vmem [shape: f32[1,1,32], index: 1, kind: input, shape index: {}]   ;;  %s413_s2 = inlined_call_operand.vmem [shape: f32[1,1,32], index: 2, kind: input, shape index: {}]   ;;  %s414_s3 = inlined_call_operand.vmem [shape: bf16[14,7,32], index: 3, kind: output, shape index: {}]  }
   0x1 LB: > { %s320_s13 = sadd.s32 4294967295, %s360_s12   ;;  %p324_p0 = scmp.ge.s32.totalorder %s360_s12, 1  ;;  %s360_s12 = sphi %s384_s12, %s13_s12  }
   0x2   : > { %p139_p1 = scmp.lt.s32.totalorder %s360_s12, 8 }
   0x4   : > { %p140_p2 = pnand %p324_p0, %p139_p1 }
   0x5   : > { %v330_v0 = vld [vmem:[%s412_s1] ss:$0 sm:$0xff] (!%p140_p2)  ;;  %s362_s16 = smov (!%p140_p2), 32   ;;  %s325_s19 = sshll.u32 (!%p140_p2), %s320_s13, 1  ;;  %vm255_vm0 = vcmask (!%p140_p2), 257024  }
   0x6   : > { %143 = sbr.rel (%p140_p2) target bundleno = 260 (0x104), region = 32  ;;  %203 = vrot.lane.b32.xlu0 (!%p140_p2), %v330_v0, %s362_s16  ;;  %v331_v1 = vld [vmem:[%s413_s2] ss:$0 sm:$0xff] (!%p140_p2)  ;;  %p165_p3 = scmp.lt.s32.totalorder (!%p140_p2), %s325_s19, 13  ;;  %vm256_vm1 = vsmask.f32 (!%p140_p2), 3328 }
   0x7   : > { %s363_s24 = smov (!%p140_p2), 96   ;;  %vm257_vm2 = vmand (!%p140_p2), %vm255_vm0, %vm256_vm1 }
   0xa   : > { %208 = vrot.lane.b32.xlu0 (!%p140_p2), %v331_v1, %s362_s16 }
   0xd   : > { %s416_s19 = smov (!%p165_p3, %s325_s19), 13 }
   0xe   : > { %s334_s20 = sshll.u32 %s416_s19, 3  ;;  %s329_s25 = sshll.u32 %s416_s19, 2 }
   0xf   : > { %s169_s23 = scalar_lea.vmem %s411_s0, %s334_s20  ;;  %s175_s28 = scalar_lea.vmem %s414_s3, %s329_s25 }
  0x10   : > { %v336_v2 = vld [vmem:[%s169_s23] sm:$0xff]   ;;  %v343_v3 = vld [vmem:[%s169_s23 + $0x8] sm:$0xff]  }
  0x11   : > { %v338_v4 = vunpack.c.h.bf16 %v336_v2  ;;  %v337_v5 = vunpack.c.l.bf16 %v336_v2  ;;  %v341_v7 = vunpack.c.l.bf16 %v343_v3  ;;  %v342_v11 = vunpack.c.h.bf16 %v343_v3  ;;  %v258_v43 = vld [vmem:[%s175_s28] sm:$0xf]  ;;  %v261_v49 = vld [vmem:[%s175_s28 + $0x4] sm:$0xf] }
  0x13   : > { %v191_v22 = vmul.f32 %v337_v5, %v330_v0  ;;  %v227_v23 = vmul.f32 %v338_v4, %v330_v0  ;;  %v192_v25 = vmul.f32 %v341_v7, %v330_v0  ;;  %v228_v27 = vmul.f32 %v342_v11, %v330_v0 }
  0x15   : > { %v199_v24 = vadd.f32 %v331_v1, %v191_v22  ;;  %v229_v26 = vadd.f32 %v331_v1, %v227_v23  ;;  %v200_v29 = vadd.f32 %v331_v1, %v192_v25  ;;  %v230_v31 = vadd.f32 %v331_v1, %v228_v27 }
  0x17   : > { %v201_v28 = vmax.f32 %v199_v24, 0.0  ;;  %v231_v30 = vmax.f32 %v229_v26, 0.0  ;;  %v202_v34 = vmax.f32 %v200_v29, 0.0  ;;  %v232_v36 = vmax.f32 %v230_v31, 0.0 }
  0x78   : > { %v204_v6 = vpop.permute.xlu0 %203 }
  0x79   : > { %v235_v8 = vmul.f32 %v338_v4, %v204_v6  ;;  %v206_v9 = vmul.f32 %v337_v5, %v204_v6  ;;  %v207_v12 = vmul.f32 %v341_v7, %v204_v6  ;;  %v236_v18 = vmul.f32 %v342_v11, %v204_v6 }
  0x7c   : > { %v209_v10 = vpop.permute.xlu0 %208 }
  0x7d   : > { %v237_v13 = vadd.f32 %v235_v8, %v209_v10  ;;  %v211_v14 = vadd.f32 %v209_v10, %v206_v9  ;;  %v212_v17 = vadd.f32 %v209_v10, %v207_v12  ;;  %v238_v20 = vadd.f32 %v236_v18, %v209_v10 }
  0x7f   : > { %v239_v15 = vmax.f32 %v237_v13, 0.0  ;;  %v213_v16 = vmax.f32 %v211_v14, 0.0  ;;  %v214_v19 = vmax.f32 %v212_v17, 0.0  ;;  %v240_v21 = vmax.f32 %v238_v20, 0.0 }
  0x81   : > { %243 = vrot.lane.b32.xlu0 %v239_v15, %s363_s24  ;;  %217 = vrot.lane.b32.xlu1 %v213_v16, %s363_s24 }
  0x85   : > { %219 = vrot.lane.b32.xlu1 %v214_v19, %s363_s24 }
  0x89   : > { %245 = vrot.lane.b32.xlu1 %v240_v21, %s363_s24 }
  0xf3   : > { %v218_v32 = vpop.permute.xlu1 %217  ;;  %v244_v37 = vpop.permute.xlu0 %243 }
  0xf4   : > { %v223_v33 = vadd.f32 %v218_v32, %v201_v28 }
  0xf6   : > { %v233_v35 = vadd.f32 %v231_v30, %v223_v33 }
  0xf7   : > { %v220_v38 = vpop.permute.xlu1 %219 }
  0xf8   : > { %v249_v39 = vadd.f32 %v244_v37, %v233_v35  ;;  %v224_v40 = vadd.f32 %v220_v38, %v202_v34 }
  0xfa   : > { %v251_v41 = vmul.f32 0.25, %v249_v39  ;;  %v234_v42 = vadd.f32 %v232_v36, %v224_v40 }
  0xfb   : > { %v246_v44 = vpop.permute.xlu1 %245 }
  0xfc   : > { %v253_v45 = vpack.c.bf16 %v251_v41, %v251_v41  ;;  %v250_v46 = vadd.f32 %v246_v44, %v234_v42 }
  0xfe   : > { %v252_v47 = vmul.f32 0.25, %v250_v46  ;;  %v259_v48 = vsel %vm257_vm2, %v253_v45, %v258_v43 }
  0xff   : > { %260 = vst [vmem:[%s175_s28] sm:$0xf] %v259_v48 }
 0x100   : > { %v254_v50 = vpack.c.bf16 %v252_v47, %v252_v47 }
 0x102   : > { %v262_v51 = vsel %vm257_vm2, %v254_v50, %v261_v49 }
 0x103   : > { %263 = vst [vmem:[%s175_s28 + $0x4] sm:$0xf] %v262_v51 }
 0x104 PF: > { %s13_s12 = sadd.s32 1, %s360_s12  }
 0x105   : > { %p10_p4 = scmp.ge.s32.totalorder %s13_s12, 9  }
 0x107   :  { %12 = sbr.rel (!%p10_p4) target bundleno = 1 (0x1), region = 62 }

// kernel: tile.19
= control target key start
LH: loop header
LB: loop body
LE: loop exit
PB: predicated region body
PF: predicated region fallthrough
CT: control target
= control target key end

     0   :  { %vm3_vm0 = vcmask 523264   ;;  %s41_s8 = smov 64   ;;  %vm9_vm1 = vcmask 1048064   ;;  %s70_s0 = inlined_call_operand.vmem [shape: f32[7,64], index: 0, kind: input, shape index: {}]   ;;  %s71_s1 = inlined_call_operand.vmem [shape: f32[1,448], index: 1, kind: output, shape index: {}]  }
   0x1   :  { %v36_v0 = vld [vmem:[%s70_s0 + $0x1] ss:$2 sm:$0x7]   ;;  %v2_v1 = vld [vmem:[%s70_s0] ss:$2 sm:$0xf]  }
   0x2   :  { %7 = vrot.lane.b32.xlu0 %v36_v0, %s41_s8  ;;  %4 = vst.msk [vmem:[#allocation0] ss:$8 sm:$0xf] %vm3_vm0, %v2_v1  }
   0x9   :  { %v29_v2 = vld [vmem:[#allocation0 + $0x18] sm:$0x1] }
   0xa   :  { %39 = vst [vmem:[%s71_s1 + $0x3] sm:$0x1] %v29_v2 }
  0x74   :  { %v8_v3 = vpop.permute.xlu0 %7  }
  0x75   :  { %10 = vst.msk [vmem:[#allocation0] ss:$8 sm:$0x7] %vm9_vm1, %v8_v3  }
  0x7c   :  { %v14_v4 = vld [vmem:[#allocation0] sm:$0x1]  ;;  %v18_v5 = vld [vmem:[#allocation0 + $0x8] sm:$0x1]  ;;  %v23_v6 = vld [vmem:[#allocation0 + $0x10] sm:$0x1] }
  0x7d   :  { %16 = vst [vmem:[%s71_s1] sm:$0x1] %v14_v4  ;;  %37 = vst [vmem:[%s71_s1 + $0x1] sm:$0x1] %v18_v5 }
  0x7e   :  { %38 = vst [vmem:[%s71_s1 + $0x2] sm:$0x1] %v23_v6 }

// kernel: tile.18
= control target key start
LH: loop header
LB: loop body
LE: loop exit
PB: predicated region body
PF: predicated region fallthrough
CT: control target
= control target key end

     0   :  { %s22_s0 = inlined_call_operand.vmem [shape: f32[64], index: 0, kind: input, shape index: {}]   ;;  %s23_s1 = inlined_call_operand.vmem [shape: f32[7,64], index: 1, kind: output, shape index: {}]  }
   0x1   :  { %v4_v0 = vld [vmem:[%s22_s0] ss:$0 sm:$0xff] }
   0x2   :  { %5 = vst [vmem:[%s23_s1] sm:$0xff] %v4_v0 }

// kernel: cnn_forward.10
= control target key start
LH: loop header
LB: loop body
LE: loop exit
PB: predicated region body
PF: predicated region fallthrough
CT: control target
= control target key end

     0   :  { %s3090_s15 = smov 0   ;;  %s3873_s0 = inlined_call_operand.vmem [shape: bf16[2,9,288], index: 0, kind: input, shape index: {}]   ;;  %s3874_s1 = inlined_call_operand.vmem [shape: bf16[3,288,448], index: 1, kind: input, shape index: {}]   ;;  %s3875_s2 = inlined_call_operand.vmem [shape: f32[1,448], index: 2, kind: input, shape index: {}]   ;;  %s3876_s3 = inlined_call_operand.vmem [shape: bf16[2,7,448], index: 3, kind: output, shape index: {0}]   ;;  %s3877_s4 = inlined_call_operand.vmem [shape: f32[2,2,448], index: 4, kind: output, shape index: {1}]  }
   0x1 LB: > { %s2323_s16 = sadd.s32 4294967295, %s3061_s15   ;;  %p2327_p0 = scmp.ge.s32.totalorder %s3061_s15, 1  ;;  %s3061_s15 = sphi %s3090_s15, %s15_s15  }
   0x2   : > { %p165_p1 = scmp.lt.s32.totalorder %s3061_s15, 3 }
   0x4   : > { %p166_p2 = pnand %p2327_p0, %p165_p1 }
   0x5   : > { %v2724_v0 = vld [vmem:[%s3874_s1 + $0x244] ss:$16 sps:$4 sm:$0xff] (!%p166_p2)   ;;  %p196_p3 = scmp.lt.s32.totalorder (!%p166_p2), %s2323_s16, 1  ;;  %v2726_v1 = vld [vmem:[%s3874_s1 + $0x240] ss:$16 sps:$4 sm:$0xff] (!%p166_p2)   ;;  %v3063_v2 = vmov (!%p166_p2), 0  }
   0x6   : > { %169 = sbr.rel (%p166_p2) target bundleno = 474 (0x1da), region = 32  ;;  %828 = vmatprep.mubr.bf16.mxu1 (!%p166_p2), %v3063_v2  ;;  %755 = vmatprep.subr.bf16.mxu0 (!%p166_p2), %v2724_v0  ;;  %v2727_v3 = vld [vmem:[%s3874_s1 + $0x264] ss:$16 sps:$4 sm:$0xff] (!%p166_p2)   ;;  %v2731_v5 = vld [vmem:[%s3874_s1 + $0x260] ss:$16 sps:$4 sm:$0xff] (!%p166_p2)   ;;  %vm751_vm0 = vcmask (!%p166_p2), 261120  }
   0x7   : > { %756 = vmatpush1.bf16.msra.mxu0 (!%p166_p2), %v2726_v1  ;;  %v2729_v4 = vld [vmem:[%s3874_s1 + $0x444] ss:$16 sps:$4 sm:$0xff] (!%p166_p2)   ;;  %v2732_v6 = vld [vmem:[%s3874_s1 + $0x440] ss:$16 sps:$4 sm:$0xff] (!%p166_p2)   ;;  %v2743_v12 = vld [vmem:[%s3874_s1 + $0x24c] ss:$16 sps:$4 sm:$0xff] (!%p166_p2)  }
   0x8   : > { %757 = vmatprep.subr.bf16.mxu0 (!%p166_p2), %v2727_v3  ;;  %v2733_v7 = vld [vmem:[%s3874_s1 + $0x284] ss:$16 sps:$4 sm:$0xff] (!%p166_p2)   ;;  %796 = vmatprep.subr.bf16.mxu1 (!%p166_p2), %v2729_v4  ;;  %v2738_v9 = vld [vmem:[%s3874_s1 + $0x460] ss:$16 sps:$4 sm:$0xff] (!%p166_p2)   ;;  %v2741_v19 = vld [vmem:[%s3874_s1 + $0x248] ss:$16 sps:$4 sm:$0xff] (!%p166_p2)  }
   0x9   : > { %v2735_v8 = vld [vmem:[%s3874_s1 + $0x464] ss:$16 sps:$4 sm:$0xff] (!%p166_p2)   ;;  %797 = vmatpush1.bf16.msra.mxu1 (!%p166_p2), %v2732_v6  ;;  %v2737_v10 = vld [vmem:[%s3874_s1 + $0x280] ss:$16 sps:$4 sm:$0xff] (!%p166_p2)   ;;  %v2750_v20 = vld [vmem:[%s3874_s1 + $0x26c] ss:$16 sps:$4 sm:$0xff] (!%p166_p2)  }
   0xa   : > { %798 = vmatprep.subr.bf16.mxu1 (!%p166_p2), %v2735_v8  ;;  %v2739_v11 = vld [vmem:[%s3874_s1 + $0x2a4] ss:$16 sps:$4 sm:$0xff] (!%p166_p2)   ;;  %v2744_v14 = vld [vmem:[%s3874_s1 + $0x2a0] ss:$16 sps:$4 sm:$0xff] (!%p166_p2)   ;;  %v2748_v24 = vld [vmem:[%s3874_s1 + $0x268] ss:$16 sps:$4 sm:$0xff] (!%p166_p2)  }
   0xb   : > { %758 = vmatpush1.bf16.msra.mxu0 (!%p166_p2), %v2731_v5  ;;  %v2746_v17 = vld [vmem:[%s3874_s1 + $0x2c4] ss:$16 sps:$4 sm:$0xff] (!%p166_p2)   ;;  %v2751_v22 = vld [vmem:[%s3874_s1 + $0x2c0] ss:$16 sps:$4 sm:$0xff] (!%p166_p2)   ;;  %v2756_v25 = vld [vmem:[%s3874_s1 + $0x28c] ss:$16 sps:$4 sm:$0xff] (!%p166_p2)  }
   0xc   : > { %759 = vmatprep.subr.bf16.mxu0 (!%p166_p2), %v2733_v7  ;;  %v2752_v23 = vld [vmem:[%s3874_s1 + $0x2e4] ss:$16 sps:$4 sm:$0xff] (!%p166_p2)   ;;  %v2757_v26 = vld [vmem:[%s3874_s1 + $0x2e0] ss:$16 sps:$4 sm:$0xff] (!%p166_p2)   ;;  %v2754_v28 = vld [vmem:[%s3874_s1 + $0x288] ss:$16 sps:$4 sm:$0xff] (!%p166_p2)  }
   0xd   : > { %s3885_s16 = smov (!%p196_p3, %s2323_s16), 1  ;;  %799 = vmatpush1.bf16.msra.mxu1 %v2738_v9  ;;  %v2758_v27 = vld [vmem:[%s3874_s1 + $0x304] ss:$16 sps:$4 sm:$0xff]   ;;  %v2762_v29 = vld [vmem:[%s3874_s1 + $0x2ac] ss:$16 sps:$4 sm:$0xff]   ;;  %vm2114_vm1 = vcmask 1043456  }
   0xe   : > { %s2713_s5 = smul.u32 24, %s3885_s16  ;;  %837 = vmatprep.subr.bf16.mxu1 %v2743_v12  ;;  %v2763_v30 = vld [vmem:[%s3874_s1 + $0x300] ss:$16 sps:$4 sm:$0xff]   ;;  %v2764_v31 = vld [vmem:[%s3874_s1 + $0x324] ss:$16 sps:$4 sm:$0xff]   ;;  %s2709_s14 = sshll.u32 %s3885_s16, 4 }
   0xf   : > { %760 = vmatpush1.bf16.msra.mxu0 %v2737_v10  ;;  %v2760_v32 = vld [vmem:[%s3874_s1 + $0x2a8] ss:$16 sps:$4 sm:$0xff]   ;;  %v2768_v33 = vld [vmem:[%s3874_s1 + $0x2cc] ss:$16 sps:$4 sm:$0xff]   ;;  %v2769_v34 = vld [vmem:[%s3874_s1 + $0x320] ss:$16 sps:$4 sm:$0xff]   ;;  %s3823_s19 = scalar_lea.vmem %s3876_s3, %s2709_s14 }
  0x10   : > { %s3132_s12 = scalar_lea.vmem %s3873_s0, %s2713_s5  ;;  %761 = vmatprep.subr.bf16.mxu0 %v2739_v11  ;;  %v2770_v35 = vld [vmem:[%s3874_s1 + $0x344] ss:$16 sps:$4 sm:$0xff]   ;;  %v2766_v36 = vld [vmem:[%s3874_s1 + $0x2c8] ss:$16 sps:$4 sm:$0xff]   ;;  %v2774_v37 = vld [vmem:[%s3874_s1 + $0x2ec] ss:$16 sps:$4 sm:$0xff]  }
  0x11   : > { %v3144_v13 = vld [vmem:[%s3132_s12 + $0x8] ss:$0 sps:$4 sm:$0xff]   ;;  %v2775_v38 = vld [vmem:[%s3874_s1 + $0x340] ss:$16 sps:$4 sm:$0xff]   ;;  %v2776_v39 = vld [vmem:[%s3874_s1 + $0x364] ss:$16 sps:$4 sm:$0xff]  }
  0x12   : > { %v383_v15 = vshrl.u32 %v3144_v13, 16  ;;  %v385_v16 = vshll.u32 %v3144_v13, 16  ;;  %v2772_v40 = vld [vmem:[%s3874_s1 + $0x2e8] ss:$16 sps:$4 sm:$0xff]   ;;  %v2780_v41 = vld [vmem:[%s3874_s1 + $0x30c] ss:$16 sps:$4 sm:$0xff]  }
  0x13   : > { %762 = vmatpush1.bf16.msra.mxu0 %v2744_v14  ;;  %v2781_v42 = vld [vmem:[%s3874_s1 + $0x360] ss:$16 sps:$4 sm:$0xff]   ;;  %v2782_v43 = vld [vmem:[%s3874_s1 + $0x384] ss:$16 sps:$4 sm:$0xff]   ;;  %v2778_v44 = vld [vmem:[%s3874_s1 + $0x308] ss:$16 sps:$4 sm:$0xff]  }
  0x14   : > { %v387_v18 = vrot.slane %v385_v16, 1  ;;  %763 = vmatprep.subr.bf16.mxu0 %v2746_v17  ;;  %v2786_v45 = vld [vmem:[%s3874_s1 + $0x32c] ss:$16 sps:$4 sm:$0xff]   ;;  %v2787_v46 = vld [vmem:[%s3874_s1 + $0x380] ss:$16 sps:$4 sm:$0xff]   ;;  %vm2117_vm3 = vcmask 1047556  }
  0x15   : > { %v2788_v47 = vld [vmem:[%s3874_s1 + $0x3a4] ss:$16 sps:$4 sm:$0xff]   ;;  %v2784_v48 = vld [vmem:[%s3874_s1 + $0x328] ss:$16 sps:$4 sm:$0xff]   ;;  %v2792_v50 = vld [vmem:[%s3874_s1 + $0x34c] ss:$16 sps:$4 sm:$0xff]  }
  0x16   : > { %v3160_v21 = vor.u32 %v387_v18, %v383_v15  ;;  %v213_v49 = vld [vmem:[%s3132_s12] sm:$0xff]  ;;  %v2790_v56 = vld [vmem:[%s3874_s1 + $0x348] ss:$16 sps:$4 sm:$0xff]   ;;  %v2798_v57 = vld [vmem:[%s3874_s1 + $0x36c] ss:$16 sps:$4 sm:$0xff]   ;;  %vm2130_vm6 = vcmask 1046528  }
  0x17   : > { %764 = vmatpush1.bf16.msra.mxu0 %v2751_v22  ;;  %v2793_v51 = vld [vmem:[%s3874_s1 + $0x3a0] ss:$16 sps:$4 sm:$0xff]   ;;  %v3252_v52 = vcombine.high %v213_v49, %v213_v49  ;;  %v2794_v53 = vld [vmem:[%s3874_s1 + $0x3c4] ss:$16 sps:$4 sm:$0xff]   ;;  %v2796_v62 = vld [vmem:[%s3874_s1 + $0x368] ss:$16 sps:$4 sm:$0xff]   ;;  %v3274_v63 = vcombine.low %v213_v49, %v213_v49 }
  0x18   : > { %2480 = vmatmul.mubr.msk.bf16.vlgmr.msra.gmra.mrb[0].mxu1 %vm751_vm0, %v3160_v21  ;;  %765 = vmatprep.subr.bf16.mxu0 %v2752_v23  ;;  %v2799_v58 = vld [vmem:[%s3874_s1 + $0x3c0] ss:$16 sps:$4 sm:$0xff]   ;;  %v2800_v60 = vld [vmem:[%s3874_s1 + $0x3e4] ss:$16 sps:$4 sm:$0xff]   ;;  %v2804_v0 = vld [vmem:[%s3874_s1 + $0x38c] ss:$16 sps:$4 sm:$0xff]  }
  0x19   : > { %838 = vmatpush1.bf16.msra.mxu1 %v2741_v19  ;;  %v376_v54 = vshrl.u32 %v3252_v52, 16  ;;  %v378_v55 = vshll.u32 %v3252_v52, 16  ;;  %v2805_v1 = vld [vmem:[%s3874_s1 + $0x3e0] ss:$16 sps:$4 sm:$0xff]   ;;  %v2806_v3 = vld [vmem:[%s3874_s1 + $0x404] ss:$16 sps:$4 sm:$0xff]  }
  0x1a   : > { %839 = vmatprep.subr.bf16.mxu1 %v2750_v20  ;;  %v2802_v4 = vld [vmem:[%s3874_s1 + $0x388] ss:$16 sps:$4 sm:$0xff]   ;;  %v371_v5 = vshll.u32 %v3274_v63, 16  ;;  %v2810_v6 = vld [vmem:[%s3874_s1 + $0x3ac] ss:$16 sps:$4 sm:$0xff]   ;;  %v369_v10 = vshrl.u32 %v3274_v63, 16 }
  0x1b   : > { %766 = vmatpush1.bf16.msra.mxu0 %v2757_v26  ;;  %v380_v59 = vrot.slane %v378_v55, 1  ;;  %v2811_v7 = vld [vmem:[%s3874_s1 + $0x400] ss:$16 sps:$4 sm:$0xff]   ;;  %v2812_v8 = vld [vmem:[%s3874_s1 + $0x424] ss:$16 sps:$4 sm:$0xff]   ;;  %vm2124_vm9 = vcmask 523268  }
  0x1c   : > { %767 = vmatprep.subr.bf16.mxu0 %v2758_v27  ;;  %v2808_v9 = vld [vmem:[%s3874_s1 + $0x3a8] ss:$16 sps:$4 sm:$0xff]   ;;  %v373_v11 = vrot.slane %v371_v5, 1  ;;  %v2816_v12 = vld [vmem:[%s3874_s1 + $0x3cc] ss:$16 sps:$4 sm:$0xff]   ;;  %vm2200_vm10 = vcmask 1040384  }
  0x1d   : > { %840 = vmatpush1.bf16.msra.mxu1 %v2748_v24  ;;  %v381_v61 = vor.u32 %v380_v59, %v376_v54  ;;  %v2817_v14 = vld [vmem:[%s3874_s1 + $0x420] ss:$16 sps:$4 sm:$0xff]   ;;  %v2825_v15 = vld [vmem:[%s3874_s1 + $0x44c] ss:$16 sps:$4 sm:$0xff]   ;;  %v2814_v16 = vld [vmem:[%s3874_s1 + $0x3c8] ss:$16 sps:$4 sm:$0xff]  }
  0x1e   : > { %841 = vmatprep.subr.bf16.mxu1 %v2756_v25  ;;  %v374_v17 = vor.u32 %v373_v11, %v369_v10  ;;  %v2822_v18 = vld [vmem:[%s3874_s1 + $0x3ec] ss:$16 sps:$4 sm:$0xff]   ;;  %v2823_v19 = vld [vmem:[%s3874_s1 + $0x448] ss:$16 sps:$4 sm:$0xff]   ;;  %v2837_v25 = vld [vmem:[%s3874_s1 + $0x4] ss:$16 sps:$4 sm:$0xff]  }
  0x1f   : > { %768 = vmatpush1.bf16.msra.mxu0 %v2763_v30  ;;  %787 = vmatprep.mubr.bf16.mxu0 %v381_v61  ;;  %v2831_v20 = vld [vmem:[%s3874_s1 + $0x46c] ss:$16 sps:$4 sm:$0xff]   ;;  %v2820_v22 = vld [vmem:[%s3874_s1 + $0x3e8] ss:$16 sps:$4 sm:$0xff]   ;;  %v2874_v54 = vld [vmem:[%s3874_s1 + $0xe0] ss:$16 sps:$4 sm:$0xff]  }
  0x20   : > { %769 = vmatprep.subr.bf16.mxu0 %v2764_v31  ;;  %869 = vmatprep.mubr.bf16.mxu1 %v381_v61  ;;  %v2828_v23 = vld [vmem:[%s3874_s1 + $0x40c] ss:$16 sps:$4 sm:$0xff]   ;;  %v2829_v24 = vld [vmem:[%s3874_s1 + $0x468] ss:$16 sps:$4 sm:$0xff]   ;;  %v2838_v31 = vld [vmem:[%s3874_s1 + $0x20] ss:$16 sps:$4 sm:$0xff]  }
  0x21   : > { %842 = vmatpush1.bf16.msra.mxu1 %v2754_v28  ;;  %v2826_v26 = vld [vmem:[%s3874_s1 + $0x408] ss:$16 sps:$4 sm:$0xff]   ;;  %v2834_v27 = vld [vmem:[%s3874_s1 + $0x42c] ss:$16 sps:$4 sm:$0xff]   ;;  %v2835_v28 = vld [vmem:[%s3874_s1] ss:$16 sps:$4 sm:$0xff]  }
  0x22   : > { %843 = vmatprep.subr.bf16.mxu1 %v2762_v29  ;;  %v2840_v29 = vld [vmem:[%s3874_s1 + $0x24] ss:$16 sps:$4 sm:$0xff]   ;;  %v2832_v30 = vld [vmem:[%s3874_s1 + $0x428] ss:$16 sps:$4 sm:$0xff]   ;;  %v2879_v55 = vld [vmem:[%s3874_s1 + $0x8c] ss:$16 sps:$4 sm:$0xff]  }
  0x23   : > { %770 = vmatpush1.bf16.msra.mxu0 %v2769_v34  ;;  %v2844_v34 = vld [vmem:[%s3874_s1 + $0x40] ss:$16 sps:$4 sm:$0xff]   ;;  %v2865_v49 = vld [vmem:[%s3874_s1 + $0x48] ss:$16 sps:$4 sm:$0xff]   ;;  %v2885_v59 = vld [vmem:[%s3874_s1 + $0xac] ss:$16 sps:$4 sm:$0xff]  }
  0x24   : > { %771 = vmatprep.subr.bf16.mxu0 %v2770_v35  ;;  %v2849_v35 = vld [vmem:[%s3874_s1 + $0x224] ss:$16 sps:$4 sm:$0xff]   ;;  %v2883_v61 = vld [vmem:[%s3874_s1 + $0xa8] ss:$16 sps:$4 sm:$0xff]   ;;  %v2897_v5 = vld [vmem:[%s3874_s1 + $0xec] ss:$16 sps:$4 sm:$0xff]  }
  0x25   : > { %844 = vmatpush1.bf16.msra.mxu1 %v2760_v32  ;;  %v2843_v32 = vld [vmem:[%s3874_s1 + $0x204] ss:$16 sps:$4 sm:$0xff]   ;;  %v2901_v11 = vld [vmem:[%s3874_s1 + $0x108] ss:$16 sps:$4 sm:$0xff]   ;;  %vm2115_vm2 = vsmask.f32 3328 }
  0x26   : > { %845 = vmatprep.subr.bf16.mxu1 %v2768_v33  ;;  %v2846_v33 = vld [vmem:[%s3874_s1 + $0x44] ss:$16 sps:$4 sm:$0xff]   ;;  %vm2118_vm4 = vsmask.f32 7424  ;;  %vm3816_vm5 = vmand %vm2114_vm1, %vm2115_vm2  ;;  %vm2152_vm12 = vcmask 522240   ;;  %vm2227_vm14 = vcmask 1041408  }
  0x27   : > { %772 = vmatpush1.bf16.msra.mxu0 %v2775_v38  ;;  %v2850_v38 = vld [vmem:[%s3874_s1 + $0x60] ss:$16 sps:$4 sm:$0xff]   ;;  %v2906_v10 = vld [vmem:[%s3874_s1 + $0x184] ss:$16 sps:$4 sm:$0xff]   ;;  %vm3826_vm7 = vmand %vm2117_vm3, %vm2118_vm4  ;;  %vm2228_vm15 = vcmask 1043458   ;;  %vm2230_vm1 = vcmask 1045508  }
  0x28   : > { %773 = vmatprep.subr.bf16.mxu0 %v2776_v39  ;;  %v2855_v39 = vld [vmem:[%s3874_s1 + $0xc] ss:$16 sps:$4 sm:$0xff]   ;;  %vm2120_vm8 = vmor %vm3826_vm7, %vm3816_vm5  ;;  %vm2232_vm3 = vcmask 523270  }
  0x29   : > { %846 = vmatpush1.bf16.msra.mxu1 %v2766_v36  ;;  %v2852_v36 = vld [vmem:[%s3874_s1 + $0x64] ss:$16 sps:$4 sm:$0xff]   ;;  %vm3847_vm11 = vmand %vm2124_vm9, %vm2118_vm4 }
  0x2a   : > { %847 = vmatprep.subr.bf16.mxu1 %v2774_v37  ;;  %v2847_v37 = vld [vmem:[%s3874_s1 + $0x220] ss:$16 sps:$4 sm:$0xff]   ;;  %vm2126_vm13 = vmor %vm3847_vm11, %vm3816_vm5 }
  0x2b   : > { %774 = vmatpush1.bf16.msra.mxu0 %v2781_v42  ;;  %v2856_v42 = vld [vmem:[%s3874_s1 + $0x80] ss:$16 sps:$4 sm:$0xff]  }
  0x2c   : > { %775 = vmatprep.subr.bf16.mxu0 %v2782_v43  ;;  %v2861_v43 = vld [vmem:[%s3874_s1 + $0x2c] ss:$16 sps:$4 sm:$0xff]  }
  0x2d   : > { %848 = vmatpush1.bf16.msra.mxu1 %v2772_v40  ;;  %v2858_v40 = vld [vmem:[%s3874_s1 + $0x84] ss:$16 sps:$4 sm:$0xff]  }
  0x2e   : > { %849 = vmatprep.subr.bf16.mxu1 %v2780_v41  ;;  %v2853_v41 = vld [vmem:[%s3874_s1 + $0x8] ss:$16 sps:$4 sm:$0xff]  }
  0x2f   : > { %776 = vmatpush1.bf16.msra.mxu0 %v2787_v46  ;;  %v2862_v46 = vld [vmem:[%s3874_s1 + $0xa0] ss:$16 sps:$4 sm:$0xff]  }
  0x30   : > { %777 = vmatprep.subr.bf16.mxu0 %v2788_v47  ;;  %v2867_v47 = vld [vmem:[%s3874_s1 + $0x4c] ss:$16 sps:$4 sm:$0xff]  }
  0x31   : > { %850 = vmatpush1.bf16.msra.mxu1 %v2778_v44  ;;  %v2864_v44 = vld [vmem:[%s3874_s1 + $0xa4] ss:$16 sps:$4 sm:$0xff]  }
  0x32   : > { %851 = vmatprep.subr.bf16.mxu1 %v2786_v45  ;;  %v2859_v45 = vld [vmem:[%s3874_s1 + $0x28] ss:$16 sps:$4 sm:$0xff]  }
  0x33   : > { %778 = vmatpush1.bf16.msra.mxu0 %v2793_v51  ;;  %v2873_v51 = vld [vmem:[%s3874_s1 + $0x6c] ss:$16 sps:$4 sm:$0xff]  }
  0x34   : > { %779 = vmatprep.subr.bf16.mxu0 %v2794_v53  ;;  %v2871_v53 = vld [vmem:[%s3874_s1 + $0x68] ss:$16 sps:$4 sm:$0xff]  }
  0x35   : > { %852 = vmatpush1.bf16.msra.mxu1 %v2784_v48  ;;  %v2870_v48 = vld [vmem:[%s3874_s1 + $0xc4] ss:$16 sps:$4 sm:$0xff]  }
  0x36   : > { %853 = vmatprep.subr.bf16.mxu1 %v2792_v50  ;;  %v2868_v50 = vld [vmem:[%s3874_s1 + $0xc0] ss:$16 sps:$4 sm:$0xff]  }
  0x37   : > { %780 = vmatpush1.bf16.msra.mxu0 %v2799_v58  ;;  %v2880_v58 = vld [vmem:[%s3874_s1 + $0x100] ss:$16 sps:$4 sm:$0xff]  }
  0x38   : > { %781 = vmatprep.subr.bf16.mxu0 %v2800_v60  ;;  %v2888_v60 = vld [vmem:[%s3874_s1 + $0x124] ss:$16 sps:$4 sm:$0xff]  }
  0x39   : > { %854 = vmatpush1.bf16.msra.mxu1 %v2790_v56  ;;  %v2882_v56 = vld [vmem:[%s3874_s1 + $0x104] ss:$16 sps:$4 sm:$0xff]  }
  0x3a   : > { %855 = vmatprep.subr.bf16.mxu1 %v2798_v57  ;;  %v2877_v57 = vld [vmem:[%s3874_s1 + $0x88] ss:$16 sps:$4 sm:$0xff]  }
  0x3b   : > { %782 = vmatpush1.bf16.msra.mxu0 %v2805_v1  ;;  %v2894_v1 = vld [vmem:[%s3874_s1 + $0x144] ss:$16 sps:$4 sm:$0xff]  }
  0x3c   : > { %783 = vmatprep.subr.bf16.mxu0 %v2806_v3  ;;  %v2889_v3 = vld [vmem:[%s3874_s1 + $0xc8] ss:$16 sps:$4 sm:$0xff]  }
  0x3d   : > { %856 = vmatpush1.bf16.msra.mxu1 %v2796_v62  ;;  %v2886_v62 = vld [vmem:[%s3874_s1 + $0x120] ss:$16 sps:$4 sm:$0xff]  }
  0x3e   : > { %857 = vmatprep.subr.bf16.mxu1 %v2804_v0  ;;  %v2891_v0 = vld [vmem:[%s3874_s1 + $0xcc] ss:$16 sps:$4 sm:$0xff]  }
  0x3f   : > { %784 = vmatpush1.bf16.msra.mxu0 %v2811_v7  ;;  %v2895_v7 = vld [vmem:[%s3874_s1 + $0xe8] ss:$16 sps:$4 sm:$0xff]  }
  0x40   : > { %785 = vmatprep.subr.bf16.mxu0 %v2812_v8  ;;  %v2898_v8 = vld [vmem:[%s3874_s1 + $0x160] ss:$16 sps:$4 sm:$0xff]  }
  0x41   : > { %858 = vmatpush1.bf16.msra.mxu1 %v2802_v4  ;;  %v2892_v4 = vld [vmem:[%s3874_s1 + $0x140] ss:$16 sps:$4 sm:$0xff]  }
  0x42   : > { %859 = vmatprep.subr.bf16.mxu1 %v2810_v6  ;;  %v2900_v6 = vld [vmem:[%s3874_s1 + $0x164] ss:$16 sps:$4 sm:$0xff]  }
  0x43   : > { %786 = vmatpush1.bf16.msra.mxu0 %v2817_v14  ;;  %v2909_v14 = vld [vmem:[%s3874_s1 + $0x12c] ss:$16 sps:$4 sm:$0xff]  }
  0x44   : > { %878 = vmatprep.subr.bf16.mxu0 %v2825_v15  ;;  %v2912_v15 = vld [vmem:[%s3874_s1 + $0x1a4] ss:$16 sps:$4 sm:$0xff]  }
  0x45   : > { %860 = vmatpush1.bf16.msra.mxu1 %v2808_v9  ;;  %v2903_v9 = vld [vmem:[%s3874_s1 + $0x10c] ss:$16 sps:$4 sm:$0xff]  }
  0x46   : > { %861 = vmatprep.subr.bf16.mxu1 %v2816_v12  ;;  %788 = vmatmul.mubr.bf16.vlgmr.msra.gmra.mrb[0].mxu0 %v374_v17  ;;  %v2904_v12 = vld [vmem:[%s3874_s1 + $0x180] ss:$16 sps:$4 sm:$0xff]  }
  0x47   : > { %879 = vmatpush1.bf16.msra.mxu0 %v2823_v19  ;;  %910 = vmatprep.mubr.bf16.mxu0 %v3063_v2  ;;  %v2918_v19 = vld [vmem:[%s3874_s1 + $0x1c4] ss:$16 sps:$4 sm:$0xff]  }
  0x48   : > { %880 = vmatprep.subr.bf16.mxu0 %v2831_v20  ;;  %v2913_v20 = vld [vmem:[%s3874_s1 + $0x148] ss:$16 sps:$4 sm:$0xff]  }
  0x49   : > { %862 = vmatpush1.bf16.msra.mxu1 %v2814_v16  ;;  %v2907_v16 = vld [vmem:[%s3874_s1 + $0x128] ss:$16 sps:$4 sm:$0xff]  }
  0x4a   : > { %863 = vmatprep.subr.bf16.mxu1 %v2822_v18  ;;  %v2915_v18 = vld [vmem:[%s3874_s1 + $0x14c] ss:$16 sps:$4 sm:$0xff]  }
  0x4b   : > { %881 = vmatpush1.bf16.msra.mxu0 %v2829_v24  ;;  %v2924_v24 = vld [vmem:[%s3874_s1 + $0x1e4] ss:$16 sps:$4 sm:$0xff]  }
  0x4c   : > { %1283 = vmatprep.subr.bf16.mxu0 %v2837_v25  ;;  %v2919_v25 = vld [vmem:[%s3874_s1 + $0x168] ss:$16 sps:$4 sm:$0xff]  }
  0x4d   : > { %864 = vmatpush1.bf16.msra.mxu1 %v2820_v22  ;;  %v2916_v22 = vld [vmem:[%s3874_s1 + $0x1c0] ss:$16 sps:$4 sm:$0xff]  }
  0x4e   : > { %865 = vmatprep.subr.bf16.mxu1 %v2828_v23  ;;  %2481 = vmatmul.mubr.msk.bf16.vlgmr.msra.gmra.mrb[4].mxu0 %vm751_vm0, %v3160_v21  ;;  %v2841_v21 = vld [vmem:[%s3874_s1 + $0x200] ss:$16 sps:$4 sm:$0xff]   ;;  %v2921_v23 = vld [vmem:[%s3874_s1 + $0x16c] ss:$16 sps:$4 sm:$0xff]  }
  0x4f   : > { %1284 = vmatpush1.bf16.msra.mxu0 %v2835_v28  ;;  %1315 = vmatprep.mubr.bf16.mxu0 %v3252_v52  ;;  %v2933_v28 = vld [vmem:[%s3874_s1 + $0x20c] ss:$16 sps:$4 sm:$0xff]  }
  0x50   : > { %1285 = vmatprep.subr.bf16.mxu0 %v2840_v29  ;;  %v2925_v29 = vld [vmem:[%s3874_s1 + $0x188] ss:$16 sps:$4 sm:$0xff]  }
  0x51   : > { %866 = vmatpush1.bf16.msra.mxu1 %v2826_v26  ;;  %v2922_v26 = vld [vmem:[%s3874_s1 + $0x1e0] ss:$16 sps:$4 sm:$0xff]  }
  0x52   : > { %867 = vmatprep.subr.bf16.mxu1 %v2834_v27  ;;  %v2927_v27 = vld [vmem:[%s3874_s1 + $0x18c] ss:$16 sps:$4 sm:$0xff]  }
  0x53   : > { %1286 = vmatpush1.bf16.msra.mxu0 %v2838_v31  ;;  %v2931_v31 = vld [vmem:[%s3874_s1 + $0x208] ss:$16 sps:$4 sm:$0xff]  }
  0x54   : > { %1287 = vmatprep.subr.bf16.mxu0 %v2846_v33  ;;  %v2928_v33 = vld [vmem:[%s3874_s1 + $0x1a8] ss:$16 sps:$4 sm:$0xff]  }
  0x55   : > { %868 = vmatpush1.bf16.msra.mxu1 %v2832_v30  ;;  %v2930_v30 = vld [vmem:[%s3874_s1 + $0x1ac] ss:$16 sps:$4 sm:$0xff]  }
  0x56   : > { %1324 = vmatprep.subr.bf16.mxu1 %v2843_v32  ;;  %v2939_v32 = vld [vmem:[%s3874_s1 + $0x22c] ss:$16 sps:$4 sm:$0xff]  }
  0x57   : > { %1288 = vmatpush1.bf16.msra.mxu0 %v2844_v34  ;;  %v2937_v34 = vld [vmem:[%s3874_s1 + $0x228] ss:$16 sps:$4 sm:$0xff]  }
  0x58   : > { %870 = vmatmul.mubr.bf16.vlgmr.msra.gmra.mrb[4].mxu1 %v374_v17  ;;  %1289 = vmatprep.subr.bf16.mxu0 %v2852_v36  ;;  %v2910_v17 = vld [vmem:[%s3874_s1 + $0x1a0] ss:$16 sps:$4 sm:$0xff]  }
  0x59   : > { %1325 = vmatpush1.bf16.msra.mxu1 %v2841_v21  ;;  %1356 = vmatprep.mubr.bf16.mxu1 %v3063_v2  ;;  %v2936_v21 = vld [vmem:[%s3874_s1 + $0x1cc] ss:$16 sps:$4 sm:$0xff]   ;;  %v3039_v36 = vld [vmem:[%s3132_s12 + $0x4] ss:$12 sps:$4 sm:$0x1e]  }
  0x5a   : > { %1326 = vmatprep.subr.bf16.mxu1 %v2849_v35  ;;  %v2945_v35 = vld [vmem:[%s3874_s1 + $0x484] ss:$16 sps:$4 sm:$0xff]  }
  0x5b   : > { %1290 = vmatpush1.bf16.msra.mxu0 %v2850_v38  ;;  %v2942_v38 = vld [vmem:[%s3874_s1 + $0x1ec] ss:$16 sps:$4 sm:$0xff]  }
  0x5c   : > { %1291 = vmatprep.subr.bf16.mxu0 %v2858_v40  ;;  %v2948_v40 = vld [vmem:[%s3874_s1 + $0x4a4] ss:$16 sps:$4 sm:$0xff]  }
  0x5d   : > { %1327 = vmatpush1.bf16.msra.mxu1 %v2847_v37  ;;  %v2934_v37 = vld [vmem:[%s3874_s1 + $0x1c8] ss:$16 sps:$4 sm:$0xff]  }
  0x5e   : > { %1365 = vmatprep.subr.bf16.mxu1 %v2855_v39  ;;  %v2943_v39 = vld [vmem:[%s3874_s1 + $0x480] ss:$16 sps:$4 sm:$0xff]  }
  0x5f   : > { %1292 = vmatpush1.bf16.msra.mxu0 %v2856_v42  ;;  %v2940_v42 = vld [vmem:[%s3874_s1 + $0x1e8] ss:$16 sps:$4 sm:$0xff]  }
  0x60   : > { %2554 = vmatmul.mubr.msk.bf16.vlgmr.msra.gmra.mrb[8].mxu1 %vm751_vm0, %v3144_v13  ;;  %1293 = vmatprep.subr.bf16.mxu0 %v2864_v44  ;;  %v2951_v44 = vld [vmem:[%s3874_s1 + $0x684] ss:$16 sps:$4 sm:$0xff]  }
  0x61   : > { %1366 = vmatpush1.bf16.msra.mxu1 %v2853_v41  ;;  %1397 = vmatprep.mubr.bf16.mxu1 %v3252_v52  ;;  %v2876_v52 = vld [vmem:[%s3874_s1 + $0xe4] ss:$16 sps:$4 sm:$0xff]   ;;  %v1538_v41 = vrot.slane %v3039_v36, 1 }
  0x62   : > { %1367 = vmatprep.subr.bf16.mxu1 %v2861_v43  ;;  %v2946_v43 = vld [vmem:[%s3874_s1 + $0x4a0] ss:$16 sps:$4 sm:$0xff]   ;;  %v3033_v36 = vld [vmem:[%s3874_s1 + $0x664] ss:$16 sps:$4 sm:$0xff]  }
  0x63   : > { %1294 = vmatpush1.bf16.msra.mxu0 %v2862_v46  ;;  %v2952_v46 = vld [vmem:[%s3874_s1 + $0x4c0] ss:$16 sps:$4 sm:$0xff]  }
  0x64   : > { %1295 = vmatprep.subr.bf16.mxu0 %v2870_v48  ;;  %v2960_v48 = vld [vmem:[%s3874_s1 + $0x4e4] ss:$16 sps:$4 sm:$0xff]  }
  0x65   : > { %1368 = vmatpush1.bf16.msra.mxu1 %v2859_v45  ;;  %v2954_v45 = vld [vmem:[%s3874_s1 + $0x4c4] ss:$16 sps:$4 sm:$0xff]  }
  0x66   : > { %1369 = vmatprep.subr.bf16.mxu1 %v2867_v47  ;;  %v2957_v47 = vld [vmem:[%s3874_s1 + $0x6a4] ss:$16 sps:$4 sm:$0xff]  }
  0x67   : > { %1296 = vmatpush1.bf16.msra.mxu0 %v2868_v50  ;;  %v2955_v50 = vld [vmem:[%s3874_s1 + $0x6a0] ss:$16 sps:$4 sm:$0xff]  }
  0x68   : > { %1297 = vmatprep.subr.bf16.mxu0 %v2876_v52  ;;  %v2964_v52 = vld [vmem:[%s3874_s1 + $0x48c] ss:$16 sps:$4 sm:$0xff]  }
  0x69   : > { %1370 = vmatpush1.bf16.msra.mxu1 %v2865_v49  ;;  %v3602_v49 = vld [vmem:[%s3132_s12 + $0x8] ss:$12 sps:$4 sm:$0x1e]  }
  0x6a   : > { %1371 = vmatprep.subr.bf16.mxu1 %v2873_v51  ;;  %v2958_v51 = vld [vmem:[%s3874_s1 + $0x4e0] ss:$16 sps:$4 sm:$0xff]  }
  0x6b   : > { %1298 = vmatpush1.bf16.msra.mxu0 %v2874_v54  ;;  %v2962_v54 = vld [vmem:[%s3874_s1 + $0x488] ss:$16 sps:$4 sm:$0xff]  }
  0x6c   : > { %1299 = vmatprep.subr.bf16.mxu0 %v2882_v56  ;;  %v2970_v56 = vld [vmem:[%s3874_s1 + $0x4ac] ss:$16 sps:$4 sm:$0xff]  }
  0x6d   : > { %1372 = vmatpush1.bf16.msra.mxu1 %v2871_v53  ;;  %v1539_v53 = vrot.slane %v3602_v49, 1 }
  0x6e   : > { %1373 = vmatprep.subr.bf16.mxu1 %v2879_v55  ;;  %v2965_v55 = vld [vmem:[%s3874_s1 + $0x500] ss:$16 sps:$4 sm:$0xff]  }
  0x6f   : > { %1300 = vmatpush1.bf16.msra.mxu0 %v2880_v58  ;;  %v2968_v58 = vld [vmem:[%s3874_s1 + $0x4a8] ss:$16 sps:$4 sm:$0xff]  }
  0x70   : > { %1301 = vmatprep.subr.bf16.mxu0 %v2888_v60  ;;  %v2976_v60 = vld [vmem:[%s3874_s1 + $0x4cc] ss:$16 sps:$4 sm:$0xff]  }
  0x71   : > { %1374 = vmatpush1.bf16.msra.mxu1 %v2877_v57  ;;  %v2973_v57 = vld [vmem:[%s3874_s1 + $0x524] ss:$16 sps:$4 sm:$0xff]  }
  0x72   : > { %1375 = vmatprep.subr.bf16.mxu1 %v2885_v59  ;;  %v2971_v59 = vld [vmem:[%s3874_s1 + $0x520] ss:$16 sps:$4 sm:$0xff]  }
  0x73   : > { %1302 = vmatpush1.bf16.msra.mxu0 %v2886_v62  ;;  %v2974_v62 = vld [vmem:[%s3874_s1 + $0x4c8] ss:$16 sps:$4 sm:$0xff]  }
  0x74   : > { %1303 = vmatprep.subr.bf16.mxu0 %v2894_v1  ;;  %v2982_v1 = vld [vmem:[%s3874_s1 + $0x4ec] ss:$16 sps:$4 sm:$0xff]  }
  0x75   : > { %1376 = vmatpush1.bf16.msra.mxu1 %v2883_v61  ;;  %v2979_v61 = vld [vmem:[%s3874_s1 + $0x544] ss:$16 sps:$4 sm:$0xff]  }
  0x76   : > { %1377 = vmatprep.subr.bf16.mxu1 %v2891_v0  ;;  %v2977_v0 = vld [vmem:[%s3874_s1 + $0x540] ss:$16 sps:$4 sm:$0xff]  }
  0x77   : > { %1304 = vmatpush1.bf16.msra.mxu0 %v2892_v4  ;;  %v2980_v4 = vld [vmem:[%s3874_s1 + $0x4e8] ss:$16 sps:$4 sm:$0xff]  }
  0x78   : > { %1305 = vmatprep.subr.bf16.mxu0 %v2900_v6  ;;  %v2988_v6 = vld [vmem:[%s3874_s1 + $0x50c] ss:$16 sps:$4 sm:$0xff]  }
  0x79   : > { %1378 = vmatpush1.bf16.msra.mxu1 %v2889_v3  ;;  %v2985_v3 = vld [vmem:[%s3874_s1 + $0x564] ss:$16 sps:$4 sm:$0xff]  }
  0x7a   : > { %1379 = vmatprep.subr.bf16.mxu1 %v2897_v5  ;;  %v2983_v5 = vld [vmem:[%s3874_s1 + $0x560] ss:$16 sps:$4 sm:$0xff]  }
  0x7b   : > { %1306 = vmatpush1.bf16.msra.mxu0 %v2898_v8  ;;  %v2986_v8 = vld [vmem:[%s3874_s1 + $0x508] ss:$16 sps:$4 sm:$0xff]  }
  0x7c   : > { %1307 = vmatprep.subr.bf16.mxu0 %v2906_v10  ;;  %v2994_v10 = vld [vmem:[%s3874_s1 + $0x52c] ss:$16 sps:$4 sm:$0xff]  }
  0x7d   : > { %1380 = vmatpush1.bf16.msra.mxu1 %v2895_v7  ;;  %v2991_v7 = vld [vmem:[%s3874_s1 + $0x584] ss:$16 sps:$4 sm:$0xff]  }
  0x7e   : > { %1381 = vmatprep.subr.bf16.mxu1 %v2903_v9  ;;  %v2989_v9 = vld [vmem:[%s3874_s1 + $0x580] ss:$16 sps:$4 sm:$0xff]  }
  0x7f   : > { %1308 = vmatpush1.bf16.msra.mxu0 %v2904_v12  ;;  %v2992_v12 = vld [vmem:[%s3874_s1 + $0x528] ss:$16 sps:$4 sm:$0xff]  }
  0x80   : > { %1309 = vmatprep.subr.bf16.mxu0 %v2912_v15  ;;  %v3000_v15 = vld [vmem:[%s3874_s1 + $0x54c] ss:$16 sps:$4 sm:$0xff]  }
  0x81   : > { %1382 = vmatpush1.bf16.msra.mxu1 %v2901_v11  ;;  %v2997_v11 = vld [vmem:[%s3874_s1 + $0x5a4] ss:$16 sps:$4 sm:$0xff]  }
  0x82   : > { %1383 = vmatprep.subr.bf16.mxu1 %v2909_v14  ;;  %v2995_v14 = vld [vmem:[%s3874_s1 + $0x5a0] ss:$16 sps:$4 sm:$0xff]  }
  0x83   : > { %1310 = vmatpush1.bf16.msra.mxu0 %v2910_v17  ;;  %v2998_v17 = vld [vmem:[%s3874_s1 + $0x548] ss:$16 sps:$4 sm:$0xff]  }
  0x84   : > { %1311 = vmatprep.subr.bf16.mxu0 %v2918_v19  ;;  %v3006_v19 = vld [vmem:[%s3874_s1 + $0x56c] ss:$16 sps:$4 sm:$0xff]  }
  0x85   : > { %1384 = vmatpush1.bf16.msra.mxu1 %v2907_v16  ;;  %v3003_v16 = vld [vmem:[%s3874_s1 + $0x5c4] ss:$16 sps:$4 sm:$0xff]  }
  0x86   : > { %1385 = vmatprep.subr.bf16.mxu1 %v2915_v18  ;;  %v3001_v18 = vld [vmem:[%s3874_s1 + $0x5c0] ss:$16 sps:$4 sm:$0xff]  }
  0x87   : > { %1312 = vmatpush1.bf16.msra.mxu0 %v2916_v22  ;;  %v3004_v22 = vld [vmem:[%s3874_s1 + $0x568] ss:$16 sps:$4 sm:$0xff]  }
  0x88   : > { %1313 = vmatprep.subr.bf16.mxu0 %v2924_v24  ;;  %v3012_v24 = vld [vmem:[%s3874_s1 + $0x58c] ss:$16 sps:$4 sm:$0xff]  }
  0x89   : > { %1386 = vmatpush1.bf16.msra.mxu1 %v2913_v20  ;;  %v3009_v20 = vld [vmem:[%s3874_s1 + $0x5e4] ss:$16 sps:$4 sm:$0xff]  }
  0x8a   : > { %1387 = vmatprep.subr.bf16.mxu1 %v2921_v23  ;;  %v3007_v23 = vld [vmem:[%s3874_s1 + $0x5e0] ss:$16 sps:$4 sm:$0xff]  }
  0x8b   : > { %1314 = vmatpush1.bf16.msra.mxu0 %v2922_v26  ;;  %v3010_v26 = vld [vmem:[%s3874_s1 + $0x588] ss:$16 sps:$4 sm:$0xff]  }
  0x8c   : > { %1406 = vmatprep.subr.bf16.mxu0 %v2933_v28  ;;  %v3018_v28 = vld [vmem:[%s3874_s1 + $0x5ac] ss:$16 sps:$4 sm:$0xff]  }
  0x8d   : > { %1388 = vmatpush1.bf16.msra.mxu1 %v2919_v25  ;;  %v3015_v25 = vld [vmem:[%s3874_s1 + $0x604] ss:$16 sps:$4 sm:$0xff]  }
  0x8e   : > { %1389 = vmatprep.subr.bf16.mxu1 %v2927_v27  ;;  %1316 = vmatmul.mubr.bf16.vlgmr.msra.gmra.mrb[8].mxu0 %v3274_v63  ;;  %v3013_v27 = vld [vmem:[%s3874_s1 + $0x600] ss:$16 sps:$4 sm:$0xff]  }
  0x8f   : > { %1407 = vmatpush1.bf16.msra.mxu0 %v2931_v31  ;;  %1438 = vmatprep.mubr.bf16.mxu0 %v3063_v2  ;;  %v3019_v31 = vld [vmem:[%s3874_s1 + $0x620] ss:$16 sps:$4 sm:$0xff]  }
  0x90   : > { %1408 = vmatprep.subr.bf16.mxu0 %v2939_v32  ;;  %v3024_v32 = vld [vmem:[%s3874_s1 + $0x5cc] ss:$16 sps:$4 sm:$0xff]  }
  0x91   : > { %1390 = vmatpush1.bf16.msra.mxu1 %v2925_v29  ;;  %v3021_v29 = vld [vmem:[%s3874_s1 + $0x624] ss:$16 sps:$4 sm:$0xff]  }
  0x92   : > { %1391 = vmatprep.subr.bf16.mxu1 %v2930_v30  ;;  %v3016_v30 = vld [vmem:[%s3874_s1 + $0x5a8] ss:$16 sps:$4 sm:$0xff]  }
  0x93   : > { %1409 = vmatpush1.bf16.msra.mxu0 %v2937_v34  ;;  %v3025_v34 = vld [vmem:[%s3874_s1 + $0x640] ss:$16 sps:$4 sm:$0xff]  }
  0x94   : > { %1905 = vmatprep.subr.bf16.mxu0 %v2945_v35  ;;  %v3030_v35 = vld [vmem:[%s3874_s1 + $0x5ec] ss:$16 sps:$4 sm:$0xff]  }
  0x95   : > { %1392 = vmatpush1.bf16.msra.mxu1 %v2928_v33  ;;  %v3027_v33 = vld [vmem:[%s3874_s1 + $0x644] ss:$16 sps:$4 sm:$0xff]  }
  0x96   : > { %1393 = vmatprep.subr.bf16.mxu1 %v2936_v21  ;;  %2555 = vmatmul.mubr.msk.bf16.vlgmr.msra.gmra.mrb[12].mxu0 %vm751_vm0, %v3144_v13  ;;  %v2949_v13 = vld [vmem:[%s3874_s1 + $0x680] ss:$16 sps:$4 sm:$0xff]   ;;  %v3022_v21 = vld [vmem:[%s3874_s1 + $0x5c8] ss:$16 sps:$4 sm:$0xff]  }
  0x97   : > { %1906 = vmatpush1.bf16.msra.mxu0 %v2943_v39  ;;  %1937 = vmatprep.mubr.bf16.mxu0 %v1538_v41  ;;  %v3031_v39 = vld [vmem:[%s3874_s1 + $0x660] ss:$16 sps:$4 sm:$0xff]  }
  0x98   : > { %1907 = vmatprep.subr.bf16.mxu0 %v2948_v40  ;;  %v3036_v40 = vld [vmem:[%s3874_s1 + $0x60c] ss:$16 sps:$4 sm:$0xff]  }
  0x99   : > { %1394 = vmatpush1.bf16.msra.mxu1 %v2934_v37  ;;  %v3028_v37 = vld [vmem:[%s3874_s1 + $0x5e8] ss:$16 sps:$4 sm:$0xff]  }
  0x9a   : > { %1395 = vmatprep.subr.bf16.mxu1 %v2942_v38  ;;  %v3037_v38 = vld [vmem:[%s3132_s12] ss:$12 sps:$4 sm:$0x1e]   ;;  %s2710_s12 = sshll.u32 %s3885_s16, 3 }
  0x9b   : > { %1908 = vmatpush1.bf16.msra.mxu0 %v2946_v43  ;;  %v1537_v43 = vrot.slane %v3037_v38, 1  ;;  %s210_s22 = scalar_lea.vmem %s3877_s4, %s2710_s12 }
  0x9c   : > { %1909 = vmatprep.subr.bf16.mxu0 %v2954_v45  ;;  %v3043_v45 = vld [vmem:[%s3874_s1 + $0x688] ss:$16 sps:$4 sm:$0xff]  }
  0x9d   : > { %1396 = vmatpush1.bf16.msra.mxu1 %v2940_v42  ;;  %v3034_v42 = vld [vmem:[%s3874_s1 + $0x608] ss:$16 sps:$4 sm:$0xff]  }
  0x9e   : > { %1946 = vmatprep.subr.bf16.mxu1 %v2951_v44  ;;  %v3042_v44 = vld [vmem:[%s3874_s1 + $0x62c] ss:$16 sps:$4 sm:$0xff]  }
  0x9f   : > { %1910 = vmatpush1.bf16.msra.mxu0 %v2952_v46  ;;  %v3040_v46 = vld [vmem:[%s3874_s1 + $0x628] ss:$16 sps:$4 sm:$0xff]  }
  0xa0   : > { %1398 = vmatmul.mubr.bf16.vlgmr.msra.gmra.mrb[12].mxu1 %v3274_v63  ;;  %1911 = vmatprep.subr.bf16.mxu0 %v2960_v48  ;;  %v2967_v63 = vld [vmem:[%s3874_s1 + $0x504] ss:$16 sps:$4 sm:$0xff]   ;;  %v3049_v48 = vld [vmem:[%s3874_s1 + $0x6a8] ss:$16 sps:$4 sm:$0xff]  }
  0xa1   : > { %1947 = vmatpush1.bf16.msra.mxu1 %v2949_v13  ;;  %1978 = vmatprep.mubr.bf16.mxu1 %v3063_v2  ;;  %v3051_v13 = vld [vmem:[%s3874_s1 + $0x6ac] ss:$16 sps:$4 sm:$0xff]  }
  0xa2   : > { %1948 = vmatprep.subr.bf16.mxu1 %v2957_v47  ;;  %v3048_v47 = vld [vmem:[%s3874_s1 + $0x64c] ss:$16 sps:$4 sm:$0xff]  }
  0xa3   : > { %1912 = vmatpush1.bf16.msra.mxu0 %v2958_v51  ;;  %v3054_v51 = vld [vmem:[%s3874_s1 + $0x66c] ss:$16 sps:$4 sm:$0xff]  }
  0xa4   : > { %1913 = vmatprep.subr.bf16.mxu0 %v2967_v63 }
  0xa5   : > { %1949 = vmatpush1.bf16.msra.mxu1 %v2955_v50  ;;  %v3046_v50 = vld [vmem:[%s3874_s1 + $0x648] ss:$16 sps:$4 sm:$0xff]  }
  0xa6   : > { %1987 = vmatprep.subr.bf16.mxu1 %v2964_v52  ;;  %v3052_v52 = vld [vmem:[%s3874_s1 + $0x668] ss:$16 sps:$4 sm:$0xff]  }
  0xa7   : > { %1914 = vmatpush1.bf16.msra.mxu0 %v2965_v55 }
  0xa8   : > { %2703 = vmatmul.mubr.msk.bf16.vlgmr.msra.gmra.mrb[16].mxu1 %vm751_vm0, %v1539_v53  ;;  %1915 = vmatprep.subr.bf16.mxu0 %v2973_v57 }
  0xa9   : > { %1988 = vmatpush1.bf16.msra.mxu1 %v2962_v54  ;;  %2019 = vmatprep.mubr.bf16.mxu1 %v1538_v41  ;;  %v3045_v41 = vld [vmem:[%s3874_s1 + $0x68c] ss:$16 sps:$4 sm:$0xff]  }
  0xaa   : > { %1989 = vmatprep.subr.bf16.mxu1 %v2970_v56 }
  0xab   : > { %1916 = vmatpush1.bf16.msra.mxu0 %v2971_v59 }
  0xac   : > { %1917 = vmatprep.subr.bf16.mxu0 %v2979_v61 }
  0xad   : > { %1990 = vmatpush1.bf16.msra.mxu1 %v2968_v58 }
  0xae   : > { %1991 = vmatprep.subr.bf16.mxu1 %v2976_v60 }
  0xaf   : > { %1918 = vmatpush1.bf16.msra.mxu0 %v2977_v0 }
  0xb0   : > { %1919 = vmatprep.subr.bf16.mxu0 %v2985_v3 }
  0xb1   : > { %1992 = vmatpush1.bf16.msra.mxu1 %v2974_v62 }
  0xb2   : > { %1993 = vmatprep.subr.bf16.mxu1 %v2982_v1 }
  0xb3   : > { %1920 = vmatpush1.bf16.msra.mxu0 %v2983_v5 }
  0xb4   : > { %1921 = vmatprep.subr.bf16.mxu0 %v2991_v7 }
  0xb5   : > { %1994 = vmatpush1.bf16.msra.mxu1 %v2980_v4 }
  0xb6   : > { %1995 = vmatprep.subr.bf16.mxu1 %v2988_v6 }
  0xb7   : > { %1922 = vmatpush1.bf16.msra.mxu0 %v2989_v9 }
  0xb8   : > { %1923 = vmatprep.subr.bf16.mxu0 %v2997_v11 }
  0xb9   : > { %1996 = vmatpush1.bf16.msra.mxu1 %v2986_v8 }
  0xba   : > { %1997 = vmatprep.subr.bf16.mxu1 %v2994_v10 }
  0xbb   : > { %1924 = vmatpush1.bf16.msra.mxu0 %v2995_v14 }
  0xbc   : > { %1925 = vmatprep.subr.bf16.mxu0 %v3003_v16 }
  0xbd   : > { %1998 = vmatpush1.bf16.msra.mxu1 %v2992_v12 }
  0xbe   : > { %1999 = vmatprep.subr.bf16.mxu1 %v3000_v15 }
  0xbf   : > { %1926 = vmatpush1.bf16.msra.mxu0 %v3001_v18 }
  0xc0   : > { %1927 = vmatprep.subr.bf16.mxu0 %v3009_v20 }
  0xc1   : > { %2000 = vmatpush1.bf16.msra.mxu1 %v2998_v17 }
  0xc2   : > { %2001 = vmatprep.subr.bf16.mxu1 %v3006_v19 }
  0xc3   : > { %1928 = vmatpush1.bf16.msra.mxu0 %v3007_v23 }
  0xc4   : > { %1929 = vmatprep.subr.bf16.mxu0 %v3015_v25 }
  0xc5   : > { %2002 = vmatpush1.bf16.msra.mxu1 %v3004_v22 }
  0xc6   : > { %2003 = vmatprep.subr.bf16.mxu1 %v3012_v24 }
  0xc7   : > { %1930 = vmatpush1.bf16.msra.mxu0 %v3013_v27 }
  0xc8   : > { %1931 = vmatprep.subr.bf16.mxu0 %v3021_v29 }
  0xc9   : > { %2004 = vmatpush1.bf16.msra.mxu1 %v3010_v26 }
  0xca   : > { %2005 = vmatprep.subr.bf16.mxu1 %v3018_v28 }
  0xcb   : > { %1932 = vmatpush1.bf16.msra.mxu0 %v3019_v31 }
  0xcc   : > { %1933 = vmatprep.subr.bf16.mxu0 %v3027_v33 }
  0xcd   : > { %2006 = vmatpush1.bf16.msra.mxu1 %v3016_v30 }
  0xce   : > { %2007 = vmatprep.subr.bf16.mxu1 %v3024_v32 }
  0xcf   : > { %1934 = vmatpush1.bf16.msra.mxu0 %v3025_v34 }
  0xd0   : > { %1935 = vmatprep.subr.bf16.mxu0 %v3033_v36 }
  0xd1   : > { %2008 = vmatpush1.bf16.msra.mxu1 %v3022_v21 }
  0xd2   : > { %2009 = vmatprep.subr.bf16.mxu1 %v3030_v35 }
  0xd3   : > { %1936 = vmatpush1.bf16.msra.mxu0 %v3031_v39 }
  0xd4   : > { %2028 = vmatprep.subr.bf16.mxu0 %v3045_v41 }
  0xd5   : > { %2010 = vmatpush1.bf16.msra.mxu1 %v3028_v37  ;;  %v2074_v37 = vlaneseq }
  0xd6   : > { %2011 = vmatprep.subr.bf16.mxu1 %v3036_v40  ;;  %1938 = vmatmul.mubr.bf16.vlgmr.msra.gmra.mrb[16].mxu0 %v1537_v43  ;;  %v3810_v40 = vld [vmem:[%s3875_s2] sm:$0xf] }
  0xd7   : > { %2029 = vmatpush1.bf16.msra.mxu0 %v3043_v45  ;;  %2060 = vmatprep.mubr.bf16.mxu0 %v3063_v2  ;;  %v3804_v38 = vshrl.u32 %v2074_v37, 7 }
  0xd8   : > { %2030 = vmatprep.subr.bf16.mxu0 %v3051_v13 }
  0xd9   : > { %2012 = vmatpush1.bf16.msra.mxu1 %v3034_v42  ;;  %v2076_v39 = vsub.s32 0, %v3804_v38  ;;  %v2080_v41 = vsub.s32 1, %v3804_v38 }
  0xda   : > { %2013 = vmatprep.subr.bf16.mxu1 %v3042_v44 }
  0xdb   : > { %2031 = vmatpush1.bf16.msra.mxu0 %v3049_v48  ;;  %v2077_v44 = vrot.slane %v3810_v40, %v2076_v39 }
  0xdd   : > { %2014 = vmatpush1.bf16.msra.mxu1 %v3040_v46  ;;  %v2081_v46 = vrot.slane %v3810_v40, %v2080_v41 }
  0xde   : > { %2015 = vmatprep.subr.bf16.mxu1 %v3048_v47  ;;  %2704 = vmatmul.mubr.msk.bf16.vlgmr.msra.gmra.mrb[20].mxu0 %vm751_vm0, %v1539_v53  ;;  %vm2229_vm0 = vmor %vm2228_vm15, %vm2227_vm14 }
  0xdf   : > { %vm2231_vm2 = vmor %vm2230_vm1, %vm2229_vm0 }
  0xe0   : > { %vm2233_vm4 = vmor %vm2232_vm3, %vm2231_vm2 }
  0xe1   : > { %2016 = vmatpush1.bf16.msra.mxu1 %v3046_v50 }
  0xe2   : > { %2017 = vmatprep.subr.bf16.mxu1 %v3054_v51 }
  0xe5   : > { %2018 = vmatpush1.bf16.msra.mxu1 %v3052_v52 }
  0xe8   : > { %2020 = vmatmul.mubr.bf16.vlgmr.msra.gmra.mrb[20].mxu1 %v1537_v43 }
  0xeb   : > { %v830_v2 = vpop.f32.mrb[0].mxu1 }
  0xec   : > { %v832_v63 = vpop.f32.mrb[1].mxu1 }
  0xed   : > { %v834_v54 = vpop.f32.mrb[2].mxu1 }
  0xee   : > { %v835_v55 = vpop.f32.mrb[3].mxu1 }
 0x119   : > { %v789_v56 = vpop.f32.mrb[0].mxu0 }
 0x11a   : > { %v831_v57 = vadd.f32 %v830_v2, %v789_v56  ;;  %v791_v58 = vpop.f32.mrb[1].mxu0 }
 0x11b   : > { %v833_v59 = vadd.f32 %v832_v63, %v791_v58  ;;  %v793_v60 = vpop.f32.mrb[2].mxu0 }
 0x11c   : > { %v794_v61 = vpop.f32.mrb[3].mxu0 }
 0x121   : > { %v912_v62 = vpop.f32.mrb[4].mxu0 }
 0x122   : > { %v914_v0 = vpop.f32.mrb[5].mxu0 }
 0x123   : > { %v916_v1 = vpop.f32.mrb[6].mxu0 }
 0x124   : > { %v917_v3 = vpop.f32.mrb[7].mxu0 }
 0x12b   : > { %v871_v49 = vpop.f32.mrb[4].mxu1 }
 0x12c   : > { %v913_v4 = vadd.f32 %v912_v62, %v871_v49  ;;  %v873_v53 = vpop.f32.mrb[5].mxu1 }
 0x12d   : > { %v915_v5 = vadd.f32 %v914_v0, %v873_v53  ;;  %v875_v6 = vpop.f32.mrb[6].mxu1 }
 0x12e   : > { %v876_v7 = vpop.f32.mrb[7].mxu1 }
 0x133   : > { %v1358_v8 = vpop.f32.mrb[8].mxu1 }
 0x134   : > { %v1360_v9 = vpop.f32.mrb[9].mxu1 }
 0x135   : > { %v1362_v10 = vpop.f32.mrb[10].mxu1 }
 0x136   : > { %v1363_v11 = vpop.f32.mrb[11].mxu1 }
 0x161   : > { %v1317_v12 = vpop.f32.mrb[8].mxu0 }
 0x162   : > { %v1318_v14 = vadd.f32 %v1317_v12, %v831_v57  ;;  %v1319_v15 = vpop.f32.mrb[9].mxu0  ;;  %v2121_v57 = vld [vmem:[%s3823_s19] sm:$0xff] }
 0x163   : > { %v1320_v16 = vadd.f32 %v1319_v15, %v833_v59  ;;  %v1321_v17 = vpop.f32.mrb[10].mxu0 }
 0x164   : > { %v1359_v18 = vadd.f32 %v1358_v8, %v1318_v14  ;;  %v1322_v19 = vpop.f32.mrb[11].mxu0 }
 0x165   : > { %v1361_v20 = vadd.f32 %v1360_v9, %v1320_v16  ;;  %v2084_v9 = vsub.s32 2, %v3804_v38  ;;  %v2088_v16 = vsub.s32 3, %v3804_v38 }
 0x169   : > { %v1440_v22 = vpop.f32.mrb[12].mxu0 }
 0x16a   : > { %v1442_v23 = vpop.f32.mrb[13].mxu0 }
 0x16b   : > { %v1444_v24 = vpop.f32.mrb[14].mxu0 }
 0x16c   : > { %v1445_v25 = vpop.f32.mrb[15].mxu0 }
 0x173   : > { %v1399_v26 = vpop.f32.mrb[12].mxu1 }
 0x174   : > { %v1400_v27 = vadd.f32 %v1399_v26, %v913_v4  ;;  %v1401_v28 = vpop.f32.mrb[13].mxu1 }
 0x175   : > { %v1402_v29 = vadd.f32 %v1401_v28, %v915_v5  ;;  %v1403_v30 = vpop.f32.mrb[14].mxu1 }
 0x176   : > { %v3800_v31 = vadd.f32 %v1440_v22, %v1400_v27  ;;  %v1404_v32 = vpop.f32.mrb[15].mxu1 }
 0x177   : > { %v3802_v33 = vadd.f32 %v1442_v23, %v1402_v29  ;;  %v2085_v23 = vrot.slane %v3810_v40, %v2084_v9  ;;  %v2089_v32 = vrot.slane %v3810_v40, %v2088_v16 }
 0x17b   : > { %v1980_v21 = vpop.f32.mrb[16].mxu1 }
 0x17c   : > { %v1982_v34 = vpop.f32.mrb[17].mxu1 }
 0x17d   : > { %v1984_v35 = vpop.f32.mrb[18].mxu1 }
 0x17e   : > { %v1985_v36 = vpop.f32.mrb[19].mxu1 }
 0x1a9   : > { %v1939_v42 = vpop.f32.mrb[16].mxu0 }
 0x1aa   : > { %v1981_v43 = vadd.f32 %v1980_v21, %v1939_v42  ;;  %v1941_v45 = vpop.f32.mrb[17].mxu0 }
 0x1ab   : > { %v1983_v13 = vadd.f32 %v1982_v34, %v1941_v45  ;;  %v1943_v47 = vpop.f32.mrb[18].mxu0 }
 0x1ac   : > { %v2069_v48 = vadd.f32 %v1981_v43, %v1359_v18  ;;  %v1944_v51 = vpop.f32.mrb[19].mxu0 }
 0x1ad   : > { %v2070_v52 = vadd.f32 %v1983_v13, %v1361_v20 }
 0x1ae   : > { %v2094_v63 = vadd.f32 %v2077_v44, %v2069_v48 }
 0x1af   : > { %v2095_v54 = vadd.f32 %v2081_v46, %v2070_v52 }
 0x1b0   : > { %v2131_v55 = vsel %vm2130_vm6, %v2094_v63, 0.0  ;;  %v2164_v56 = vmul.f32 %v2094_v63, %v2094_v63 }
 0x1b1   : > { %v2132_v58 = vrot.slane %v2131_v55, 4  ;;  %v2711_v59 = vpack.c.bf16 %v2095_v54, %v2094_v63  ;;  %v2138_v60 = vsel %vm2130_vm6, %v2095_v54, 0.0  ;;  %v2165_v61 = vmul.f32 %v2095_v54, %v2095_v54  ;;  %v2062_v62 = vpop.f32.mrb[20].mxu0 }
 0x1b2   : > { %v2168_v0 = vsel %vm2130_vm6, %v2164_v56, 0.0  ;;  %v2139_v1 = vrot.slane %v2138_v60, 4  ;;  %v2064_v3 = vpop.f32.mrb[21].mxu0 }
 0x1b3   : > { %v2133_v49 = vadd.f32 %v2132_v58, %v2131_v55  ;;  %v2169_v4 = vrot.slane %v2168_v0, 4  ;;  %v2122_v53 = vsel %vm2120_vm8, %v2711_v59, %v2121_v57  ;;  %v2175_v5 = vsel %vm2130_vm6, %v2165_v61, 0.0  ;;  %v2066_v6 = vpop.f32.mrb[22].mxu0 }
 0x1b4   : > { %2123 = vst [vmem:[%s3823_s19] sm:$0xff] %v2122_v53  ;;  %v2140_v7 = vadd.f32 %v2139_v1, %v2138_v60  ;;  %v2176_v8 = vrot.slane %v2175_v5, 4  ;;  %v2067_v10 = vpop.f32.mrb[23].mxu0  ;;  %v3064_v53 = vmov 1983009808  }
 0x1b5   : > { %v2134_v11 = vrot.slane %v2133_v49, 2  ;;  %v2170_v12 = vadd.f32 %v2169_v4, %v2168_v0 }
 0x1b6   : > { %v2141_v14 = vrot.slane %v2140_v7, 2  ;;  %v2177_v15 = vadd.f32 %v2176_v8, %v2175_v5  ;;  %v2212_v5 = vunpack.c.l.s4 %v3064_v53 }
 0x1b7   : > { %v2135_v17 = vadd.f32 %v2134_v11, %v2133_v49  ;;  %v2171_v18 = vrot.slane %v2170_v12, 2 }
 0x1b8   : > { %v2142_v19 = vadd.f32 %v2141_v14, %v2140_v7  ;;  %v2178_v20 = vrot.slane %v2177_v15, 2  ;;  %v2213_v14 = vunpack.c.0.s8 %v2212_v5 }
 0x1b9   : > { %v2136_v24 = vrot.slane %v2135_v17, 1  ;;  %v2172_v25 = vadd.f32 %v2171_v18, %v2170_v12 }
 0x1ba   : > { %v2143_v28 = vrot.slane %v2142_v19, 1  ;;  %v2179_v29 = vadd.f32 %v2178_v20, %v2177_v15 }
 0x1bb   : > { %v2021_v22 = vpop.f32.mrb[20].mxu1  ;;  %v2173_v34 = vrot.slane %v2172_v25, 1  ;;  %v2137_v42 = vadd.f32 %v2136_v24, %v2135_v17 }
 0x1bc   : > { %v2063_v26 = vadd.f32 %v2062_v62, %v2021_v22  ;;  %v2023_v27 = vpop.f32.mrb[21].mxu1  ;;  %v2180_v37 = vrot.slane %v2179_v29, 1  ;;  %v2144_v40 = vadd.f32 %v2143_v28, %v2142_v19  ;;  %v2216_v22 = vsub.s32 %v2213_v14, %v3804_v38 }
 0x1bd   : > { %v2065_v30 = vadd.f32 %v2064_v3, %v2023_v27  ;;  %v2025_v21 = vpop.f32.mrb[22].mxu1  ;;  %v2174_v43 = vadd.f32 %v2173_v34, %v2172_v25 }
 0x1be   : > { %v2071_v35 = vadd.f32 %v2063_v26, %v3800_v31  ;;  %v2026_v36 = vpop.f32.mrb[23].mxu1  ;;  %v2181_v45 = vadd.f32 %v2180_v37, %v2179_v29 }
 0x1bf   : > { %v2072_v39 = vadd.f32 %v2065_v30, %v3802_v33  ;;  %v2201_v31 = vsel %vm2200_vm10, %v2137_v42, %v2174_v43  ;;  %v2127_v33 = vld [vmem:[%s3823_s19 + $0x8] sm:$0xff] }
 0x1c0   : > { %v2096_v44 = vadd.f32 %v2085_v23, %v2071_v35  ;;  %v2202_v48 = vsel %vm2200_vm10, %v2144_v40, %v2181_v45 }
 0x1c1   : > { %v2097_v13 = vadd.f32 %v2089_v32, %v2072_v39  ;;  %v2209_v63 = vcombine.low %v2201_v31, %v2202_v48 }
 0x1c2   : > { %v2145_v46 = vsel %vm2130_vm6, %v2096_v44, 0.0  ;;  %v2166_v47 = vmul.f32 %v2096_v44, %v2096_v44 }
 0x1c3   : > { %v2146_v51 = vrot.slane %v2145_v46, 4  ;;  %v2712_v52 = vpack.c.bf16 %v2097_v13, %v2096_v44  ;;  %v2153_v2 = vsel %vm2152_vm12, %v2097_v13, 0.0  ;;  %v2167_v56 = vmul.f32 %v2097_v13, %v2097_v13 }
 0x1c4   : > { %v2182_v54 = vsel %vm2130_vm6, %v2166_v47, 0.0  ;;  %v2154_v55 = vrot.slane %v2153_v2, 4  ;;  %v2217_v25 = vrot.slane %v2209_v63, %v2216_v22 }
 0x1c5   : > { %v2147_v57 = vadd.f32 %v2146_v51, %v2145_v46  ;;  %v2183_v58 = vrot.slane %v2182_v54, 4  ;;  %v2128_v59 = vsel %vm2126_vm13, %v2712_v52, %v2127_v33  ;;  %v2189_v60 = vsel %vm2152_vm12, %v2167_v56, 0.0 }
 0x1c6   : > { %2129 = vst [vmem:[%s3823_s19 + $0x8] sm:$0xff] %v2128_v59  ;;  %v2155_v50 = vadd.f32 %v2154_v55, %v2153_v2  ;;  %v2190_v0 = vrot.slane %v2189_v60, 4 }
 0x1c7   : > { %v2148_v61 = vrot.slane %v2147_v57, 2  ;;  %v2184_v62 = vadd.f32 %v2183_v58, %v2182_v54 }
 0x1c8   : > { %v2156_v1 = vrot.slane %v2155_v50, 2  ;;  %v2191_v4 = vadd.f32 %v2190_v0, %v2189_v60 }
 0x1c9   : > { %v2149_v3 = vadd.f32 %v2148_v61, %v2147_v57  ;;  %v2185_v49 = vrot.slane %v2184_v62, 2 }
 0x1ca   : > { %v2157_v6 = vadd.f32 %v2156_v1, %v2155_v50  ;;  %v2192_v9 = vrot.slane %v2191_v4, 2 }
 0x1cb   : > { %v2150_v7 = vrot.slane %v2149_v3, 1  ;;  %v2186_v8 = vadd.f32 %v2185_v49, %v2184_v62 }
 0x1cc   : > { %v2158_v11 = vrot.slane %v2157_v6, 1  ;;  %v2193_v12 = vadd.f32 %v2192_v9, %v2191_v4 }
 0x1cd   : > { %v2187_v10 = vrot.slane %v2186_v8, 1  ;;  %v2151_v15 = vadd.f32 %v2150_v7, %v2149_v3 }
 0x1ce   : > { %v2194_v17 = vrot.slane %v2193_v12, 1  ;;  %v2159_v19 = vadd.f32 %v2158_v11, %v2157_v6 }
 0x1cf   : > { %v2188_v16 = vadd.f32 %v2187_v10, %v2186_v8 }
 0x1d0   : > { %v2195_v20 = vadd.f32 %v2194_v17, %v2193_v12 }
 0x1d1   : > { %v2203_v18 = vsel %vm2200_vm10, %v2151_v15, %v2188_v16 }
 0x1d2   : > { %v2204_v23 = vsel %vm2200_vm10, %v2159_v19, %v2195_v20 }
 0x1d3   : > { %v2210_v24 = vcombine.low %v2203_v18, %v2204_v23 }
 0x1d5   : > { %v2224_v26 = vrot.slane %v2210_v24, %v2216_v22 }
 0x1d7   : > { %v2225_v27 = vcombine.low %v2217_v25, %v2224_v26 }
 0x1d9   : > { %2234 = vst.msk [vmem:[%s210_s22] sm:$0xff] %vm2233_vm4, %v2225_v27 }
 0x1da PF: > { %s15_s15 = sadd.s32 1, %s3061_s15  }
 0x1db   : > { %p12_p4 = scmp.ge.s32.totalorder %s15_s15, 4  }
 0x1dd   :  { %14 = sbr.rel (!%p12_p4) target bundleno = 1 (0x1), region = 76 }

// kernel: cnn_forward.8
= control target key start
LH: loop header
LB: loop body
LE: loop exit
PB: predicated region body
PF: predicated region fallthrough
CT: control target
= control target key end

     0   :  { %s5082_s15 = smov 0   ;;  %s6338_s0 = inlined_call_operand.vmem [shape: bf16[2,18,288], index: 0, kind: input, shape index: {}]   ;;  %s6339_s1 = inlined_call_operand.vmem [shape: bf16[5,288,448], index: 1, kind: input, shape index: {}]   ;;  %s6340_s2 = inlined_call_operand.vmem [shape: f32[1,448], index: 2, kind: input, shape index: {}]   ;;  %s6341_s3 = inlined_call_operand.vmem [shape: bf16[2,14,448], index: 3, kind: output, shape index: {0}]   ;;  %s6342_s4 = inlined_call_operand.vmem [shape: f32[2,2,448], index: 4, kind: output, shape index: {1}]  }
   0x1 LB: > { %s3706_s16 = sadd.s32 4294967295, %s5053_s15   ;;  %p3710_p0 = scmp.ge.s32.totalorder %s5053_s15, 1  ;;  %s5053_s15 = sphi %s5082_s15, %s15_s15  }
   0x2   : > { %p165_p1 = scmp.lt.s32.totalorder %s5053_s15, 3 }
   0x4   : > { %p166_p2 = pnand %p3710_p0, %p165_p1 }
   0x5   : > { %v4487_v0 = vld [vmem:[%s6339_s1 + $0x244] ss:$16 sps:$4 sm:$0xff] (!%p166_p2)   ;;  %v4489_v1 = vld [vmem:[%s6339_s1 + $0x24c] ss:$16 sps:$4 sm:$0xff] (!%p166_p2)   ;;  %v4491_v2 = vld [vmem:[%s6339_s1 + $0x240] ss:$16 sps:$4 sm:$0xff] (!%p166_p2)  }
   0x6   : > { %169 = sbr.rel (%p166_p2) target bundleno = 635 (0x27b), region = 32  ;;  %764 = vmatprep.subr.bf16.mxu0 (!%p166_p2), %v4487_v0  ;;  %v4492_v3 = vld [vmem:[%s6339_s1 + $0x248] ss:$16 sps:$4 sm:$0xff] (!%p166_p2)   ;;  %850 = vmatprep.subr.bf16.mxu1 (!%p166_p2), %v4489_v1  ;;  %v4493_v4 = vld [vmem:[%s6339_s1 + $0x264] ss:$16 sps:$4 sm:$0xff] (!%p166_p2)   ;;  %p196_p3 = scmp.lt.s32.totalorder (!%p166_p2), %s3706_s16, 1 }
   0x7   : > { %765 = vmatpush1.bf16.msra.mxu0 (!%p166_p2), %v4491_v2  ;;  %851 = vmatpush1.bf16.msra.mxu1 (!%p166_p2), %v4492_v3  ;;  %v4495_v5 = vld [vmem:[%s6339_s1 + $0x26c] ss:$16 sps:$4 sm:$0xff] (!%p166_p2)   ;;  %v4497_v6 = vld [vmem:[%s6339_s1 + $0x260] ss:$16 sps:$4 sm:$0xff] (!%p166_p2)   ;;  %v4498_v7 = vld [vmem:[%s6339_s1 + $0x268] ss:$16 sps:$4 sm:$0xff] (!%p166_p2)  }
   0x8   : > { %766 = vmatprep.subr.bf16.mxu0 (!%p166_p2), %v4493_v4  ;;  %852 = vmatprep.subr.bf16.mxu1 (!%p166_p2), %v4495_v5  ;;  %v4499_v8 = vld [vmem:[%s6339_s1 + $0x284] ss:$16 sps:$4 sm:$0xff] (!%p166_p2)   ;;  %v4501_v9 = vld [vmem:[%s6339_s1 + $0x28c] ss:$16 sps:$4 sm:$0xff] (!%p166_p2)   ;;  %v4503_v10 = vld [vmem:[%s6339_s1 + $0x280] ss:$16 sps:$4 sm:$0xff] (!%p166_p2)  }
   0x9   : > { %v4504_v11 = vld [vmem:[%s6339_s1 + $0x288] ss:$16 sps:$4 sm:$0xff] (!%p166_p2)   ;;  %v4505_v12 = vld [vmem:[%s6339_s1 + $0x2a4] ss:$16 sps:$4 sm:$0xff] (!%p166_p2)   ;;  %v4507_v13 = vld [vmem:[%s6339_s1 + $0x2ac] ss:$16 sps:$4 sm:$0xff] (!%p166_p2)  }
   0xa   : > { %v4509_v14 = vld [vmem:[%s6339_s1 + $0x2a0] ss:$16 sps:$4 sm:$0xff] (!%p166_p2)   ;;  %v4510_v15 = vld [vmem:[%s6339_s1 + $0x2a8] ss:$16 sps:$4 sm:$0xff] (!%p166_p2)   ;;  %v4511_v16 = vld [vmem:[%s6339_s1 + $0x2c4] ss:$16 sps:$4 sm:$0xff] (!%p166_p2)  }
   0xb   : > { %767 = vmatpush1.bf16.msra.mxu0 (!%p166_p2), %v4497_v6  ;;  %853 = vmatpush1.bf16.msra.mxu1 (!%p166_p2), %v4498_v7  ;;  %v4513_v17 = vld [vmem:[%s6339_s1 + $0x2cc] ss:$16 sps:$4 sm:$0xff] (!%p166_p2)   ;;  %v4515_v18 = vld [vmem:[%s6339_s1 + $0x2c0] ss:$16 sps:$4 sm:$0xff] (!%p166_p2)   ;;  %v4516_v19 = vld [vmem:[%s6339_s1 + $0x2c8] ss:$16 sps:$4 sm:$0xff] (!%p166_p2)  }
   0xc   : > { %768 = vmatprep.subr.bf16.mxu0 (!%p166_p2), %v4499_v8  ;;  %854 = vmatprep.subr.bf16.mxu1 (!%p166_p2), %v4501_v9  ;;  %v4517_v20 = vld [vmem:[%s6339_s1 + $0x2e4] ss:$16 sps:$4 sm:$0xff] (!%p166_p2)   ;;  %v4519_v21 = vld [vmem:[%s6339_s1 + $0x2ec] ss:$16 sps:$4 sm:$0xff] (!%p166_p2)   ;;  %v4521_v22 = vld [vmem:[%s6339_s1 + $0x2e0] ss:$16 sps:$4 sm:$0xff] (!%p166_p2)  }
   0xd   : > { %v4522_v23 = vld [vmem:[%s6339_s1 + $0x2e8] ss:$16 sps:$4 sm:$0xff]   ;;  %v4523_v24 = vld [vmem:[%s6339_s1 + $0x304] ss:$16 sps:$4 sm:$0xff]   ;;  %v4525_v25 = vld [vmem:[%s6339_s1 + $0x30c] ss:$16 sps:$4 sm:$0xff]  }
   0xe   : > { %v4527_v26 = vld [vmem:[%s6339_s1 + $0x300] ss:$16 sps:$4 sm:$0xff]   ;;  %v4528_v27 = vld [vmem:[%s6339_s1 + $0x308] ss:$16 sps:$4 sm:$0xff]   ;;  %v4529_v28 = vld [vmem:[%s6339_s1 + $0x324] ss:$16 sps:$4 sm:$0xff]  }
   0xf   : > { %769 = vmatpush1.bf16.msra.mxu0 %v4503_v10  ;;  %855 = vmatpush1.bf16.msra.mxu1 %v4504_v11  ;;  %v4531_v29 = vld [vmem:[%s6339_s1 + $0x32c] ss:$16 sps:$4 sm:$0xff]   ;;  %v4533_v30 = vld [vmem:[%s6339_s1 + $0x320] ss:$16 sps:$4 sm:$0xff]   ;;  %v4534_v31 = vld [vmem:[%s6339_s1 + $0x328] ss:$16 sps:$4 sm:$0xff]  }
  0x10   : > { %770 = vmatprep.subr.bf16.mxu0 %v4505_v12  ;;  %856 = vmatprep.subr.bf16.mxu1 %v4507_v13  ;;  %v4535_v32 = vld [vmem:[%s6339_s1 + $0x344] ss:$16 sps:$4 sm:$0xff]   ;;  %v4537_v33 = vld [vmem:[%s6339_s1 + $0x34c] ss:$16 sps:$4 sm:$0xff]   ;;  %v4539_v34 = vld [vmem:[%s6339_s1 + $0x340] ss:$16 sps:$4 sm:$0xff]  }
  0x11   : > { %v4540_v35 = vld [vmem:[%s6339_s1 + $0x348] ss:$16 sps:$4 sm:$0xff]   ;;  %s6344_s16 = smov (!%p196_p3, %s3706_s16), 1  ;;  %v4541_v36 = vld [vmem:[%s6339_s1 + $0x364] ss:$16 sps:$4 sm:$0xff]   ;;  %vm760_vm0 = vcmask 261120  }
  0x12   : > { %v4543_v37 = vld [vmem:[%s6339_s1 + $0x36c] ss:$16 sps:$4 sm:$0xff]   ;;  %v4545_v38 = vld [vmem:[%s6339_s1 + $0x360] ss:$16 sps:$4 sm:$0xff]   ;;  %s4476_s23 = smul.u32 36, %s6344_s16  ;;  %vm2880_vm2 = vcmask 1045504  }
  0x13   : > { %771 = vmatpush1.bf16.msra.mxu0 %v4509_v14  ;;  %857 = vmatpush1.bf16.msra.mxu1 %v4510_v15  ;;  %v4546_v39 = vld [vmem:[%s6339_s1 + $0x368] ss:$16 sps:$4 sm:$0xff]   ;;  %v4547_v40 = vld [vmem:[%s6339_s1 + $0x384] ss:$16 sps:$4 sm:$0xff]   ;;  %v4549_v41 = vld [vmem:[%s6339_s1 + $0x38c] ss:$16 sps:$4 sm:$0xff]  }
  0x14   : > { %772 = vmatprep.subr.bf16.mxu0 %v4511_v16  ;;  %858 = vmatprep.subr.bf16.mxu1 %v4513_v17  ;;  %v4551_v42 = vld [vmem:[%s6339_s1 + $0x380] ss:$16 sps:$4 sm:$0xff]   ;;  %v4552_v43 = vld [vmem:[%s6339_s1 + $0x388] ss:$16 sps:$4 sm:$0xff]   ;;  %s5232_s10 = scalar_lea.vmem %s6338_s0, %s4476_s23  ;;  %v4553_v44 = vld [vmem:[%s6339_s1 + $0x3a4] ss:$16 sps:$4 sm:$0xff]  }
  0x15   : > { %v4555_v45 = vld [vmem:[%s6339_s1 + $0x3ac] ss:$16 sps:$4 sm:$0xff]   ;;  %v5241_v46 = vld [vmem:[%s5232_s10] sm:$0xff]  ;;  %v4558_v49 = vld [vmem:[%s6339_s1 + $0x3a8] ss:$16 sps:$4 sm:$0xff]   ;;  %s4398_s19 = sshll.u32 %s6344_s16, 5 }
  0x16   : > { %v5244_v47 = vld [vmem:[%s5232_s10 + $0xc] sm:$0xff]  ;;  %v4559_v51 = vld [vmem:[%s6339_s1 + $0x3c4] ss:$16 sps:$4 sm:$0xff]   ;;  %v4564_v56 = vld [vmem:[%s6339_s1 + $0x3c8] ss:$16 sps:$4 sm:$0xff]   ;;  %vm3489_vm3 = vcmask 1043456   ;;  %s6306_s22 = scalar_lea.vmem %s6341_s3, %s4398_s19 }
  0x17   : > { %773 = vmatpush1.bf16.msra.mxu0 %v4515_v18  ;;  %859 = vmatpush1.bf16.msra.mxu1 %v4516_v19  ;;  %v4557_v48 = vld [vmem:[%s6339_s1 + $0x3a0] ss:$16 sps:$4 sm:$0xff]   ;;  %v3789_v50 = vcombine.high %v5241_v46, %v5244_v47  ;;  %v4561_v52 = vld [vmem:[%s6339_s1 + $0x3cc] ss:$16 sps:$4 sm:$0xff]   ;;  %v4565_v58 = vld [vmem:[%s6339_s1 + $0x3e4] ss:$16 sps:$4 sm:$0xff]   ;;  %v3788_v62 = vcombine.low %v5241_v46, %v5244_v47 }
  0x18   : > { %774 = vmatprep.subr.bf16.mxu0 %v4517_v20  ;;  %860 = vmatprep.subr.bf16.mxu1 %v4519_v21  ;;  %v4563_v55 = vld [vmem:[%s6339_s1 + $0x3c0] ss:$16 sps:$4 sm:$0xff]   ;;  %v4567_v59 = vld [vmem:[%s6339_s1 + $0x3ec] ss:$16 sps:$4 sm:$0xff]   ;;  %v4570_v63 = vld [vmem:[%s6339_s1 + $0x3e8] ss:$16 sps:$4 sm:$0xff]  }
  0x19   : > { %v385_v53 = vshrl.u32 %v3789_v50, 16  ;;  %v387_v54 = vshll.u32 %v3789_v50, 16  ;;  %v4569_v61 = vld [vmem:[%s6339_s1 + $0x3e0] ss:$16 sps:$4 sm:$0xff]   ;;  %v4571_v0 = vld [vmem:[%s6339_s1 + $0x404] ss:$16 sps:$4 sm:$0xff]  }
  0x1a   : > { %v4573_v1 = vld [vmem:[%s6339_s1 + $0x40c] ss:$16 sps:$4 sm:$0xff]   ;;  %v4575_v2 = vld [vmem:[%s6339_s1 + $0x400] ss:$16 sps:$4 sm:$0xff]   ;;  %v380_v3 = vshll.u32 %v3788_v62, 16  ;;  %v378_v9 = vshrl.u32 %v3788_v62, 16 }
  0x1b   : > { %775 = vmatpush1.bf16.msra.mxu0 %v4521_v22  ;;  %861 = vmatpush1.bf16.msra.mxu1 %v4522_v23  ;;  %v389_v57 = vrot.slane %v387_v54, 1  ;;  %v4576_v4 = vld [vmem:[%s6339_s1 + $0x408] ss:$16 sps:$4 sm:$0xff]   ;;  %v4577_v5 = vld [vmem:[%s6339_s1 + $0x424] ss:$16 sps:$4 sm:$0xff]   ;;  %vm3490_vm4 = vcmask 523268  }
  0x1c   : > { %776 = vmatprep.subr.bf16.mxu0 %v4523_v24  ;;  %862 = vmatprep.subr.bf16.mxu1 %v4525_v25  ;;  %v4579_v6 = vld [vmem:[%s6339_s1 + $0x42c] ss:$16 sps:$4 sm:$0xff]   ;;  %v4581_v7 = vld [vmem:[%s6339_s1 + $0x420] ss:$16 sps:$4 sm:$0xff]   ;;  %v4582_v8 = vld [vmem:[%s6339_s1 + $0x428] ss:$16 sps:$4 sm:$0xff]  }
  0x1d   : > { %v390_v60 = vor.u32 %v389_v57, %v385_v53  ;;  %v382_v10 = vrot.slane %v380_v3, 1  ;;  %v5305_v11 = vld [vmem:[%s5232_s10 + $0x8] sm:$0xf]  ;;  %v290_v12 = vld [vmem:[%s5232_s10 + $0x14] sm:$0xf]  ;;  %vm3523_vm5 = vcmask 523264   ;;  %vm3491_vm9 = vmor %vm3490_vm4, %vm3489_vm3 }
  0x1e   : > { %v4587_v13 = vld [vmem:[%s6339_s1 + $0x444] ss:$16 sps:$4 sm:$0xff]   ;;  %v4590_v14 = vld [vmem:[%s6339_s1 + $0x44c] ss:$16 sps:$4 sm:$0xff]   ;;  %v4585_v16 = vld [vmem:[%s6339_s1 + $0x440] ss:$16 sps:$4 sm:$0xff]   ;;  %v3790_v17 = vcombine.low %v5305_v11, %v290_v12 }
  0x1f   : > { %777 = vmatpush1.bf16.msra.mxu0 %v4527_v26  ;;  %863 = vmatpush1.bf16.msra.mxu1 %v4528_v27  ;;  %v383_v15 = vor.u32 %v382_v10, %v378_v9  ;;  %v4588_v18 = vld [vmem:[%s6339_s1 + $0x448] ss:$16 sps:$4 sm:$0xff]   ;;  %v4593_v19 = vld [vmem:[%s6339_s1 + $0x464] ss:$16 sps:$4 sm:$0xff]   ;;  %v4596_v20 = vld [vmem:[%s6339_s1 + $0x46c] ss:$16 sps:$4 sm:$0xff]  }
  0x20   : > { %778 = vmatprep.subr.bf16.mxu0 %v4529_v28  ;;  %864 = vmatprep.subr.bf16.mxu1 %v4531_v29  ;;  %v4591_v21 = vld [vmem:[%s6339_s1 + $0x460] ss:$16 sps:$4 sm:$0xff]   ;;  %v394_v22 = vshll.u32 %v3790_v17, 16  ;;  %v4594_v23 = vld [vmem:[%s6339_s1 + $0x468] ss:$16 sps:$4 sm:$0xff]   ;;  %v5055_v26 = vmov 0  }
  0x21   : > { %796 = vmatprep.mubr.bf16.mxu0 %v390_v60  ;;  %882 = vmatprep.mubr.bf16.mxu1 %v390_v60  ;;  %v4599_v24 = vld [vmem:[%s6339_s1 + $0x4] ss:$16 sps:$4 sm:$0xff]   ;;  %v4602_v25 = vld [vmem:[%s6339_s1 + $0xc] ss:$16 sps:$4 sm:$0xff]   ;;  %v392_v27 = vshrl.u32 %v3790_v17, 16  ;;  %vm3525_vm6 = vcmask 521216  }
  0x22   : > { %v396_v28 = vrot.slane %v394_v22, 1  ;;  %v4597_v29 = vld [vmem:[%s6339_s1] ss:$16 sps:$4 sm:$0xff]   ;;  %v4639_v57 = vld [vmem:[%s6339_s1 + $0xcc] ss:$16 sps:$4 sm:$0xff]   ;;  %vm3494_vm7 = vcmask 1042432  }
  0x23   : > { %779 = vmatpush1.bf16.msra.mxu0 %v4533_v30  ;;  %865 = vmatpush1.bf16.msra.mxu1 %v4534_v31  ;;  %v4600_v31 = vld [vmem:[%s6339_s1 + $0x8] ss:$16 sps:$4 sm:$0xff]   ;;  %v5398_v50 = vld [vmem:[%s5232_s10 + $0xc] sm:$0x77]  ;;  %v4642_v60 = vld [vmem:[%s6339_s1 + $0xe4] ss:$16 sps:$4 sm:$0xff]  }
  0x24   : > { %780 = vmatprep.subr.bf16.mxu0 %v4535_v32  ;;  %866 = vmatprep.subr.bf16.mxu1 %v4537_v33  ;;  %v397_v30 = vor.u32 %v396_v28, %v392_v27  ;;  %v4606_v32 = vld [vmem:[%s6339_s1 + $0x24] ss:$16 sps:$4 sm:$0xff]   ;;  %v4609_v33 = vld [vmem:[%s6339_s1 + $0x2c] ss:$16 sps:$4 sm:$0xff]   ;;  %v3866_v53 = vcombine.high %v5241_v46, %v5398_v50  ;;  %v4628_v54 = vld [vmem:[%s6339_s1 + $0xa0] ss:$16 sps:$4 sm:$0xff]  }
  0x25   : > { %v4640_v62 = vld [vmem:[%s6339_s1 + $0xe0] ss:$16 sps:$4 sm:$0xff]   ;;  %v4649_v3 = vld [vmem:[%s6339_s1 + $0x108] ss:$16 sps:$4 sm:$0xff]   ;;  %v4663_v9 = vld [vmem:[%s6339_s1 + $0x14c] ss:$16 sps:$4 sm:$0xff]  }
  0x26   : > { %v4658_v10 = vld [vmem:[%s6339_s1 + $0x140] ss:$16 sps:$4 sm:$0xff]   ;;  %v4661_v12 = vld [vmem:[%s6339_s1 + $0x148] ss:$16 sps:$4 sm:$0xff]   ;;  %v4672_v17 = vld [vmem:[%s6339_s1 + $0x184] ss:$16 sps:$4 sm:$0xff]  }
  0x27   : > { %781 = vmatpush1.bf16.msra.mxu0 %v4539_v34  ;;  %867 = vmatpush1.bf16.msra.mxu1 %v4540_v35  ;;  %v4604_v34 = vld [vmem:[%s6339_s1 + $0x20] ss:$16 sps:$4 sm:$0xff]   ;;  %v4607_v35 = vld [vmem:[%s6339_s1 + $0x28] ss:$16 sps:$4 sm:$0xff]   ;;  %v4681_v22 = vld [vmem:[%s6339_s1 + $0x1ac] ss:$16 sps:$4 sm:$0xff]  }
  0x28   : > { %782 = vmatprep.subr.bf16.mxu0 %v4541_v36  ;;  %868 = vmatprep.subr.bf16.mxu1 %v4543_v37  ;;  %v4612_v36 = vld [vmem:[%s6339_s1 + $0x44] ss:$16 sps:$4 sm:$0xff]   ;;  %v4615_v37 = vld [vmem:[%s6339_s1 + $0x4c] ss:$16 sps:$4 sm:$0xff]   ;;  %v4682_v28 = vld [vmem:[%s6339_s1 + $0x1c0] ss:$16 sps:$4 sm:$0xff]  }
  0x29   : > { %v4687_v27 = vld [vmem:[%s6339_s1 + $0x1cc] ss:$16 sps:$4 sm:$0xff]   ;;  %vm2212_vm1 = vsmask.f32 6400  ;;  %vm3495_vm8 = vcmask 522244   ;;  %vm3583_vm11 = vcmask 1040384  }
  0x2a   : > { %vm3496_vm10 = vmor %vm3495_vm8, %vm3494_vm7  ;;  %vm3610_vm12 = vcmask 1041408   ;;  %vm3611_vm13 = vcmask 1043458   ;;  %vm3613_vm15 = vcmask 1045508   ;;  %s4399_s23 = sshll.u32 %s6344_s16, 3 }
  0x2b   : > { %783 = vmatpush1.bf16.msra.mxu0 %v4545_v38  ;;  %869 = vmatpush1.bf16.msra.mxu1 %v4546_v39  ;;  %v4610_v38 = vld [vmem:[%s6339_s1 + $0x40] ss:$16 sps:$4 sm:$0xff]   ;;  %v4613_v39 = vld [vmem:[%s6339_s1 + $0x48] ss:$16 sps:$4 sm:$0xff]   ;;  %vm3612_vm14 = vmor %vm3611_vm13, %vm3610_vm12  ;;  %s210_s26 = scalar_lea.vmem %s6342_s4, %s4399_s23 }
  0x2c   : > { %784 = vmatprep.subr.bf16.mxu0 %v4547_v40  ;;  %870 = vmatprep.subr.bf16.mxu1 %v4549_v41  ;;  %v4618_v40 = vld [vmem:[%s6339_s1 + $0x64] ss:$16 sps:$4 sm:$0xff]   ;;  %v4621_v41 = vld [vmem:[%s6339_s1 + $0x6c] ss:$16 sps:$4 sm:$0xff]  }
  0x2f   : > { %785 = vmatpush1.bf16.msra.mxu0 %v4551_v42  ;;  %871 = vmatpush1.bf16.msra.mxu1 %v4552_v43  ;;  %v4616_v42 = vld [vmem:[%s6339_s1 + $0x60] ss:$16 sps:$4 sm:$0xff]   ;;  %v4619_v43 = vld [vmem:[%s6339_s1 + $0x68] ss:$16 sps:$4 sm:$0xff]  }
  0x30   : > { %786 = vmatprep.subr.bf16.mxu0 %v4553_v44  ;;  %872 = vmatprep.subr.bf16.mxu1 %v4555_v45  ;;  %v4624_v44 = vld [vmem:[%s6339_s1 + $0x84] ss:$16 sps:$4 sm:$0xff]   ;;  %v4627_v45 = vld [vmem:[%s6339_s1 + $0x8c] ss:$16 sps:$4 sm:$0xff]  }
  0x33   : > { %787 = vmatpush1.bf16.msra.mxu0 %v4557_v48  ;;  %873 = vmatpush1.bf16.msra.mxu1 %v4558_v49  ;;  %v4622_v48 = vld [vmem:[%s6339_s1 + $0x80] ss:$16 sps:$4 sm:$0xff]   ;;  %v4625_v49 = vld [vmem:[%s6339_s1 + $0x88] ss:$16 sps:$4 sm:$0xff]  }
  0x34   : > { %788 = vmatprep.subr.bf16.mxu0 %v4559_v51  ;;  %874 = vmatprep.subr.bf16.mxu1 %v4561_v52  ;;  %v4630_v51 = vld [vmem:[%s6339_s1 + $0xa4] ss:$16 sps:$4 sm:$0xff]   ;;  %v4633_v52 = vld [vmem:[%s6339_s1 + $0xac] ss:$16 sps:$4 sm:$0xff]  }
  0x37   : > { %789 = vmatpush1.bf16.msra.mxu0 %v4563_v55  ;;  %875 = vmatpush1.bf16.msra.mxu1 %v4564_v56  ;;  %v4631_v55 = vld [vmem:[%s6339_s1 + $0xa8] ss:$16 sps:$4 sm:$0xff]   ;;  %v4636_v56 = vld [vmem:[%s6339_s1 + $0xc4] ss:$16 sps:$4 sm:$0xff]  }
  0x38   : > { %790 = vmatprep.subr.bf16.mxu0 %v4565_v58  ;;  %876 = vmatprep.subr.bf16.mxu1 %v4567_v59  ;;  %v4634_v58 = vld [vmem:[%s6339_s1 + $0xc0] ss:$16 sps:$4 sm:$0xff]   ;;  %v4637_v59 = vld [vmem:[%s6339_s1 + $0xc8] ss:$16 sps:$4 sm:$0xff]  }
  0x3b   : > { %791 = vmatpush1.bf16.msra.mxu0 %v4569_v61  ;;  %877 = vmatpush1.bf16.msra.mxu1 %v4570_v63  ;;  %v4645_v61 = vld [vmem:[%s6339_s1 + $0xec] ss:$16 sps:$4 sm:$0xff]   ;;  %v4643_v63 = vld [vmem:[%s6339_s1 + $0xe8] ss:$16 sps:$4 sm:$0xff]  }
  0x3c   : > { %792 = vmatprep.subr.bf16.mxu0 %v4571_v0  ;;  %878 = vmatprep.subr.bf16.mxu1 %v4573_v1  ;;  %v4648_v0 = vld [vmem:[%s6339_s1 + $0x104] ss:$16 sps:$4 sm:$0xff]   ;;  %v4651_v1 = vld [vmem:[%s6339_s1 + $0x10c] ss:$16 sps:$4 sm:$0xff]  }
  0x3f   : > { %793 = vmatpush1.bf16.msra.mxu0 %v4575_v2  ;;  %879 = vmatpush1.bf16.msra.mxu1 %v4576_v4  ;;  %v4646_v2 = vld [vmem:[%s6339_s1 + $0x100] ss:$16 sps:$4 sm:$0xff]   ;;  %v4654_v4 = vld [vmem:[%s6339_s1 + $0x124] ss:$16 sps:$4 sm:$0xff]  }
  0x40   : > { %794 = vmatprep.subr.bf16.mxu0 %v4577_v5  ;;  %880 = vmatprep.subr.bf16.mxu1 %v4579_v6  ;;  %v4657_v5 = vld [vmem:[%s6339_s1 + $0x12c] ss:$16 sps:$4 sm:$0xff]   ;;  %v4652_v6 = vld [vmem:[%s6339_s1 + $0x120] ss:$16 sps:$4 sm:$0xff]  }
  0x43   : > { %795 = vmatpush1.bf16.msra.mxu0 %v4581_v7  ;;  %881 = vmatpush1.bf16.msra.mxu1 %v4582_v8  ;;  %v4655_v7 = vld [vmem:[%s6339_s1 + $0x128] ss:$16 sps:$4 sm:$0xff]   ;;  %v4660_v8 = vld [vmem:[%s6339_s1 + $0x144] ss:$16 sps:$4 sm:$0xff]  }
  0x44   : > { %807 = vmatprep.subr.bf16.mxu0 %v4587_v13  ;;  %893 = vmatprep.subr.bf16.mxu1 %v4590_v14  ;;  %v4666_v13 = vld [vmem:[%s6339_s1 + $0x164] ss:$16 sps:$4 sm:$0xff]   ;;  %v4669_v14 = vld [vmem:[%s6339_s1 + $0x16c] ss:$16 sps:$4 sm:$0xff]  }
  0x46   : > { %797 = vmatmul.mubr.bf16.vlgmr.msra.gmra.mrb[0].mxu0 %v383_v15  ;;  %883 = vmatmul.mubr.bf16.vlgmr.msra.gmra.mrb[0].mxu1 %v383_v15  ;;  %v4664_v15 = vld [vmem:[%s6339_s1 + $0x160] ss:$16 sps:$4 sm:$0xff]  }
  0x47   : > { %808 = vmatpush1.bf16.msra.mxu0 %v4585_v16  ;;  %894 = vmatpush1.bf16.msra.mxu1 %v4588_v18  ;;  %v4667_v16 = vld [vmem:[%s6339_s1 + $0x168] ss:$16 sps:$4 sm:$0xff]   ;;  %v4675_v18 = vld [vmem:[%s6339_s1 + $0x18c] ss:$16 sps:$4 sm:$0xff]  }
  0x48   : > { %809 = vmatprep.subr.bf16.mxu0 %v4593_v19  ;;  %895 = vmatprep.subr.bf16.mxu1 %v4596_v20  ;;  %v4670_v19 = vld [vmem:[%s6339_s1 + $0x180] ss:$16 sps:$4 sm:$0xff]   ;;  %v4673_v20 = vld [vmem:[%s6339_s1 + $0x188] ss:$16 sps:$4 sm:$0xff]  }
  0x49   : > { %839 = vmatprep.mubr.bf16.mxu0 %v5055_v26  ;;  %925 = vmatprep.mubr.bf16.mxu1 %v5055_v26 }
  0x4b   : > { %810 = vmatpush1.bf16.msra.mxu0 %v4591_v21  ;;  %896 = vmatpush1.bf16.msra.mxu1 %v4594_v23  ;;  %v4678_v21 = vld [vmem:[%s6339_s1 + $0x1a4] ss:$16 sps:$4 sm:$0xff]   ;;  %v4676_v23 = vld [vmem:[%s6339_s1 + $0x1a0] ss:$16 sps:$4 sm:$0xff]  }
  0x4c   : > { %1309 = vmatprep.subr.bf16.mxu0 %v4599_v24  ;;  %1395 = vmatprep.subr.bf16.mxu1 %v4602_v25  ;;  %v4679_v24 = vld [vmem:[%s6339_s1 + $0x1a8] ss:$16 sps:$4 sm:$0xff]   ;;  %v4684_v25 = vld [vmem:[%s6339_s1 + $0x1c4] ss:$16 sps:$4 sm:$0xff]  }
  0x52   : > { %3863 = vmatmul.mubr.msk.bf16.vlgmr.msra.gmra.mrb[0].mxu0 %vm760_vm0, %v397_v30  ;;  %3864 = vmatmul.mubr.msk.bf16.vlgmr.msra.gmra.mrb[0].mxu1 %vm760_vm0, %v397_v30  ;;  %v4690_v30 = vld [vmem:[%s6339_s1 + $0x1e4] ss:$16 sps:$4 sm:$0xff]  }
  0x53   : > { %1310 = vmatpush1.bf16.msra.mxu0 %v4597_v29  ;;  %1396 = vmatpush1.bf16.msra.mxu1 %v4600_v31  ;;  %v4685_v29 = vld [vmem:[%s6339_s1 + $0x1c8] ss:$16 sps:$4 sm:$0xff]   ;;  %v4693_v31 = vld [vmem:[%s6339_s1 + $0x1ec] ss:$16 sps:$4 sm:$0xff]  }
  0x54   : > { %1311 = vmatprep.subr.bf16.mxu0 %v4606_v32  ;;  %1397 = vmatprep.subr.bf16.mxu1 %v4609_v33  ;;  %v4688_v32 = vld [vmem:[%s6339_s1 + $0x1e0] ss:$16 sps:$4 sm:$0xff]   ;;  %v4691_v33 = vld [vmem:[%s6339_s1 + $0x1e8] ss:$16 sps:$4 sm:$0xff]  }
  0x55   : > { %1341 = vmatprep.mubr.bf16.mxu0 %v3866_v53  ;;  %1427 = vmatprep.mubr.bf16.mxu1 %v3866_v53  ;;  %v4720_v53 = vld [vmem:[%s6339_s1 + $0x4ac] ss:$16 sps:$4 sm:$0xff]  }
  0x57   : > { %1312 = vmatpush1.bf16.msra.mxu0 %v4604_v34  ;;  %1398 = vmatpush1.bf16.msra.mxu1 %v4607_v35  ;;  %v4698_v34 = vld [vmem:[%s6339_s1 + $0x204] ss:$16 sps:$4 sm:$0xff]   ;;  %v4701_v35 = vld [vmem:[%s6339_s1 + $0x20c] ss:$16 sps:$4 sm:$0xff]  }
  0x58   : > { %1313 = vmatprep.subr.bf16.mxu0 %v4612_v36  ;;  %1399 = vmatprep.subr.bf16.mxu1 %v4615_v37  ;;  %v3865_v36 = vcombine.low %v5241_v46, %v5398_v50  ;;  %v4696_v37 = vld [vmem:[%s6339_s1 + $0x200] ss:$16 sps:$4 sm:$0xff]   ;;  %v4707_v46 = vld [vmem:[%s6339_s1 + $0x22c] ss:$16 sps:$4 sm:$0xff]  }
  0x5b   : > { %1314 = vmatpush1.bf16.msra.mxu0 %v4610_v38  ;;  %1400 = vmatpush1.bf16.msra.mxu1 %v4613_v39  ;;  %v4699_v38 = vld [vmem:[%s6339_s1 + $0x208] ss:$16 sps:$4 sm:$0xff]   ;;  %v4704_v39 = vld [vmem:[%s6339_s1 + $0x224] ss:$16 sps:$4 sm:$0xff]  }
  0x5c   : > { %1315 = vmatprep.subr.bf16.mxu0 %v4618_v40  ;;  %1401 = vmatprep.subr.bf16.mxu1 %v4621_v41  ;;  %v4702_v40 = vld [vmem:[%s6339_s1 + $0x220] ss:$16 sps:$4 sm:$0xff]   ;;  %v4705_v41 = vld [vmem:[%s6339_s1 + $0x228] ss:$16 sps:$4 sm:$0xff]  }
  0x5f   : > { %1316 = vmatpush1.bf16.msra.mxu0 %v4616_v42  ;;  %1402 = vmatpush1.bf16.msra.mxu1 %v4619_v43  ;;  %v4710_v42 = vld [vmem:[%s6339_s1 + $0x484] ss:$16 sps:$4 sm:$0xff]   ;;  %v4713_v43 = vld [vmem:[%s6339_s1 + $0x48c] ss:$16 sps:$4 sm:$0xff]  }
  0x60   : > { %1317 = vmatprep.subr.bf16.mxu0 %v4624_v44  ;;  %1403 = vmatprep.subr.bf16.mxu1 %v4627_v45  ;;  %v5569_v44 = vld [vmem:[%s5232_s10] sm:$0xee]  ;;  %v216_v45 = vld [vmem:[%s5232_s10 + $0x14] sm:$0x7] }
  0x61   : > { %v3867_v50 = vcombine.low %v5305_v11, %v216_v45  ;;  %v4718_v11 = vld [vmem:[%s6339_s1 + $0x4a8] ss:$16 sps:$4 sm:$0xff]   ;;  %v4801_v45 = vld [vmem:[%s6339_s1 + $0x664] ss:$16 sps:$4 sm:$0xff]  }
  0x63   : > { %1318 = vmatpush1.bf16.msra.mxu0 %v4622_v48  ;;  %1404 = vmatpush1.bf16.msra.mxu1 %v4625_v49  ;;  %v4015_v48 = vcombine.high %v5569_v44, %v5244_v47  ;;  %v4708_v49 = vld [vmem:[%s6339_s1 + $0x480] ss:$16 sps:$4 sm:$0xff]  }
  0x64   : > { %1319 = vmatprep.subr.bf16.mxu0 %v4630_v51  ;;  %1405 = vmatprep.subr.bf16.mxu1 %v4633_v52  ;;  %v4711_v51 = vld [vmem:[%s6339_s1 + $0x488] ss:$16 sps:$4 sm:$0xff]   ;;  %v4717_v52 = vld [vmem:[%s6339_s1 + $0x4a4] ss:$16 sps:$4 sm:$0xff]   ;;  %v4715_v47 = vld [vmem:[%s6339_s1 + $0x4a0] ss:$16 sps:$4 sm:$0xff]  }
  0x67   : > { %1320 = vmatpush1.bf16.msra.mxu0 %v4628_v54  ;;  %1406 = vmatpush1.bf16.msra.mxu1 %v4631_v55  ;;  %v1565_v54 = vrot.slane %v4015_v48, 1  ;;  %v4723_v55 = vld [vmem:[%s6339_s1 + $0x4c4] ss:$16 sps:$4 sm:$0xff]   ;;  %v4804_v48 = vld [vmem:[%s6339_s1 + $0x66c] ss:$16 sps:$4 sm:$0xff]  }
  0x68   : > { %1321 = vmatprep.subr.bf16.mxu0 %v4636_v56  ;;  %1407 = vmatprep.subr.bf16.mxu1 %v4639_v57  ;;  %v4726_v56 = vld [vmem:[%s6339_s1 + $0x4cc] ss:$16 sps:$4 sm:$0xff]   ;;  %v4721_v57 = vld [vmem:[%s6339_s1 + $0x4c0] ss:$16 sps:$4 sm:$0xff]  }
  0x6b   : > { %1322 = vmatpush1.bf16.msra.mxu0 %v4634_v58  ;;  %1408 = vmatpush1.bf16.msra.mxu1 %v4637_v59  ;;  %v4724_v58 = vld [vmem:[%s6339_s1 + $0x4c8] ss:$16 sps:$4 sm:$0xff]   ;;  %v4729_v59 = vld [vmem:[%s6339_s1 + $0x4e4] ss:$16 sps:$4 sm:$0xff]  }
  0x6c   : > { %1323 = vmatprep.subr.bf16.mxu0 %v4642_v60  ;;  %1409 = vmatprep.subr.bf16.mxu1 %v4645_v61  ;;  %v4732_v60 = vld [vmem:[%s6339_s1 + $0x4ec] ss:$16 sps:$4 sm:$0xff]   ;;  %v4727_v61 = vld [vmem:[%s6339_s1 + $0x4e0] ss:$16 sps:$4 sm:$0xff]  }
  0x6f   : > { %1324 = vmatpush1.bf16.msra.mxu0 %v4640_v62  ;;  %1410 = vmatpush1.bf16.msra.mxu1 %v4643_v63  ;;  %v4730_v62 = vld [vmem:[%s6339_s1 + $0x4e8] ss:$16 sps:$4 sm:$0xff]   ;;  %v4735_v63 = vld [vmem:[%s6339_s1 + $0x504] ss:$16 sps:$4 sm:$0xff]  }
  0x70   : > { %1325 = vmatprep.subr.bf16.mxu0 %v4648_v0  ;;  %1411 = vmatprep.subr.bf16.mxu1 %v4651_v1  ;;  %v4738_v0 = vld [vmem:[%s6339_s1 + $0x50c] ss:$16 sps:$4 sm:$0xff]   ;;  %v4733_v1 = vld [vmem:[%s6339_s1 + $0x500] ss:$16 sps:$4 sm:$0xff]  }
  0x73   : > { %1326 = vmatpush1.bf16.msra.mxu0 %v4646_v2  ;;  %1412 = vmatpush1.bf16.msra.mxu1 %v4649_v3  ;;  %v4736_v2 = vld [vmem:[%s6339_s1 + $0x508] ss:$16 sps:$4 sm:$0xff]   ;;  %v4741_v3 = vld [vmem:[%s6339_s1 + $0x524] ss:$16 sps:$4 sm:$0xff]  }
  0x74   : > { %1327 = vmatprep.subr.bf16.mxu0 %v4654_v4  ;;  %1413 = vmatprep.subr.bf16.mxu1 %v4657_v5  ;;  %v4744_v4 = vld [vmem:[%s6339_s1 + $0x52c] ss:$16 sps:$4 sm:$0xff]   ;;  %v4739_v5 = vld [vmem:[%s6339_s1 + $0x520] ss:$16 sps:$4 sm:$0xff]  }
  0x77   : > { %1328 = vmatpush1.bf16.msra.mxu0 %v4652_v6  ;;  %1414 = vmatpush1.bf16.msra.mxu1 %v4655_v7  ;;  %v4742_v6 = vld [vmem:[%s6339_s1 + $0x528] ss:$16 sps:$4 sm:$0xff]   ;;  %v4747_v7 = vld [vmem:[%s6339_s1 + $0x544] ss:$16 sps:$4 sm:$0xff]  }
  0x78   : > { %1329 = vmatprep.subr.bf16.mxu0 %v4660_v8  ;;  %1415 = vmatprep.subr.bf16.mxu1 %v4663_v9  ;;  %v4750_v8 = vld [vmem:[%s6339_s1 + $0x54c] ss:$16 sps:$4 sm:$0xff]   ;;  %v4745_v9 = vld [vmem:[%s6339_s1 + $0x540] ss:$16 sps:$4 sm:$0xff]  }
  0x7b   : > { %1330 = vmatpush1.bf16.msra.mxu0 %v4658_v10  ;;  %1416 = vmatpush1.bf16.msra.mxu1 %v4661_v12  ;;  %v4748_v10 = vld [vmem:[%s6339_s1 + $0x548] ss:$16 sps:$4 sm:$0xff]   ;;  %v4753_v12 = vld [vmem:[%s6339_s1 + $0x564] ss:$16 sps:$4 sm:$0xff]  }
  0x7c   : > { %1331 = vmatprep.subr.bf16.mxu0 %v4666_v13  ;;  %1417 = vmatprep.subr.bf16.mxu1 %v4669_v14  ;;  %v4756_v13 = vld [vmem:[%s6339_s1 + $0x56c] ss:$16 sps:$4 sm:$0xff]   ;;  %v4751_v14 = vld [vmem:[%s6339_s1 + $0x560] ss:$16 sps:$4 sm:$0xff]  }
  0x7f   : > { %1332 = vmatpush1.bf16.msra.mxu0 %v4664_v15  ;;  %1418 = vmatpush1.bf16.msra.mxu1 %v4667_v16  ;;  %v4754_v15 = vld [vmem:[%s6339_s1 + $0x568] ss:$16 sps:$4 sm:$0xff]   ;;  %v4759_v16 = vld [vmem:[%s6339_s1 + $0x584] ss:$16 sps:$4 sm:$0xff]  }
  0x80   : > { %1333 = vmatprep.subr.bf16.mxu0 %v4672_v17  ;;  %1419 = vmatprep.subr.bf16.mxu1 %v4675_v18  ;;  %v4762_v17 = vld [vmem:[%s6339_s1 + $0x58c] ss:$16 sps:$4 sm:$0xff]   ;;  %v4757_v18 = vld [vmem:[%s6339_s1 + $0x580] ss:$16 sps:$4 sm:$0xff]  }
  0x83   : > { %1334 = vmatpush1.bf16.msra.mxu0 %v4670_v19  ;;  %1420 = vmatpush1.bf16.msra.mxu1 %v4673_v20  ;;  %v4760_v19 = vld [vmem:[%s6339_s1 + $0x588] ss:$16 sps:$4 sm:$0xff]   ;;  %v4765_v20 = vld [vmem:[%s6339_s1 + $0x5a4] ss:$16 sps:$4 sm:$0xff]  }
  0x84   : > { %1335 = vmatprep.subr.bf16.mxu0 %v4678_v21  ;;  %1421 = vmatprep.subr.bf16.mxu1 %v4681_v22  ;;  %v4768_v21 = vld [vmem:[%s6339_s1 + $0x5ac] ss:$16 sps:$4 sm:$0xff]   ;;  %v4763_v22 = vld [vmem:[%s6339_s1 + $0x5a0] ss:$16 sps:$4 sm:$0xff]  }
  0x87   : > { %1336 = vmatpush1.bf16.msra.mxu0 %v4676_v23  ;;  %1422 = vmatpush1.bf16.msra.mxu1 %v4679_v24  ;;  %v4766_v23 = vld [vmem:[%s6339_s1 + $0x5a8] ss:$16 sps:$4 sm:$0xff]   ;;  %v4771_v24 = vld [vmem:[%s6339_s1 + $0x5c4] ss:$16 sps:$4 sm:$0xff]  }
  0x88   : > { %1337 = vmatprep.subr.bf16.mxu0 %v4684_v25  ;;  %1423 = vmatprep.subr.bf16.mxu1 %v4687_v27  ;;  %v4774_v25 = vld [vmem:[%s6339_s1 + $0x5cc] ss:$16 sps:$4 sm:$0xff]   ;;  %v4769_v27 = vld [vmem:[%s6339_s1 + $0x5c0] ss:$16 sps:$4 sm:$0xff]  }
  0x8b   : > { %1338 = vmatpush1.bf16.msra.mxu0 %v4682_v28  ;;  %1424 = vmatpush1.bf16.msra.mxu1 %v4685_v29  ;;  %v4772_v28 = vld [vmem:[%s6339_s1 + $0x5c8] ss:$16 sps:$4 sm:$0xff]   ;;  %v4777_v29 = vld [vmem:[%s6339_s1 + $0x5e4] ss:$16 sps:$4 sm:$0xff]  }
  0x8c   : > { %1339 = vmatprep.subr.bf16.mxu0 %v4690_v30  ;;  %1425 = vmatprep.subr.bf16.mxu1 %v4693_v31  ;;  %v4780_v30 = vld [vmem:[%s6339_s1 + $0x5ec] ss:$16 sps:$4 sm:$0xff]   ;;  %v4775_v31 = vld [vmem:[%s6339_s1 + $0x5e0] ss:$16 sps:$4 sm:$0xff]  }
  0x8f   : > { %1340 = vmatpush1.bf16.msra.mxu0 %v4688_v32  ;;  %1426 = vmatpush1.bf16.msra.mxu1 %v4691_v33  ;;  %v4778_v32 = vld [vmem:[%s6339_s1 + $0x5e8] ss:$16 sps:$4 sm:$0xff]   ;;  %v4783_v33 = vld [vmem:[%s6339_s1 + $0x604] ss:$16 sps:$4 sm:$0xff]  }
  0x90   : > { %1352 = vmatprep.subr.bf16.mxu0 %v4698_v34  ;;  %1438 = vmatprep.subr.bf16.mxu1 %v4701_v35  ;;  %v4786_v34 = vld [vmem:[%s6339_s1 + $0x60c] ss:$16 sps:$4 sm:$0xff]   ;;  %v4781_v35 = vld [vmem:[%s6339_s1 + $0x600] ss:$16 sps:$4 sm:$0xff]  }
  0x92   : > { %1342 = vmatmul.mubr.bf16.vlgmr.msra.gmra.mrb[0].mxu0 %v3865_v36  ;;  %1428 = vmatmul.mubr.bf16.vlgmr.msra.gmra.mrb[0].mxu1 %v3865_v36  ;;  %v4784_v36 = vld [vmem:[%s6339_s1 + $0x608] ss:$16 sps:$4 sm:$0xff]  }
  0x93   : > { %1353 = vmatpush1.bf16.msra.mxu0 %v4696_v37  ;;  %1439 = vmatpush1.bf16.msra.mxu1 %v4699_v38  ;;  %v4789_v37 = vld [vmem:[%s6339_s1 + $0x624] ss:$16 sps:$4 sm:$0xff]   ;;  %v4792_v38 = vld [vmem:[%s6339_s1 + $0x62c] ss:$16 sps:$4 sm:$0xff]  }
  0x94   : > { %1354 = vmatprep.subr.bf16.mxu0 %v4704_v39  ;;  %1440 = vmatprep.subr.bf16.mxu1 %v4707_v46  ;;  %v4787_v39 = vld [vmem:[%s6339_s1 + $0x620] ss:$16 sps:$4 sm:$0xff]   ;;  %v4790_v46 = vld [vmem:[%s6339_s1 + $0x628] ss:$16 sps:$4 sm:$0xff]  }
  0x95   : > { %1384 = vmatprep.mubr.bf16.mxu0 %v5055_v26  ;;  %1470 = vmatprep.mubr.bf16.mxu1 %v5055_v26 }
  0x97   : > { %1355 = vmatpush1.bf16.msra.mxu0 %v4702_v40  ;;  %1441 = vmatpush1.bf16.msra.mxu1 %v4705_v41  ;;  %v4795_v40 = vld [vmem:[%s6339_s1 + $0x644] ss:$16 sps:$4 sm:$0xff]   ;;  %v4798_v41 = vld [vmem:[%s6339_s1 + $0x64c] ss:$16 sps:$4 sm:$0xff]  }
  0x98   : > { %1932 = vmatprep.subr.bf16.mxu0 %v4710_v42  ;;  %2018 = vmatprep.subr.bf16.mxu1 %v4713_v43  ;;  %v4793_v42 = vld [vmem:[%s6339_s1 + $0x640] ss:$16 sps:$4 sm:$0xff]   ;;  %v4796_v43 = vld [vmem:[%s6339_s1 + $0x648] ss:$16 sps:$4 sm:$0xff]  }
  0x9e   : > { %3940 = vmatmul.mubr.msk.bf16.vlgmr.msra.gmra.mrb[0].mxu0 %vm760_vm0, %v3867_v50  ;;  %3941 = vmatmul.mubr.msk.bf16.vlgmr.msra.gmra.mrb[0].mxu1 %vm760_vm0, %v3867_v50  ;;  %v4802_v50 = vld [vmem:[%s6339_s1 + $0x668] ss:$16 sps:$4 sm:$0xff]  }
  0x9f   : > { %1933 = vmatpush1.bf16.msra.mxu0 %v4708_v49  ;;  %2019 = vmatpush1.bf16.msra.mxu1 %v4711_v51  ;;  %v4799_v49 = vld [vmem:[%s6339_s1 + $0x660] ss:$16 sps:$4 sm:$0xff]  }
  0xa0   : > { %1934 = vmatprep.subr.bf16.mxu0 %v4717_v52  ;;  %2020 = vmatprep.subr.bf16.mxu1 %v4720_v53  ;;  %v5045_v51 = vld [vmem:[%s5232_s10 + $0xc] sm:$0xff]  ;;  %v5766_v53 = vld [vmem:[%s5232_s10] sm:$0xee] }
  0xa1   : > { %1964 = vmatprep.mubr.bf16.mxu0 %v1565_v54  ;;  %2050 = vmatprep.mubr.bf16.mxu1 %v1565_v54  ;;  %v4014_v52 = vcombine.low %v5569_v44, %v5045_v51  ;;  %v5769_v54 = vld [vmem:[%s5232_s10 + $0xc] sm:$0xff]  ;;  %v5903_v51 = vld [vmem:[%s5232_s10 + $0x14] sm:$0xf] }
  0xa2   : > { %v4807_v44 = vld [vmem:[%s6339_s1 + $0x680] ss:$16 sps:$4 sm:$0xff]  }
  0xa3   : > { %1935 = vmatpush1.bf16.msra.mxu0 %v4715_v47  ;;  %2021 = vmatpush1.bf16.msra.mxu1 %v4718_v11  ;;  %v4809_v47 = vld [vmem:[%s6339_s1 + $0x684] ss:$16 sps:$4 sm:$0xff]   ;;  %v4812_v11 = vld [vmem:[%s6339_s1 + $0x68c] ss:$16 sps:$4 sm:$0xff]  }
  0xa4   : > { %1936 = vmatprep.subr.bf16.mxu0 %v4723_v55  ;;  %2022 = vmatprep.subr.bf16.mxu1 %v4726_v56  ;;  %v1564_v55 = vrot.slane %v4014_v52, 1  ;;  %v4164_v56 = vcombine.high %v5766_v53, %v5769_v54  ;;  %v2798_v52 = vld [vmem:[%s5232_s10 + $0x8] sm:$0xc] }
  0xa7   : > { %1937 = vmatpush1.bf16.msra.mxu0 %v4721_v57  ;;  %2023 = vmatpush1.bf16.msra.mxu1 %v4724_v58  ;;  %v4810_v57 = vld [vmem:[%s6339_s1 + $0x688] ss:$16 sps:$4 sm:$0xff]  }
  0xa8   : > { %1938 = vmatprep.subr.bf16.mxu0 %v4729_v59  ;;  %2024 = vmatprep.subr.bf16.mxu1 %v4732_v60  ;;  %v5786_v58 = vld [vmem:[%s5232_s10 + $0x18] sm:$0x11]  ;;  %v4815_v59 = vld [vmem:[%s6339_s1 + $0x6a4] ss:$16 sps:$4 sm:$0xff]  }
  0xa9   : > { %v4818_v60 = vld [vmem:[%s6339_s1 + $0x6ac] ss:$16 sps:$4 sm:$0xff]  }
  0xab   : > { %1939 = vmatpush1.bf16.msra.mxu0 %v4727_v61  ;;  %2025 = vmatpush1.bf16.msra.mxu1 %v4730_v62  ;;  %v4813_v61 = vld [vmem:[%s6339_s1 + $0x6a0] ss:$16 sps:$4 sm:$0xff]   ;;  %v5799_v62 = vcombine.high %v5786_v58, %v5786_v58 }
  0xac   : > { %1940 = vmatprep.subr.bf16.mxu0 %v4735_v63  ;;  %2026 = vmatprep.subr.bf16.mxu1 %v4738_v0  ;;  %v2227_v63 = vshrl.u32 %v4164_v56, 16  ;;  %v2230_v0 = vshll.u32 %v4164_v56, 16 }
  0xaf   : > { %1941 = vmatpush1.bf16.msra.mxu0 %v4733_v1  ;;  %2027 = vmatpush1.bf16.msra.mxu1 %v4736_v2  ;;  %v4816_v1 = vld [vmem:[%s6339_s1 + $0x6a8] ss:$16 sps:$4 sm:$0xff]  }
  0xb0   : > { %1942 = vmatprep.subr.bf16.mxu0 %v4741_v3  ;;  %2028 = vmatprep.subr.bf16.mxu1 %v4744_v4  ;;  %v1482_v2 = vld [vmem:[%s5232_s10 + $0x8] sm:$0xe]  ;;  %v4821_v3 = vld [vmem:[%s6339_s1 + $0x6c4] ss:$16 sps:$4 sm:$0xff]   ;;  %v4824_v4 = vld [vmem:[%s6339_s1 + $0x6cc] ss:$16 sps:$4 sm:$0xff]  }
  0xb3   : > { %1943 = vmatpush1.bf16.msra.mxu0 %v4739_v5  ;;  %2029 = vmatpush1.bf16.msra.mxu1 %v4742_v6  ;;  %v5046_v5 = vld [vmem:[%s5232_s10 + $0x14] sm:$0xf] }
  0xb4   : > { %1944 = vmatprep.subr.bf16.mxu0 %v4747_v7  ;;  %2030 = vmatprep.subr.bf16.mxu1 %v4750_v8  ;;  %v4016_v6 = vcombine.low %v1482_v2, %v5046_v5  ;;  %v2229_v7 = vrot.slane %v2227_v63, 1  ;;  %v2232_v8 = vrot.slane %v2230_v0, 2  ;;  %v4865_v63 = vld [vmem:[%s6339_s1 + $0x7a8] ss:$16 sps:$4 sm:$0xff]   ;;  %v4870_v0 = vld [vmem:[%s6339_s1 + $0x7c4] ss:$16 sps:$4 sm:$0xff]  }
  0xb5   : > { %v4868_v2 = vld [vmem:[%s6339_s1 + $0x7c0] ss:$16 sps:$4 sm:$0xff]   ;;  %v4879_v5 = vld [vmem:[%s6339_s1 + $0x7ec] ss:$16 sps:$4 sm:$0xff]  }
  0xb7   : > { %1945 = vmatpush1.bf16.msra.mxu0 %v4745_v9  ;;  %2031 = vmatpush1.bf16.msra.mxu1 %v4748_v10  ;;  %v2235_v9 = vshll.u32 %v5799_v62, 16  ;;  %v4819_v10 = vld [vmem:[%s6339_s1 + $0x6c0] ss:$16 sps:$4 sm:$0xff]  }
  0xb8   : > { %1946 = vmatprep.subr.bf16.mxu0 %v4753_v12  ;;  %2032 = vmatprep.subr.bf16.mxu1 %v4756_v13  ;;  %v1566_v12 = vrot.slane %v4016_v6, 1  ;;  %v2233_v13 = vor.u32 %v2232_v8, %v2229_v7  ;;  %v4874_v6 = vld [vmem:[%s6339_s1 + $0x7e0] ss:$16 sps:$4 sm:$0xff]   ;;  %v4877_v7 = vld [vmem:[%s6339_s1 + $0x7e8] ss:$16 sps:$4 sm:$0xff]  }
  0xb9   : > { %v4882_v8 = vld [vmem:[%s6339_s1 + $0x804] ss:$16 sps:$4 sm:$0xff]  }
  0xbb   : > { %1947 = vmatpush1.bf16.msra.mxu0 %v4751_v14  ;;  %2033 = vmatpush1.bf16.msra.mxu1 %v4754_v15  ;;  %v2237_v14 = vrot.slane %v2235_v9, 2  ;;  %v4822_v15 = vld [vmem:[%s6339_s1 + $0x6c8] ss:$16 sps:$4 sm:$0xff]   ;;  %v4885_v9 = vld [vmem:[%s6339_s1 + $0x80c] ss:$16 sps:$4 sm:$0xff]  }
  0xbc   : > { %1948 = vmatprep.subr.bf16.mxu0 %v4759_v16  ;;  %2034 = vmatprep.subr.bf16.mxu1 %v4762_v17  ;;  %v4828_v16 = vld [vmem:[%s6339_s1 + $0x6e4] ss:$16 sps:$4 sm:$0xff]   ;;  %v4831_v17 = vld [vmem:[%s6339_s1 + $0x6ec] ss:$16 sps:$4 sm:$0xff]  }
  0xbf   : > { %1949 = vmatpush1.bf16.msra.mxu0 %v4757_v18  ;;  %2035 = vmatpush1.bf16.msra.mxu1 %v4760_v19  ;;  %v2238_v18 = vsel %vm2212_vm1, %v2233_v13, %v2237_v14  ;;  %v4826_v19 = vld [vmem:[%s6339_s1 + $0x6e0] ss:$16 sps:$4 sm:$0xff]   ;;  %v4888_v13 = vld [vmem:[%s6339_s1 + $0x824] ss:$16 sps:$4 sm:$0xff]   ;;  %v4891_v14 = vld [vmem:[%s6339_s1 + $0x82c] ss:$16 sps:$4 sm:$0xff]  }
  0xc0   : > { %1950 = vmatprep.subr.bf16.mxu0 %v4765_v20  ;;  %2036 = vmatprep.subr.bf16.mxu1 %v4768_v21  ;;  %v4829_v20 = vld [vmem:[%s6339_s1 + $0x6e8] ss:$16 sps:$4 sm:$0xff]   ;;  %v4834_v21 = vld [vmem:[%s6339_s1 + $0x704] ss:$16 sps:$4 sm:$0xff]  }
  0xc3   : > { %1951 = vmatpush1.bf16.msra.mxu0 %v4763_v22  ;;  %2037 = vmatpush1.bf16.msra.mxu1 %v4766_v23  ;;  %v4837_v22 = vld [vmem:[%s6339_s1 + $0x70c] ss:$16 sps:$4 sm:$0xff]   ;;  %v4832_v23 = vld [vmem:[%s6339_s1 + $0x700] ss:$16 sps:$4 sm:$0xff]  }
  0xc4   : > { %1952 = vmatprep.subr.bf16.mxu0 %v4771_v24  ;;  %2038 = vmatprep.subr.bf16.mxu1 %v4774_v25  ;;  %v4835_v24 = vld [vmem:[%s6339_s1 + $0x708] ss:$16 sps:$4 sm:$0xff]   ;;  %v4840_v25 = vld [vmem:[%s6339_s1 + $0x724] ss:$16 sps:$4 sm:$0xff]  }
  0xc7   : > { %1953 = vmatpush1.bf16.msra.mxu0 %v4769_v27  ;;  %2039 = vmatpush1.bf16.msra.mxu1 %v4772_v28  ;;  %v4843_v27 = vld [vmem:[%s6339_s1 + $0x72c] ss:$16 sps:$4 sm:$0xff]   ;;  %v4838_v28 = vld [vmem:[%s6339_s1 + $0x720] ss:$16 sps:$4 sm:$0xff]  }
  0xc8   : > { %1954 = vmatprep.subr.bf16.mxu0 %v4777_v29  ;;  %2040 = vmatprep.subr.bf16.mxu1 %v4780_v30  ;;  %v4841_v29 = vld [vmem:[%s6339_s1 + $0x728] ss:$16 sps:$4 sm:$0xff]   ;;  %v4846_v30 = vld [vmem:[%s6339_s1 + $0x744] ss:$16 sps:$4 sm:$0xff]  }
  0xcb   : > { %1955 = vmatpush1.bf16.msra.mxu0 %v4775_v31  ;;  %2041 = vmatpush1.bf16.msra.mxu1 %v4778_v32  ;;  %v4849_v31 = vld [vmem:[%s6339_s1 + $0x74c] ss:$16 sps:$4 sm:$0xff]   ;;  %v5868_v32 = vcombine.low %v5786_v58, %v5786_v58  ;;  %v4859_v58 = vld [vmem:[%s6339_s1 + $0x788] ss:$16 sps:$4 sm:$0xff]  }
  0xcc   : > { %1956 = vmatprep.subr.bf16.mxu0 %v4783_v33  ;;  %2042 = vmatprep.subr.bf16.mxu1 %v4786_v34  ;;  %v2797_v33 = vld [vmem:[%s5232_s10] sm:$0xcc] }
  0xcd   : > { %v4844_v34 = vld [vmem:[%s6339_s1 + $0x740] ss:$16 sps:$4 sm:$0xff]  }
  0xcf   : > { %1957 = vmatpush1.bf16.msra.mxu0 %v4781_v35  ;;  %2043 = vmatpush1.bf16.msra.mxu1 %v4784_v36  ;;  %v4316_v35 = vcombine.high %v2797_v33, %v5769_v54  ;;  %v2885_v36 = vrot.slane %v5799_v62, 2  ;;  %v4862_v62 = vld [vmem:[%s6339_s1 + $0x7a0] ss:$16 sps:$4 sm:$0xff]  }
  0xd0   : > { %1958 = vmatprep.subr.bf16.mxu0 %v4789_v37  ;;  %2044 = vmatprep.subr.bf16.mxu1 %v4792_v38  ;;  %v4315_v37 = vcombine.low %v2797_v33, %v5769_v54  ;;  %v2882_v38 = vrot.slane %v5868_v32, 2 }
  0xd3   : > { %1959 = vmatpush1.bf16.msra.mxu0 %v4787_v39  ;;  %2045 = vmatpush1.bf16.msra.mxu1 %v4790_v46  ;;  %v4847_v39 = vld [vmem:[%s6339_s1 + $0x748] ss:$16 sps:$4 sm:$0xff]   ;;  %v4852_v46 = vld [vmem:[%s6339_s1 + $0x764] ss:$16 sps:$4 sm:$0xff]  }
  0xd4   : > { %1960 = vmatprep.subr.bf16.mxu0 %v4795_v40  ;;  %2046 = vmatprep.subr.bf16.mxu1 %v4798_v41  ;;  %v4855_v40 = vld [vmem:[%s6339_s1 + $0x76c] ss:$16 sps:$4 sm:$0xff]   ;;  %v2884_v41 = vrot.slane %v4316_v35, 2  ;;  %v4912_v35 = vld [vmem:[%s6339_s1 + $0x8a4] ss:$16 sps:$4 sm:$0xff]  }
  0xd7   : > { %1961 = vmatpush1.bf16.msra.mxu0 %v4793_v42  ;;  %2047 = vmatpush1.bf16.msra.mxu1 %v4796_v43  ;;  %v2881_v42 = vrot.slane %v4315_v37, 2  ;;  %v4850_v43 = vld [vmem:[%s6339_s1 + $0x760] ss:$16 sps:$4 sm:$0xff]   ;;  %v2113_v37 = vld [vmem:[%s5232_s10 + $0x8] sm:$0xe] }
  0xd8   : > { %1962 = vmatprep.subr.bf16.mxu0 %v4801_v45  ;;  %2048 = vmatprep.subr.bf16.mxu1 %v4804_v48  ;;  %v5891_v45 = vld [vmem:[%s5232_s10 + $0x20] ss:$0 sps:$4 sm:$0x11]   ;;  %v5894_v48 = vsel %vm2880_vm2, %v2884_v41, %v2885_v36  ;;  %v4915_v36 = vld [vmem:[%s6339_s1 + $0x8ac] ss:$16 sps:$4 sm:$0xff]  }
  0xd9   : > { %v4922_v41 = vld [vmem:[%s6339_s1 + $0x8c4] ss:$16 sps:$4 sm:$0xff]  }
  0xdb   : > { %1963 = vmatpush1.bf16.msra.mxu0 %v4799_v49  ;;  %2049 = vmatpush1.bf16.msra.mxu1 %v4802_v50  ;;  %v5897_v49 = vsel %vm2880_vm2, %v2881_v42, %v2882_v38  ;;  %v4853_v50 = vld [vmem:[%s6339_s1 + $0x768] ss:$16 sps:$4 sm:$0xff]   ;;  %v4910_v38 = vld [vmem:[%s6339_s1 + $0x8a0] ss:$16 sps:$4 sm:$0xff]   ;;  %v4925_v42 = vld [vmem:[%s6339_s1 + $0x8cc] ss:$16 sps:$4 sm:$0xff]  }
  0xdc   : > { %1975 = vmatprep.subr.bf16.mxu0 %v4809_v47  ;;  %2061 = vmatprep.subr.bf16.mxu1 %v4812_v11  ;;  %v4858_v47 = vld [vmem:[%s6339_s1 + $0x784] ss:$16 sps:$4 sm:$0xff]   ;;  %v4861_v11 = vld [vmem:[%s6339_s1 + $0x78c] ss:$16 sps:$4 sm:$0xff]  }
  0xde   : > { %1965 = vmatmul.mubr.bf16.vlgmr.msra.gmra.mrb[0].mxu0 %v1564_v55  ;;  %2051 = vmatmul.mubr.bf16.vlgmr.msra.gmra.mrb[0].mxu1 %v1564_v55  ;;  %v4317_v55 = vcombine.low %v2798_v52, %v5903_v51 }
  0xdf   : > { %1976 = vmatpush1.bf16.msra.mxu0 %v4807_v44  ;;  %2062 = vmatpush1.bf16.msra.mxu1 %v4810_v57  ;;  %v2888_v44 = vrot.slane %v5891_v45, 2  ;;  %v4856_v57 = vld [vmem:[%s6339_s1 + $0x780] ss:$16 sps:$4 sm:$0xff]  }
  0xe0   : > { %1977 = vmatprep.subr.bf16.mxu0 %v4815_v59  ;;  %2063 = vmatprep.subr.bf16.mxu1 %v4818_v60  ;;  %v2887_v56 = vrot.slane %v4317_v55, 2  ;;  %v4864_v59 = vld [vmem:[%s6339_s1 + $0x7a4] ss:$16 sps:$4 sm:$0xff]   ;;  %v4867_v60 = vld [vmem:[%s6339_s1 + $0x7ac] ss:$16 sps:$4 sm:$0xff]  }
  0xe1   : > { %2007 = vmatprep.mubr.bf16.mxu0 %v5055_v26  ;;  %2093 = vmatprep.mubr.bf16.mxu1 %v5055_v26  ;;  %v4931_v55 = vld [vmem:[%s6339_s1 + $0x8ec] ss:$16 sps:$4 sm:$0xff]  }
  0xe3   : > { %1978 = vmatpush1.bf16.msra.mxu0 %v4813_v61  ;;  %2064 = vmatpush1.bf16.msra.mxu1 %v4816_v1  ;;  %v5927_v61 = vsel %vm2880_vm2, %v2887_v56, %v2888_v44  ;;  %v4873_v1 = vld [vmem:[%s6339_s1 + $0x7cc] ss:$16 sps:$4 sm:$0xff]   ;;  %v4926_v44 = vld [vmem:[%s6339_s1 + $0x8e0] ss:$16 sps:$4 sm:$0xff]   ;;  %v4929_v56 = vld [vmem:[%s6339_s1 + $0x8e8] ss:$16 sps:$4 sm:$0xff]  }
  0xe4   : > { %2617 = vmatprep.subr.bf16.mxu0 %v4821_v3  ;;  %2703 = vmatprep.subr.bf16.mxu1 %v4824_v4  ;;  %v4871_v3 = vld [vmem:[%s6339_s1 + $0x7c8] ss:$16 sps:$4 sm:$0xff]   ;;  %v4876_v4 = vld [vmem:[%s6339_s1 + $0x7e4] ss:$16 sps:$4 sm:$0xff]  }
  0xea   : > { %4089 = vmatmul.mubr.msk.bf16.vlgmr.msra.gmra.mrb[0].mxu0 %vm760_vm0, %v1566_v12  ;;  %4090 = vmatmul.mubr.msk.bf16.vlgmr.msra.gmra.mrb[0].mxu1 %vm760_vm0, %v1566_v12  ;;  %v4883_v12 = vld [vmem:[%s6339_s1 + $0x808] ss:$16 sps:$4 sm:$0xff]  }
  0xeb   : > { %2618 = vmatpush1.bf16.msra.mxu0 %v4819_v10  ;;  %2704 = vmatpush1.bf16.msra.mxu1 %v4822_v15  ;;  %v4880_v10 = vld [vmem:[%s6339_s1 + $0x800] ss:$16 sps:$4 sm:$0xff]  }
  0xec   : > { %2619 = vmatprep.subr.bf16.mxu0 %v4828_v16  ;;  %2705 = vmatprep.subr.bf16.mxu1 %v4831_v17  ;;  %v4886_v15 = vld [vmem:[%s6339_s1 + $0x820] ss:$16 sps:$4 sm:$0xff]   ;;  %v4889_v16 = vld [vmem:[%s6339_s1 + $0x828] ss:$16 sps:$4 sm:$0xff]   ;;  %v4894_v17 = vld [vmem:[%s6339_s1 + $0x844] ss:$16 sps:$4 sm:$0xff]  }
  0xed   : > { %2649 = vmatprep.mubr.bf16.mxu0 %v2238_v18  ;;  %2735 = vmatprep.mubr.bf16.mxu1 %v2238_v18  ;;  %v4897_v18 = vld [vmem:[%s6339_s1 + $0x84c] ss:$16 sps:$4 sm:$0xff]  }
  0xef   : > { %2620 = vmatpush1.bf16.msra.mxu0 %v4826_v19  ;;  %2706 = vmatpush1.bf16.msra.mxu1 %v4829_v20  ;;  %v4892_v19 = vld [vmem:[%s6339_s1 + $0x840] ss:$16 sps:$4 sm:$0xff]   ;;  %v4895_v20 = vld [vmem:[%s6339_s1 + $0x848] ss:$16 sps:$4 sm:$0xff]  }
  0xf0   : > { %2621 = vmatprep.subr.bf16.mxu0 %v4834_v21  ;;  %2707 = vmatprep.subr.bf16.mxu1 %v4837_v22  ;;  %v4163_v21 = vcombine.low %v5766_v53, %v5769_v54  ;;  %v4900_v22 = vld [vmem:[%s6339_s1 + $0x864] ss:$16 sps:$4 sm:$0xff]   ;;  %v4901_v53 = vld [vmem:[%s6339_s1 + $0x868] ss:$16 sps:$4 sm:$0xff]  }
  0xf2   : > { %v2214_v54 = vshrl.u32 %v4163_v21, 16 }
  0xf3   : > { %2622 = vmatpush1.bf16.msra.mxu0 %v4832_v23  ;;  %2708 = vmatpush1.bf16.msra.mxu1 %v4835_v24  ;;  %v4903_v23 = vld [vmem:[%s6339_s1 + $0x86c] ss:$16 sps:$4 sm:$0xff]   ;;  %v4898_v24 = vld [vmem:[%s6339_s1 + $0x860] ss:$16 sps:$4 sm:$0xff]  }
  0xf4   : > { %2623 = vmatprep.subr.bf16.mxu0 %v4840_v25  ;;  %2709 = vmatprep.subr.bf16.mxu1 %v4843_v27  ;;  %v2217_v25 = vshll.u32 %v4163_v21, 16  ;;  %v4906_v27 = vld [vmem:[%s6339_s1 + $0x884] ss:$16 sps:$4 sm:$0xff]   ;;  %v4964_v21 = vld [vmem:[%s6339_s1 + $0x9a0] ss:$16 sps:$4 sm:$0xff]  }
  0xf6   : > { %v2219_v33 = vrot.slane %v2217_v25, 2  ;;  %v4978_v25 = vld [vmem:[%s6339_s1 + $0x9e4] ss:$16 sps:$4 sm:$0xff]  }
  0xf7   : > { %2624 = vmatpush1.bf16.msra.mxu0 %v4838_v28  ;;  %2710 = vmatpush1.bf16.msra.mxu1 %v4841_v29  ;;  %v4909_v28 = vld [vmem:[%s6339_s1 + $0x88c] ss:$16 sps:$4 sm:$0xff]   ;;  %v4904_v29 = vld [vmem:[%s6339_s1 + $0x880] ss:$16 sps:$4 sm:$0xff]  }
  0xf8   : > { %2625 = vmatprep.subr.bf16.mxu0 %v4846_v30  ;;  %2711 = vmatprep.subr.bf16.mxu1 %v4849_v31  ;;  %v4907_v30 = vld [vmem:[%s6339_s1 + $0x888] ss:$16 sps:$4 sm:$0xff]   ;;  %v2216_v31 = vrot.slane %v2214_v54, 1 }
  0xf9   : > { %v4973_v54 = vld [vmem:[%s6339_s1 + $0x9c8] ss:$16 sps:$4 sm:$0xff]  }
  0xfb   : > { %2626 = vmatpush1.bf16.msra.mxu0 %v4844_v34  ;;  %2712 = vmatpush1.bf16.msra.mxu1 %v4847_v39  ;;  %v2222_v34 = vshll.u32 %v5868_v32, 16  ;;  %v4913_v32 = vld [vmem:[%s6339_s1 + $0x8a8] ss:$16 sps:$4 sm:$0xff]   ;;  %v2220_v39 = vor.u32 %v2219_v33, %v2216_v31  ;;  %v4987_v31 = vld [vmem:[%s6339_s1 + $0xa0c] ss:$16 sps:$4 sm:$0xff]  }
  0xfc   : > { %2627 = vmatprep.subr.bf16.mxu0 %v4852_v46  ;;  %2713 = vmatprep.subr.bf16.mxu1 %v4855_v40  ;;  %v4165_v40 = vcombine.low %v2113_v37, %v5903_v51  ;;  %v4923_v51 = vld [vmem:[%s6339_s1 + $0x8c8] ss:$16 sps:$4 sm:$0xff]   ;;  %v4982_v33 = vld [vmem:[%s6339_s1 + $0xa00] ss:$16 sps:$4 sm:$0xff]  }
  0xfd   : > { %v2224_v46 = vrot.slane %v2222_v34, 2  ;;  %v4985_v34 = vld [vmem:[%s6339_s1 + $0xa08] ss:$16 sps:$4 sm:$0xff]   ;;  %v4988_v37 = vld [vmem:[%s6339_s1 + $0xa20] ss:$16 sps:$4 sm:$0xff]  }
  0xfe   : > { %v2240_v52 = vshrl.u32 %v4165_v40, 16 }
  0xff   : > { %2628 = vmatpush1.bf16.msra.mxu0 %v4850_v43  ;;  %2714 = vmatpush1.bf16.msra.mxu1 %v4853_v50  ;;  %v2225_v43 = vsel %vm2212_vm1, %v2220_v39, %v2224_v46  ;;  %v4920_v50 = vld [vmem:[%s6339_s1 + $0x8c0] ss:$16 sps:$4 sm:$0xff]   ;;  %v4999_v39 = vld [vmem:[%s6339_s1 + $0xa4c] ss:$16 sps:$4 sm:$0xff]  }
 0x100   : > { %2629 = vmatprep.subr.bf16.mxu0 %v4858_v47  ;;  %2715 = vmatprep.subr.bf16.mxu1 %v4861_v11  ;;  %v2243_v47 = vshll.u32 %v4165_v40, 16  ;;  %v4928_v11 = vld [vmem:[%s6339_s1 + $0x8e4] ss:$16 sps:$4 sm:$0xff]   ;;  %v4994_v46 = vld [vmem:[%s6339_s1 + $0xa40] ss:$16 sps:$4 sm:$0xff]  }
 0x101   : > { %v4997_v40 = vld [vmem:[%s6339_s1 + $0xa48] ss:$16 sps:$4 sm:$0xff]  }
 0x103   : > { %2630 = vmatpush1.bf16.msra.mxu0 %v4856_v57  ;;  %2716 = vmatpush1.bf16.msra.mxu1 %v4859_v58  ;;  %v2242_v57 = vrot.slane %v2240_v52, 1  ;;  %v2245_v58 = vrot.slane %v2243_v47, 2  ;;  %v5011_v52 = vld [vmem:[%s6339_s1 + $0xa8c] ss:$16 sps:$4 sm:$0xff]   ;;  %v5006_v47 = vld [vmem:[%s6339_s1 + $0xa80] ss:$16 sps:$4 sm:$0xff]  }
 0x104   : > { %2631 = vmatprep.subr.bf16.mxu0 %v4864_v59  ;;  %2717 = vmatprep.subr.bf16.mxu1 %v4867_v60  ;;  %v2248_v59 = vshll.u32 %v5891_v45, 16  ;;  %v4934_v60 = vld [vmem:[%s6339_s1 + $0x904] ss:$16 sps:$4 sm:$0xff]   ;;  %v4932_v45 = vld [vmem:[%s6339_s1 + $0x900] ss:$16 sps:$4 sm:$0xff]  }
 0x107   : > { %2632 = vmatpush1.bf16.msra.mxu0 %v4862_v62  ;;  %2718 = vmatpush1.bf16.msra.mxu1 %v4865_v63  ;;  %v4937_v62 = vld [vmem:[%s6339_s1 + $0x90c] ss:$16 sps:$4 sm:$0xff]   ;;  %v2246_v63 = vor.u32 %v2245_v58, %v2242_v57  ;;  %v5015_v57 = vld [vmem:[%s6339_s1 + $0xaa8] ss:$16 sps:$4 sm:$0xff]   ;;  %v5020_v58 = vld [vmem:[%s6339_s1 + $0xac4] ss:$16 sps:$4 sm:$0xff]  }
 0x108   : > { %2633 = vmatprep.subr.bf16.mxu0 %v4870_v0  ;;  %2719 = vmatprep.subr.bf16.mxu1 %v4873_v1  ;;  %v2250_v0 = vrot.slane %v2248_v59, 2  ;;  %v4935_v1 = vld [vmem:[%s6339_s1 + $0x908] ss:$16 sps:$4 sm:$0xff]   ;;  %v5023_v59 = vld [vmem:[%s6339_s1 + $0xacc] ss:$16 sps:$4 sm:$0xff]  }
 0x10b   : > { %2634 = vmatpush1.bf16.msra.mxu0 %v4868_v2  ;;  %2720 = vmatpush1.bf16.msra.mxu1 %v4871_v3  ;;  %v2251_v2 = vsel %vm2212_vm1, %v2246_v63, %v2250_v0  ;;  %v4942_v3 = vld [vmem:[%s6339_s1 + $0x924] ss:$16 sps:$4 sm:$0xff]   ;;  %v5029_v0 = vld [vmem:[%s6339_s1 + $0xaec] ss:$16 sps:$4 sm:$0xff]   ;;  %vm3615_vm1 = vcmask 523270  }
 0x10c   : > { %2635 = vmatprep.subr.bf16.mxu0 %v4876_v4  ;;  %2721 = vmatprep.subr.bf16.mxu1 %v4879_v5  ;;  %v4945_v4 = vld [vmem:[%s6339_s1 + $0x92c] ss:$16 sps:$4 sm:$0xff]   ;;  %v4940_v5 = vld [vmem:[%s6339_s1 + $0x920] ss:$16 sps:$4 sm:$0xff]   ;;  %v5026_v63 = vld [vmem:[%s6339_s1 + $0xae4] ss:$16 sps:$4 sm:$0xff]  }
 0x10f   : > { %2636 = vmatpush1.bf16.msra.mxu0 %v4874_v6  ;;  %2722 = vmatpush1.bf16.msra.mxu1 %v4877_v7  ;;  %v4943_v6 = vld [vmem:[%s6339_s1 + $0x928] ss:$16 sps:$4 sm:$0xff]   ;;  %v4948_v7 = vld [vmem:[%s6339_s1 + $0x944] ss:$16 sps:$4 sm:$0xff]  }
 0x110   : > { %2637 = vmatprep.subr.bf16.mxu0 %v4882_v8  ;;  %2723 = vmatprep.subr.bf16.mxu1 %v4885_v9  ;;  %v4951_v8 = vld [vmem:[%s6339_s1 + $0x94c] ss:$16 sps:$4 sm:$0xff]   ;;  %v4946_v9 = vld [vmem:[%s6339_s1 + $0x940] ss:$16 sps:$4 sm:$0xff]  }
 0x113   : > { %2638 = vmatpush1.bf16.msra.mxu0 %v4880_v10  ;;  %2724 = vmatpush1.bf16.msra.mxu1 %v4883_v12  ;;  %v4949_v10 = vld [vmem:[%s6339_s1 + $0x948] ss:$16 sps:$4 sm:$0xff]   ;;  %v4954_v12 = vld [vmem:[%s6339_s1 + $0x964] ss:$16 sps:$4 sm:$0xff]  }
 0x114   : > { %2639 = vmatprep.subr.bf16.mxu0 %v4888_v13  ;;  %2725 = vmatprep.subr.bf16.mxu1 %v4891_v14  ;;  %v4952_v13 = vld [vmem:[%s6339_s1 + $0x960] ss:$16 sps:$4 sm:$0xff]   ;;  %v4955_v14 = vld [vmem:[%s6339_s1 + $0x968] ss:$16 sps:$4 sm:$0xff]  }
 0x117   : > { %2640 = vmatpush1.bf16.msra.mxu0 %v4886_v15  ;;  %2726 = vmatpush1.bf16.msra.mxu1 %v4889_v16  ;;  %v4960_v15 = vld [vmem:[%s6339_s1 + $0x984] ss:$16 sps:$4 sm:$0xff]   ;;  %v4963_v16 = vld [vmem:[%s6339_s1 + $0x98c] ss:$16 sps:$4 sm:$0xff]  }
 0x118   : > { %2641 = vmatprep.subr.bf16.mxu0 %v4894_v17  ;;  %2727 = vmatprep.subr.bf16.mxu1 %v4897_v18  ;;  %v4958_v17 = vld [vmem:[%s6339_s1 + $0x980] ss:$16 sps:$4 sm:$0xff]   ;;  %v4961_v18 = vld [vmem:[%s6339_s1 + $0x988] ss:$16 sps:$4 sm:$0xff]  }
 0x11b   : > { %2642 = vmatpush1.bf16.msra.mxu0 %v4892_v19  ;;  %2728 = vmatpush1.bf16.msra.mxu1 %v4895_v20  ;;  %v4966_v19 = vld [vmem:[%s6339_s1 + $0x9a4] ss:$16 sps:$4 sm:$0xff]   ;;  %v4969_v20 = vld [vmem:[%s6339_s1 + $0x9ac] ss:$16 sps:$4 sm:$0xff]  }
 0x11c   : > { %2643 = vmatprep.subr.bf16.mxu0 %v4900_v22  ;;  %2729 = vmatprep.subr.bf16.mxu1 %v4903_v23  ;;  %v4967_v22 = vld [vmem:[%s6339_s1 + $0x9a8] ss:$16 sps:$4 sm:$0xff]   ;;  %v4972_v23 = vld [vmem:[%s6339_s1 + $0x9c4] ss:$16 sps:$4 sm:$0xff]  }
 0x11f   : > { %2644 = vmatpush1.bf16.msra.mxu0 %v4898_v24  ;;  %2730 = vmatpush1.bf16.msra.mxu1 %v4901_v53  ;;  %v4975_v24 = vld [vmem:[%s6339_s1 + $0x9cc] ss:$16 sps:$4 sm:$0xff]   ;;  %v4970_v53 = vld [vmem:[%s6339_s1 + $0x9c0] ss:$16 sps:$4 sm:$0xff]  }
 0x120   : > { %2645 = vmatprep.subr.bf16.mxu0 %v4906_v27  ;;  %2731 = vmatprep.subr.bf16.mxu1 %v4909_v28  ;;  %v4981_v27 = vld [vmem:[%s6339_s1 + $0x9ec] ss:$16 sps:$4 sm:$0xff]   ;;  %v4976_v28 = vld [vmem:[%s6339_s1 + $0x9e0] ss:$16 sps:$4 sm:$0xff]  }
 0x123   : > { %2646 = vmatpush1.bf16.msra.mxu0 %v4904_v29  ;;  %2732 = vmatpush1.bf16.msra.mxu1 %v4907_v30  ;;  %v4979_v29 = vld [vmem:[%s6339_s1 + $0x9e8] ss:$16 sps:$4 sm:$0xff]   ;;  %v4984_v30 = vld [vmem:[%s6339_s1 + $0xa04] ss:$16 sps:$4 sm:$0xff]  }
 0x124   : > { %2647 = vmatprep.subr.bf16.mxu0 %v4912_v35  ;;  %2733 = vmatprep.subr.bf16.mxu1 %v4915_v36  ;;  %v4990_v35 = vld [vmem:[%s6339_s1 + $0xa24] ss:$16 sps:$4 sm:$0xff]   ;;  %v4993_v36 = vld [vmem:[%s6339_s1 + $0xa2c] ss:$16 sps:$4 sm:$0xff]  }
 0x127   : > { %2648 = vmatpush1.bf16.msra.mxu0 %v4910_v38  ;;  %2734 = vmatpush1.bf16.msra.mxu1 %v4913_v32  ;;  %v4991_v38 = vld [vmem:[%s6339_s1 + $0xa28] ss:$16 sps:$4 sm:$0xff]   ;;  %v4996_v32 = vld [vmem:[%s6339_s1 + $0xa44] ss:$16 sps:$4 sm:$0xff]  }
 0x128   : > { %2660 = vmatprep.subr.bf16.mxu0 %v4922_v41  ;;  %2746 = vmatprep.subr.bf16.mxu1 %v4925_v42  ;;  %v5002_v41 = vld [vmem:[%s6339_s1 + $0xa64] ss:$16 sps:$4 sm:$0xff]   ;;  %v5005_v42 = vld [vmem:[%s6339_s1 + $0xa6c] ss:$16 sps:$4 sm:$0xff]  }
 0x12a   : > { %2650 = vmatmul.mubr.bf16.vlgmr.msra.gmra.mrb[0].mxu0 %v2225_v43  ;;  %2736 = vmatmul.mubr.bf16.vlgmr.msra.gmra.mrb[0].mxu1 %v2225_v43  ;;  %v5000_v43 = vld [vmem:[%s6339_s1 + $0xa60] ss:$16 sps:$4 sm:$0xff]  }
 0x12b   : > { %2661 = vmatpush1.bf16.msra.mxu0 %v4920_v50  ;;  %2747 = vmatpush1.bf16.msra.mxu1 %v4923_v51  ;;  %v5003_v50 = vld [vmem:[%s6339_s1 + $0xa68] ss:$16 sps:$4 sm:$0xff]   ;;  %v5008_v51 = vld [vmem:[%s6339_s1 + $0xa84] ss:$16 sps:$4 sm:$0xff]  }
 0x12c   : > { %2662 = vmatprep.subr.bf16.mxu0 %v4928_v11  ;;  %2748 = vmatprep.subr.bf16.mxu1 %v4931_v55  ;;  %v5009_v11 = vld [vmem:[%s6339_s1 + $0xa88] ss:$16 sps:$4 sm:$0xff]   ;;  %v5014_v55 = vld [vmem:[%s6339_s1 + $0xaa4] ss:$16 sps:$4 sm:$0xff]  }
 0x12d   : > { %2692 = vmatprep.mubr.bf16.mxu0 %v5055_v26  ;;  %2778 = vmatprep.mubr.bf16.mxu1 %v5055_v26 }
 0x12f   : > { %2663 = vmatpush1.bf16.msra.mxu0 %v4926_v44  ;;  %2749 = vmatpush1.bf16.msra.mxu1 %v4929_v56  ;;  %v5017_v44 = vld [vmem:[%s6339_s1 + $0xaac] ss:$16 sps:$4 sm:$0xff]   ;;  %v5012_v56 = vld [vmem:[%s6339_s1 + $0xaa0] ss:$16 sps:$4 sm:$0xff]  }
 0x130   : > { %3255 = vmatprep.subr.bf16.mxu0 %v4934_v60  ;;  %3341 = vmatprep.subr.bf16.mxu1 %v4937_v62  ;;  %v5018_v60 = vld [vmem:[%s6339_s1 + $0xac0] ss:$16 sps:$4 sm:$0xff]   ;;  %v5021_v62 = vld [vmem:[%s6339_s1 + $0xac8] ss:$16 sps:$4 sm:$0xff]  }
 0x136   : > { %4241 = vmatmul.mubr.msk.bf16.vlgmr.msra.gmra.mrb[0].mxu0 %vm760_vm0, %v2251_v2  ;;  %4242 = vmatmul.mubr.msk.bf16.vlgmr.msra.gmra.mrb[0].mxu1 %vm760_vm0, %v2251_v2  ;;  %v5034_v2 = vld [vmem:[%s6339_s1 + $0xb04] ss:$16 sps:$4 sm:$0xff]  }
 0x137   : > { %3256 = vmatpush1.bf16.msra.mxu0 %v4932_v45  ;;  %3342 = vmatpush1.bf16.msra.mxu1 %v4935_v1  ;;  %v5024_v45 = vld [vmem:[%s6339_s1 + $0xae0] ss:$16 sps:$4 sm:$0xff]   ;;  %v5027_v1 = vld [vmem:[%s6339_s1 + $0xae8] ss:$16 sps:$4 sm:$0xff]  }
 0x138   : > { %3257 = vmatprep.subr.bf16.mxu0 %v4942_v3  ;;  %3343 = vmatprep.subr.bf16.mxu1 %v4945_v4  ;;  %v5037_v3 = vld [vmem:[%s6339_s1 + $0xb0c] ss:$16 sps:$4 sm:$0xff]   ;;  %v5032_v4 = vld [vmem:[%s6339_s1 + $0xb00] ss:$16 sps:$4 sm:$0xff]  }
 0x139   : > { %3287 = vmatprep.mubr.bf16.mxu0 %v5894_v48  ;;  %3373 = vmatprep.mubr.bf16.mxu1 %v5894_v48  ;;  %v4957_v48 = vld [vmem:[%s6339_s1 + $0x96c] ss:$16 sps:$4 sm:$0xff]  }
 0x13b   : > { %3258 = vmatpush1.bf16.msra.mxu0 %v4940_v5  ;;  %3344 = vmatpush1.bf16.msra.mxu1 %v4943_v6  ;;  %v5035_v5 = vld [vmem:[%s6339_s1 + $0xb08] ss:$16 sps:$4 sm:$0xff]   ;;  %v5040_v6 = vld [vmem:[%s6339_s1 + $0xb24] ss:$16 sps:$4 sm:$0xff]  }
 0x13c   : > { %3259 = vmatprep.subr.bf16.mxu0 %v4948_v7  ;;  %3345 = vmatprep.subr.bf16.mxu1 %v4951_v8  ;;  %v5043_v7 = vld [vmem:[%s6339_s1 + $0xb2c] ss:$16 sps:$4 sm:$0xff]   ;;  %v5038_v8 = vld [vmem:[%s6339_s1 + $0xb20] ss:$16 sps:$4 sm:$0xff]  }
 0x13f   : > { %3260 = vmatpush1.bf16.msra.mxu0 %v4946_v9  ;;  %3346 = vmatpush1.bf16.msra.mxu1 %v4949_v10  ;;  %v5041_v9 = vld [vmem:[%s6339_s1 + $0xb28] ss:$16 sps:$4 sm:$0xff]  }
 0x140   : > { %3261 = vmatprep.subr.bf16.mxu0 %v4954_v12  ;;  %3347 = vmatprep.subr.bf16.mxu1 %v4957_v48 }
 0x143   : > { %3262 = vmatpush1.bf16.msra.mxu0 %v4952_v13  ;;  %3348 = vmatpush1.bf16.msra.mxu1 %v4955_v14 }
 0x144   : > { %3263 = vmatprep.subr.bf16.mxu0 %v4960_v15  ;;  %3349 = vmatprep.subr.bf16.mxu1 %v4963_v16 }
 0x147   : > { %3264 = vmatpush1.bf16.msra.mxu0 %v4958_v17  ;;  %3350 = vmatpush1.bf16.msra.mxu1 %v4961_v18 }
 0x148   : > { %3265 = vmatprep.subr.bf16.mxu0 %v4966_v19  ;;  %3351 = vmatprep.subr.bf16.mxu1 %v4969_v20 }
 0x14b   : > { %3266 = vmatpush1.bf16.msra.mxu0 %v4964_v21  ;;  %3352 = vmatpush1.bf16.msra.mxu1 %v4967_v22 }
 0x14c   : > { %3267 = vmatprep.subr.bf16.mxu0 %v4972_v23  ;;  %3353 = vmatprep.subr.bf16.mxu1 %v4975_v24 }
 0x14f   : > { %3268 = vmatpush1.bf16.msra.mxu0 %v4970_v53  ;;  %3354 = vmatpush1.bf16.msra.mxu1 %v4973_v54 }
 0x150   : > { %3269 = vmatprep.subr.bf16.mxu0 %v4978_v25  ;;  %3355 = vmatprep.subr.bf16.mxu1 %v4981_v27 }
 0x153   : > { %3270 = vmatpush1.bf16.msra.mxu0 %v4976_v28  ;;  %3356 = vmatpush1.bf16.msra.mxu1 %v4979_v29 }
 0x154   : > { %3271 = vmatprep.subr.bf16.mxu0 %v4984_v30  ;;  %3357 = vmatprep.subr.bf16.mxu1 %v4987_v31 }
 0x157   : > { %3272 = vmatpush1.bf16.msra.mxu0 %v4982_v33  ;;  %3358 = vmatpush1.bf16.msra.mxu1 %v4985_v34 }
 0x158   : > { %3273 = vmatprep.subr.bf16.mxu0 %v4990_v35  ;;  %3359 = vmatprep.subr.bf16.mxu1 %v4993_v36 }
 0x15b   : > { %3274 = vmatpush1.bf16.msra.mxu0 %v4988_v37  ;;  %3360 = vmatpush1.bf16.msra.mxu1 %v4991_v38 }
 0x15c   : > { %3275 = vmatprep.subr.bf16.mxu0 %v4996_v32  ;;  %3361 = vmatprep.subr.bf16.mxu1 %v4999_v39 }
 0x15f   : > { %3276 = vmatpush1.bf16.msra.mxu0 %v4994_v46  ;;  %3362 = vmatpush1.bf16.msra.mxu1 %v4997_v40 }
 0x160   : > { %3277 = vmatprep.subr.bf16.mxu0 %v5002_v41  ;;  %3363 = vmatprep.subr.bf16.mxu1 %v5005_v42 }
 0x163   : > { %3278 = vmatpush1.bf16.msra.mxu0 %v5000_v43  ;;  %3364 = vmatpush1.bf16.msra.mxu1 %v5003_v50 }
 0x164   : > { %3279 = vmatprep.subr.bf16.mxu0 %v5008_v51  ;;  %3365 = vmatprep.subr.bf16.mxu1 %v5011_v52 }
 0x167   : > { %3280 = vmatpush1.bf16.msra.mxu0 %v5006_v47  ;;  %3366 = vmatpush1.bf16.msra.mxu1 %v5009_v11 }
 0x168   : > { %3281 = vmatprep.subr.bf16.mxu0 %v5014_v55  ;;  %3367 = vmatprep.subr.bf16.mxu1 %v5017_v44 }
 0x16b   : > { %3282 = vmatpush1.bf16.msra.mxu0 %v5012_v56  ;;  %3368 = vmatpush1.bf16.msra.mxu1 %v5015_v57 }
 0x16c   : > { %3283 = vmatprep.subr.bf16.mxu0 %v5020_v58  ;;  %3369 = vmatprep.subr.bf16.mxu1 %v5023_v59 }
 0x16f   : > { %3284 = vmatpush1.bf16.msra.mxu0 %v5018_v60  ;;  %3370 = vmatpush1.bf16.msra.mxu1 %v5021_v62 }
 0x170   : > { %3285 = vmatprep.subr.bf16.mxu0 %v5026_v63  ;;  %3371 = vmatprep.subr.bf16.mxu1 %v5029_v0 }
 0x173   : > { %3286 = vmatpush1.bf16.msra.mxu0 %v5024_v45  ;;  %3372 = vmatpush1.bf16.msra.mxu1 %v5027_v1 }
 0x174   : > { %3298 = vmatprep.subr.bf16.mxu0 %v5034_v2  ;;  %3384 = vmatprep.subr.bf16.mxu1 %v5037_v3 }
 0x176   : > { %3288 = vmatmul.mubr.bf16.vlgmr.msra.gmra.mrb[0].mxu0 %v5897_v49  ;;  %3374 = vmatmul.mubr.bf16.vlgmr.msra.gmra.mrb[0].mxu1 %v5897_v49  ;;  %v3436_v49 = vlaneseq }
 0x177   : > { %3299 = vmatpush1.bf16.msra.mxu0 %v5032_v4  ;;  %3385 = vmatpush1.bf16.msra.mxu1 %v5035_v5 }
 0x178   : > { %3300 = vmatprep.subr.bf16.mxu0 %v5040_v6  ;;  %3386 = vmatprep.subr.bf16.mxu1 %v5043_v7  ;;  %v6293_v10 = vshrl.u32 %v3436_v49, 7 }
 0x179   : > { %3330 = vmatprep.mubr.bf16.mxu0 %v5055_v26  ;;  %3416 = vmatprep.mubr.bf16.mxu1 %v5055_v26  ;;  %v212_v26 = vld [vmem:[%s6340_s2] sm:$0xf] }
 0x17a   : > { %v3438_v12 = vsub.s32 0, %v6293_v10  ;;  %v3446_v48 = vsub.s32 2, %v6293_v10  ;;  %v3442_v13 = vsub.s32 1, %v6293_v10  ;;  %v3450_v14 = vsub.s32 3, %v6293_v10 }
 0x17b   : > { %3301 = vmatpush1.bf16.msra.mxu0 %v5038_v8  ;;  %3387 = vmatpush1.bf16.msra.mxu1 %v5041_v9 }
 0x17c   : > { %v3439_v15 = vrot.slane %v212_v26, %v3438_v12  ;;  %v3447_v16 = vrot.slane %v212_v26, %v3446_v48  ;;  %v3443_v17 = vrot.slane %v212_v26, %v3442_v13  ;;  %v3451_v18 = vrot.slane %v212_v26, %v3450_v14 }
 0x182   : > { %4390 = vmatmul.mubr.msk.bf16.vlgmr.msra.gmra.mrb[0].mxu0 %vm760_vm0, %v5927_v61  ;;  %4391 = vmatmul.mubr.msk.bf16.vlgmr.msra.gmra.mrb[0].mxu1 %vm760_vm0, %v5927_v61  ;;  %vm3614_vm0 = vmor %vm3613_vm15, %vm3612_vm14 }
 0x255   : > { %v3332_v61 = vpop.f32.mrb[0].mxu0  ;;  %v3418_v19 = vpop.f32.mrb[0].mxu1 }
 0x256   : > { %v3456_v20 = vadd.f32 %v3439_v15, %v3332_v61  ;;  %v3458_v21 = vadd.f32 %v3447_v16, %v3418_v19  ;;  %v3334_v22 = vpop.f32.mrb[1].mxu0  ;;  %v3420_v23 = vpop.f32.mrb[1].mxu1 }
 0x257   : > { %v3457_v24 = vadd.f32 %v3443_v17, %v3334_v22  ;;  %v3459_v53 = vadd.f32 %v3451_v18, %v3420_v23  ;;  %v3336_v54 = vpop.f32.mrb[2].mxu0  ;;  %v3422_v25 = vpop.f32.mrb[2].mxu1 }
 0x258   : > { %v3538_v27 = vmul.f32 %v3456_v20, %v3456_v20  ;;  %v3460_v28 = vadd.f32 %v3439_v15, %v3336_v54  ;;  %v3462_v29 = vadd.f32 %v3447_v16, %v3422_v25  ;;  %v3338_v30 = vpop.f32.mrb[3].mxu0  ;;  %v3424_v31 = vpop.f32.mrb[3].mxu1  ;;  %v3540_v33 = vmul.f32 %v3458_v21, %v3458_v21 }
 0x259   : > { %v4400_v34 = vpack.c.bf16 %v3457_v24, %v3456_v20  ;;  %v3539_v35 = vmul.f32 %v3457_v24, %v3457_v24  ;;  %v4401_v36 = vpack.c.bf16 %v3459_v53, %v3458_v21  ;;  %v3541_v37 = vmul.f32 %v3459_v53, %v3459_v53 }
 0x25a   : > { %v3499_v38 = vsel %vm2880_vm2, %v3460_v28, 0.0  ;;  %v3542_v32 = vmul.f32 %v3460_v28, %v3460_v28  ;;  %v3515_v39 = vsel %vm2880_vm2, %v3462_v29, 0.0  ;;  %v3544_v41 = vmul.f32 %v3462_v29, %v3462_v29 }
 0x25b   : > { %3488 = vst [vmem:[%s6306_s22] sm:$0xff] %v4400_v34  ;;  %3492 = vst.msk [vmem:[%s6306_s22 + $0x8] sm:$0xff] %vm3491_vm9, %v4401_v36  ;;  %v3500_v46 = vadd.f32 %v3499_v38, %v3456_v20  ;;  %v3516_v40 = vadd.f32 %v3515_v39, %v3458_v21  ;;  %v3461_v42 = vadd.f32 %v3443_v17, %v3338_v30  ;;  %v3524_v43 = vsel %vm3523_vm5, %v3459_v53, 0.0 }
 0x25c   : > { %v3570_v50 = vsel %vm3523_vm5, %v3541_v37, 0.0  ;;  %v3546_v51 = vsel %vm2880_vm2, %v3542_v32, 0.0  ;;  %v3463_v52 = vadd.f32 %v3451_v18, %v3424_v31  ;;  %v3562_v44 = vsel %vm2880_vm2, %v3544_v41, 0.0 }
 0x25d   : > { %v3501_v47 = vrot.slane %v3500_v46, 4  ;;  %v3547_v11 = vadd.f32 %v3546_v51, %v3538_v27  ;;  %v3517_v55 = vrot.slane %v3516_v40, 4  ;;  %v3563_v56 = vadd.f32 %v3562_v44, %v3540_v33 }
 0x25e   : > { %v4402_v57 = vpack.c.bf16 %v3461_v42, %v3460_v28  ;;  %v3507_v58 = vsel %vm2880_vm2, %v3461_v42, 0.0  ;;  %v3543_v59 = vmul.f32 %v3461_v42, %v3461_v42  ;;  %v4403_v2 = vpack.c.bf16 %v3463_v52, %v3462_v29 }
 0x25f   : > { %v3502_v60 = vadd.f32 %v3501_v47, %v3500_v46  ;;  %v3548_v62 = vrot.slane %v3547_v11, 4  ;;  %v3518_v63 = vadd.f32 %v3517_v55, %v3516_v40  ;;  %v3508_v0 = vadd.f32 %v3507_v58, %v3457_v24 }
 0x260   : > { %v3564_v45 = vrot.slane %v3563_v56, 4  ;;  %3493 = vst [vmem:[%s6306_s22 + $0x10] sm:$0x77] %v4402_v57  ;;  %v3554_v1 = vsel %vm2880_vm2, %v3543_v59, 0.0  ;;  %v3526_v3 = vsel %vm3525_vm6, %v3463_v52, 0.0  ;;  %v3545_v12 = vmul.f32 %v3463_v52, %v3463_v52  ;;  %vm3616_vm2 = vmor %vm3615_vm1, %vm3614_vm0 }
 0x261   : > { %v3503_v4 = vrot.slane %v3502_v60, 2  ;;  %v3549_v5 = vadd.f32 %v3548_v62, %v3547_v11  ;;  %v3519_v6 = vrot.slane %v3518_v63, 2  ;;  %v3509_v7 = vrot.slane %v3508_v0, 4  ;;  %3497 = vst.msk [vmem:[%s6306_s22 + $0x18] sm:$0x77] %vm3496_vm10, %v4403_v2 }
 0x262   : > { %v3565_v8 = vadd.f32 %v3564_v45, %v3563_v56  ;;  %v3555_v9 = vadd.f32 %v3554_v1, %v3539_v35  ;;  %v3527_v49 = vadd.f32 %v3526_v3, %v3524_v43  ;;  %v3571_v18 = vsel %vm3525_vm6, %v3545_v12, 0.0 }
 0x263   : > { %v3504_v48 = vadd.f32 %v3503_v4, %v3502_v60  ;;  %v3550_v26 = vrot.slane %v3549_v5, 2  ;;  %v3520_v13 = vadd.f32 %v3519_v6, %v3518_v63  ;;  %v3510_v14 = vadd.f32 %v3509_v7, %v3508_v0 }
 0x264   : > { %v3566_v15 = vrot.slane %v3565_v8, 2  ;;  %v3556_v16 = vrot.slane %v3555_v9, 4  ;;  %v3528_v17 = vrot.slane %v3527_v49, 4  ;;  %v3572_v53 = vadd.f32 %v3571_v18, %v3570_v50 }
 0x265   : > { %v3505_v61 = vrot.slane %v3504_v48, 1  ;;  %v3551_v19 = vadd.f32 %v3550_v26, %v3549_v5  ;;  %v3521_v20 = vrot.slane %v3520_v13, 1  ;;  %v3511_v21 = vrot.slane %v3510_v14, 2 }
 0x266   : > { %v3567_v22 = vadd.f32 %v3566_v15, %v3565_v8  ;;  %v3557_v23 = vadd.f32 %v3556_v16, %v3555_v9  ;;  %v3529_v24 = vadd.f32 %v3528_v17, %v3527_v49  ;;  %v5056_v27 = vmov 1983009808  }
 0x267   : > { %v3552_v54 = vrot.slane %v3551_v19, 1  ;;  %v3512_v25 = vadd.f32 %v3511_v21, %v3510_v14  ;;  %v3595_v28 = vunpack.c.l.s4 %v5056_v27  ;;  %v3573_v33 = vrot.slane %v3572_v53, 4 }
 0x268   : > { %v3568_v29 = vrot.slane %v3567_v22, 1  ;;  %v3558_v30 = vrot.slane %v3557_v23, 2  ;;  %v3530_v31 = vrot.slane %v3529_v24, 2  ;;  %v3506_v34 = vadd.f32 %v3505_v61, %v3504_v48 }
 0x269   : > { %v3553_v35 = vadd.f32 %v3552_v54, %v3551_v19  ;;  %v3522_v36 = vadd.f32 %v3521_v20, %v3520_v13  ;;  %v3513_v37 = vrot.slane %v3512_v25, 1  ;;  %v3574_v46 = vadd.f32 %v3573_v33, %v3572_v53 }
 0x26a   : > { %v3569_v38 = vadd.f32 %v3568_v29, %v3567_v22  ;;  %v3559_v32 = vadd.f32 %v3558_v30, %v3557_v23  ;;  %v3531_v39 = vadd.f32 %v3530_v31, %v3529_v24  ;;  %v3596_v50 = vunpack.c.0.s8 %v3595_v28 }
 0x26b   : > { %v3584_v40 = vsel %vm3583_vm11, %v3506_v34, %v3553_v35  ;;  %v3575_v43 = vrot.slane %v3574_v46, 2  ;;  %v3514_v51 = vadd.f32 %v3513_v37, %v3512_v25 }
 0x26c   : > { %v3586_v41 = vsel %vm3583_vm11, %v3522_v36, %v3569_v38  ;;  %v3560_v42 = vrot.slane %v3559_v32, 1  ;;  %v3532_v47 = vrot.slane %v3531_v39, 1  ;;  %v3599_v57 = vsub.s32 %v3596_v50, %v6293_v10 }
 0x26d   : > { %v3576_v11 = vadd.f32 %v3575_v43, %v3574_v46 }
 0x26e   : > { %v3561_v52 = vadd.f32 %v3560_v42, %v3559_v32  ;;  %v3533_v58 = vadd.f32 %v3532_v47, %v3531_v39 }
 0x26f   : > { %v3577_v44 = vrot.slane %v3576_v11, 1 }
 0x270   : > { %v3585_v55 = vsel %vm3583_vm11, %v3514_v51, %v3561_v52 }
 0x271   : > { %v3592_v56 = vcombine.low %v3584_v40, %v3585_v55  ;;  %v3578_v59 = vadd.f32 %v3577_v44, %v3576_v11 }
 0x273   : > { %v3587_v60 = vsel %vm3583_vm11, %v3533_v58, %v3578_v59  ;;  %v3600_v62 = vrot.slane %v3592_v56, %v3599_v57 }
 0x274   : > { %v3593_v63 = vcombine.low %v3586_v41, %v3587_v60 }
 0x276   : > { %v3607_v0 = vrot.slane %v3593_v63, %v3599_v57 }
 0x278   : > { %v3608_v45 = vcombine.low %v3600_v62, %v3607_v0 }
 0x27a   : > { %3617 = vst.msk [vmem:[%s210_s26] sm:$0xff] %vm3616_vm2, %v3608_v45 }
 0x27b PF: > { %s15_s15 = sadd.s32 1, %s5053_s15  }
 0x27c   : > { %p12_p4 = scmp.ge.s32.totalorder %s15_s15, 4  }
 0x27e   :  { %14 = sbr.rel (!%p12_p4) target bundleno = 1 (0x1), region = 78 }

// kernel: cnn_forward.11
= control target key start
LH: loop header
LB: loop body
LE: loop exit
PB: predicated region body
PF: predicated region fallthrough
CT: control target
= control target key end

     0   :  { %10 = vsyncpa [#allocation3], 0  ;;  %s4625_s0 = inlined_call_operand.vmem [shape: bf16[2,7,448], index: 0, kind: input, shape index: {}]   ;;  %s4626_s1 = inlined_call_operand.vmem [shape: f32[1,448], index: 1, kind: input, shape index: {}]   ;;  %s4627_s2 = inlined_call_operand.vmem [shape: f32[1,448], index: 2, kind: input, shape index: {}]   ;;  %s4628_s3 = inlined_call_operand.vmem [shape: bf16[7,448,128], index: 3, kind: input, shape index: {}]   ;;  %s4629_s4 = inlined_call_operand.vmem [shape: f32[1,128], index: 4, kind: input, shape index: {}]   ;;  %s4630_s5 = inlined_call_operand.hbm [shape: f32[2,1,128], index: 5, kind: output, shape index: {}]  }
   0x1   :  { %12 = vsyncpa [#allocation3 + $0x1], 0  ;;  %s3707_s18 = smov 0   ;;  %s3709_s19 = smov 0  }
   0x2   :  { %s3711_s20 = smov 0   ;;  %s3713_s21 = smov 0  }
   0x3 LB: > { %s3728_s22 = sadd.s32 4294967295, %s3673_s21   ;;  %s2672_s23 = sadd.s32 4294967294, %s3673_s21   ;;  %s3673_s21 = sphi %s3713_s21, %s4636_s21   ;;  %s3669_s20 = sphi %s3711_s20, %s4635_s20   ;;  %s3665_s19 = sphi %s3709_s19, %s4634_s19   ;;  %s3661_s18 = sphi %s3707_s18, %s4633_s18  }
   0x4   : > { %s3732_s24 = sadd.s32 1, %s3673_s21   ;;  %s135_s25 = sadd.s32 1, %s3669_s20 }
   0x5   : > { %s132_s26 = ssub.s32 %s3673_s21, %s3732_s24  ;;  %p145_p0 = scmp.ne.s32.totalorder %s3669_s20, %s3665_s19 }
   0x6   : > { %p133_p1 = scmp.eq.s32.totalorder %s132_s26, 0  ;;  %p146_p2 = scmp.eq.s32.totalorder %s3728_s22, 1 }
   0x7   : > { %p151_p3 = scmp.ne.s32.totalorder %s3665_s19, %s3661_s18  ;;  %p152_p4 = scmp.eq.s32.totalorder %s2672_s23, 1 }
   0x8   : > { %s3743_s27 = scalar_select %p133_p1, %s3669_s20, %s135_s25  }
   0x9   : > { %p3745_p5 = por %p146_p2, %p145_p0  ;;  %p3749_p6 = por %p152_p4, %p151_p3 }
   0xa   : > { %p2675_p7 = scmp.ge.s32.totalorder %s3673_s21, 1  ;;  %p190_p8 = scmp.lt.s32.totalorder %s3673_s21, 3 }
   0xc   : > { %p191_p9 = pnand %p2675_p7, %p190_p8 }
   0xd   : > { %v3415_v0 = vld [vmem:[%s4628_s3 + $0x120] sm:$0xff] (!%p191_p9)   ;;  %v3419_v4 = vld [vmem:[%s4628_s3 + $0x128] sm:$0xff] (!%p191_p9)   ;;  %v3423_v8 = vld [vmem:[%s4628_s3 + $0x130] sm:$0xff] (!%p191_p9)   ;;  %p217_p10 = scmp.lt.s32.totalorder (!%p191_p9), %s3728_s22, 1  ;;  %v232_v22 = vlaneseq (!%p191_p9)  ;;  %v3675_v43 = vmov (!%p191_p9), 0   ;;  %vm585_vm0 = vcmask (!%p191_p9), 523264  }
   0xe   : > { %194 = sbr.rel (%p191_p9) target bundleno = 537 (0x219), region = 40  ;;  %v3416_v1 = vld [vmem:[%s4628_s3 + $0x40] sm:$0xff] (!%p191_p9)   ;;  %3221 = vmatprep.subr.bf16.mxu1 (!%p191_p9), %v3415_v0  ;;  %v3420_v5 = vld [vmem:[%s4628_s3 + $0x48] sm:$0xff] (!%p191_p9)   ;;  %v3424_v9 = vld [vmem:[%s4628_s3 + $0x50] sm:$0xff] (!%p191_p9)   ;;  %s215_s30 = sand.u32 (!%p191_p9), 1, %s3665_s19  }
   0xf   : > { %v3417_v2 = vld [vmem:[%s4628_s3 + $0xe0] sm:$0xff] (!%p191_p9)   ;;  %3243 = vmatprep.subr.bf16.mxu0 (!%p191_p9), %v3416_v1  ;;  %v3421_v6 = vld [vmem:[%s4628_s3 + $0xe8] sm:$0xff] (!%p191_p9)   ;;  %v3425_v10 = vld [vmem:[%s4628_s3 + $0xf0] sm:$0xff] (!%p191_p9)   ;;  %v3835_v27 = vshrl.u32 (!%p191_p9), %v232_v22, 7  ;;  %s3217_s8 = sshll.u32 (!%p191_p9), %s3728_s22, 4  ;;  %s216_s9 = scalar_lea.vmem (!%p191_p9), [#allocation2], %s215_s30 }
  0x10   : > { %v3418_v3 = vld [vmem:[%s4628_s3] sm:$0xff] (!%p191_p9)   ;;  %3222 = vmatpush3.bf16.msra.mxu1 (!%p191_p9), %v3417_v2  ;;  %v3422_v7 = vld [vmem:[%s4628_s3 + $0x8] sm:$0xff] (!%p191_p9)   ;;  %v3426_v11 = vld [vmem:[%s4628_s3 + $0x10] sm:$0xff] (!%p191_p9)   ;;  %s2617_s10 = sshll.u32 (!%p191_p9), %s216_s9, 4  ;;  %s4583_s13 = scalar_lea.hbm (!%p191_p9), %s4630_s5, %s3217_s8  ;;  %s4585_s10 = int_to_ptr.vmem [resolvable:$true] %s2617_s10 }
  0x11   : > { %3244 = vmatpush3.bf16.msra.mxu0 (!%p191_p9), %v3418_v3  ;;  %3223 = vmatprep.subr.bf16.mxu1 (!%p191_p9), %v3419_v4  ;;  %v3427_v12 = vld [vmem:[%s4628_s3 + $0x138] sm:$0xff] (!%p191_p9)   ;;  %v3431_v16 = vld [vmem:[%s4628_s3 + $0x140] sm:$0xff] (!%p191_p9)   ;;  %v3435_v20 = vld [vmem:[%s4628_s3 + $0x148] sm:$0xff] (!%p191_p9)   ;;  %v238_v32 = vsub.s32 (!%p191_p9), 1, %v3835_v27  ;;  %v234_v34 = vsub.s32 (!%p191_p9), 0, %v3835_v27  ;;  %s2605_s14 = scalar_lea.sflag (!%p191_p9), [#allocation3], %s215_s30 }
  0x12   : > { %3245 = vmatprep.subr.bf16.mxu0 (!%p191_p9), %v3420_v5  ;;  %v3428_v13 = vld [vmem:[%s4628_s3 + $0x58] sm:$0xff] (!%p191_p9)   ;;  %v3432_v17 = vld [vmem:[%s4628_s3 + $0x60] sm:$0xff] (!%p191_p9)   ;;  %v3436_v21 = vld [vmem:[%s4628_s3 + $0x68] sm:$0xff] (!%p191_p9)   ;;  %s3611_s15 = scalar_lea.vmem (!%p191_p9), %s4585_s10, 16 }
  0x13   : > { %v3429_v14 = vld [vmem:[%s4628_s3 + $0xf8] sm:$0xff] (!%p191_p9)   ;;  %v3433_v18 = vld [vmem:[%s4628_s3 + $0x100] sm:$0xff] (!%p191_p9)   ;;  %v3437_v23 = vld [vmem:[%s4628_s3 + $0x108] sm:$0xff] (!%p191_p9)   ;;  %p3612_p11 = scmp.ne.s32.totalorder (!%p191_p9), %s4585_s10, %s3611_s15 }
  0x14   : > { %3224 = vmatpush3.bf16.msra.mxu1 (!%p191_p9), %v3421_v6  ;;  %v3430_v15 = vld [vmem:[%s4628_s3 + $0x18] sm:$0xff] (!%p191_p9)   ;;  %v3434_v19 = vld [vmem:[%s4628_s3 + $0x20] sm:$0xff] (!%p191_p9)   ;;  %v3438_v24 = vld [vmem:[%s4628_s3 + $0x28] sm:$0xff] (!%p191_p9)  }
  0x15   : > { %3246 = vmatpush3.bf16.msra.mxu0 %v3422_v7  ;;  %3225 = vmatprep.subr.bf16.mxu1 %v3423_v8  ;;  %s218_s25 = scalar_select %p217_p10, %s3728_s22, 1  ;;  %v3439_v25 = vld [vmem:[%s4628_s3 + $0x150] sm:$0xff]   ;;  %v3443_v30 = vld [vmem:[%s4628_s3 + $0x158] sm:$0xff]   ;;  %v3865_v36 = vld [vmem:[%s4626_s1] sm:$0xf] }
  0x16   : > { %3247 = vmatprep.subr.bf16.mxu0 %v3424_v9  ;;  %v3440_v26 = vld [vmem:[%s4628_s3 + $0x70] sm:$0xff]   ;;  %v3444_v31 = vld [vmem:[%s4628_s3 + $0x78] sm:$0xff]   ;;  %v3870_v37 = vld [vmem:[%s4627_s2] sm:$0xf]  ;;  %v3874_v41 = vrot.slane %v3865_v36, %v238_v32  ;;  %v3884_v45 = vrot.slane %v3865_v36, %v234_v34  ;;  %p3613_p12 = pnand %p3612_p11, %p3745_p5  ;;  %s3676_s22 = smov [#allocation2]  }
  0x17   : > { %v3441_v28 = vld [vmem:[%s4628_s3 + $0x110] sm:$0xff]   ;;  %s3220_s12 = sshll.u32 %s218_s25, 4  ;;  %v3445_v33 = vld [vmem:[%s4628_s3 + $0x118] sm:$0xff]   ;;  %v3877_v42 = vrot.slane %v3870_v37, %v238_v32  ;;  %v3447_v44 = vld [vmem:[%s4628_s3 + $0x200] sm:$0xff]   ;;  %v3887_v46 = vrot.slane %v3870_v37, %v234_v34  ;;  %s3615_s16 = sshll.u32 %s3676_s22, 4  ;;  %s3616_s16 = int_to_ptr.vmem [resolvable:$false] %s3615_s16 }
  0x18   : > { %3226 = vmatpush3.bf16.msra.mxu1 %v3425_v10  ;;  %v3442_v29 = vld [vmem:[%s4628_s3 + $0x30] sm:$0xff]   ;;  %s3852_s6 = scalar_lea.vmem %s4625_s0, %s3220_s12  ;;  %v3446_v35 = vld [vmem:[%s4628_s3 + $0x38] sm:$0xff]   ;;  %v3449_v54 = vld [vmem:[%s4628_s3 + $0x1c0] sm:$0xff]   ;;  %p3614_p13 = pneg %p3613_p12 }
  0x19   : > { %3248 = vmatpush3.bf16.msra.mxu0 %v3426_v11  ;;  %3227 = vmatprep.subr.bf16.mxu1 %v3427_v12  ;;  %v225_v38 = vld [vmem:[%s3852_s6] sm:$0x11]  ;;  %v3450_v56 = vld [vmem:[%s4628_s3 + $0x208] sm:$0xff]   ;;  %v3453_v61 = vld [vmem:[%s4628_s3 + $0x210] sm:$0xff]   ;;  %s3617_s17 = scalar_lea.vmem %s3616_s16, 32  ;;  %p3618_p0 = scmp.lt.s32.totalorder %s4585_s10, %s3616_s16 }
  0x1a   : > { %3249 = vmatprep.subr.bf16.mxu0 %v3428_v13  ;;  %v227_v39 = vunpack.c.l.bf16 %v225_v38  ;;  %v228_v40 = vunpack.c.h.bf16 %v225_v38  ;;  %v3448_v58 = vld [vmem:[%s4628_s3 + $0x160] sm:$0xff]   ;;  %v3452_v60 = vld [vmem:[%s4628_s3 + $0x1c8] sm:$0xff]   ;;  %v3455_v63 = vld [vmem:[%s4628_s3 + $0x1d0] sm:$0xff]   ;;  %v246_v13 = vsub.s32 3, %v3835_v27  ;;  %p3619_p1 = scmp.lt.s32.totalorder %s3617_s17, %s3611_s15 }
  0x1b   : > { %v3451_v62 = vld [vmem:[%s4628_s3 + $0x168] sm:$0xff]   ;;  %v3456_v0 = vld [vmem:[%s4628_s3 + $0x218] sm:$0xff]   ;;  %v3454_v1 = vld [vmem:[%s4628_s3 + $0x170] sm:$0xff]  }
  0x1c   : > { %3228 = vmatpush3.bf16.msra.mxu1 %v3429_v14  ;;  %v253_v47 = vmul.f32 %v3874_v41, %v228_v40  ;;  %v252_v48 = vmul.f32 %v3884_v45, %v227_v39  ;;  %v3458_v2 = vld [vmem:[%s4628_s3 + $0x1d8] sm:$0xff]   ;;  %v3459_v3 = vld [vmem:[%s4628_s3 + $0x220] sm:$0xff]   ;;  %v3462_v7 = vld [vmem:[%s4628_s3 + $0x228] sm:$0xff]   ;;  %v3962_v22 = vrot.slane %v3865_v36, %v246_v13  ;;  %p3620_p2 = por %p3619_p1, %p3618_p0 }
  0x1d   : > { %3250 = vmatpush3.bf16.msra.mxu0 %v3430_v15  ;;  %3229 = vmatprep.subr.bf16.mxu1 %v3431_v16  ;;  %v3457_v4 = vld [vmem:[%s4628_s3 + $0x178] sm:$0xff]   ;;  %v3461_v5 = vld [vmem:[%s4628_s3 + $0x1e0] sm:$0xff]   ;;  %v3464_v14 = vld [vmem:[%s4628_s3 + $0x1e8] sm:$0xff]  }
  0x1e   : > { %3251 = vmatprep.subr.bf16.mxu0 %v3432_v17  ;;  %v278_v49 = vadd.f32 %v3877_v42, %v253_v47  ;;  %v277_v50 = vadd.f32 %v3887_v46, %v252_v48  ;;  %v919_v6 = vld [vmem:[%s3852_s6] sm:$0x22]  ;;  %v3465_v15 = vld [vmem:[%s4628_s3 + $0x230] sm:$0xff]   ;;  %v3469_v39 = vld [vmem:[%s4628_s3 + $0x198] sm:$0xff]   ;;  %p3621_p3 = pnand %p3620_p2, %p3614_p13 }
  0x1f   : > { %v921_v8 = vunpack.c.l.bf16 %v919_v6  ;;  %v922_v9 = vunpack.c.h.bf16 %v919_v6  ;;  %v3460_v10 = vld [vmem:[%s4628_s3 + $0x180] sm:$0xff]  }
  0x20   : > { %3230 = vmatpush3.bf16.msra.mxu1 %v3433_v18  ;;  %v282_v51 = vmax.f32 %v278_v49, 0.0  ;;  %v281_v52 = vmax.f32 %v277_v50, 0.0  ;;  %v3463_v18 = vld [vmem:[%s4628_s3 + $0x188] sm:$0xff]   ;;  %v3471_v50 = vld [vmem:[%s4628_s3 + $0x1a0] sm:$0xff]  }
  0x21   : > { %3252 = vmatpush3.bf16.msra.mxu0 %v3434_v19  ;;  %3231 = vmatprep.subr.bf16.mxu1 %v3435_v20  ;;  %v926_v11 = vmul.f32 %v922_v9, %v3874_v41  ;;  %v925_v12 = vmul.f32 %v921_v8, %v3884_v45  ;;  %v3467_v19 = vld [vmem:[%s4628_s3 + $0x1f0] sm:$0xff]  }
  0x22   : > { %3253 = vmatprep.subr.bf16.mxu0 %v3436_v21  ;;  %v286_v53 = vpack.c.bf16 %v282_v51, %v282_v51  ;;  %v285_v55 = vpack.c.bf16 %v281_v52, %v281_v52  ;;  %v3474_v51 = vld [vmem:[%s4628_s3 + $0x248] sm:$0xff]   ;;  %v3484_v8 = vld [vmem:[%s4628_s3 + $0x270] sm:$0xff]  }
  0x23   : > { %v930_v16 = vadd.f32 %v926_v11, %v3877_v42  ;;  %v929_v17 = vadd.f32 %v925_v12, %v3887_v46  ;;  %v3483_v9 = vld [vmem:[%s4628_s3 + $0x90] sm:$0xff]   ;;  %v3486_v11 = vld [vmem:[%s4628_s3 + $0x278] sm:$0xff]  }
  0x24   : > { %3232 = vmatpush3.bf16.msra.mxu1 %v3437_v23  ;;  %v406_v57 = vshrl.u32 %v286_v53, 16  ;;  %871 = vmatprep.mubr.bf16.mxu0 %v286_v53  ;;  %v403_v59 = vshrl.u32 %v285_v55, 16  ;;  %v226_v23 = vld [vmem:[%s3852_s6 + $0x8] sm:$0x11]  ;;  %v3485_v12 = vld [vmem:[%s4628_s3 + $0x98] sm:$0xff]  }
  0x25   : > { %3254 = vmatpush3.bf16.msra.mxu0 %v3438_v24  ;;  %3233 = vmatprep.subr.bf16.mxu1 %v3439_v25  ;;  %v934_v20 = vmax.f32 %v930_v16, 0.0  ;;  %v933_v21 = vmax.f32 %v929_v17, 0.0  ;;  %v3468_v24 = vld [vmem:[%s4628_s3 + $0x238] sm:$0xff]   ;;  %v3473_v53 = vld [vmem:[%s4628_s3 + $0x1a8] sm:$0xff]  }
  0x26   : > { %3255 = vmatprep.subr.bf16.mxu0 %v3440_v26  ;;  %621 = vmatprep.mubr.bf16.mxu1 %v406_v57  ;;  %v230_v26 = vunpack.c.h.bf16 %v226_v23  ;;  %v3490_v17 = vld [vmem:[%s4628_s3 + $0x288] sm:$0xff]  }
  0x27   : > { %v3968_v25 = vpack.c.bf16 %v934_v20, %v934_v20 }
  0x28   : > { %3234 = vmatpush3.bf16.msra.mxu1 %v3441_v28  ;;  %v3971_v28 = vrot.slane %v3870_v37, %v246_v13  ;;  %v255_v34 = vmul.f32 %v3962_v22, %v230_v26  ;;  %v3491_v26 = vld [vmem:[%s4628_s3 + $0xb0] sm:$0xff]  }
  0x29   : > { %3256 = vmatpush3.bf16.msra.mxu0 %v3442_v29  ;;  %3235 = vmatprep.subr.bf16.mxu1 %v3443_v30  ;;  %v242_v29 = vsub.s32 2, %v3835_v27  ;;  %v3466_v30 = vld [vmem:[%s4628_s3 + $0x190] sm:$0xff]   ;;  %v1003_v32 = vrot.slane %v3968_v25, 1 }
  0x2a   : > { %3257 = vmatprep.subr.bf16.mxu0 %v3444_v31  ;;  %v3470_v31 = vld [vmem:[%s4628_s3 + $0x1f8] sm:$0xff]   ;;  %v280_v27 = vadd.f32 %v3971_v28, %v255_v34  ;;  %v3495_v34 = vld [vmem:[%s4628_s3 + $0x3c0] sm:$0xff]  }
  0x2b   : > { %v3987_v38 = vrot.slane %v3865_v36, %v242_v29  ;;  %v4000_v49 = vrot.slane %v3870_v37, %v242_v29 }
  0x2c   : > { %3236 = vmatpush3.bf16.msra.mxu1 %v3445_v33  ;;  %v3982_v33 = vpack.c.bf16 %v933_v21, %v933_v21  ;;  %v284_v47 = vmax.f32 %v280_v27, 0.0 }
  0x2d   : > { %3258 = vmatpush3.bf16.msra.mxu0 %v3446_v35  ;;  %629 = vmatprep.subr.bf16.mxu1 %v3675_v43  ;;  %v229_v35 = vunpack.c.l.bf16 %v226_v23  ;;  %v3492_v23 = vld [vmem:[%s4628_s3 + $0x290] sm:$0xff]  }
  0x2e   : > { %3265 = vmatprep.subr.bf16.mxu0 %v3447_v44  ;;  %v1002_v40 = vrot.slane %v3982_v33, 1  ;;  %v3472_v44 = vld [vmem:[%s4628_s3 + $0x240] sm:$0xff]   ;;  %v288_v48 = vpack.c.bf16 %v284_v47, %v284_v47  ;;  %v3498_v47 = vld [vmem:[%s4628_s3 + $0x3c8] sm:$0xff]  }
  0x2f   : > { %622 = vmatmul.mubr.bf16.vlgmr.msra.gmra.mrb[0].mxu1 %v403_v59  ;;  %v254_v36 = vmul.f32 %v3987_v38, %v229_v35 }
  0x30   : > { %872 = vmatmul.mubr.bf16.vlgmr.msra.gmra.mrb[0].mxu0 %v285_v55  ;;  %630 = vmatpush1.bf16.msra.mxu1 %v3448_v58  ;;  %v412_v52 = vshrl.u32 %v288_v48, 16  ;;  %v920_v55 = vld [vmem:[%s3852_s6 + $0x8] sm:$0x22]  ;;  %v3475_v58 = vld [vmem:[%s4628_s3 + $0x1b0] sm:$0xff]  }
  0x31   : > { %3266 = vmatpush3.bf16.msra.mxu0 %v3449_v54  ;;  %631 = vmatprep.subr.bf16.mxu1 %v3675_v43  ;;  %v279_v37 = vadd.f32 %v4000_v49, %v254_v36  ;;  %v3476_v54 = vld [vmem:[%s4628_s3 + $0x250] sm:$0xff]   ;;  %v924_v57 = vunpack.c.h.bf16 %v920_v55  ;;  %v3500_v36 = vld [vmem:[%s4628_s3 + $0x388] sm:$0xff]  }
  0x32   : > { %3267 = vmatprep.subr.bf16.mxu0 %v3450_v56  ;;  %1212 = vmatprep.mubr.bf16.mxu0 %v1003_v32  ;;  %v3493_v32 = vld [vmem:[%s4628_s3 + $0xb8] sm:$0xff]  }
  0x33   : > { %2762 = vmatprep.mubr.msk.bf16.mxu1 %vm585_vm0, %v412_v52  ;;  %v283_v56 = vmax.f32 %v279_v37, 0.0  ;;  %v928_v59 = vmul.f32 %v924_v57, %v3962_v22  ;;  %v3503_v52 = vld [vmem:[%s4628_s3 + $0x390] sm:$0xff]   ;;  %v3504_v37 = vld [vmem:[%s4628_s3 + $0x3d8] sm:$0xff]  }
  0x34   : > { %632 = vmatpush1.bf16.msra.mxu1 %v3451_v62  ;;  %v3505_v57 = vld [vmem:[%s4628_s3 + $0xd8] sm:$0xff]  }
  0x35   : > { %3268 = vmatpush3.bf16.msra.mxu0 %v3452_v60  ;;  %633 = vmatprep.subr.bf16.mxu1 %v3675_v43  ;;  %v3478_v60 = vld [vmem:[%s4628_s3 + $0x258] sm:$0xff]   ;;  %v932_v62 = vadd.f32 %v928_v59, %v3971_v28  ;;  %v3507_v59 = vld [vmem:[%s4628_s3 + $0x2e0] sm:$0xff]  }
  0x36   : > { %3269 = vmatprep.subr.bf16.mxu0 %v3453_v61  ;;  %v4030_v61 = vpack.c.bf16 %v283_v56, %v283_v56  ;;  %v3508_v56 = vld [vmem:[%s4628_s3 + $0x3e0] sm:$0xff]  }
  0x38   : > { %634 = vmatpush1.bf16.msra.mxu1 %v3454_v1  ;;  %v3480_v1 = vld [vmem:[%s4628_s3 + $0x260] sm:$0xff]  }
  0x39   : > { %3270 = vmatpush3.bf16.msra.mxu0 %v3455_v63  ;;  %635 = vmatprep.subr.bf16.mxu1 %v3675_v43  ;;  %v3477_v63 = vld [vmem:[%s4628_s3 + $0x1b8] sm:$0xff]  }
  0x3a   : > { %3271 = vmatprep.subr.bf16.mxu0 %v3456_v0  ;;  %v936_v0 = vmax.f32 %v932_v62, 0.0  ;;  %v3510_v62 = vld [vmem:[%s4628_s3 + $0x3a0] sm:$0xff]  }
  0x3c   : > { %636 = vmatpush1.bf16.msra.mxu1 %v3457_v4  ;;  %v3479_v4 = vld [vmem:[%s4628_s3 + $0x80] sm:$0xff]  }
  0x3d   : > { %3272 = vmatpush3.bf16.msra.mxu0 %v3458_v2  ;;  %637 = vmatprep.subr.bf16.mxu1 %v3675_v43  ;;  %v409_v2 = vshrl.u32 %v4030_v61, 16 }
  0x3e   : > { %3273 = vmatprep.subr.bf16.mxu0 %v3459_v3  ;;  %v4042_v3 = vpack.c.bf16 %v936_v0, %v936_v0  ;;  %v4173_v0 = vld [vmem:[%s3852_s6 + $0x8] sm:$0x44] }
  0x40   : > { %638 = vmatpush1.bf16.msra.mxu1 %v3460_v10  ;;  %v1005_v6 = vrot.slane %v4042_v3, 1  ;;  %v923_v10 = vunpack.c.l.bf16 %v920_v55  ;;  %v3506_v55 = vld [vmem:[%s4628_s3 + $0x398] sm:$0xff]  }
  0x41   : > { %3274 = vmatpush3.bf16.msra.mxu0 %v3461_v5  ;;  %639 = vmatprep.subr.bf16.mxu1 %v3675_v43  ;;  %v3482_v5 = vld [vmem:[%s4628_s3 + $0x268] sm:$0xff]  }
  0x42   : > { %3275 = vmatprep.subr.bf16.mxu0 %v3462_v7  ;;  %v3481_v7 = vld [vmem:[%s4628_s3 + $0x88] sm:$0xff]   ;;  %v927_v13 = vmul.f32 %v923_v10, %v3987_v38 }
  0x44   : > { %640 = vmatpush1.bf16.msra.mxu1 %v3463_v18  ;;  %v931_v16 = vadd.f32 %v927_v13, %v4000_v49  ;;  %v3489_v18 = vld [vmem:[%s4628_s3 + $0xa8] sm:$0xff]  }
  0x45   : > { %3276 = vmatpush3.bf16.msra.mxu0 %v3464_v14  ;;  %641 = vmatprep.subr.bf16.mxu1 %v3675_v43  ;;  %v3488_v14 = vld [vmem:[%s4628_s3 + $0x280] sm:$0xff]  }
  0x46   : > { %3277 = vmatprep.subr.bf16.mxu0 %v3465_v15  ;;  %v3487_v15 = vld [vmem:[%s4628_s3 + $0xa0] sm:$0xff]   ;;  %v935_v20 = vmax.f32 %v931_v16, 0.0  ;;  %v3519_v16 = vld [vmem:[%s4628_s3 + $0x2f8] sm:$0xff]  }
  0x48   : > { %642 = vmatpush1.bf16.msra.mxu1 %v3466_v30  ;;  %v4103_v29 = vpack.c.bf16 %v935_v20, %v935_v20  ;;  %v3521_v20 = vld [vmem:[%s4628_s3 + $0x2b8] sm:$0xff]  }
  0x49   : > { %3278 = vmatpush3.bf16.msra.mxu0 %v3467_v19  ;;  %643 = vmatprep.subr.bf16.mxu1 %v3675_v43  ;;  %v1589_v19 = vld [vmem:[%s3852_s6] sm:$0x44] }
  0x4a   : > { %3279 = vmatprep.subr.bf16.mxu0 %v3468_v24  ;;  %v1592_v21 = vunpack.c.h.bf16 %v1589_v19  ;;  %v1004_v35 = vrot.slane %v4103_v29, 1 }
  0x4c   : > { %644 = vmatpush1.bf16.msra.mxu1 %v3469_v39  ;;  %v1596_v24 = vmul.f32 %v1592_v21, %v3874_v41  ;;  %v3523_v21 = vld [vmem:[%s4628_s3 + $0x300] sm:$0xff]  }
  0x4d   : > { %3280 = vmatpush3.bf16.msra.mxu0 %v3470_v31  ;;  %645 = vmatprep.subr.bf16.mxu1 %v3675_v43  ;;  %v3494_v31 = vld [vmem:[%s4628_s3 + $0x298] sm:$0xff]  }
  0x4e   : > { %1220 = vmatprep.subr.bf16.mxu0 %v3675_v43  ;;  %v1600_v30 = vadd.f32 %v1596_v24, %v3877_v42  ;;  %v3525_v24 = vld [vmem:[%s4628_s3 + $0x400] sm:$0xff]  }
  0x50   : > { %1213 = vmatmul.mubr.bf16.vlgmr.msra.gmra.mrb[4].mxu0 %v1002_v40  ;;  %646 = vmatpush1.bf16.msra.mxu1 %v3471_v50  ;;  %v1604_v27 = vmax.f32 %v1600_v30, 0.0  ;;  %v3497_v40 = vld [vmem:[%s4628_s3 + $0x380] sm:$0xff]   ;;  %v3501_v50 = vld [vmem:[%s4628_s3 + $0x3d0] sm:$0xff]  }
  0x51   : > { %1221 = vmatpush1.bf16.msra.mxu0 %v3472_v44  ;;  %647 = vmatprep.subr.bf16.mxu1 %v3675_v43  ;;  %v3496_v44 = vld [vmem:[%s4628_s3 + $0xc0] sm:$0xff]  }
  0x52   : > { %1222 = vmatprep.subr.bf16.mxu0 %v3675_v43  ;;  %2876 = vmatprep.mubr.msk.bf16.mxu0 %vm585_vm0, %v1005_v6  ;;  %v4118_v39 = vpack.c.bf16 %v1604_v27, %v1604_v27  ;;  %v3514_v6 = vld [vmem:[%s4628_s3 + $0x3a8] sm:$0xff]   ;;  %v3524_v30 = vld [vmem:[%s4628_s3 + $0x2c0] sm:$0xff]   ;;  %v3529_v27 = vld [vmem:[%s4628_s3 + $0x310] sm:$0xff]  }
  0x54   : > { %648 = vmatpush1.bf16.msra.mxu1 %v3473_v53  ;;  %v3502_v53 = vld [vmem:[%s4628_s3 + $0xd0] sm:$0xff]  }
  0x55   : > { %1223 = vmatpush1.bf16.msra.mxu0 %v3474_v51  ;;  %649 = vmatprep.subr.bf16.mxu1 %v3675_v43  ;;  %v3499_v51 = vld [vmem:[%s4628_s3 + $0xc8] sm:$0xff]  }
  0x56   : > { %1224 = vmatprep.subr.bf16.mxu0 %v3675_v43 }
  0x58   : > { %650 = vmatpush1.bf16.msra.mxu1 %v3475_v58  ;;  %v1323_v58 = vshrl.u32 %v3968_v25, 16  ;;  %v3509_v25 = vld [vmem:[%s4628_s3 + $0x2a0] sm:$0xff]  }
  0x59   : > { %1225 = vmatpush1.bf16.msra.mxu0 %v3476_v54  ;;  %651 = vmatprep.subr.bf16.mxu1 %v3675_v43  ;;  %v1591_v54 = vunpack.c.l.bf16 %v1589_v19 }
  0x5a   : > { %1226 = vmatprep.subr.bf16.mxu0 %v3675_v43 }
  0x5c   : > { %652 = vmatpush1.bf16.msra.mxu1 %v3477_v63  ;;  %v3512_v63 = vld [vmem:[%s4628_s3 + $0x3e8] sm:$0xff]  }
  0x5d   : > { %1227 = vmatpush1.bf16.msra.mxu0 %v3478_v60  ;;  %879 = vmatprep.subr.bf16.mxu1 %v3675_v43  ;;  %v1595_v60 = vmul.f32 %v1591_v54, %v3884_v45  ;;  %v3540_v54 = vld [vmem:[%s4628_s3 + $0x430] sm:$0xff]  }
  0x5e   : > { %1228 = vmatprep.subr.bf16.mxu0 %v3675_v43 }
  0x5f   : > { %662 = vmatmul.mubr.bf16.vlgmr.msra.gmra.mrb[4].mxu1 %v409_v2  ;;  %v1594_v2 = vunpack.c.h.bf16 %v4173_v0 }
  0x60   : > { %880 = vmatpush1.bf16.msra.mxu1 %v3479_v4  ;;  %2791 = vmatprep.mubr.msk.bf16.mxu1 %vm585_vm0, %v288_v48  ;;  %v1673_v48 = vrot.slane %v4118_v39, 2  ;;  %v3511_v4 = vld [vmem:[%s4628_s3 + $0x2e8] sm:$0xff]  }
  0x61   : > { %1229 = vmatpush1.bf16.msra.mxu0 %v3480_v1  ;;  %881 = vmatprep.subr.bf16.mxu1 %v3675_v43  ;;  %v1325_v1 = vrot.slane %v1323_v58, 1  ;;  %v3542_v58 = vld [vmem:[%s4628_s3 + $0x438] sm:$0xff]  }
  0x62   : > { %1230 = vmatprep.subr.bf16.mxu0 %v3675_v43 }
  0x64   : > { %882 = vmatpush1.bf16.msra.mxu1 %v3481_v7  ;;  %v1598_v7 = vmul.f32 %v1594_v2, %v3962_v22  ;;  %v3546_v2 = vld [vmem:[%s4628_s3 + $0x448] sm:$0xff]  }
  0x65   : > { %1231 = vmatpush1.bf16.msra.mxu0 %v3482_v5  ;;  %883 = vmatprep.subr.bf16.mxu1 %v3675_v43  ;;  %v1599_v5 = vadd.f32 %v1595_v60, %v3887_v46  ;;  %v3541_v60 = vld [vmem:[%s4628_s3 + $0x338] sm:$0xff]  }
  0x66   : > { %1232 = vmatprep.subr.bf16.mxu0 %v3675_v43  ;;  %v1602_v10 = vadd.f32 %v1598_v7, %v3971_v28 }
  0x68   : > { %884 = vmatpush1.bf16.msra.mxu1 %v3483_v9  ;;  %v3513_v9 = vld [vmem:[%s4628_s3 + $0x2a8] sm:$0xff]   ;;  %v1606_v13 = vmax.f32 %v1602_v10, 0.0 }
  0x69   : > { %1233 = vmatpush1.bf16.msra.mxu0 %v3484_v8  ;;  %885 = vmatprep.subr.bf16.mxu1 %v3675_v43  ;;  %v3516_v8 = vld [vmem:[%s4628_s3 + $0x3f0] sm:$0xff]  }
  0x6a   : > { %1234 = vmatprep.subr.bf16.mxu0 %v3675_v43  ;;  %v4215_v19 = vpack.c.bf16 %v1606_v13, %v1606_v13  ;;  %v3553_v13 = vld [vmem:[%s4628_s3 + $0x540] sm:$0xff]  }
  0x6c   : > { %886 = vmatpush1.bf16.msra.mxu1 %v3485_v12  ;;  %v1603_v12 = vmax.f32 %v1599_v5, 0.0 }
  0x6d   : > { %1235 = vmatpush1.bf16.msra.mxu0 %v3486_v11  ;;  %887 = vmatprep.subr.bf16.mxu1 %v3675_v43  ;;  %v3515_v11 = vld [vmem:[%s4628_s3 + $0x2f0] sm:$0xff]  }
  0x6e   : > { %1236 = vmatprep.subr.bf16.mxu0 %v3675_v43 }
  0x70   : > { %888 = vmatpush1.bf16.msra.mxu1 %v3487_v15  ;;  %v3517_v15 = vld [vmem:[%s4628_s3 + $0x2b0] sm:$0xff]  }
  0x71   : > { %1237 = vmatpush1.bf16.msra.mxu0 %v3488_v14  ;;  %889 = vmatprep.subr.bf16.mxu1 %v3675_v43  ;;  %v3520_v14 = vld [vmem:[%s4628_s3 + $0x3f8] sm:$0xff]  }
  0x72   : > { %1238 = vmatprep.subr.bf16.mxu0 %v3675_v43 }
  0x74   : > { %890 = vmatpush1.bf16.msra.mxu1 %v3489_v18  ;;  %v3522_v18 = vld [vmem:[%s4628_s3 + $0x3b8] sm:$0xff]  }
  0x75   : > { %1239 = vmatpush1.bf16.msra.mxu0 %v3490_v17  ;;  %891 = vmatprep.subr.bf16.mxu1 %v3675_v43  ;;  %v4210_v17 = vpack.c.bf16 %v1603_v12, %v1603_v12  ;;  %v3549_v12 = vld [vmem:[%s4628_s3 + $0x358] sm:$0xff]  }
  0x76   : > { %1240 = vmatprep.subr.bf16.mxu0 %v3675_v43 }
  0x78   : > { %892 = vmatpush1.bf16.msra.mxu1 %v3491_v26  ;;  %v1675_v26 = vrot.slane %v4215_v19, 2 }
  0x79   : > { %1241 = vmatpush1.bf16.msra.mxu0 %v3492_v23  ;;  %893 = vmatprep.subr.bf16.mxu1 %v3675_v43  ;;  %v1672_v23 = vrot.slane %v4210_v17, 2 }
  0x7a   : > { %1242 = vmatprep.subr.bf16.mxu0 %v3675_v43 }
  0x7c   : > { %894 = vmatpush1.bf16.msra.mxu1 %v3493_v32  ;;  %v3528_v32 = vld [vmem:[%s4628_s3 + $0x408] sm:$0xff]  }
  0x7d   : > { %1243 = vmatpush1.bf16.msra.mxu0 %v3494_v31  ;;  %895 = vmatprep.subr.bf16.mxu1 %v3675_v43  ;;  %v3526_v31 = vld [vmem:[%s4628_s3 + $0x308] sm:$0xff]  }
  0x7e   : > { %3309 = vmatprep.subr.bf16.mxu0 %v3495_v34  ;;  %v3527_v34 = vld [vmem:[%s4628_s3 + $0x2c8] sm:$0xff]  }
  0x80   : > { %1253 = vmatmul.mubr.bf16.vlgmr.msra.gmra.mrb[8].mxu0 %v1004_v35  ;;  %896 = vmatpush1.bf16.msra.mxu1 %v3496_v44  ;;  %v3531_v35 = vld [vmem:[%s4628_s3 + $0x410] sm:$0xff]   ;;  %v3532_v44 = vld [vmem:[%s4628_s3 + $0x318] sm:$0xff]  }
  0x81   : > { %3310 = vmatpush3.bf16.msra.mxu0 %v3497_v40  ;;  %1882 = vmatprep.mubr.bf16.mxu0 %v1673_v48  ;;  %v3530_v40 = vld [vmem:[%s4628_s3 + $0x2d0] sm:$0xff]   ;;  %v1319_v48 = vshrl.u32 %v3982_v33, 16  ;;  %v3535_v33 = vld [vmem:[%s4628_s3 + $0x320] sm:$0xff]  }
  0x82   : > { %3311 = vmatprep.subr.bf16.mxu0 %v3498_v47  ;;  %897 = vmatprep.subr.bf16.mxu1 %v3675_v43  ;;  %v3534_v47 = vld [vmem:[%s4628_s3 + $0x418] sm:$0xff]  }
  0x84   : > { %898 = vmatpush1.bf16.msra.mxu1 %v3499_v51  ;;  %v3536_v51 = vld [vmem:[%s4628_s3 + $0x420] sm:$0xff]  }
  0x85   : > { %3312 = vmatpush3.bf16.msra.mxu0 %v3500_v36  ;;  %899 = vmatprep.subr.bf16.mxu1 %v3675_v43  ;;  %v3533_v36 = vld [vmem:[%s4628_s3 + $0x2d8] sm:$0xff]  }
  0x86   : > { %3313 = vmatprep.subr.bf16.mxu0 %v3501_v50  ;;  %v1331_v50 = vshrl.u32 %v4042_v3, 16  ;;  %v3538_v3 = vld [vmem:[%s4628_s3 + $0x428] sm:$0xff]  }
  0x88   : > { %900 = vmatpush1.bf16.msra.mxu1 %v3502_v53  ;;  %v3537_v53 = vld [vmem:[%s4628_s3 + $0x328] sm:$0xff]  }
  0x89   : > { %3314 = vmatpush3.bf16.msra.mxu0 %v3503_v52  ;;  %901 = vmatprep.subr.bf16.mxu1 %v3675_v43  ;;  %v1321_v52 = vrot.slane %v1319_v48, 1 }
  0x8a   : > { %3315 = vmatprep.subr.bf16.mxu0 %v3504_v37  ;;  %v1333_v37 = vrot.slane %v1331_v50, 1 }
  0x8c   : > { %902 = vmatpush1.bf16.msra.mxu1 %v3505_v57  ;;  %v1593_v57 = vunpack.c.l.bf16 %v4173_v0 }
  0x8d   : > { %3316 = vmatpush3.bf16.msra.mxu0 %v3506_v55  ;;  %3287 = vmatprep.subr.bf16.mxu1 %v3507_v59  ;;  %v4287_v55 = vld [vmem:[%s3852_s6] sm:$0x88] }
  0x8e   : > { %3317 = vmatprep.subr.bf16.mxu0 %v3508_v56  ;;  %v3539_v56 = vld [vmem:[%s4628_s3 + $0x330] sm:$0xff]   ;;  %v2262_v59 = vunpack.c.h.bf16 %v4287_v55 }
  0x8f   : > { %912 = vmatmul.mubr.bf16.vlgmr.msra.gmra.mrb[8].mxu1 %v4030_v61  ;;  %v3518_v61 = vld [vmem:[%s4628_s3 + $0x3b0] sm:$0xff]  }
  0x90   : > { %3288 = vmatpush3.bf16.msra.mxu1 %v3509_v25  ;;  %1540 = vmatprep.mubr.bf16.mxu1 %v1325_v1  ;;  %v2266_v0 = vmul.f32 %v2262_v59, %v3874_v41  ;;  %v3543_v25 = vld [vmem:[%s4628_s3 + $0x340] sm:$0xff]   ;;  %v3545_v41 = vld [vmem:[%s4628_s3 + $0x348] sm:$0xff]  }
  0x91   : > { %3318 = vmatpush3.bf16.msra.mxu0 %v3510_v62  ;;  %3289 = vmatprep.subr.bf16.mxu1 %v3511_v4  ;;  %v1597_v62 = vmul.f32 %v1593_v57, %v3987_v38  ;;  %v3573_v57 = vld [vmem:[%s4628_s3 + $0x470] sm:$0xff]  }
  0x92   : > { %3319 = vmatprep.subr.bf16.mxu0 %v3512_v63  ;;  %v3544_v63 = vld [vmem:[%s4628_s3 + $0x440] sm:$0xff]   ;;  %v2270_v4 = vadd.f32 %v2266_v0, %v3877_v42  ;;  %v3547_v42 = vld [vmem:[%s4628_s3 + $0x350] sm:$0xff]  }
  0x93   : > { %v1601_v1 = vadd.f32 %v1597_v62, %v4000_v49  ;;  %v3579_v0 = vld [vmem:[%s4628_s3 + $0x4c0] sm:$0xff]  }
  0x94   : > { %3290 = vmatpush3.bf16.msra.mxu1 %v3513_v9  ;;  %v2274_v7 = vmax.f32 %v2270_v4, 0.0  ;;  %v3550_v9 = vld [vmem:[%s4628_s3 + $0x458] sm:$0xff]   ;;  %v3580_v4 = vld [vmem:[%s4628_s3 + $0x480] sm:$0xff]  }
  0x95   : > { %3320 = vmatpush3.bf16.msra.mxu0 %v3514_v6  ;;  %3291 = vmatprep.subr.bf16.mxu1 %v3515_v11  ;;  %v1605_v5 = vmax.f32 %v1601_v1, 0.0  ;;  %v3548_v6 = vld [vmem:[%s4628_s3 + $0x450] sm:$0xff]   ;;  %v3551_v11 = vld [vmem:[%s4628_s3 + $0x580] sm:$0xff]  }
  0x96   : > { %3321 = vmatprep.subr.bf16.mxu0 %v3516_v8  ;;  %v2278_v10 = vpack.c.bf16 %v2274_v7, %v2274_v7  ;;  %v3581_v1 = vld [vmem:[%s4628_s3 + $0x5c0] sm:$0xff]   ;;  %v3585_v7 = vld [vmem:[%s4628_s3 + $0x4d0] sm:$0xff]  }
  0x97   : > { %v4331_v8 = vpack.c.bf16 %v1605_v5, %v1605_v5  ;;  %v3584_v5 = vld [vmem:[%s4628_s3 + $0x5c8] sm:$0xff]  }
  0x98   : > { %3292 = vmatpush3.bf16.msra.mxu1 %v3517_v15  ;;  %v3554_v15 = vld [vmem:[%s4628_s3 + $0x588] sm:$0xff]  }
  0x99   : > { %3322 = vmatpush3.bf16.msra.mxu0 %v3518_v61  ;;  %3293 = vmatprep.subr.bf16.mxu1 %v3519_v16  ;;  %v1674_v61 = vrot.slane %v4331_v8, 2  ;;  %v3552_v16 = vld [vmem:[%s4628_s3 + $0x360] sm:$0xff]  }
  0x9a   : > { %3323 = vmatprep.subr.bf16.mxu0 %v3520_v14  ;;  %v2343_v14 = vrot.slane %v2278_v10, 3  ;;  %v3588_v10 = vld [vmem:[%s4628_s3 + $0x4d8] sm:$0xff]  }
  0x9c   : > { %3294 = vmatpush3.bf16.msra.mxu1 %v3521_v20  ;;  %v3557_v20 = vld [vmem:[%s4628_s3 + $0x590] sm:$0xff]  }
  0x9d   : > { %3324 = vmatpush3.bf16.msra.mxu0 %v3522_v18  ;;  %3295 = vmatprep.subr.bf16.mxu1 %v3523_v21  ;;  %v3556_v18 = vld [vmem:[%s4628_s3 + $0x548] sm:$0xff]  }
  0x9e   : > { %1890 = vmatprep.subr.bf16.mxu0 %v3675_v43  ;;  %v3555_v21 = vld [vmem:[%s4628_s3 + $0x368] sm:$0xff]  }
  0xa0   : > { %1883 = vmatmul.mubr.bf16.vlgmr.msra.gmra.mrb[12].mxu0 %v1672_v23  ;;  %3296 = vmatpush3.bf16.msra.mxu1 %v3524_v30  ;;  %v3559_v23 = vld [vmem:[%s4628_s3 + $0x550] sm:$0xff]  }
  0xa1   : > { %1891 = vmatpush1.bf16.msra.mxu0 %v3525_v24  ;;  %3046 = vmatprep.mubr.msk.bf16.mxu0 %vm585_vm0, %v1675_v26  ;;  %v3560_v24 = vld [vmem:[%s4628_s3 + $0x598] sm:$0xff]   ;;  %v4372_v26 = vld [vmem:[%s3852_s6 + $0x8] sm:$0x88]  ;;  %v3558_v30 = vld [vmem:[%s4628_s3 + $0x370] sm:$0xff]  }
  0xa2   : > { %1892 = vmatprep.subr.bf16.mxu0 %v3675_v43  ;;  %3297 = vmatprep.subr.bf16.mxu1 %v3526_v31  ;;  %v2261_v31 = vunpack.c.l.bf16 %v4287_v55 }
  0xa4   : > { %3298 = vmatpush3.bf16.msra.mxu1 %v3527_v34  ;;  %v2264_v34 = vunpack.c.h.bf16 %v4372_v26  ;;  %v2265_v48 = vmul.f32 %v2261_v31, %v3884_v45  ;;  %v3567_v45 = vld [vmem:[%s4628_s3 + $0x4a8] sm:$0xff]  }
  0xa5   : > { %1893 = vmatpush1.bf16.msra.mxu0 %v3528_v32  ;;  %3299 = vmatprep.subr.bf16.mxu1 %v3529_v27  ;;  %v3562_v32 = vld [vmem:[%s4628_s3 + $0x558] sm:$0xff]   ;;  %v1327_v27 = vshrl.u32 %v4103_v29, 16  ;;  %v3566_v29 = vld [vmem:[%s4628_s3 + $0x560] sm:$0xff]  }
  0xa6   : > { %1894 = vmatprep.subr.bf16.mxu0 %v3675_v43 }
  0xa7   : > { %v1329_v50 = vrot.slane %v1327_v27, 1 }
  0xa8   : > { %3300 = vmatpush3.bf16.msra.mxu1 %v3530_v40  ;;  %v3561_v40 = vld [vmem:[%s4628_s3 + $0x378] sm:$0xff]  }
  0xa9   : > { %1895 = vmatpush1.bf16.msra.mxu0 %v3531_v35  ;;  %3301 = vmatprep.subr.bf16.mxu1 %v3532_v44  ;;  %v3564_v35 = vld [vmem:[%s4628_s3 + $0x5a0] sm:$0xff]   ;;  %v1993_v44 = vshrl.u32 %v4118_v39, 16  ;;  %v3568_v39 = vld [vmem:[%s4628_s3 + $0x5a8] sm:$0xff]  }
  0xaa   : > { %1896 = vmatprep.subr.bf16.mxu0 %v3675_v43 }
  0xac   : > { %3302 = vmatpush3.bf16.msra.mxu1 %v3533_v36  ;;  %v2268_v36 = vmul.f32 %v2264_v34, %v3962_v22  ;;  %v3570_v22 = vld [vmem:[%s4628_s3 + $0x568] sm:$0xff]  }
  0xad   : > { %1897 = vmatpush1.bf16.msra.mxu0 %v3534_v47  ;;  %1548 = vmatprep.subr.bf16.mxu1 %v3675_v43  ;;  %v3563_v47 = vld [vmem:[%s4628_s3 + $0x4a0] sm:$0xff]  }
  0xae   : > { %1898 = vmatprep.subr.bf16.mxu0 %v3675_v43 }
  0xaf   : > { %1541 = vmatmul.mubr.bf16.vlgmr.msra.gmra.mrb[12].mxu1 %v1321_v52  ;;  %v1995_v52 = vrot.slane %v1993_v44, 2 }
  0xb0   : > { %1549 = vmatpush1.bf16.msra.mxu1 %v3535_v33  ;;  %2961 = vmatprep.mubr.msk.bf16.mxu1 %vm585_vm0, %v1333_v37  ;;  %v2269_v33 = vadd.f32 %v2265_v48, %v3887_v46  ;;  %v2272_v37 = vadd.f32 %v2268_v36, %v3971_v28  ;;  %v3571_v46 = vld [vmem:[%s4628_s3 + $0x4b0] sm:$0xff]   ;;  %v3598_v48 = vld [vmem:[%s4628_s3 + $0x5f8] sm:$0xff]  }
  0xb1   : > { %1899 = vmatpush1.bf16.msra.mxu0 %v3536_v51  ;;  %1550 = vmatprep.subr.bf16.mxu1 %v3675_v43  ;;  %v3565_v51 = vld [vmem:[%s4628_s3 + $0x460] sm:$0xff]   ;;  %v3574_v28 = vld [vmem:[%s4628_s3 + $0x570] sm:$0xff]  }
  0xb2   : > { %1900 = vmatprep.subr.bf16.mxu0 %v3675_v43  ;;  %v2276_v55 = vmax.f32 %v2272_v37, 0.0  ;;  %v3605_v37 = vld [vmem:[%s4628_s3 + $0x518] sm:$0xff]  }
  0xb4   : > { %1551 = vmatpush1.bf16.msra.mxu1 %v3537_v53  ;;  %v3569_v53 = vld [vmem:[%s4628_s3 + $0x468] sm:$0xff]   ;;  %v2280_v62 = vpack.c.bf16 %v2276_v55, %v2276_v55 }
  0xb5   : > { %1901 = vmatpush1.bf16.msra.mxu0 %v3538_v3  ;;  %1552 = vmatprep.subr.bf16.mxu1 %v3675_v43  ;;  %v3572_v3 = vld [vmem:[%s4628_s3 + $0x5b0] sm:$0xff]  }
  0xb6   : > { %1902 = vmatprep.subr.bf16.mxu0 %v3675_v43 }
  0xb8   : > { %1553 = vmatpush1.bf16.msra.mxu1 %v3539_v56  ;;  %v3576_v56 = vld [vmem:[%s4628_s3 + $0x5b8] sm:$0xff]  }
  0xb9   : > { %1903 = vmatpush1.bf16.msra.mxu0 %v3540_v54  ;;  %1554 = vmatprep.subr.bf16.mxu1 %v3675_v43  ;;  %v2273_v54 = vmax.f32 %v2269_v33, 0.0 }
  0xba   : > { %1904 = vmatprep.subr.bf16.mxu0 %v3675_v43 }
  0xbb   : > { %v2277_v59 = vpack.c.bf16 %v2273_v54, %v2273_v54 }
  0xbc   : > { %1555 = vmatpush1.bf16.msra.mxu1 %v3541_v60  ;;  %v3578_v60 = vld [vmem:[%s4628_s3 + $0x578] sm:$0xff]  }
  0xbd   : > { %1905 = vmatpush1.bf16.msra.mxu0 %v3542_v58  ;;  %1556 = vmatprep.subr.bf16.mxu1 %v3675_v43  ;;  %v3575_v58 = vld [vmem:[%s4628_s3 + $0x4b8] sm:$0xff]  }
  0xbe   : > { %1906 = vmatprep.subr.bf16.mxu0 %v3675_v43 }
  0xc0   : > { %1557 = vmatpush1.bf16.msra.mxu1 %v3543_v25  ;;  %v2342_v25 = vrot.slane %v2277_v59, 3  ;;  %v1997_v59 = vshrl.u32 %v4331_v8, 16 }
  0xc1   : > { %1907 = vmatpush1.bf16.msra.mxu0 %v3544_v63  ;;  %1558 = vmatprep.subr.bf16.mxu1 %v3675_v43  ;;  %v3577_v63 = vld [vmem:[%s4628_s3 + $0x478] sm:$0xff]  }
  0xc2   : > { %1908 = vmatprep.subr.bf16.mxu0 %v3675_v43 }
  0xc4   : > { %1559 = vmatpush1.bf16.msra.mxu1 %v3545_v41  ;;  %v3582_v41 = vld [vmem:[%s4628_s3 + $0x4c8] sm:$0xff]  }
  0xc5   : > { %1909 = vmatpush1.bf16.msra.mxu0 %v3546_v2  ;;  %1560 = vmatprep.subr.bf16.mxu1 %v3675_v43  ;;  %v2345_v2 = vrot.slane %v2280_v62, 3  ;;  %v1999_v62 = vrot.slane %v1997_v59, 2 }
  0xc6   : > { %1910 = vmatprep.subr.bf16.mxu0 %v3675_v43 }
  0xc8   : > { %1561 = vmatpush1.bf16.msra.mxu1 %v3547_v42  ;;  %v3587_v42 = vld [vmem:[%s4628_s3 + $0x5d0] sm:$0xff]  }
  0xc9   : > { %1911 = vmatpush1.bf16.msra.mxu0 %v3548_v6  ;;  %1562 = vmatprep.subr.bf16.mxu1 %v3675_v43  ;;  %v3583_v6 = vld [vmem:[%s4628_s3 + $0x488] sm:$0xff]  }
  0xca   : > { %1912 = vmatprep.subr.bf16.mxu0 %v3675_v43 }
  0xcc   : > { %1563 = vmatpush1.bf16.msra.mxu1 %v3549_v12  ;;  %v1989_v12 = vshrl.u32 %v4210_v17, 16  ;;  %v3591_v17 = vld [vmem:[%s4628_s3 + $0x4e0] sm:$0xff]  }
  0xcd   : > { %1913 = vmatpush1.bf16.msra.mxu0 %v3550_v9  ;;  %1564 = vmatprep.subr.bf16.mxu1 %v3675_v43  ;;  %v3586_v9 = vld [vmem:[%s4628_s3 + $0x490] sm:$0xff]  }
  0xce   : > { %3353 = vmatprep.subr.bf16.mxu0 %v3551_v11  ;;  %v3590_v11 = vld [vmem:[%s4628_s3 + $0x5d8] sm:$0xff]  }
  0xd0   : > { %1923 = vmatmul.mubr.bf16.vlgmr.msra.gmra.mrb[16].mxu0 %v1674_v61  ;;  %1565 = vmatpush1.bf16.msra.mxu1 %v3552_v16  ;;  %v3589_v61 = vld [vmem:[%s4628_s3 + $0x498] sm:$0xff]  }
  0xd1   : > { %3354 = vmatpush3.bf16.msra.mxu0 %v3553_v13  ;;  %2552 = vmatprep.mubr.bf16.mxu0 %v2343_v14  ;;  %v2001_v13 = vshrl.u32 %v4215_v19, 16  ;;  %v3592_v14 = vld [vmem:[%s4628_s3 + $0x5e0] sm:$0xff]   ;;  %v3594_v19 = vld [vmem:[%s4628_s3 + $0x5e8] sm:$0xff]  }
  0xd2   : > { %3355 = vmatprep.subr.bf16.mxu0 %v3554_v15  ;;  %1566 = vmatprep.subr.bf16.mxu1 %v3675_v43  ;;  %v1991_v15 = vrot.slane %v1989_v12, 2 }
  0xd3   : > { %v2003_v16 = vrot.slane %v2001_v13, 2 }
  0xd4   : > { %1567 = vmatpush1.bf16.msra.mxu1 %v3555_v21 }
  0xd5   : > { %3356 = vmatpush3.bf16.msra.mxu0 %v3556_v18  ;;  %1568 = vmatprep.subr.bf16.mxu1 %v3675_v43  ;;  %v3593_v18 = vld [vmem:[%s4628_s3 + $0x4e8] sm:$0xff]  }
  0xd6   : > { %3357 = vmatprep.subr.bf16.mxu0 %v3557_v20 }
  0xd8   : > { %1569 = vmatpush1.bf16.msra.mxu1 %v3558_v30 }
  0xd9   : > { %3358 = vmatpush3.bf16.msra.mxu0 %v3559_v23  ;;  %1570 = vmatprep.subr.bf16.mxu1 %v3675_v43 }
  0xda   : > { %3359 = vmatprep.subr.bf16.mxu0 %v3560_v24  ;;  %v3596_v24 = vld [vmem:[%s4628_s3 + $0x5f0] sm:$0xff]  }
  0xdc   : > { %1571 = vmatpush1.bf16.msra.mxu1 %v3561_v40  ;;  %v3595_v40 = vld [vmem:[%s4628_s3 + $0x4f0] sm:$0xff]  }
  0xdd   : > { %3360 = vmatpush3.bf16.msra.mxu0 %v3562_v32  ;;  %3331 = vmatprep.subr.bf16.mxu1 %v3563_v47  ;;  %v2263_v47 = vunpack.c.l.bf16 %v4372_v26  ;;  %v3600_v26 = vld [vmem:[%s4628_s3 + $0x600] sm:$0xff]  }
  0xde   : > { %3361 = vmatprep.subr.bf16.mxu0 %v3564_v35 }
  0xdf   : > { %1581 = vmatmul.mubr.bf16.vlgmr.msra.gmra.mrb[16].mxu1 %v1329_v50  ;;  %v2267_v36 = vmul.f32 %v2263_v47, %v3987_v38  ;;  %v3599_v50 = vld [vmem:[%s4628_s3 + $0x500] sm:$0xff]   ;;  %v3602_v38 = vld [vmem:[%s4628_s3 + $0x608] sm:$0xff]  }
  0xe0   : > { %3332 = vmatpush3.bf16.msra.mxu1 %v3565_v51  ;;  %2210 = vmatprep.mubr.bf16.mxu1 %v1995_v52  ;;  %v3601_v51 = vld [vmem:[%s4628_s3 + $0x508] sm:$0xff]  }
  0xe1   : > { %3362 = vmatpush3.bf16.msra.mxu0 %v3566_v29  ;;  %3333 = vmatprep.subr.bf16.mxu1 %v3567_v45  ;;  %v3597_v29 = vld [vmem:[%s4628_s3 + $0x4f8] sm:$0xff]   ;;  %v3603_v45 = vld [vmem:[%s4628_s3 + $0x510] sm:$0xff]  }
  0xe2   : > { %3363 = vmatprep.subr.bf16.mxu0 %v3568_v39  ;;  %v2271_v39 = vadd.f32 %v2267_v36, %v4000_v49  ;;  %v3604_v49 = vld [vmem:[%s4628_s3 + $0x610] sm:$0xff]  }
  0xe4   : > { %3334 = vmatpush3.bf16.msra.mxu1 %v3569_v53  ;;  %v2275_v52 = vmax.f32 %v2271_v39, 0.0  ;;  %v3607_v53 = vld [vmem:[%s4628_s3 + $0x520] sm:$0xff]  }
  0xe5   : > { %3364 = vmatpush3.bf16.msra.mxu0 %v3570_v22  ;;  %3335 = vmatprep.subr.bf16.mxu1 %v3571_v46  ;;  %v3606_v22 = vld [vmem:[%s4628_s3 + $0x618] sm:$0xff]   ;;  %v3608_v46 = vld [vmem:[%s4628_s3 + $0x528] sm:$0xff]  }
  0xe6   : > { %3365 = vmatprep.subr.bf16.mxu0 %v3572_v3  ;;  %v2279_v33 = vpack.c.bf16 %v2275_v52, %v2275_v52 }
  0xe8   : > { %3336 = vmatpush3.bf16.msra.mxu1 %v3573_v57  ;;  %v2344_v3 = vrot.slane %v2279_v33, 3 }
  0xe9   : > { %3366 = vmatpush3.bf16.msra.mxu0 %v3574_v28  ;;  %3337 = vmatprep.subr.bf16.mxu1 %v3575_v58  ;;  %v3609_v58 = vld [vmem:[%s4628_s3 + $0x530] sm:$0xff]  }
  0xea   : > { %3367 = vmatprep.subr.bf16.mxu0 %v3576_v56 }
  0xec   : > { %3338 = vmatpush3.bf16.msra.mxu1 %v3577_v63 }
  0xed   : > { %3368 = vmatpush3.bf16.msra.mxu0 %v3578_v60  ;;  %3339 = vmatprep.subr.bf16.mxu1 %v3579_v0  ;;  %v3610_v60 = vld [vmem:[%s4628_s3 + $0x538] sm:$0xff]  }
  0xee   : > { %2560 = vmatprep.subr.bf16.mxu0 %v3675_v43 }
  0xf0   : > { %2553 = vmatmul.mubr.bf16.vlgmr.msra.gmra.mrb[20].mxu0 %v2342_v25  ;;  %3340 = vmatpush3.bf16.msra.mxu1 %v3580_v4 }
  0xf1   : > { %2561 = vmatpush1.bf16.msra.mxu0 %v3581_v1  ;;  %3216 = vmatprep.mubr.msk.bf16.mxu0 %vm585_vm0, %v2345_v2 }
  0xf2   : > { %2562 = vmatprep.subr.bf16.mxu0 %v3675_v43  ;;  %3341 = vmatprep.subr.bf16.mxu1 %v3582_v41 }
  0xf4   : > { %3342 = vmatpush3.bf16.msra.mxu1 %v3583_v6 }
  0xf5   : > { %2563 = vmatpush1.bf16.msra.mxu0 %v3584_v5  ;;  %3343 = vmatprep.subr.bf16.mxu1 %v3585_v7 }
  0xf6   : > { %2564 = vmatprep.subr.bf16.mxu0 %v3675_v43 }
  0xf8   : > { %3344 = vmatpush3.bf16.msra.mxu1 %v3586_v9 }
  0xf9   : > { %2565 = vmatpush1.bf16.msra.mxu0 %v3587_v42  ;;  %3345 = vmatprep.subr.bf16.mxu1 %v3588_v10 }
  0xfa   : > { %2566 = vmatprep.subr.bf16.mxu0 %v3675_v43 }
  0xfc   : > { %3346 = vmatpush3.bf16.msra.mxu1 %v3589_v61 }
  0xfd   : > { %2567 = vmatpush1.bf16.msra.mxu0 %v3590_v11  ;;  %2218 = vmatprep.subr.bf16.mxu1 %v3675_v43 }
  0xfe   : > { %2568 = vmatprep.subr.bf16.mxu0 %v3675_v43 }
  0xff   : > { %2211 = vmatmul.mubr.bf16.vlgmr.msra.gmra.mrb[20].mxu1 %v1991_v15 }
 0x100   : > { %2219 = vmatpush1.bf16.msra.mxu1 %v3591_v17  ;;  %3131 = vmatprep.mubr.msk.bf16.mxu1 %vm585_vm0, %v2003_v16 }
 0x101   : > { %2569 = vmatpush1.bf16.msra.mxu0 %v3592_v14  ;;  %2220 = vmatprep.subr.bf16.mxu1 %v3675_v43 }
 0x102   : > { %2570 = vmatprep.subr.bf16.mxu0 %v3675_v43  ;;  %v3237_v23 = vpop.f32.mrb[0].mxu1 }
 0x103   : > { %v3259_v20 = vpop.f32.mrb[0].mxu0  ;;  %v3238_v32 = vpop.f32.mrb[1].mxu1 }
 0x104   : > { %v3260_v21 = vpop.f32.mrb[1].mxu0  ;;  %v4507_v27 = vadd.f32 %v3238_v32, %v3237_v23  ;;  %v3240_v35 = vpop.f32.mrb[2].mxu1  ;;  %2221 = vmatpush1.bf16.msra.mxu1 %v3593_v18 }
 0x105   : > { %2571 = vmatpush1.bf16.msra.mxu0 %v3594_v19  ;;  %v4504_v30 = vadd.f32 %v3260_v21, %v3259_v20  ;;  %v3262_v31 = vpop.f32.mrb[2].mxu0  ;;  %v3241_v44 = vpop.f32.mrb[3].mxu1  ;;  %2222 = vmatprep.subr.bf16.mxu1 %v3675_v43 }
 0x106   : > { %2572 = vmatprep.subr.bf16.mxu0 %v3675_v43  ;;  %v3263_v34 = vpop.f32.mrb[3].mxu0 }
 0x108   : > { %2223 = vmatpush1.bf16.msra.mxu1 %v3595_v40 }
 0x109   : > { %2573 = vmatpush1.bf16.msra.mxu0 %v3596_v24  ;;  %2224 = vmatprep.subr.bf16.mxu1 %v3675_v43 }
 0x10a   : > { %2574 = vmatprep.subr.bf16.mxu0 %v3675_v43 }
 0x10c   : > { %2225 = vmatpush1.bf16.msra.mxu1 %v3597_v29 }
 0x10d   : > { %2575 = vmatpush1.bf16.msra.mxu0 %v3598_v48  ;;  %2226 = vmatprep.subr.bf16.mxu1 %v3675_v43 }
 0x10e   : > { %2576 = vmatprep.subr.bf16.mxu0 %v3675_v43 }
 0x110   : > { %2227 = vmatpush1.bf16.msra.mxu1 %v3599_v50 }
 0x111   : > { %2577 = vmatpush1.bf16.msra.mxu0 %v3600_v26  ;;  %2228 = vmatprep.subr.bf16.mxu1 %v3675_v43 }
 0x112   : > { %2578 = vmatprep.subr.bf16.mxu0 %v3675_v43 }
 0x114   : > { %2229 = vmatpush1.bf16.msra.mxu1 %v3601_v51 }
 0x115   : > { %2579 = vmatpush1.bf16.msra.mxu0 %v3602_v38  ;;  %2230 = vmatprep.subr.bf16.mxu1 %v3675_v43 }
 0x116   : > { %2580 = vmatprep.subr.bf16.mxu0 %v3675_v43 }
 0x118   : > { %2231 = vmatpush1.bf16.msra.mxu1 %v3603_v45 }
 0x119   : > { %2581 = vmatpush1.bf16.msra.mxu0 %v3604_v49  ;;  %2232 = vmatprep.subr.bf16.mxu1 %v3675_v43 }
 0x11a   : > { %2582 = vmatprep.subr.bf16.mxu0 %v3675_v43 }
 0x11c   : > { %2233 = vmatpush1.bf16.msra.mxu1 %v3605_v37 }
 0x11d   : > { %2583 = vmatpush1.bf16.msra.mxu0 %v3606_v22  ;;  %2234 = vmatprep.subr.bf16.mxu1 %v3675_v43 }
 0x120   : > { %2593 = vmatmul.mubr.bf16.vlgmr.msra.gmra.mrb[24].mxu0 %v2344_v3  ;;  %2235 = vmatpush1.bf16.msra.mxu1 %v3607_v53 }
 0x121   : > { %2236 = vmatprep.subr.bf16.mxu1 %v3675_v43 }
 0x123   : > { %v3281_v54 = vpop.f32.mrb[4].mxu0 }
 0x124   : > { %v3282_v28 = vpop.f32.mrb[5].mxu0  ;;  %2237 = vmatpush1.bf16.msra.mxu1 %v3608_v46 }
 0x125   : > { %v3283_v55 = vadd.f32 %v3282_v28, %v3281_v54  ;;  %v3284_v56 = vpop.f32.mrb[6].mxu0  ;;  %2238 = vmatprep.subr.bf16.mxu1 %v3675_v43 }
 0x126   : > { %v3285_v57 = vpop.f32.mrb[7].mxu0 }
 0x128   : > { %2239 = vmatpush1.bf16.msra.mxu1 %v3609_v58  ;;  %v2601_v58 = vld [vmem:[%s4629_s4] sm:$0x1] }
 0x129   : > { %2240 = vmatprep.subr.bf16.mxu1 %v3675_v43 }
 0x12c   : > { %2241 = vmatpush1.bf16.msra.mxu1 %v3610_v60 }
 0x12f   : > { %2251 = vmatmul.mubr.bf16.vlgmr.msra.gmra.mrb[24].mxu1 %v1999_v62 }
 0x132   : > { %v663_v63 = vpop.f32.mrb[4].mxu1 }
 0x133   : > { %v664_v0 = vadd.f32 %v4507_v27, %v663_v63  ;;  %v665_v25 = vpop.f32.mrb[5].mxu1 }
 0x134   : > { %v666_v1 = vpop.f32.mrb[6].mxu1 }
 0x135   : > { %v667_v2 = vpop.f32.mrb[7].mxu1  ;;  %v874_v4 = vadd.f32 %v4504_v30, %v664_v0 }
 0x153   : > { %v1254_v41 = vpop.f32.mrb[8].mxu0 }
 0x154   : > { %v1255_v8 = vadd.f32 %v3283_v55, %v1254_v41  ;;  %v1256_v5 = vpop.f32.mrb[9].mxu0 }
 0x155   : > { %v1257_v6 = vpop.f32.mrb[10].mxu0 }
 0x156   : > { %v1258_v7 = vpop.f32.mrb[11].mxu0 }
 0x162   : > { %v913_v42 = vpop.f32.mrb[8].mxu1 }
 0x163   : > { %v914_v9 = vadd.f32 %v913_v42, %v874_v4  ;;  %v915_v10 = vpop.f32.mrb[9].mxu1 }
 0x164   : > { %v916_v43 = vpop.f32.mrb[10].mxu1 }
 0x165   : > { %v1260_v11 = vadd.f32 %v1255_v8, %v914_v9  ;;  %v917_v12 = vpop.f32.mrb[11].mxu1 }
 0x173   : > { %v3325_v61 = vpop.f32.mrb[12].mxu0 }
 0x174   : > { %v3326_v13 = vpop.f32.mrb[13].mxu0 }
 0x175   : > { %v3327_v14 = vadd.f32 %v3326_v13, %v3325_v61  ;;  %v3328_v15 = vpop.f32.mrb[14].mxu0 }
 0x176   : > { %v3329_v17 = vpop.f32.mrb[15].mxu0 }
 0x182   : > { %v3303_v16 = vpop.f32.mrb[12].mxu1 }
 0x183   : > { %v3304_v19 = vpop.f32.mrb[13].mxu1 }
 0x184   : > { %v3305_v18 = vadd.f32 %v3304_v19, %v3303_v16  ;;  %v3306_v20 = vpop.f32.mrb[14].mxu1 }
 0x185   : > { %v3307_v21 = vpop.f32.mrb[15].mxu1 }
 0x1a3   : > { %v1924_v23 = vpop.f32.mrb[16].mxu0 }
 0x1a4   : > { %v1925_v24 = vadd.f32 %v3327_v14, %v1924_v23  ;;  %v1926_v30 = vpop.f32.mrb[17].mxu0 }
 0x1a5   : > { %v1927_v31 = vpop.f32.mrb[18].mxu0 }
 0x1a6   : > { %v1928_v32 = vpop.f32.mrb[19].mxu0 }
 0x1b2   : > { %v1582_v34 = vpop.f32.mrb[16].mxu1 }
 0x1b3   : > { %v1583_v27 = vadd.f32 %v3305_v18, %v1582_v34  ;;  %v1584_v35 = vpop.f32.mrb[17].mxu1 }
 0x1b4   : > { %v1585_v40 = vpop.f32.mrb[18].mxu1 }
 0x1b5   : > { %v1588_v44 = vadd.f32 %v1583_v27, %v1260_v11  ;;  %v1586_v47 = vpop.f32.mrb[19].mxu1 }
 0x1b7   : > { %v1930_v48 = vadd.f32 %v1925_v24, %v1588_v44 }
 0x1c3   : > { %v3369_v29 = vpop.f32.mrb[20].mxu0 }
 0x1c4   : > { %v3370_v36 = vpop.f32.mrb[21].mxu0 }
 0x1c5   : > { %v3371_v26 = vadd.f32 %v3370_v36, %v3369_v29  ;;  %v3372_v50 = vpop.f32.mrb[22].mxu0 }
 0x1c6   : > { %v3373_v39 = vpop.f32.mrb[23].mxu0 }
 0x1d2   : > { %v3347_v38 = vpop.f32.mrb[20].mxu1 }
 0x1d3   : > { %v3348_v51 = vpop.f32.mrb[21].mxu1 }
 0x1d4   : > { %v3349_v52 = vadd.f32 %v3348_v51, %v3347_v38  ;;  %v3350_v49 = vpop.f32.mrb[22].mxu1 }
 0x1d5   : > { %v3351_v45 = vpop.f32.mrb[23].mxu1 }
 0x1f3   : > { %v2594_v33 = vpop.f32.mrb[24].mxu0 }
 0x1f4   : > { %v2595_v22 = vadd.f32 %v3371_v26, %v2594_v33  ;;  %v2596_v37 = vpop.f32.mrb[25].mxu0 }
 0x1f5   : > { %v2597_v3 = vpop.f32.mrb[26].mxu0 }
 0x1f6   : > { %v2598_v53 = vpop.f32.mrb[27].mxu0 }
 0x202   : > { %v2252_v46 = vpop.f32.mrb[24].mxu1 }
 0x203   : > { %v2253_v54 = vadd.f32 %v3349_v52, %v2252_v46  ;;  %v2254_v28 = vpop.f32.mrb[25].mxu1 }
 0x204   : > { %v2255_v55 = vpop.f32.mrb[26].mxu1 }
 0x205   : > { %v2258_v56 = vadd.f32 %v2253_v54, %v1930_v48  ;;  %v2256_v57 = vpop.f32.mrb[27].mxu1 }
 0x207   : > { %v2600_v59 = vadd.f32 %v2595_v22, %v2258_v56 }
 0x209   : > { %v2602_v60 = vadd.f32 %v2601_v58, %v2600_v59 }
 0x20b   : > { %2603 = vst [vmem:[%s216_s9] sm:$0x1] %v2602_v60 }
 0x20c   : > { %3624 = shalt.err (!%p3621_p3)
}
 0x20d   : > { %s3625_s23 = scalar_lea.hbm %s4583_s13, 16  ;;  %s3629_s30 = scalar_lea.hbm %s4630_s5, 32 }
 0x20e   : > { %p3626_p4 = scmp.ne.s32.totalorder %s4583_s13, %s3625_s23  ;;  %p3630_p9 = scmp.lt.u32.totalorder %s4583_s13, %s4630_s5 }
 0x20f   : > { %p3631_p10 = scmp.lt.u32.totalorder %s3629_s30, %s3625_s23  ;;  %p3633_p12 = scmp.lt.u32.totalorder %s3625_s23, %s4583_s13 }
 0x210   : > { %p3627_p7 = pnand %p3626_p4, %p3745_p5 }
 0x211   : > { %p3632_p11 = por %p3631_p10, %p3630_p9 }
 0x212   : > { %p3628_p8 = pneg %p3627_p7 }
 0x213   : > { %p3634_p13 = por %p3633_p12, %p3632_p11 }
 0x215   : > { %p3635_p0 = pnand %p3634_p13, %p3628_p8 }
 0x217   : > { %3638 = shalt.err (!%p3635_p0)
}
 0x218   : > { %3375 = dma.vmem_to_hbm [thread:$0]  (%p3745_p5), %s4585_s10, 16, %s4583_s13, %s2605_s14  }
 0x219 PF: > { %p3381_p1 = scmp.ge.s32.totalorder %s3673_s21, 2  ;;  %s2629_s8 = sand.u32 1, %s3661_s18  }
 0x21a   : > { %s2630_s9 = scalar_lea.sflag [#allocation3], %s2629_s8 }
 0x21b   : > { %p3378_p2 = pnand %p3381_p1, %p3749_p6 }
 0x21d   : > { %3656 = dma.done.wait (!%p3378_p2), %s2630_s9, 16  }
 0x21e   : > { %3658 = vsyncadd (!%p3378_p2), %s2630_s9, 4294967280  ;;  %p15_p3 = scmp.ge.s32.totalorder %s3732_s24, 4   ;;  %s4633_s18 = smov %s3665_s19 }
 0x21f   : > { %s4634_s19 = smov %s3669_s20  ;;  %s4635_s20 = smov %s3743_s27 }
 0x220   : > { %s4636_s21 = smov %s3732_s24  ;;  %17 = sbr.rel (!%p15_p3) target bundleno = 3 (0x3), region = 81 }
 0x227   :  { %2634 = vsyncpa [#allocation3], 1 }
 0x228   :  { %2636 = vsyncpa [#allocation3 + $0x1], 1 }

</bundles_post_ra>
